<compile_context>
chip_gen: v5e
topology: v5e:2x2
jax: 0.10.0
libtpu: 0.0.40
codegen_flags: <defaults>
</compile_context>

<pallas_src>
import functools

import jax
import jax.numpy as jnp
from jax.experimental import pallas as pl
from jax.experimental.pallas import tpu as pltpu


OC_PAD = 128                    # conv-stack channel dims padded to one lane width
TILE_M = 1024                   # M tile for the im2col matmul kernel
TAIL_TB = 8                     # batch tile for the fused conv3+fc tail
VMEM_LIMIT = 32 * 1024 * 1024   # explicit scoped-VMEM budget (safe on v5e/v6e/v7x)


# ----------------------------------------------------------------------------
# Pallas kernel 1: out = [relu](A @ B + bias), bf16 in / f32 acc / bf16 out.
# Used for conv1 and conv2 (as im2col matmuls).
# ----------------------------------------------------------------------------
def _matmul_bias_kernel(a_ref, b_ref, bias_ref, o_ref, *, relu):
    # Native bf16 x bf16 MXU matmul with an f32 accumulator (no VPU cast).
    acc = jnp.dot(a_ref[...], b_ref[...], preferred_element_type=jnp.float32)
    acc = acc + bias_ref[...]                      # (1, N) f32 bias epilogue
    if relu:
        acc = jnp.maximum(acc, 0.0)
    o_ref[...] = acc.astype(o_ref.dtype)           # lane-dense (tm, 128) store


def pallas_matmul_bias(a, b, bias, *, relu, out_dtype=jnp.bfloat16):
    """a: (M, K) bf16, b: (K, N) bf16, bias: (1, N) f32 -> (M, N) out_dtype.

    M is tiled on a 'parallel' grid axis (double-buffered by BlockSpec
    pipelining, shardable across v7x's two TensorCores).  K and N stay whole
    blocks (K <= 2048, N = 128 for this network).
    """
    M, K = a.shape
    N = b.shape[1]
    tm = min(M, TILE_M)
    kernel = functools.partial(_matmul_bias_kernel, relu=relu)
    # If DMA is still exposed at large M (xprof: wall >> compute), the next
    # lever is pipeline_mode=pl.Buffered(3) on the A-stream BlockSpec only.
    return pl.pallas_call(
        kernel,
        out_shape=jax.ShapeDtypeStruct((M, N), out_dtype),
        grid=(pl.cdiv(M, tm),),
        in_specs=[
            pl.BlockSpec((tm, K), lambda i: (i, 0)),
            pl.BlockSpec((K, N), lambda i: (0, 0)),
            pl.BlockSpec((1, N), lambda i: (0, 0)),
        ],
        out_specs=pl.BlockSpec((tm, N), lambda i: (i, 0)),
        compiler_params=pltpu.CompilerParams(
            dimension_semantics=("parallel",),
            vmem_limit_bytes=VMEM_LIMIT),
    )(a, b, bias)


# ----------------------------------------------------------------------------
# Pallas kernel 2: fused conv3 + ReLU + fc1 + ReLU + fc2, tiled over batch.
#
# conv2's output arrives as (OH2, OW2, B, 128) bf16, so each 3x3 conv3 tap is
# a dense, aligned (tb, 128) tile load -- no 9x im2col patch matrix in HBM and
# no in-kernel flatten relayout.  fc1 is a spatial-sum of (tb,128)@(128,512)
# matmuls into one f32 accumulator.  All intermediates stay in vregs/VMEM; the
# only HBM store is the final (B, 128) Q slab.
# ----------------------------------------------------------------------------
def _tail_kernel(h2_ref, w3_ref, b3_ref, w4_ref, b4_ref, w5_ref, b5_ref,
                 o_ref, *, oh3, ow3):
    tb = o_ref.shape[0]
    fc_acc = jnp.zeros((tb, 512), jnp.float32)
    for oy in range(oh3):                          # static, fully unrolled
        for ox in range(ow3):
            c_acc = jnp.zeros((tb, OC_PAD), jnp.float32)
            for t in range(9):                     # 3x3 conv3 taps
                i, j = divmod(t, 3)
                patch = h2_ref[oy + i, ox + j]     # (tb, 128) bf16 tile
                c_acc = c_acc + jnp.dot(
                    patch, w3_ref[t], preferred_element_type=jnp.float32)
            a = jnp.maximum(c_acc + b3_ref[...], 0.0).astype(jnp.bfloat16)
            fc_acc = fc_acc + jnp.dot(
                a, w4_ref[oy * ow3 + ox], preferred_element_type=jnp.float32)
    h = jnp.maximum(fc_acc + b4_ref[...], 0.0).astype(jnp.bfloat16)
    q = jnp.dot(h, w5_ref[...], preferred_element_type=jnp.float32)
    o_ref[...] = q + b5_ref[...]                   # (tb, 128) lane-dense f32


def pallas_conv3_fc(h2, w3, b3, w4, b4, w5, b5, *, batch, oh3, ow3, tb):
    oh2, ow2 = h2.shape[0], h2.shape[1]

    def const_spec(shape):
        return pl.BlockSpec(shape, lambda i, n=len(shape): (0,) * n)

    kernel = functools.partial(_tail_kernel, oh3=oh3, ow3=ow3)
    return pl.pallas_call(
        kernel,
        out_shape=jax.ShapeDtypeStruct((batch, OC_PAD), jnp.float32),
        grid=(pl.cdiv(batch, tb),),
        in_specs=[
            # Batch-tiled activation stream (pipelined across grid steps).
            pl.BlockSpec((oh2, ow2, tb, OC_PAD), lambda i: (0, 0, i, 0)),
            # Weights/biases: constant index maps -> stay VMEM-resident.
            const_spec(w3.shape), const_spec(b3.shape),
            const_spec(w4.shape), const_spec(b4.shape),
            const_spec(w5.shape), const_spec(b5.shape),
        ],
        out_specs=pl.BlockSpec((tb, OC_PAD), lambda i: (i, 0)),
        compiler_params=pltpu.CompilerParams(
            dimension_semantics=("parallel",),
            vmem_limit_bytes=VMEM_LIMIT),
    )(h2, w3, b3, w4, b4, w5, b5)


# ----------------------------------------------------------------------------
# JAX glue: NHWC im2col for conv1/conv2 (the matmuls themselves run in Pallas)
# TODO(synk): conv1/conv2 patch extraction is still XLA slicing in the wrapper
# (4x HBM inflation for conv2); it can be removed the same way conv3 was
# (shifted-tap matmuls inside the kernel) as a follow-up.
# ----------------------------------------------------------------------------
def _im2col_nhwc(x, kh, kw, stride):
    """x: (N, H, W, C) -> (N*OH*OW, KH*KW*C); columns ordered (kh, kw, c)."""
    n, h, w, c = x.shape
    oh = (h - kh) // stride + 1
    ow = (w - kw) // stride + 1
    cols = []
    for i in range(kh):
        for j in range(kw):
            cols.append(x[:, i:i + stride * oh:stride,
                            j:j + stride * ow:stride, :])
    p = jnp.stack(cols, axis=3)                    # (N, OH, OW, KH*KW, C)
    return p.reshape(n * oh * ow, kh * kw * c), oh, ow


# ----------------------------------------------------------------------------
# DQN parameters (PyTorch layout) + one-time kernel-friendly weight prep
# ----------------------------------------------------------------------------
def _conv_out(s, k, st):
    return (s - k) // st + 1


def init_dqn_params(key, input_shape, n_actions):
    """PyTorch-layout parameters (OIHW convs, (out, in) linears)."""
    c, hh, ww = input_shape
    h1, w1 = _conv_out(hh, 8, 4), _conv_out(ww, 8, 4)
    h2, w2 = _conv_out(h1, 4, 2), _conv_out(w1, 4, 2)
    h3, w3 = _conv_out(h2, 3, 1), _conv_out(w2, 3, 1)
    flat = 64 * h3 * w3

    ks = jax.random.split(key, 10)

    def uni(k, shape, fan_in):
        bound = 1.0 / float(fan_in) ** 0.5
        return jax.random.uniform(k, shape, jnp.float32, -bound, bound)

    return {
        "conv1_w": uni(ks[0], (32, c, 8, 8), c * 8 * 8),
        "conv1_b": uni(ks[1], (32,), c * 8 * 8),
        "conv2_w": uni(ks[2], (64, 32, 4, 4), 32 * 4 * 4),
        "conv2_b": uni(ks[3], (64,), 32 * 4 * 4),
        "conv3_w": uni(ks[4], (64, 64, 3, 3), 64 * 3 * 3),
        "conv3_b": uni(ks[5], (64,), 64 * 3 * 3),
        "fc1_w": uni(ks[6], (512, flat), flat),     # PyTorch (out, in)
        "fc1_b": uni(ks[7], (512,), flat),
        "fc2_w": uni(ks[8], (n_actions, 512), 512),
        "fc2_b": uni(ks[9], (n_actions,), 512),
    }


def prepare_dqn_params(params, input_shape, n_actions):
    """One-time weight prep (all matmul operands bf16, biases f32):
    * conv1/conv2 -> (KH*KW*IC_pad, 128) im2col matmul matrices, zero-padded
      in both channel dims, /255 folded into conv1.
    * conv3 -> (9, 128, 128) per-tap matrices for the fused tail.
    * fc1 -> (OH3*OW3, 128, 512) spatial-sum layout (matches NHWC+pad conv3).
    * fc2 -> (512, 128) with the output padded to a full lane width.
    """
    c, hh, ww = input_shape
    h1, w1 = _conv_out(hh, 8, 4), _conv_out(ww, 8, 4)
    h2, w2 = _conv_out(h1, 4, 2), _conv_out(w1, 4, 2)
    h3, w3 = _conv_out(h2, 3, 1), _conv_out(w2, 3, 1)

    def conv_mat(w, ic_total, scale=1.0):
        oc, ic, kh, kw = w.shape
        wt = jnp.transpose(w, (2, 3, 1, 0)).astype(jnp.float32) * scale
        full = jnp.zeros((kh, kw, ic_total, OC_PAD), jnp.float32)
        full = full.at[:, :, :ic, :oc].set(wt)
        return full.reshape(kh * kw * ic_total, OC_PAD).astype(jnp.bfloat16)

    def pad_row(v, width=OC_PAD):
        return jnp.zeros((1, width), jnp.float32).at[0, :v.shape[0]].set(v)

    # conv3 as per-tap (IC_pad, OC_pad) matrices for the shifted-view matmuls.
    w3p = jnp.transpose(params["conv3_w"], (2, 3, 1, 0))        # (3,3,64,64)
    conv3_full = jnp.zeros((3, 3, OC_PAD, OC_PAD), jnp.float32)
    conv3_full = conv3_full.at[:, :, :64, :64].set(w3p)
    conv3_full = conv3_full.reshape(9, OC_PAD, OC_PAD).astype(jnp.bfloat16)

    # fc1 in (spatial, IC_pad, 512) layout for the spatial-sum formulation.
    fc1 = params["fc1_w"].reshape(512, 64, h3, w3)              # (out, c, y, x)
    fc1 = jnp.transpose(fc1, (2, 3, 1, 0))                      # (y, x, c, out)
    fc1_full = jnp.zeros((h3, w3, OC_PAD, 512), jnp.float32)
    fc1_full = fc1_full.at[:, :, :64, :].set(fc1)
    fc1_full = fc1_full.reshape(h3 * w3, OC_PAD, 512).astype(jnp.bfloat16)
    # TODO(synk): on v7x, fc1_full could additionally be fp8 with a per-column
    # scale folded into fc1_b (fc1 is weight-DMA-bound at DQN batch sizes).

    fc2 = jnp.zeros((512, OC_PAD), jnp.float32)
    fc2 = fc2.at[:, :n_actions].set(params["fc2_w"].T)

    return {
        "conv1_w": conv_mat(params["conv1_w"], c, scale=1.0 / 255.0),
        "conv1_b": pad_row(params["conv1_b"]),
        "conv2_w": conv_mat(params["conv2_w"], OC_PAD),
        "conv2_b": pad_row(params["conv2_b"]),
        "conv3_w": conv3_full,
        "conv3_b": pad_row(params["conv3_b"]),
        "fc1_w": fc1_full,
        "fc1_b": params["fc1_b"].reshape(1, 512).astype(jnp.float32),
        "fc2_w": fc2.astype(jnp.bfloat16),
        "fc2_b": pad_row(params["fc2_b"]),
    }


# ----------------------------------------------------------------------------
# Forward pass: matches DQN.forward(x) = fc(conv(x / 255.)) for uint8 NCHW x.
# ----------------------------------------------------------------------------
def dqn_forward(prep, x, *, n_actions):
    n = x.shape[0]
    # Byte image -> bf16 (0..255 exact), NHWC.  The /255 lives in conv1_w.
    xh = jnp.transpose(x, (0, 2, 3, 1)).astype(jnp.bfloat16)

    p1, oh1, ow1 = _im2col_nhwc(xh, 8, 8, 4)
    h = pallas_matmul_bias(p1, prep["conv1_w"], prep["conv1_b"], relu=True)
    h = h.reshape(n, oh1, ow1, OC_PAD)

    p2, oh2, ow2 = _im2col_nhwc(h, 4, 4, 2)
    h = pallas_matmul_bias(p2, prep["conv2_w"], prep["conv2_b"], relu=True)

    # (B*OH2*OW2, 128) bf16 -> (OH2, OW2, B, 128): spatial-major so every conv3
    # tap inside the fused tail is a dense, aligned (tb, 128) tile load.
    h = h.reshape(n, oh2, ow2, OC_PAD).transpose(1, 2, 0, 3)

    oh3, ow3 = oh2 - 2, ow2 - 2                    # 3x3, stride 1, VALID
    q_pad = pallas_conv3_fc(h, prep["conv3_w"], prep["conv3_b"],
                            prep["fc1_w"], prep["fc1_b"],
                            prep["fc2_w"], prep["fc2_b"],
                            batch=n, oh3=oh3, ow3=ow3, tb=min(n, TAIL_TB))
    return q_pad[:, :n_actions]


# Pure-JAX f32 reference (numeric sanity check against the PyTorch semantics).
def dqn_reference(params, x):
    xf = x.astype(jnp.float32) / 255.0

    def conv(y, w, b, s):
        y = jax.lax.conv_general_dilated(
            y, w, (s, s), "VALID",
            dimension_numbers=("NCHW", "OIHW", "NCHW"))
        return jax.nn.relu(y + b.reshape(1, -1, 1, 1))

    h = conv(xf, params["conv1_w"], params["conv1_b"], 4)
    h = conv(h, params["conv2_w"], params["conv2_b"], 2)
    h = conv(h, params["conv3_w"], params["conv3_b"], 1)
    flat = h.reshape(h.shape[0], -1)
    h = jax.nn.relu(flat @ params["fc1_w"].T + params["fc1_b"])
    return h @ params["fc2_w"].T + params["fc2_b"]


if __name__ == "__main__":
    input_shape = (4, 52, 52)   # 52 -> 12 -> 5 -> 3 through the conv stack
    n_actions = 6
    batch = 2

    key = jax.random.PRNGKey(0)
    pkey, xkey = jax.random.split(key)
    params = init_dqn_params(pkey, input_shape, n_actions)
    prep = prepare_dqn_params(params, input_shape, n_actions)   # one-time prep
    x = jax.random.randint(xkey, (batch,) + input_shape, 0, 256,
                           dtype=jnp.int32).astype(jnp.uint8)

    fwd = jax.jit(dqn_forward, static_argnames=("n_actions",))
    q = jax.block_until_ready(fwd(prep, x, n_actions=n_actions))

    assert q.shape == (batch, n_actions), q.shape
    q_ref = dqn_reference(params, x)
    # bf16 weights + bf16 inter-layer activations vs an f32 reference:
    # tolerance loosened accordingly (per review).
    assert jnp.allclose(q, q_ref, rtol=2e-2, atol=2e-2), (
        "mismatch vs reference", float(jnp.abs(q - q_ref).max()))

    print("KERNEL_OK")
</pallas_src>

<mosaic_0001>
module attributes {stable_mosaic.version = 11 : i64} {
  func.func @_matmul_bias_kernel(%arg0: i32, %arg1: memref<288x256xbf16, #tpu.memory_space<vmem>>, %arg2: memref<256x128xbf16, #tpu.memory_space<vmem>>, %arg3: memref<1x128xf32, #tpu.memory_space<vmem>>, %arg4: memref<288x128xbf16, #tpu.memory_space<vmem>>) attributes {dimension_semantics = [#tpu.dimension_semantics<parallel>], iteration_bounds = array<i64: 1>, scalar_prefetch = 0 : i64, scratch_operands = 0 : i64, tpu.core_type = #tpu.core_type<tc>, window_params = [{transform_indices = @transform_0, window_bounds = array<i64: 288, 256>}, {pipeline_mode = #tpu.pipeline_mode<synchronous>, transform_indices = @transform_1, window_bounds = array<i64: 256, 128>}, {pipeline_mode = #tpu.pipeline_mode<synchronous>, transform_indices = @transform_2, window_bounds = array<i64: 1, 128>}, {transform_indices = @transform_3, window_bounds = array<i64: 288, 128>}]} {
    %c0 = arith.constant 0 : index
    %c0_0 = arith.constant 0 : index
    %0 = vector.load %arg1[%c0, %c0_0] : memref<288x256xbf16, #tpu.memory_space<vmem>>, vector<288x256xbf16>
    %c0_1 = arith.constant 0 : index
    %c0_2 = arith.constant 0 : index
    %1 = vector.load %arg2[%c0_1, %c0_2] : memref<256x128xbf16, #tpu.memory_space<vmem>>, vector<256x128xbf16>
    %cst = arith.constant dense<0.000000e+00> : vector<288x128xf32>
    %2 = tpu.matmul %0, %1, %cst {dimension_numbers = #tpu.dot_dimension_numbers<[1], [0], [0], [1], [0, 0, 1, 1], [], []>} : vector<288x256xbf16>, vector<256x128xbf16>, vector<288x128xf32> -> vector<288x128xf32>
    %c0_3 = arith.constant 0 : index
    %c0_4 = arith.constant 0 : index
    %3 = vector.load %arg3[%c0_3, %c0_4] : memref<1x128xf32, #tpu.memory_space<vmem>>, vector<1x128xf32>
    %4 = vector.broadcast %3 : vector<1x128xf32> to vector<288x128xf32>
    %5 = arith.addf %2, %4 : vector<288x128xf32>
    %cst_5 = arith.constant 0.000000e+00 : f32
    %6 = vector.broadcast %cst_5 : f32 to vector<288x128xf32>
    %7 = arith.maximumf %5, %6 : vector<288x128xf32>
    %8 = arith.truncf %7 : vector<288x128xf32> to vector<288x128xbf16>
    %c0_6 = arith.constant 0 : index
    %c0_7 = arith.constant 0 : index
    %9 = vector.load %arg4[%c0_6, %c0_7] : memref<288x128xbf16, #tpu.memory_space<vmem>>, vector<288x128xbf16>
    tpu.vector_store %arg4[%c0_6, %c0_7], %8 {strides = array<i32>} : memref<288x128xbf16, #tpu.memory_space<vmem>>, vector<288x128xbf16>,
    return
  }
  func.func @transform_0(%arg0: i32) -> (i32, i32) {
    %c0_i32 = arith.constant 0 : i32
    %c0_i32_0 = arith.constant 0 : i32
    return %arg0, %c0_i32 : i32, i32
  }
  func.func @transform_1(%arg0: i32) -> (i32, i32) {
    %c0_i32 = arith.constant 0 : i32
    %c0_i32_0 = arith.constant 0 : i32
    %c0_i32_1 = arith.constant 0 : i32
    return %c0_i32, %c0_i32_0 : i32, i32
  }
  func.func @transform_2(%arg0: i32) -> (i32, i32) {
    %c0_i32 = arith.constant 0 : i32
    %c0_i32_0 = arith.constant 0 : i32
    %c0_i32_1 = arith.constant 0 : i32
    return %c0_i32, %c0_i32_0 : i32, i32
  }
  func.func @transform_3(%arg0: i32) -> (i32, i32) {
    %c0_i32 = arith.constant 0 : i32
    %c0_i32_0 = arith.constant 0 : i32
    return %arg0, %c0_i32 : i32, i32
  }
}

module attributes {stable_mosaic.version = 11 : i64} {
  func.func @_matmul_bias_kernel(%arg0: i32, %arg1: memref<50x2048xbf16, #tpu.memory_space<vmem>>, %arg2: memref<2048x128xbf16, #tpu.memory_space<vmem>>, %arg3: memref<1x128xf32, #tpu.memory_space<vmem>>, %arg4: memref<50x128xbf16, #tpu.memory_space<vmem>>) attributes {dimension_semantics = [#tpu.dimension_semantics<parallel>], iteration_bounds = array<i64: 1>, scalar_prefetch = 0 : i64, scratch_operands = 0 : i64, tpu.core_type = #tpu.core_type<tc>, window_params = [{transform_indices = @transform_0, window_bounds = array<i64: 50, 2048>}, {pipeline_mode = #tpu.pipeline_mode<synchronous>, transform_indices = @transform_1, window_bounds = array<i64: 2048, 128>}, {pipeline_mode = #tpu.pipeline_mode<synchronous>, transform_indices = @transform_2, window_bounds = array<i64: 1, 128>}, {transform_indices = @transform_3, window_bounds = array<i64: 50, 128>}]} {
    %c0 = arith.constant 0 : index
    %c0_0 = arith.constant 0 : index
    %0 = vector.load %arg1[%c0, %c0_0] : memref<50x2048xbf16, #tpu.memory_space<vmem>>, vector<50x2048xbf16>
    %c0_1 = arith.constant 0 : index
    %c0_2 = arith.constant 0 : index
    %1 = vector.load %arg2[%c0_1, %c0_2] : memref<2048x128xbf16, #tpu.memory_space<vmem>>, vector<2048x128xbf16>
    %cst = arith.constant dense<0.000000e+00> : vector<50x128xf32>
    %2 = tpu.matmul %0, %1, %cst {dimension_numbers = #tpu.dot_dimension_numbers<[1], [0], [0], [1], [0, 0, 1, 1], [], []>} : vector<50x2048xbf16>, vector<2048x128xbf16>, vector<50x128xf32> -> vector<50x128xf32>
    %c0_3 = arith.constant 0 : index
    %c0_4 = arith.constant 0 : index
    %3 = vector.load %arg3[%c0_3, %c0_4] : memref<1x128xf32, #tpu.memory_space<vmem>>, vector<1x128xf32>
    %4 = vector.broadcast %3 : vector<1x128xf32> to vector<50x128xf32>
    %5 = arith.addf %2, %4 : vector<50x128xf32>
    %cst_5 = arith.constant 0.000000e+00 : f32
    %6 = vector.broadcast %cst_5 : f32 to vector<50x128xf32>
    %7 = arith.maximumf %5, %6 : vector<50x128xf32>
    %8 = arith.truncf %7 : vector<50x128xf32> to vector<50x128xbf16>
    %c0_6 = arith.constant 0 : index
    %c0_7 = arith.constant 0 : index
    %9 = vector.load %arg4[%c0_6, %c0_7] : memref<50x128xbf16, #tpu.memory_space<vmem>>, vector<50x128xbf16>
    tpu.vector_store %arg4[%c0_6, %c0_7], %8 {strides = array<i32>} : memref<50x128xbf16, #tpu.memory_space<vmem>>, vector<50x128xbf16>,
    return
  }
  func.func @transform_0(%arg0: i32) -> (i32, i32) {
    %c0_i32 = arith.constant 0 : i32
    %c0_i32_0 = arith.constant 0 : i32
    return %arg0, %c0_i32 : i32, i32
  }
  func.func @transform_1(%arg0: i32) -> (i32, i32) {
    %c0_i32 = arith.constant 0 : i32
    %c0_i32_0 = arith.constant 0 : i32
    %c0_i32_1 = arith.constant 0 : i32
    return %c0_i32, %c0_i32_0 : i32, i32
  }
  func.func @transform_2(%arg0: i32) -> (i32, i32) {
    %c0_i32 = arith.constant 0 : i32
    %c0_i32_0 = arith.constant 0 : i32
    %c0_i32_1 = arith.constant 0 : i32
    return %c0_i32, %c0_i32_0 : i32, i32
  }
  func.func @transform_3(%arg0: i32) -> (i32, i32) {
    %c0_i32 = arith.constant 0 : i32
    %c0_i32_0 = arith.constant 0 : i32
    return %arg0, %c0_i32 : i32, i32
  }
}

module attributes {stable_mosaic.version = 11 : i64} {
  func.func @_tail_kernel(%arg0: i32, %arg1: memref<5x5x2x128xbf16, #tpu.memory_space<vmem>>, %arg2: memref<9x128x128xbf16, #tpu.memory_space<vmem>>, %arg3: memref<1x128xf32, #tpu.memory_space<vmem>>, %arg4: memref<9x128x512xbf16, #tpu.memory_space<vmem>>, %arg5: memref<1x512xf32, #tpu.memory_space<vmem>>, %arg6: memref<512x128xbf16, #tpu.memory_space<vmem>>, %arg7: memref<1x128xf32, #tpu.memory_space<vmem>>, %arg8: memref<2x128xf32, #tpu.memory_space<vmem>>) attributes {dimension_semantics = [#tpu.dimension_semantics<parallel>], iteration_bounds = array<i64: 1>, scalar_prefetch = 0 : i64, scratch_operands = 0 : i64, tpu.core_type = #tpu.core_type<tc>, window_params = [{transform_indices = @transform_0, window_bounds = array<i64: 5, 5, 2, 128>}, {pipeline_mode = #tpu.pipeline_mode<synchronous>, transform_indices = @transform_1, window_bounds = array<i64: 9, 128, 128>}, {pipeline_mode = #tpu.pipeline_mode<synchronous>, transform_indices = @transform_2, window_bounds = array<i64: 1, 128>}, {pipeline_mode = #tpu.pipeline_mode<synchronous>, transform_indices = @transform_3, window_bounds = array<i64: 9, 128, 512>}, {pipeline_mode = #tpu.pipeline_mode<synchronous>, transform_indices = @transform_4, window_bounds = array<i64: 1, 512>}, {pipeline_mode = #tpu.pipeline_mode<synchronous>, transform_indices = @transform_5, window_bounds = array<i64: 512, 128>}, {pipeline_mode = #tpu.pipeline_mode<synchronous>, transform_indices = @transform_6, window_bounds = array<i64: 1, 128>}, {transform_indices = @transform_7, window_bounds = array<i64: 2, 128>}]} {
    %cst = arith.constant 0.000000e+00 : f32
    %0 = vector.broadcast %cst : f32 to vector<2x512xf32>
    %cst_0 = arith.constant 0.000000e+00 : f32
    %1 = vector.broadcast %cst_0 : f32 to vector<2x128xf32>
    %c0 = arith.constant 0 : index
    %c0_1 = arith.constant 0 : index
    %c0_2 = arith.constant 0 : index
    %c0_3 = arith.constant 0 : index
    %2 = vector.load %arg1[%c0, %c0_1, %c0_2, %c0_3] : memref<5x5x2x128xbf16, #tpu.memory_space<vmem>>, vector<1x1x2x128xbf16>
    %3 = vector.shape_cast %2 : vector<1x1x2x128xbf16> to vector<2x128xbf16>
    %c0_4 = arith.constant 0 : index
    %c0_5 = arith.constant 0 : index
    %c0_6 = arith.constant 0 : index
    %4 = vector.load %arg2[%c0_4, %c0_5, %c0_6] : memref<9x128x128xbf16, #tpu.memory_space<vmem>>, vector<1x128x128xbf16>
    %5 = vector.shape_cast %4 : vector<1x128x128xbf16> to vector<128x128xbf16>
    %cst_7 = arith.constant dense<0.000000e+00> : vector<2x128xf32>
    %6 = tpu.matmul %3, %5, %cst_7 {dimension_numbers = #tpu.dot_dimension_numbers<[1], [0], [0], [1], [0, 0, 1, 1], [], []>} : vector<2x128xbf16>, vector<128x128xbf16>, vector<2x128xf32> -> vector<2x128xf32>
    %7 = arith.addf %1, %6 : vector<2x128xf32>
    %c0_8 = arith.constant 0 : index
    %c1 = arith.constant 1 : index
    %c0_9 = arith.constant 0 : index
    %c0_10 = arith.constant 0 : index
    %8 = vector.load %arg1[%c0_8, %c1, %c0_9, %c0_10] : memref<5x5x2x128xbf16, #tpu.memory_space<vmem>>, vector<1x1x2x128xbf16>
    %9 = vector.shape_cast %8 : vector<1x1x2x128xbf16> to vector<2x128xbf16>
    %c1_11 = arith.constant 1 : index
    %c0_12 = arith.constant 0 : index
    %c0_13 = arith.constant 0 : index
    %10 = vector.load %arg2[%c1_11, %c0_12, %c0_13] : memref<9x128x128xbf16, #tpu.memory_space<vmem>>, vector<1x128x128xbf16>
    %11 = vector.shape_cast %10 : vector<1x128x128xbf16> to vector<128x128xbf16>
    %cst_14 = arith.constant dense<0.000000e+00> : vector<2x128xf32>
    %12 = tpu.matmul %9, %11, %cst_14 {dimension_numbers = #tpu.dot_dimension_numbers<[1], [0], [0], [1], [0, 0, 1, 1], [], []>} : vector<2x128xbf16>, vector<128x128xbf16>, vector<2x128xf32> -> vector<2x128xf32>
    %13 = arith.addf %7, %12 : vector<2x128xf32>
    %c0_15 = arith.constant 0 : index
    %c2 = arith.constant 2 : index
    %c0_16 = arith.constant 0 : index
    %c0_17 = arith.constant 0 : index
    %14 = vector.load %arg1[%c0_15, %c2, %c0_16, %c0_17] : memref<5x5x2x128xbf16, #tpu.memory_space<vmem>>, vector<1x1x2x128xbf16>
    %15 = vector.shape_cast %14 : vector<1x1x2x128xbf16> to vector<2x128xbf16>
    %c2_18 = arith.constant 2 : index
    %c0_19 = arith.constant 0 : index
    %c0_20 = arith.constant 0 : index
    %16 = vector.load %arg2[%c2_18, %c0_19, %c0_20] : memref<9x128x128xbf16, #tpu.memory_space<vmem>>, vector<1x128x128xbf16>
    %17 = vector.shape_cast %16 : vector<1x128x128xbf16> to vector<128x128xbf16>
    %cst_21 = arith.constant dense<0.000000e+00> : vector<2x128xf32>
    %18 = tpu.matmul %15, %17, %cst_21 {dimension_numbers = #tpu.dot_dimension_numbers<[1], [0], [0], [1], [0, 0, 1, 1], [], []>} : vector<2x128xbf16>, vector<128x128xbf16>, vector<2x128xf32> -> vector<2x128xf32>
    %19 = arith.addf %13, %18 : vector<2x128xf32>
    %c1_22 = arith.constant 1 : index
    %c0_23 = arith.constant 0 : index
    %c0_24 = arith.constant 0 : index
    %c0_25 = arith.constant 0 : index
    %20 = vector.load %arg1[%c1_22, %c0_23, %c0_24, %c0_25] : memref<5x5x2x128xbf16, #tpu.memory_space<vmem>>, vector<1x1x2x128xbf16>
    %21 = vector.shape_cast %20 : vector<1x1x2x128xbf16> to vector<2x128xbf16>
    %c3 = arith.constant 3 : index
    %c0_26 = arith.constant 0 : index
    %c0_27 = arith.constant 0 : index
    %22 = vector.load %arg2[%c3, %c0_26, %c0_27] : memref<9x128x128xbf16, #tpu.memory_space<vmem>>, vector<1x128x128xbf16>
    %23 = vector.shape_cast %22 : vector<1x128x128xbf16> to vector<128x128xbf16>
    %cst_28 = arith.constant dense<0.000000e+00> : vector<2x128xf32>
    %24 = tpu.matmul %21, %23, %cst_28 {dimension_numbers = #tpu.dot_dimension_numbers<[1], [0], [0], [1], [0, 0, 1, 1], [], []>} : vector<2x128xbf16>, vector<128x128xbf16>, vector<2x128xf32> -> vector<2x128xf32>
    %25 = arith.addf %19, %24 : vector<2x128xf32>
    %c1_29 = arith.constant 1 : index
    %c1_30 = arith.constant 1 : index
    %c0_31 = arith.constant 0 : index
    %c0_32 = arith.constant 0 : index
    %26 = vector.load %arg1[%c1_29, %c1_30, %c0_31, %c0_32] : memref<5x5x2x128xbf16, #tpu.memory_space<vmem>>, vector<1x1x2x128xbf16>
    %27 = vector.shape_cast %26 : vector<1x1x2x128xbf16> to vector<2x128xbf16>
    %c4 = arith.constant 4 : index
    %c0_33 = arith.constant 0 : index
    %c0_34 = arith.constant 0 : index
    %28 = vector.load %arg2[%c4, %c0_33, %c0_34] : memref<9x128x128xbf16, #tpu.memory_space<vmem>>, vector<1x128x128xbf16>
    %29 = vector.shape_cast %28 : vector<1x128x128xbf16> to vector<128x128xbf16>
    %cst_35 = arith.constant dense<0.000000e+00> : vector<2x128xf32>
    %30 = tpu.matmul %27, %29, %cst_35 {dimension_numbers = #tpu.dot_dimension_numbers<[1], [0], [0], [1], [0, 0, 1, 1], [], []>} : vector<2x128xbf16>, vector<128x128xbf16>, vector<2x128xf32> -> vector<2x128xf32>
    %31 = arith.addf %25, %30 : vector<2x128xf32>
    %c1_36 = arith.constant 1 : index
    %c2_37 = arith.constant 2 : index
    %c0_38 = arith.constant 0 : index
    %c0_39 = arith.constant 0 : index
    %32 = vector.load %arg1[%c1_36, %c2_37, %c0_38, %c0_39] : memref<5x5x2x128xbf16, #tpu.memory_space<vmem>>, vector<1x1x2x128xbf16>
    %33 = vector.shape_cast %32 : vector<1x1x2x128xbf16> to vector<2x128xbf16>
    %c5 = arith.constant 5 : index
    %c0_40 = arith.constant 0 : index
    %c0_41 = arith.constant 0 : index
    %34 = vector.load %arg2[%c5, %c0_40, %c0_41] : memref<9x128x128xbf16, #tpu.memory_space<vmem>>, vector<1x128x128xbf16>
    %35 = vector.shape_cast %34 : vector<1x128x128xbf16> to vector<128x128xbf16>
    %cst_42 = arith.constant dense<0.000000e+00> : vector<2x128xf32>
    %36 = tpu.matmul %33, %35, %cst_42 {dimension_numbers = #tpu.dot_dimension_numbers<[1], [0], [0], [1], [0, 0, 1, 1], [], []>} : vector<2x128xbf16>, vector<128x128xbf16>, vector<2x128xf32> -> vector<2x128xf32>
    %37 = arith.addf %31, %36 : vector<2x128xf32>
    %c2_43 = arith.constant 2 : index
    %c0_44 = arith.constant 0 : index
    %c0_45 = arith.constant 0 : index
    %c0_46 = arith.constant 0 : index
    %38 = vector.load %arg1[%c2_43, %c0_44, %c0_45, %c0_46] : memref<5x5x2x128xbf16, #tpu.memory_space<vmem>>, vector<1x1x2x128xbf16>
    %39 = vector.shape_cast %38 : vector<1x1x2x128xbf16> to vector<2x128xbf16>
    %c6 = arith.constant 6 : index
    %c0_47 = arith.constant 0 : index
    %c0_48 = arith.constant 0 : index
    %40 = vector.load %arg2[%c6, %c0_47, %c0_48] : memref<9x128x128xbf16, #tpu.memory_space<vmem>>, vector<1x128x128xbf16>
    %41 = vector.shape_cast %40 : vector<1x128x128xbf16> to vector<128x128xbf16>
    %cst_49 = arith.constant dense<0.000000e+00> : vector<2x128xf32>
    %42 = tpu.matmul %39, %41, %cst_49 {dimension_numbers = #tpu.dot_dimension_numbers<[1], [0], [0], [1], [0, 0, 1, 1], [], []>} : vector<2x128xbf16>, vector<128x128xbf16>, vector<2x128xf32> -> vector<2x128xf32>
    %43 = arith.addf %37, %42 : vector<2x128xf32>
    %c2_50 = arith.constant 2 : index
    %c1_51 = arith.constant 1 : index
    %c0_52 = arith.constant 0 : index
    %c0_53 = arith.constant 0 : index
    %44 = vector.load %arg1[%c2_50, %c1_51, %c0_52, %c0_53] : memref<5x5x2x128xbf16, #tpu.memory_space<vmem>>, vector<1x1x2x128xbf16>
    %45 = vector.shape_cast %44 : vector<1x1x2x128xbf16> to vector<2x128xbf16>
    %c7 = arith.constant 7 : index
    %c0_54 = arith.constant 0 : index
    %c0_55 = arith.constant 0 : index
    %46 = vector.load %arg2[%c7, %c0_54, %c0_55] : memref<9x128x128xbf16, #tpu.memory_space<vmem>>, vector<1x128x128xbf16>
    %47 = vector.shape_cast %46 : vector<1x128x128xbf16> to vector<128x128xbf16>
    %cst_56 = arith.constant dense<0.000000e+00> : vector<2x128xf32>
    %48 = tpu.matmul %45, %47, %cst_56 {dimension_numbers = #tpu.dot_dimension_numbers<[1], [0], [0], [1], [0, 0, 1, 1], [], []>} : vector<2x128xbf16>, vector<128x128xbf16>, vector<2x128xf32> -> vector<2x128xf32>
    %49 = arith.addf %43, %48 : vector<2x128xf32>
    %c2_57 = arith.constant 2 : index
    %c2_58 = arith.constant 2 : index
    %c0_59 = arith.constant 0 : index
    %c0_60 = arith.constant 0 : index
    %50 = vector.load %arg1[%c2_57, %c2_58, %c0_59, %c0_60] : memref<5x5x2x128xbf16, #tpu.memory_space<vmem>>, vector<1x1x2x128xbf16>
    %51 = vector.shape_cast %50 : vector<1x1x2x128xbf16> to vector<2x128xbf16>
    %c8 = arith.constant 8 : index
    %c0_61 = arith.constant 0 : index
    %c0_62 = arith.constant 0 : index
    %52 = vector.load %arg2[%c8, %c0_61, %c0_62] : memref<9x128x128xbf16, #tpu.memory_space<vmem>>, vector<1x128x128xbf16>
    %53 = vector.shape_cast %52 : vector<1x128x128xbf16> to vector<128x128xbf16>
    %cst_63 = arith.constant dense<0.000000e+00> : vector<2x128xf32>
    %54 = tpu.matmul %51, %53, %cst_63 {dimension_numbers = #tpu.dot_dimension_numbers<[1], [0], [0], [1], [0, 0, 1, 1], [], []>} : vector<2x128xbf16>, vector<128x128xbf16>, vector<2x128xf32> -> vector<2x128xf32>
    %55 = arith.addf %49, %54 : vector<2x128xf32>
    %c0_64 = arith.constant 0 : index
    %c0_65 = arith.constant 0 : index
    %56 = vector.load %arg3[%c0_64, %c0_65] : memref<1x128xf32, #tpu.memory_space<vmem>>, vector<1x128xf32>
    %57 = vector.broadcast %56 : vector<1x128xf32> to vector<2x128xf32>
    %58 = arith.addf %55, %57 : vector<2x128xf32>
    %cst_66 = arith.constant 0.000000e+00 : f32
    %59 = vector.broadcast %cst_66 : f32 to vector<2x128xf32>
    %60 = arith.maximumf %58, %59 : vector<2x128xf32>
    %61 = arith.truncf %60 : vector<2x128xf32> to vector<2x128xbf16>
    %c0_67 = arith.constant 0 : index
    %c0_68 = arith.constant 0 : index
    %c0_69 = arith.constant 0 : index
    %62 = vector.load %arg4[%c0_67, %c0_68, %c0_69] : memref<9x128x512xbf16, #tpu.memory_space<vmem>>, vector<1x128x512xbf16>
    %63 = vector.shape_cast %62 : vector<1x128x512xbf16> to vector<128x512xbf16>
    %cst_70 = arith.constant dense<0.000000e+00> : vector<2x512xf32>
    %64 = tpu.matmul %61, %63, %cst_70 {dimension_numbers = #tpu.dot_dimension_numbers<[1], [0], [0], [1], [0, 0, 1, 1], [], []>} : vector<2x128xbf16>, vector<128x512xbf16>, vector<2x512xf32> -> vector<2x512xf32>
    %65 = arith.addf %0, %64 : vector<2x512xf32>
    %cst_71 = arith.constant 0.000000e+00 : f32
    %66 = vector.broadcast %cst_71 : f32 to vector<2x128xf32>
    %c0_72 = arith.constant 0 : index
    %c1_73 = arith.constant 1 : index
    %c0_74 = arith.constant 0 : index
    %c0_75 = arith.constant 0 : index
    %67 = vector.load %arg1[%c0_72, %c1_73, %c0_74, %c0_75] : memref<5x5x2x128xbf16, #tpu.memory_space<vmem>>, vector<1x1x2x128xbf16>
    %68 = vector.shape_cast %67 : vector<1x1x2x128xbf16> to vector<2x128xbf16>
    %c0_76 = arith.constant 0 : index
    %c0_77 = arith.constant 0 : index
    %c0_78 = arith.constant 0 : index
    %69 = vector.load %arg2[%c0_76, %c0_77, %c0_78] : memref<9x128x128xbf16, #tpu.memory_space<vmem>>, vector<1x128x128xbf16>
    %70 = vector.shape_cast %69 : vector<1x128x128xbf16> to vector<128x128xbf16>
    %cst_79 = arith.constant dense<0.000000e+00> : vector<2x128xf32>
    %71 = tpu.matmul %68, %70, %cst_79 {dimension_numbers = #tpu.dot_dimension_numbers<[1], [0], [0], [1], [0, 0, 1, 1], [], []>} : vector<2x128xbf16>, vector<128x128xbf16>, vector<2x128xf32> -> vector<2x128xf32>
    %72 = arith.addf %66, %71 : vector<2x128xf32>
    %c0_80 = arith.constant 0 : index
    %c2_81 = arith.constant 2 : index
    %c0_82 = arith.constant 0 : index
    %c0_83 = arith.constant 0 : index
    %73 = vector.load %arg1[%c0_80, %c2_81, %c0_82, %c0_83] : memref<5x5x2x128xbf16, #tpu.memory_space<vmem>>, vector<1x1x2x128xbf16>
    %74 = vector.shape_cast %73 : vector<1x1x2x128xbf16> to vector<2x128xbf16>
    %c1_84 = arith.constant 1 : index
    %c0_85 = arith.constant 0 : index
    %c0_86 = arith.constant 0 : index
    %75 = vector.load %arg2[%c1_84, %c0_85, %c0_86] : memref<9x128x128xbf16, #tpu.memory_space<vmem>>, vector<1x128x128xbf16>
    %76 = vector.shape_cast %75 : vector<1x128x128xbf16> to vector<128x128xbf16>
    %cst_87 = arith.constant dense<0.000000e+00> : vector<2x128xf32>
    %77 = tpu.matmul %74, %76, %cst_87 {dimension_numbers = #tpu.dot_dimension_numbers<[1], [0], [0], [1], [0, 0, 1, 1], [], []>} : vector<2x128xbf16>, vector<128x128xbf16>, vector<2x128xf32> -> vector<2x128xf32>
    %78 = arith.addf %72, %77 : vector<2x128xf32>
    %c0_88 = arith.constant 0 : index
    %c3_89 = arith.constant 3 : index
    %c0_90 = arith.constant 0 : index
    %c0_91 = arith.constant 0 : index
    %79 = vector.load %arg1[%c0_88, %c3_89, %c0_90, %c0_91] : memref<5x5x2x128xbf16, #tpu.memory_space<vmem>>, vector<1x1x2x128xbf16>
    %80 = vector.shape_cast %79 : vector<1x1x2x128xbf16> to vector<2x128xbf16>
    %c2_92 = arith.constant 2 : index
    %c0_93 = arith.constant 0 : index
    %c0_94 = arith.constant 0 : index
    %81 = vector.load %arg2[%c2_92, %c0_93, %c0_94] : memref<9x128x128xbf16, #tpu.memory_space<vmem>>, vector<1x128x128xbf16>
    %82 = vector.shape_cast %81 : vector<1x128x128xbf16> to vector<128x128xbf16>
    %cst_95 = arith.constant dense<0.000000e+00> : vector<2x128xf32>
    %83 = tpu.matmul %80, %82, %cst_95 {dimension_numbers = #tpu.dot_dimension_numbers<[1], [0], [0], [1], [0, 0, 1, 1], [], []>} : vector<2x128xbf16>, vector<128x128xbf16>, vector<2x128xf32> -> vector<2x128xf32>
    %84 = arith.addf %78, %83 : vector<2x128xf32>
    %c1_96 = arith.constant 1 : index
    %c1_97 = arith.constant 1 : index
    %c0_98 = arith.constant 0 : index
    %c0_99 = arith.constant 0 : index
    %85 = vector.load %arg1[%c1_96, %c1_97, %c0_98, %c0_99] : memref<5x5x2x128xbf16, #tpu.memory_space<vmem>>, vector<1x1x2x128xbf16>
    %86 = vector.shape_cast %85 : vector<1x1x2x128xbf16> to vector<2x128xbf16>
    %c3_100 = arith.constant 3 : index
    %c0_101 = arith.constant 0 : index
    %c0_102 = arith.constant 0 : index
    %87 = vector.load %arg2[%c3_100, %c0_101, %c0_102] : memref<9x128x128xbf16, #tpu.memory_space<vmem>>, vector<1x128x128xbf16>
    %88 = vector.shape_cast %87 : vector<1x128x128xbf16> to vector<128x128xbf16>
    %cst_103 = arith.constant dense<0.000000e+00> : vector<2x128xf32>
    %89 = tpu.matmul %86, %88, %cst_103 {dimension_numbers = #tpu.dot_dimension_numbers<[1], [0], [0], [1], [0, 0, 1, 1], [], []>} : vector<2x128xbf16>, vector<128x128xbf16>, vector<2x128xf32> -> vector<2x128xf32>
    %90 = arith.addf %84, %89 : vector<2x128xf32>
    %c1_104 = arith.constant 1 : index
    %c2_105 = arith.constant 2 : index
    %c0_106 = arith.constant 0 : index
    %c0_107 = arith.constant 0 : index
    %91 = vector.load %arg1[%c1_104, %c2_105, %c0_106, %c0_107] : memref<5x5x2x128xbf16, #tpu.memory_space<vmem>>, vector<1x1x2x128xbf16>
    %92 = vector.shape_cast %91 : vector<1x1x2x128xbf16> to vector<2x128xbf16>
    %c4_108 = arith.constant 4 : index
    %c0_109 = arith.constant 0 : index
    %c0_110 = arith.constant 0 : index
    %93 = vector.load %arg2[%c4_108, %c0_109, %c0_110] : memref<9x128x128xbf16, #tpu.memory_space<vmem>>, vector<1x128x128xbf16>
    %94 = vector.shape_cast %93 : vector<1x128x128xbf16> to vector<128x128xbf16>
    %cst_111 = arith.constant dense<0.000000e+00> : vector<2x128xf32>
    %95 = tpu.matmul %92, %94, %cst_111 {dimension_numbers = #tpu.dot_dimension_numbers<[1], [0], [0], [1], [0, 0, 1, 1], [], []>} : vector<2x128xbf16>, vector<128x128xbf16>, vector<2x128xf32> -> vector<2x128xf32>
    %96 = arith.addf %90, %95 : vector<2x128xf32>
    %c1_112 = arith.constant 1 : index
    %c3_113 = arith.constant 3 : index
    %c0_114 = arith.constant 0 : index
    %c0_115 = arith.constant 0 : index
    %97 = vector.load %arg1[%c1_112, %c3_113, %c0_114, %c0_115] : memref<5x5x2x128xbf16, #tpu.memory_space<vmem>>, vector<1x1x2x128xbf16>
    %98 = vector.shape_cast %97 : vector<1x1x2x128xbf16> to vector<2x128xbf16>
    %c5_116 = arith.constant 5 : index
    %c0_117 = arith.constant 0 : index
    %c0_118 = arith.constant 0 : index
    %99 = vector.load %arg2[%c5_116, %c0_117, %c0_118] : memref<9x128x128xbf16, #tpu.memory_space<vmem>>, vector<1x128x128xbf16>
    %100 = vector.shape_cast %99 : vector<1x128x128xbf16> to vector<128x128xbf16>
    %cst_119 = arith.constant dense<0.000000e+00> : vector<2x128xf32>
    %101 = tpu.matmul %98, %100, %cst_119 {dimension_numbers = #tpu.dot_dimension_numbers<[1], [0], [0], [1], [0, 0, 1, 1], [], []>} : vector<2x128xbf16>, vector<128x128xbf16>, vector<2x128xf32> -> vector<2x128xf32>
    %102 = arith.addf %96, %101 : vector<2x128xf32>
    %c2_120 = arith.constant 2 : index
    %c1_121 = arith.constant 1 : index
    %c0_122 = arith.constant 0 : index
    %c0_123 = arith.constant 0 : index
    %103 = vector.load %arg1[%c2_120, %c1_121, %c0_122, %c0_123] : memref<5x5x2x128xbf16, #tpu.memory_space<vmem>>, vector<1x1x2x128xbf16>
    %104 = vector.shape_cast %103 : vector<1x1x2x128xbf16> to vector<2x128xbf16>
    %c6_124 = arith.constant 6 : index
    %c0_125 = arith.constant 0 : index
    %c0_126 = arith.constant 0 : index
    %105 = vector.load %arg2[%c6_124, %c0_125, %c0_126] : memref<9x128x128xbf16, #tpu.memory_space<vmem>>, vector<1x128x128xbf16>
    %106 = vector.shape_cast %105 : vector<1x128x128xbf16> to vector<128x128xbf16>
    %cst_127 = arith.constant dense<0.000000e+00> : vector<2x128xf32>
    %107 = tpu.matmul %104, %106, %cst_127 {dimension_numbers = #tpu.dot_dimension_numbers<[1], [0], [0], [1], [0, 0, 1, 1], [], []>} : vector<2x128xbf16>, vector<128x128xbf16>, vector<2x128xf32> -> vector<2x128xf32>
    %108 = arith.addf %102, %107 : vector<2x128xf32>
    %c2_128 = arith.constant 2 : index
    %c2_129 = arith.constant 2 : index
    %c0_130 = arith.constant 0 : index
    %c0_131 = arith.constant 0 : index
    %109 = vector.load %arg1[%c2_128, %c2_129, %c0_130, %c0_131] : memref<5x5x2x128xbf16, #tpu.memory_space<vmem>>, vector<1x1x2x128xbf16>
    %110 = vector.shape_cast %109 : vector<1x1x2x128xbf16> to vector<2x128xbf16>
    %c7_132 = arith.constant 7 : index
    %c0_133 = arith.constant 0 : index
    %c0_134 = arith.constant 0 : index
    %111 = vector.load %arg2[%c7_132, %c0_133, %c0_134] : memref<9x128x128xbf16, #tpu.memory_space<vmem>>, vector<1x128x128xbf16>
    %112 = vector.shape_cast %111 : vector<1x128x128xbf16> to vector<128x128xbf16>
    %cst_135 = arith.constant dense<0.000000e+00> : vector<2x128xf32>
    %113 = tpu.matmul %110, %112, %cst_135 {dimension_numbers = #tpu.dot_dimension_numbers<[1], [0], [0], [1], [0, 0, 1, 1], [], []>} : vector<2x128xbf16>, vector<128x128xbf16>, vector<2x128xf32> -> vector<2x128xf32>
    %114 = arith.addf %108, %113 : vector<2x128xf32>
    %c2_136 = arith.constant 2 : index
    %c3_137 = arith.constant 3 : index
    %c0_138 = arith.constant 0 : index
    %c0_139 = arith.constant 0 : index
    %115 = vector.load %arg1[%c2_136, %c3_137, %c0_138, %c0_139] : memref<5x5x2x128xbf16, #tpu.memory_space<vmem>>, vector<1x1x2x128xbf16>
    %116 = vector.shape_cast %115 : vector<1x1x2x128xbf16> to vector<2x128xbf16>
    %c8_140 = arith.constant 8 : index
    %c0_141 = arith.constant 0 : index
    %c0_142 = arith.constant 0 : index
    %117 = vector.load %arg2[%c8_140, %c0_141, %c0_142] : memref<9x128x128xbf16, #tpu.memory_space<vmem>>, vector<1x128x128xbf16>
    %118 = vector.shape_cast %117 : vector<1x128x128xbf16> to vector<128x128xbf16>
    %cst_143 = arith.constant dense<0.000000e+00> : vector<2x128xf32>
    %119 = tpu.matmul %116, %118, %cst_143 {dimension_numbers = #tpu.dot_dimension_numbers<[1], [0], [0], [1], [0, 0, 1, 1], [], []>} : vector<2x128xbf16>, vector<128x128xbf16>, vector<2x128xf32> -> vector<2x128xf32>
    %120 = arith.addf %114, %119 : vector<2x128xf32>
    %c0_144 = arith.constant 0 : index
    %c0_145 = arith.constant 0 : index
    %121 = vector.load %arg3[%c0_144, %c0_145] : memref<1x128xf32, #tpu.memory_space<vmem>>, vector<1x128xf32>
    %122 = vector.broadcast %121 : vector<1x128xf32> to vector<2x128xf32>
    %123 = arith.addf %120, %122 : vector<2x128xf32>
    %cst_146 = arith.constant 0.000000e+00 : f32
    %124 = vector.broadcast %cst_146 : f32 to vector<2x128xf32>
    %125 = arith.maximumf %123, %124 : vector<2x128xf32>
    %126 = arith.truncf %125 : vector<2x128xf32> to vector<2x128xbf16>
    %c1_147 = arith.constant 1 : index
    %c0_148 = arith.constant 0 : index
    %c0_149 = arith.constant 0 : index
    %127 = vector.load %arg4[%c1_147, %c0_148, %c0_149] : memref<9x128x512xbf16, #tpu.memory_space<vmem>>, vector<1x128x512xbf16>
    %128 = vector.shape_cast %127 : vector<1x128x512xbf16> to vector<128x512xbf16>
    %cst_150 = arith.constant dense<0.000000e+00> : vector<2x512xf32>
    %129 = tpu.matmul %126, %128, %cst_150 {dimension_numbers = #tpu.dot_dimension_numbers<[1], [0], [0], [1], [0, 0, 1, 1], [], []>} : vector<2x128xbf16>, vector<128x512xbf16>, vector<2x512xf32> -> vector<2x512xf32>
    %130 = arith.addf %65, %129 : vector<2x512xf32>
    %cst_151 = arith.constant 0.000000e+00 : f32
    %131 = vector.broadcast %cst_151 : f32 to vector<2x128xf32>
    %c0_152 = arith.constant 0 : index
    %c2_153 = arith.constant 2 : index
    %c0_154 = arith.constant 0 : index
    %c0_155 = arith.constant 0 : index
    %132 = vector.load %arg1[%c0_152, %c2_153, %c0_154, %c0_155] : memref<5x5x2x128xbf16, #tpu.memory_space<vmem>>, vector<1x1x2x128xbf16>
    %133 = vector.shape_cast %132 : vector<1x1x2x128xbf16> to vector<2x128xbf16>
    %c0_156 = arith.constant 0 : index
    %c0_157 = arith.constant 0 : index
    %c0_158 = arith.constant 0 : index
    %134 = vector.load %arg2[%c0_156, %c0_157, %c0_158] : memref<9x128x128xbf16, #tpu.memory_space<vmem>>, vector<1x128x128xbf16>
    %135 = vector.shape_cast %134 : vector<1x128x128xbf16> to vector<128x128xbf16>
    %cst_159 = arith.constant dense<0.000000e+00> : vector<2x128xf32>
    %136 = tpu.matmul %133, %135, %cst_159 {dimension_numbers = #tpu.dot_dimension_numbers<[1], [0], [0], [1], [0, 0, 1, 1], [], []>} : vector<2x128xbf16>, vector<128x128xbf16>, vector<2x128xf32> -> vector<2x128xf32>
    %137 = arith.addf %131, %136 : vector<2x128xf32>
    %c0_160 = arith.constant 0 : index
    %c3_161 = arith.constant 3 : index
    %c0_162 = arith.constant 0 : index
    %c0_163 = arith.constant 0 : index
    %138 = vector.load %arg1[%c0_160, %c3_161, %c0_162, %c0_163] : memref<5x5x2x128xbf16, #tpu.memory_space<vmem>>, vector<1x1x2x128xbf16>
    %139 = vector.shape_cast %138 : vector<1x1x2x128xbf16> to vector<2x128xbf16>
    %c1_164 = arith.constant 1 : index
    %c0_165 = arith.constant 0 : index
    %c0_166 = arith.constant 0 : index
    %140 = vector.load %arg2[%c1_164, %c0_165, %c0_166] : memref<9x128x128xbf16, #tpu.memory_space<vmem>>, vector<1x128x128xbf16>
    %141 = vector.shape_cast %140 : vector<1x128x128xbf16> to vector<128x128xbf16>
    %cst_167 = arith.constant dense<0.000000e+00> : vector<2x128xf32>
    %142 = tpu.matmul %139, %141, %cst_167 {dimension_numbers = #tpu.dot_dimension_numbers<[1], [0], [0], [1], [0, 0, 1, 1], [], []>} : vector<2x128xbf16>, vector<128x128xbf16>, vector<2x128xf32> -> vector<2x128xf32>
    %143 = arith.addf %137, %142 : vector<2x128xf32>
    %c0_168 = arith.constant 0 : index
    %c4_169 = arith.constant 4 : index
    %c0_170 = arith.constant 0 : index
    %c0_171 = arith.constant 0 : index
    %144 = vector.load %arg1[%c0_168, %c4_169, %c0_170, %c0_171] : memref<5x5x2x128xbf16, #tpu.memory_space<vmem>>, vector<1x1x2x128xbf16>
    %145 = vector.shape_cast %144 : vector<1x1x2x128xbf16> to vector<2x128xbf16>
    %c2_172 = arith.constant 2 : index
    %c0_173 = arith.constant 0 : index
    %c0_174 = arith.constant 0 : index
    %146 = vector.load %arg2[%c2_172, %c0_173, %c0_174] : memref<9x128x128xbf16, #tpu.memory_space<vmem>>, vector<1x128x128xbf16>
    %147 = vector.shape_cast %146 : vector<1x128x128xbf16> to vector<128x128xbf16>
    %cst_175 = arith.constant dense<0.000000e+00> : vector<2x128xf32>
    %148 = tpu.matmul %145, %147, %cst_175 {dimension_numbers = #tpu.dot_dimension_numbers<[1], [0], [0], [1], [0, 0, 1, 1], [], []>} : vector<2x128xbf16>, vector<128x128xbf16>, vector<2x128xf32> -> vector<2x128xf32>
    %149 = arith.addf %143, %148 : vector<2x128xf32>
    %c1_176 = arith.constant 1 : index
    %c2_177 = arith.constant 2 : index
    %c0_178 = arith.constant 0 : index
    %c0_179 = arith.constant 0 : index
    %150 = vector.load %arg1[%c1_176, %c2_177, %c0_178, %c0_179] : memref<5x5x2x128xbf16, #tpu.memory_space<vmem>>, vector<1x1x2x128xbf16>
    %151 = vector.shape_cast %150 : vector<1x1x2x128xbf16> to vector<2x128xbf16>
    %c3_180 = arith.constant 3 : index
    %c0_181 = arith.constant 0 : index
    %c0_182 = arith.constant 0 : index
    %152 = vector.load %arg2[%c3_180, %c0_181, %c0_182] : memref<9x128x128xbf16, #tpu.memory_space<vmem>>, vector<1x128x128xbf16>
    %153 = vector.shape_cast %152 : vector<1x128x128xbf16> to vector<128x128xbf16>
    %cst_183 = arith.constant dense<0.000000e+00> : vector<2x128xf32>
    %154 = tpu.matmul %151, %153, %cst_183 {dimension_numbers = #tpu.dot_dimension_numbers<[1], [0], [0], [1], [0, 0, 1, 1], [], []>} : vector<2x128xbf16>, vector<128x128xbf16>, vector<2x128xf32> -> vector<2x128xf32>
    %155 = arith.addf %149, %154 : vector<2x128xf32>
    %c1_184 = arith.constant 1 : index
    %c3_185 = arith.constant 3 : index
    %c0_186 = arith.constant 0 : index
    %c0_187 = arith.constant 0 : index
    %156 = vector.load %arg1[%c1_184, %c3_185, %c0_186, %c0_187] : memref<5x5x2x128xbf16, #tpu.memory_space<vmem>>, vector<1x1x2x128xbf16>
    %157 = vector.shape_cast %156 : vector<1x1x2x128xbf16> to vector<2x128xbf16>
    %c4_188 = arith.constant 4 : index
    %c0_189 = arith.constant 0 : index
    %c0_190 = arith.constant 0 : index
    %158 = vector.load %arg2[%c4_188, %c0_189, %c0_190] : memref<9x128x128xbf16, #tpu.memory_space<vmem>>, vector<1x128x128xbf16>
    %159 = vector.shape_cast %158 : vector<1x128x128xbf16> to vector<128x128xbf16>
    %cst_191 = arith.constant dense<0.000000e+00> : vector<2x128xf32>
    %160 = tpu.matmul %157, %159, %cst_191 {dimension_numbers = #tpu.dot_dimension_numbers<[1], [0], [0], [1], [0, 0, 1, 1], [], []>} : vector<2x128xbf16>, vector<128x128xbf16>, vector<2x128xf32> -> vector<2x128xf32>
    %161 = arith.addf %155, %160 : vector<2x128xf32>
    %c1_192 = arith.constant 1 : index
    %c4_193 = arith.constant 4 : index
    %c0_194 = arith.constant 0 : index
    %c0_195 = arith.constant 0 : index
    %162 = vector.load %arg1[%c1_192, %c4_193, %c0_194, %c0_195] : memref<5x5x2x128xbf16, #tpu.memory_space<vmem>>, vector<1x1x2x128xbf16>
    %163 = vector.shape_cast %162 : vector<1x1x2x128xbf16> to vector<2x128xbf16>
    %c5_196 = arith.constant 5 : index
    %c0_197 = arith.constant 0 : index
    %c0_198 = arith.constant 0 : index
    %164 = vector.load %arg2[%c5_196, %c0_197, %c0_198] : memref<9x128x128xbf16, #tpu.memory_space<vmem>>, vector<1x128x128xbf16>
    %165 = vector.shape_cast %164 : vector<1x128x128xbf16> to vector<128x128xbf16>
    %cst_199 = arith.constant dense<0.000000e+00> : vector<2x128xf32>
    %166 = tpu.matmul %163, %165, %cst_199 {dimension_numbers = #tpu.dot_dimension_numbers<[1], [0], [0], [1], [0, 0, 1, 1], [], []>} : vector<2x128xbf16>, vector<128x128xbf16>, vector<2x128xf32> -> vector<2x128xf32>
    %167 = arith.addf %161, %166 : vector<2x128xf32>
    %c2_200 = arith.constant 2 : index
    %c2_201 = arith.constant 2 : index
    %c0_202 = arith.constant 0 : index
    %c0_203 = arith.constant 0 : index
    %168 = vector.load %arg1[%c2_200, %c2_201, %c0_202, %c0_203] : memref<5x5x2x128xbf16, #tpu.memory_space<vmem>>, vector<1x1x2x128xbf16>
    %169 = vector.shape_cast %168 : vector<1x1x2x128xbf16> to vector<2x128xbf16>
    %c6_204 = arith.constant 6 : index
    %c0_205 = arith.constant 0 : index
    %c0_206 = arith.constant 0 : index
    %170 = vector.load %arg2[%c6_204, %c0_205, %c0_206] : memref<9x128x128xbf16, #tpu.memory_space<vmem>>, vector<1x128x128xbf16>
    %171 = vector.shape_cast %170 : vector<1x128x128xbf16> to vector<128x128xbf16>
    %cst_207 = arith.constant dense<0.000000e+00> : vector<2x128xf32>
    %172 = tpu.matmul %169, %171, %cst_207 {dimension_numbers = #tpu.dot_dimension_numbers<[1], [0], [0], [1], [0, 0, 1, 1], [], []>} : vector<2x128xbf16>, vector<128x128xbf16>, vector<2x128xf32> -> vector<2x128xf32>
    %173 = arith.addf %167, %172 : vector<2x128xf32>
    %c2_208 = arith.constant 2 : index
    %c3_209 = arith.constant 3 : index
    %c0_210 = arith.constant 0 : index
    %c0_211 = arith.constant 0 : index
    %174 = vector.load %arg1[%c2_208, %c3_209, %c0_210, %c0_211] : memref<5x5x2x128xbf16, #tpu.memory_space<vmem>>, vector<1x1x2x128xbf16>
    %175 = vector.shape_cast %174 : vector<1x1x2x128xbf16> to vector<2x128xbf16>
    %c7_212 = arith.constant 7 : index
    %c0_213 = arith.constant 0 : index
    %c0_214 = arith.constant 0 : index
    %176 = vector.load %arg2[%c7_212, %c0_213, %c0_214] : memref<9x128x128xbf16, #tpu.memory_space<vmem>>, vector<1x128x128xbf16>
    %177 = vector.shape_cast %176 : vector<1x128x128xbf16> to vector<128x128xbf16>
    %cst_215 = arith.constant dense<0.000000e+00> : vector<2x128xf32>
    %178 = tpu.matmul %175, %177, %cst_215 {dimension_numbers = #tpu.dot_dimension_numbers<[1], [0], [0], [1], [0, 0, 1, 1], [], []>} : vector<2x128xbf16>, vector<128x128xbf16>, vector<2x128xf32> -> vector<2x128xf32>
    %179 = arith.addf %173, %178 : vector<2x128xf32>
    %c2_216 = arith.constant 2 : index
    %c4_217 = arith.constant 4 : index
    %c0_218 = arith.constant 0 : index
    %c0_219 = arith.constant 0 : index
    %180 = vector.load %arg1[%c2_216, %c4_217, %c0_218, %c0_219] : memref<5x5x2x128xbf16, #tpu.memory_space<vmem>>, vector<1x1x2x128xbf16>
    %181 = vector.shape_cast %180 : vector<1x1x2x128xbf16> to vector<2x128xbf16>
    %c8_220 = arith.constant 8 : index
    %c0_221 = arith.constant 0 : index
    %c0_222 = arith.constant 0 : index
    %182 = vector.load %arg2[%c8_220, %c0_221, %c0_222] : memref<9x128x128xbf16, #tpu.memory_space<vmem>>, vector<1x128x128xbf16>
    %183 = vector.shape_cast %182 : vector<1x128x128xbf16> to vector<128x128xbf16>
    %cst_223 = arith.constant dense<0.000000e+00> : vector<2x128xf32>
    %184 = tpu.matmul %181, %183, %cst_223 {dimension_numbers = #tpu.dot_dimension_numbers<[1], [0], [0], [1], [0, 0, 1, 1], [], []>} : vector<2x128xbf16>, vector<128x128xbf16>, vector<2x128xf32> -> vector<2x128xf32>
    %185 = arith.addf %179, %184 : vector<2x128xf32>
    %c0_224 = arith.constant 0 : index
    %c0_225 = arith.constant 0 : index
    %186 = vector.load %arg3[%c0_224, %c0_225] : memref<1x128xf32, #tpu.memory_space<vmem>>, vector<1x128xf32>
    %187 = vector.broadcast %186 : vector<1x128xf32> to vector<2x128xf32>
    %188 = arith.addf %185, %187 : vector<2x128xf32>
    %cst_226 = arith.constant 0.000000e+00 : f32
    %189 = vector.broadcast %cst_226 : f32 to vector<2x128xf32>
    %190 = arith.maximumf %188, %189 : vector<2x128xf32>
    %191 = arith.truncf %190 : vector<2x128xf32> to vector<2x128xbf16>
    %c2_227 = arith.constant 2 : index
    %c0_228 = arith.constant 0 : index
    %c0_229 = arith.constant 0 : index
    %192 = vector.load %arg4[%c2_227, %c0_228, %c0_229] : memref<9x128x512xbf16, #tpu.memory_space<vmem>>, vector<1x128x512xbf16>
    %193 = vector.shape_cast %192 : vector<1x128x512xbf16> to vector<128x512xbf16>
    %cst_230 = arith.constant dense<0.000000e+00> : vector<2x512xf32>
    %194 = tpu.matmul %191, %193, %cst_230 {dimension_numbers = #tpu.dot_dimension_numbers<[1], [0], [0], [1], [0, 0, 1, 1], [], []>} : vector<2x128xbf16>, vector<128x512xbf16>, vector<2x512xf32> -> vector<2x512xf32>
    %195 = arith.addf %130, %194 : vector<2x512xf32>
    %cst_231 = arith.constant 0.000000e+00 : f32
    %196 = vector.broadcast %cst_231 : f32 to vector<2x128xf32>
    %c1_232 = arith.constant 1 : index
    %c0_233 = arith.constant 0 : index
    %c0_234 = arith.constant 0 : index
    %c0_235 = arith.constant 0 : index
    %197 = vector.load %arg1[%c1_232, %c0_233, %c0_234, %c0_235] : memref<5x5x2x128xbf16, #tpu.memory_space<vmem>>, vector<1x1x2x128xbf16>
    %198 = vector.shape_cast %197 : vector<1x1x2x128xbf16> to vector<2x128xbf16>
    %c0_236 = arith.constant 0 : index
    %c0_237 = arith.constant 0 : index
    %c0_238 = arith.constant 0 : index
    %199 = vector.load %arg2[%c0_236, %c0_237, %c0_238] : memref<9x128x128xbf16, #tpu.memory_space<vmem>>, vector<1x128x128xbf16>
    %200 = vector.shape_cast %199 : vector<1x128x128xbf16> to vector<128x128xbf16>
    %cst_239 = arith.constant dense<0.000000e+00> : vector<2x128xf32>
    %201 = tpu.matmul %198, %200, %cst_239 {dimension_numbers = #tpu.dot_dimension_numbers<[1], [0], [0], [1], [0, 0, 1, 1], [], []>} : vector<2x128xbf16>, vector<128x128xbf16>, vector<2x128xf32> -> vector<2x128xf32>
    %202 = arith.addf %196, %201 : vector<2x128xf32>
    %c1_240 = arith.constant 1 : index
    %c1_241 = arith.constant 1 : index
    %c0_242 = arith.constant 0 : index
    %c0_243 = arith.constant 0 : index
    %203 = vector.load %arg1[%c1_240, %c1_241, %c0_242, %c0_243] : memref<5x5x2x128xbf16, #tpu.memory_space<vmem>>, vector<1x1x2x128xbf16>
    %204 = vector.shape_cast %203 : vector<1x1x2x128xbf16> to vector<2x128xbf16>
    %c1_244 = arith.constant 1 : index
    %c0_245 = arith.constant 0 : index
    %c0_246 = arith.constant 0 : index
    %205 = vector.load %arg2[%c1_244, %c0_245, %c0_246] : memref<9x128x128xbf16, #tpu.memory_space<vmem>>, vector<1x128x128xbf16>
    %206 = vector.shape_cast %205 : vector<1x128x128xbf16> to vector<128x128xbf16>
    %cst_247 = arith.constant dense<0.000000e+00> : vector<2x128xf32>
    %207 = tpu.matmul %204, %206, %cst_247 {dimension_numbers = #tpu.dot_dimension_numbers<[1], [0], [0], [1], [0, 0, 1, 1], [], []>} : vector<2x128xbf16>, vector<128x128xbf16>, vector<2x128xf32> -> vector<2x128xf32>
    %208 = arith.addf %202, %207 : vector<2x128xf32>
    %c1_248 = arith.constant 1 : index
    %c2_249 = arith.constant 2 : index
    %c0_250 = arith.constant 0 : index
    %c0_251 = arith.constant 0 : index
    %209 = vector.load %arg1[%c1_248, %c2_249, %c0_250, %c0_251] : memref<5x5x2x128xbf16, #tpu.memory_space<vmem>>, vector<1x1x2x128xbf16>
    %210 = vector.shape_cast %209 : vector<1x1x2x128xbf16> to vector<2x128xbf16>
    %c2_252 = arith.constant 2 : index
    %c0_253 = arith.constant 0 : index
    %c0_254 = arith.constant 0 : index
    %211 = vector.load %arg2[%c2_252, %c0_253, %c0_254] : memref<9x128x128xbf16, #tpu.memory_space<vmem>>, vector<1x128x128xbf16>
    %212 = vector.shape_cast %211 : vector<1x128x128xbf16> to vector<128x128xbf16>
    %cst_255 = arith.constant dense<0.000000e+00> : vector<2x128xf32>
    %213 = tpu.matmul %210, %212, %cst_255 {dimension_numbers = #tpu.dot_dimension_numbers<[1], [0], [0], [1], [0, 0, 1, 1], [], []>} : vector<2x128xbf16>, vector<128x128xbf16>, vector<2x128xf32> -> vector<2x128xf32>
    %214 = arith.addf %208, %213 : vector<2x128xf32>
    %c2_256 = arith.constant 2 : index
    %c0_257 = arith.constant 0 : index
    %c0_258 = arith.constant 0 : index
    %c0_259 = arith.constant 0 : index
    %215 = vector.load %arg1[%c2_256, %c0_257, %c0_258, %c0_259] : memref<5x5x2x128xbf16, #tpu.memory_space<vmem>>, vector<1x1x2x128xbf16>
    %216 = vector.shape_cast %215 : vector<1x1x2x128xbf16> to vector<2x128xbf16>
    %c3_260 = arith.constant 3 : index
    %c0_261 = arith.constant 0 : index
    %c0_262 = arith.constant 0 : index
    %217 = vector.load %arg2[%c3_260, %c0_261, %c0_262] : memref<9x128x128xbf16, #tpu.memory_space<vmem>>, vector<1x128x128xbf16>
    %218 = vector.shape_cast %217 : vector<1x128x128xbf16> to vector<128x128xbf16>
    %cst_263 = arith.constant dense<0.000000e+00> : vector<2x128xf32>
    %219 = tpu.matmul %216, %218, %cst_263 {dimension_numbers = #tpu.dot_dimension_numbers<[1], [0], [0], [1], [0, 0, 1, 1], [], []>} : vector<2x128xbf16>, vector<128x128xbf16>, vector<2x128xf32> -> vector<2x128xf32>
    %220 = arith.addf %214, %219 : vector<2x128xf32>
    %c2_264 = arith.constant 2 : index
    %c1_265 = arith.constant 1 : index
    %c0_266 = arith.constant 0 : index
    %c0_267 = arith.constant 0 : index
    %221 = vector.load %arg1[%c2_264, %c1_265, %c0_266, %c0_267] : memref<5x5x2x128xbf16, #tpu.memory_space<vmem>>, vector<1x1x2x128xbf16>
    %222 = vector.shape_cast %221 : vector<1x1x2x128xbf16> to vector<2x128xbf16>
    %c4_268 = arith.constant 4 : index
    %c0_269 = arith.constant 0 : index
    %c0_270 = arith.constant 0 : index
    %223 = vector.load %arg2[%c4_268, %c0_269, %c0_270] : memref<9x128x128xbf16, #tpu.memory_space<vmem>>, vector<1x128x128xbf16>
    %224 = vector.shape_cast %223 : vector<1x128x128xbf16> to vector<128x128xbf16>
    %cst_271 = arith.constant dense<0.000000e+00> : vector<2x128xf32>
    %225 = tpu.matmul %222, %224, %cst_271 {dimension_numbers = #tpu.dot_dimension_numbers<[1], [0], [0], [1], [0, 0, 1, 1], [], []>} : vector<2x128xbf16>, vector<128x128xbf16>, vector<2x128xf32> -> vector<2x128xf32>
    %226 = arith.addf %220, %225 : vector<2x128xf32>
    %c2_272 = arith.constant 2 : index
    %c2_273 = arith.constant 2 : index
    %c0_274 = arith.constant 0 : index
    %c0_275 = arith.constant 0 : index
    %227 = vector.load %arg1[%c2_272, %c2_273, %c0_274, %c0_275] : memref<5x5x2x128xbf16, #tpu.memory_space<vmem>>, vector<1x1x2x128xbf16>
    %228 = vector.shape_cast %227 : vector<1x1x2x128xbf16> to vector<2x128xbf16>
    %c5_276 = arith.constant 5 : index
    %c0_277 = arith.constant 0 : index
    %c0_278 = arith.constant 0 : index
    %229 = vector.load %arg2[%c5_276, %c0_277, %c0_278] : memref<9x128x128xbf16, #tpu.memory_space<vmem>>, vector<1x128x128xbf16>
    %230 = vector.shape_cast %229 : vector<1x128x128xbf16> to vector<128x128xbf16>
    %cst_279 = arith.constant dense<0.000000e+00> : vector<2x128xf32>
    %231 = tpu.matmul %228, %230, %cst_279 {dimension_numbers = #tpu.dot_dimension_numbers<[1], [0], [0], [1], [0, 0, 1, 1], [], []>} : vector<2x128xbf16>, vector<128x128xbf16>, vector<2x128xf32> -> vector<2x128xf32>
    %232 = arith.addf %226, %231 : vector<2x128xf32>
    %c3_280 = arith.constant 3 : index
    %c0_281 = arith.constant 0 : index
    %c0_282 = arith.constant 0 : index
    %c0_283 = arith.constant 0 : index
    %233 = vector.load %arg1[%c3_280, %c0_281, %c0_282, %c0_283] : memref<5x5x2x128xbf16, #tpu.memory_space<vmem>>, vector<1x1x2x128xbf16>
    %234 = vector.shape_cast %233 : vector<1x1x2x128xbf16> to vector<2x128xbf16>
    %c6_284 = arith.constant 6 : index
    %c0_285 = arith.constant 0 : index
    %c0_286 = arith.constant 0 : index
    %235 = vector.load %arg2[%c6_284, %c0_285, %c0_286] : memref<9x128x128xbf16, #tpu.memory_space<vmem>>, vector<1x128x128xbf16>
    %236 = vector.shape_cast %235 : vector<1x128x128xbf16> to vector<128x128xbf16>
    %cst_287 = arith.constant dense<0.000000e+00> : vector<2x128xf32>
    %237 = tpu.matmul %234, %236, %cst_287 {dimension_numbers = #tpu.dot_dimension_numbers<[1], [0], [0], [1], [0, 0, 1, 1], [], []>} : vector<2x128xbf16>, vector<128x128xbf16>, vector<2x128xf32> -> vector<2x128xf32>
    %238 = arith.addf %232, %237 : vector<2x128xf32>
    %c3_288 = arith.constant 3 : index
    %c1_289 = arith.constant 1 : index
    %c0_290 = arith.constant 0 : index
    %c0_291 = arith.constant 0 : index
    %239 = vector.load %arg1[%c3_288, %c1_289, %c0_290, %c0_291] : memref<5x5x2x128xbf16, #tpu.memory_space<vmem>>, vector<1x1x2x128xbf16>
    %240 = vector.shape_cast %239 : vector<1x1x2x128xbf16> to vector<2x128xbf16>
    %c7_292 = arith.constant 7 : index
    %c0_293 = arith.constant 0 : index
    %c0_294 = arith.constant 0 : index
    %241 = vector.load %arg2[%c7_292, %c0_293, %c0_294] : memref<9x128x128xbf16, #tpu.memory_space<vmem>>, vector<1x128x128xbf16>
    %242 = vector.shape_cast %241 : vector<1x128x128xbf16> to vector<128x128xbf16>
    %cst_295 = arith.constant dense<0.000000e+00> : vector<2x128xf32>
    %243 = tpu.matmul %240, %242, %cst_295 {dimension_numbers = #tpu.dot_dimension_numbers<[1], [0], [0], [1], [0, 0, 1, 1], [], []>} : vector<2x128xbf16>, vector<128x128xbf16>, vector<2x128xf32> -> vector<2x128xf32>
    %244 = arith.addf %238, %243 : vector<2x128xf32>
    %c3_296 = arith.constant 3 : index
    %c2_297 = arith.constant 2 : index
    %c0_298 = arith.constant 0 : index
    %c0_299 = arith.constant 0 : index
    %245 = vector.load %arg1[%c3_296, %c2_297, %c0_298, %c0_299] : memref<5x5x2x128xbf16, #tpu.memory_space<vmem>>, vector<1x1x2x128xbf16>
    %246 = vector.shape_cast %245 : vector<1x1x2x128xbf16> to vector<2x128xbf16>
    %c8_300 = arith.constant 8 : index
    %c0_301 = arith.constant 0 : index
    %c0_302 = arith.constant 0 : index
    %247 = vector.load %arg2[%c8_300, %c0_301, %c0_302] : memref<9x128x128xbf16, #tpu.memory_space<vmem>>, vector<1x128x128xbf16>
    %248 = vector.shape_cast %247 : vector<1x128x128xbf16> to vector<128x128xbf16>
    %cst_303 = arith.constant dense<0.000000e+00> : vector<2x128xf32>
    %249 = tpu.matmul %246, %248, %cst_303 {dimension_numbers = #tpu.dot_dimension_numbers<[1], [0], [0], [1], [0, 0, 1, 1], [], []>} : vector<2x128xbf16>, vector<128x128xbf16>, vector<2x128xf32> -> vector<2x128xf32>
    %250 = arith.addf %244, %249 : vector<2x128xf32>
    %c0_304 = arith.constant 0 : index
    %c0_305 = arith.constant 0 : index
    %251 = vector.load %arg3[%c0_304, %c0_305] : memref<1x128xf32, #tpu.memory_space<vmem>>, vector<1x128xf32>
    %252 = vector.broadcast %251 : vector<1x128xf32> to vector<2x128xf32>
    %253 = arith.addf %250, %252 : vector<2x128xf32>
    %cst_306 = arith.constant 0.000000e+00 : f32
    %254 = vector.broadcast %cst_306 : f32 to vector<2x128xf32>
    %255 = arith.maximumf %253, %254 : vector<2x128xf32>
    %256 = arith.truncf %255 : vector<2x128xf32> to vector<2x128xbf16>
    %c3_307 = arith.constant 3 : index
    %c0_308 = arith.constant 0 : index
    %c0_309 = arith.constant 0 : index
    %257 = vector.load %arg4[%c3_307, %c0_308, %c0_309] : memref<9x128x512xbf16, #tpu.memory_space<vmem>>, vector<1x128x512xbf16>
    %258 = vector.shape_cast %257 : vector<1x128x512xbf16> to vector<128x512xbf16>
    %cst_310 = arith.constant dense<0.000000e+00> : vector<2x512xf32>
    %259 = tpu.matmul %256, %258, %cst_310 {dimension_numbers = #tpu.dot_dimension_numbers<[1], [0], [0], [1], [0, 0, 1, 1], [], []>} : vector<2x128xbf16>, vector<128x512xbf16>, vector<2x512xf32> -> vector<2x512xf32>
    %260 = arith.addf %195, %259 : vector<2x512xf32>
    %cst_311 = arith.constant 0.000000e+00 : f32
    %261 = vector.broadcast %cst_311 : f32 to vector<2x128xf32>
    %c1_312 = arith.constant 1 : index
    %c1_313 = arith.constant 1 : index
    %c0_314 = arith.constant 0 : index
    %c0_315 = arith.constant 0 : index
    %262 = vector.load %arg1[%c1_312, %c1_313, %c0_314, %c0_315] : memref<5x5x2x128xbf16, #tpu.memory_space<vmem>>, vector<1x1x2x128xbf16>
    %263 = vector.shape_cast %262 : vector<1x1x2x128xbf16> to vector<2x128xbf16>
    %c0_316 = arith.constant 0 : index
    %c0_317 = arith.constant 0 : index
    %c0_318 = arith.constant 0 : index
    %264 = vector.load %arg2[%c0_316, %c0_317, %c0_318] : memref<9x128x128xbf16, #tpu.memory_space<vmem>>, vector<1x128x128xbf16>
    %265 = vector.shape_cast %264 : vector<1x128x128xbf16> to vector<128x128xbf16>
    %cst_319 = arith.constant dense<0.000000e+00> : vector<2x128xf32>
    %266 = tpu.matmul %263, %265, %cst_319 {dimension_numbers = #tpu.dot_dimension_numbers<[1], [0], [0], [1], [0, 0, 1, 1], [], []>} : vector<2x128xbf16>, vector<128x128xbf16>, vector<2x128xf32> -> vector<2x128xf32>
    %267 = arith.addf %261, %266 : vector<2x128xf32>
    %c1_320 = arith.constant 1 : index
    %c2_321 = arith.constant 2 : index
    %c0_322 = arith.constant 0 : index
    %c0_323 = arith.constant 0 : index
    %268 = vector.load %arg1[%c1_320, %c2_321, %c0_322, %c0_323] : memref<5x5x2x128xbf16, #tpu.memory_space<vmem>>, vector<1x1x2x128xbf16>
    %269 = vector.shape_cast %268 : vector<1x1x2x128xbf16> to vector<2x128xbf16>
    %c1_324 = arith.constant 1 : index
    %c0_325 = arith.constant 0 : index
    %c0_326 = arith.constant 0 : index
    %270 = vector.load %arg2[%c1_324, %c0_325, %c0_326] : memref<9x128x128xbf16, #tpu.memory_space<vmem>>, vector<1x128x128xbf16>
    %271 = vector.shape_cast %270 : vector<1x128x128xbf16> to vector<128x128xbf16>
    %cst_327 = arith.constant dense<0.000000e+00> : vector<2x128xf32>
    %272 = tpu.matmul %269, %271, %cst_327 {dimension_numbers = #tpu.dot_dimension_numbers<[1], [0], [0], [1], [0, 0, 1, 1], [], []>} : vector<2x128xbf16>, vector<128x128xbf16>, vector<2x128xf32> -> vector<2x128xf32>
    %273 = arith.addf %267, %272 : vector<2x128xf32>
    %c1_328 = arith.constant 1 : index
    %c3_329 = arith.constant 3 : index
    %c0_330 = arith.constant 0 : index
    %c0_331 = arith.constant 0 : index
    %274 = vector.load %arg1[%c1_328, %c3_329, %c0_330, %c0_331] : memref<5x5x2x128xbf16, #tpu.memory_space<vmem>>, vector<1x1x2x128xbf16>
    %275 = vector.shape_cast %274 : vector<1x1x2x128xbf16> to vector<2x128xbf16>
    %c2_332 = arith.constant 2 : index
    %c0_333 = arith.constant 0 : index
    %c0_334 = arith.constant 0 : index
    %276 = vector.load %arg2[%c2_332, %c0_333, %c0_334] : memref<9x128x128xbf16, #tpu.memory_space<vmem>>, vector<1x128x128xbf16>
    %277 = vector.shape_cast %276 : vector<1x128x128xbf16> to vector<128x128xbf16>
    %cst_335 = arith.constant dense<0.000000e+00> : vector<2x128xf32>
    %278 = tpu.matmul %275, %277, %cst_335 {dimension_numbers = #tpu.dot_dimension_numbers<[1], [0], [0], [1], [0, 0, 1, 1], [], []>} : vector<2x128xbf16>, vector<128x128xbf16>, vector<2x128xf32> -> vector<2x128xf32>
    %279 = arith.addf %273, %278 : vector<2x128xf32>
    %c2_336 = arith.constant 2 : index
    %c1_337 = arith.constant 1 : index
    %c0_338 = arith.constant 0 : index
    %c0_339 = arith.constant 0 : index
    %280 = vector.load %arg1[%c2_336, %c1_337, %c0_338, %c0_339] : memref<5x5x2x128xbf16, #tpu.memory_space<vmem>>, vector<1x1x2x128xbf16>
    %281 = vector.shape_cast %280 : vector<1x1x2x128xbf16> to vector<2x128xbf16>
    %c3_340 = arith.constant 3 : index
    %c0_341 = arith.constant 0 : index
    %c0_342 = arith.constant 0 : index
    %282 = vector.load %arg2[%c3_340, %c0_341, %c0_342] : memref<9x128x128xbf16, #tpu.memory_space<vmem>>, vector<1x128x128xbf16>
    %283 = vector.shape_cast %282 : vector<1x128x128xbf16> to vector<128x128xbf16>
    %cst_343 = arith.constant dense<0.000000e+00> : vector<2x128xf32>
    %284 = tpu.matmul %281, %283, %cst_343 {dimension_numbers = #tpu.dot_dimension_numbers<[1], [0], [0], [1], [0, 0, 1, 1], [], []>} : vector<2x128xbf16>, vector<128x128xbf16>, vector<2x128xf32> -> vector<2x128xf32>
    %285 = arith.addf %279, %284 : vector<2x128xf32>
    %c2_344 = arith.constant 2 : index
    %c2_345 = arith.constant 2 : index
    %c0_346 = arith.constant 0 : index
    %c0_347 = arith.constant 0 : index
    %286 = vector.load %arg1[%c2_344, %c2_345, %c0_346, %c0_347] : memref<5x5x2x128xbf16, #tpu.memory_space<vmem>>, vector<1x1x2x128xbf16>
    %287 = vector.shape_cast %286 : vector<1x1x2x128xbf16> to vector<2x128xbf16>
    %c4_348 = arith.constant 4 : index
    %c0_349 = arith.constant 0 : index
    %c0_350 = arith.constant 0 : index
    %288 = vector.load %arg2[%c4_348, %c0_349, %c0_350] : memref<9x128x128xbf16, #tpu.memory_space<vmem>>, vector<1x128x128xbf16>
    %289 = vector.shape_cast %288 : vector<1x128x128xbf16> to vector<128x128xbf16>
    %cst_351 = arith.constant dense<0.000000e+00> : vector<2x128xf32>
    %290 = tpu.matmul %287, %289, %cst_351 {dimension_numbers = #tpu.dot_dimension_numbers<[1], [0], [0], [1], [0, 0, 1, 1], [], []>} : vector<2x128xbf16>, vector<128x128xbf16>, vector<2x128xf32> -> vector<2x128xf32>
    %291 = arith.addf %285, %290 : vector<2x128xf32>
    %c2_352 = arith.constant 2 : index
    %c3_353 = arith.constant 3 : index
    %c0_354 = arith.constant 0 : index
    %c0_355 = arith.constant 0 : index
    %292 = vector.load %arg1[%c2_352, %c3_353, %c0_354, %c0_355] : memref<5x5x2x128xbf16, #tpu.memory_space<vmem>>, vector<1x1x2x128xbf16>
    %293 = vector.shape_cast %292 : vector<1x1x2x128xbf16> to vector<2x128xbf16>
    %c5_356 = arith.constant 5 : index
    %c0_357 = arith.constant 0 : index
    %c0_358 = arith.constant 0 : index
    %294 = vector.load %arg2[%c5_356, %c0_357, %c0_358] : memref<9x128x128xbf16, #tpu.memory_space<vmem>>, vector<1x128x128xbf16>
    %295 = vector.shape_cast %294 : vector<1x128x128xbf16> to vector<128x128xbf16>
    %cst_359 = arith.constant dense<0.000000e+00> : vector<2x128xf32>
    %296 = tpu.matmul %293, %295, %cst_359 {dimension_numbers = #tpu.dot_dimension_numbers<[1], [0], [0], [1], [0, 0, 1, 1], [], []>} : vector<2x128xbf16>, vector<128x128xbf16>, vector<2x128xf32> -> vector<2x128xf32>
    %297 = arith.addf %291, %296 : vector<2x128xf32>
    %c3_360 = arith.constant 3 : index
    %c1_361 = arith.constant 1 : index
    %c0_362 = arith.constant 0 : index
    %c0_363 = arith.constant 0 : index
    %298 = vector.load %arg1[%c3_360, %c1_361, %c0_362, %c0_363] : memref<5x5x2x128xbf16, #tpu.memory_space<vmem>>, vector<1x1x2x128xbf16>
    %299 = vector.shape_cast %298 : vector<1x1x2x128xbf16> to vector<2x128xbf16>
    %c6_364 = arith.constant 6 : index
    %c0_365 = arith.constant 0 : index
    %c0_366 = arith.constant 0 : index
    %300 = vector.load %arg2[%c6_364, %c0_365, %c0_366] : memref<9x128x128xbf16, #tpu.memory_space<vmem>>, vector<1x128x128xbf16>
    %301 = vector.shape_cast %300 : vector<1x128x128xbf16> to vector<128x128xbf16>
    %cst_367 = arith.constant dense<0.000000e+00> : vector<2x128xf32>
    %302 = tpu.matmul %299, %301, %cst_367 {dimension_numbers = #tpu.dot_dimension_numbers<[1], [0], [0], [1], [0, 0, 1, 1], [], []>} : vector<2x128xbf16>, vector<128x128xbf16>, vector<2x128xf32> -> vector<2x128xf32>
    %303 = arith.addf %297, %302 : vector<2x128xf32>
    %c3_368 = arith.constant 3 : index
    %c2_369 = arith.constant 2 : index
    %c0_370 = arith.constant 0 : index
    %c0_371 = arith.constant 0 : index
    %304 = vector.load %arg1[%c3_368, %c2_369, %c0_370, %c0_371] : memref<5x5x2x128xbf16, #tpu.memory_space<vmem>>, vector<1x1x2x128xbf16>
    %305 = vector.shape_cast %304 : vector<1x1x2x128xbf16> to vector<2x128xbf16>
    %c7_372 = arith.constant 7 : index
    %c0_373 = arith.constant 0 : index
    %c0_374 = arith.constant 0 : index
    %306 = vector.load %arg2[%c7_372, %c0_373, %c0_374] : memref<9x128x128xbf16, #tpu.memory_space<vmem>>, vector<1x128x128xbf16>
    %307 = vector.shape_cast %306 : vector<1x128x128xbf16> to vector<128x128xbf16>
    %cst_375 = arith.constant dense<0.000000e+00> : vector<2x128xf32>
    %308 = tpu.matmul %305, %307, %cst_375 {dimension_numbers = #tpu.dot_dimension_numbers<[1], [0], [0], [1], [0, 0, 1, 1], [], []>} : vector<2x128xbf16>, vector<128x128xbf16>, vector<2x128xf32> -> vector<2x128xf32>
    %309 = arith.addf %303, %308 : vector<2x128xf32>
    %c3_376 = arith.constant 3 : index
    %c3_377 = arith.constant 3 : index
    %c0_378 = arith.constant 0 : index
    %c0_379 = arith.constant 0 : index
    %310 = vector.load %arg1[%c3_376, %c3_377, %c0_378, %c0_379] : memref<5x5x2x128xbf16, #tpu.memory_space<vmem>>, vector<1x1x2x128xbf16>
    %311 = vector.shape_cast %310 : vector<1x1x2x128xbf16> to vector<2x128xbf16>
    %c8_380 = arith.constant 8 : index
    %c0_381 = arith.constant 0 : index
    %c0_382 = arith.constant 0 : index
    %312 = vector.load %arg2[%c8_380, %c0_381, %c0_382] : memref<9x128x128xbf16, #tpu.memory_space<vmem>>, vector<1x128x128xbf16>
    %313 = vector.shape_cast %312 : vector<1x128x128xbf16> to vector<128x128xbf16>
    %cst_383 = arith.constant dense<0.000000e+00> : vector<2x128xf32>
    %314 = tpu.matmul %311, %313, %cst_383 {dimension_numbers = #tpu.dot_dimension_numbers<[1], [0], [0], [1], [0, 0, 1, 1], [], []>} : vector<2x128xbf16>, vector<128x128xbf16>, vector<2x128xf32> -> vector<2x128xf32>
    %315 = arith.addf %309, %314 : vector<2x128xf32>
    %c0_384 = arith.constant 0 : index
    %c0_385 = arith.constant 0 : index
    %316 = vector.load %arg3[%c0_384, %c0_385] : memref<1x128xf32, #tpu.memory_space<vmem>>, vector<1x128xf32>
    %317 = vector.broadcast %316 : vector<1x128xf32> to vector<2x128xf32>
    %318 = arith.addf %315, %317 : vector<2x128xf32>
    %cst_386 = arith.constant 0.000000e+00 : f32
    %319 = vector.broadcast %cst_386 : f32 to vector<2x128xf32>
    %320 = arith.maximumf %318, %319 : vector<2x128xf32>
    %321 = arith.truncf %320 : vector<2x128xf32> to vector<2x128xbf16>
    %c4_387 = arith.constant 4 : index
    %c0_388 = arith.constant 0 : index
    %c0_389 = arith.constant 0 : index
    %322 = vector.load %arg4[%c4_387, %c0_388, %c0_389] : memref<9x128x512xbf16, #tpu.memory_space<vmem>>, vector<1x128x512xbf16>
    %323 = vector.shape_cast %322 : vector<1x128x512xbf16> to vector<128x512xbf16>
    %cst_390 = arith.constant dense<0.000000e+00> : vector<2x512xf32>
    %324 = tpu.matmul %321, %323, %cst_390 {dimension_numbers = #tpu.dot_dimension_numbers<[1], [0], [0], [1], [0, 0, 1, 1], [], []>} : vector<2x128xbf16>, vector<128x512xbf16>, vector<2x512xf32> -> vector<2x512xf32>
    %325 = arith.addf %260, %324 : vector<2x512xf32>
    %cst_391 = arith.constant 0.000000e+00 : f32
    %326 = vector.broadcast %cst_391 : f32 to vector<2x128xf32>
    %c1_392 = arith.constant 1 : index
    %c2_393 = arith.constant 2 : index
    %c0_394 = arith.constant 0 : index
    %c0_395 = arith.constant 0 : index
    %327 = vector.load %arg1[%c1_392, %c2_393, %c0_394, %c0_395] : memref<5x5x2x128xbf16, #tpu.memory_space<vmem>>, vector<1x1x2x128xbf16>
    %328 = vector.shape_cast %327 : vector<1x1x2x128xbf16> to vector<2x128xbf16>
    %c0_396 = arith.constant 0 : index
    %c0_397 = arith.constant 0 : index
    %c0_398 = arith.constant 0 : index
    %329 = vector.load %arg2[%c0_396, %c0_397, %c0_398] : memref<9x128x128xbf16, #tpu.memory_space<vmem>>, vector<1x128x128xbf16>
    %330 = vector.shape_cast %329 : vector<1x128x128xbf16> to vector<128x128xbf16>
    %cst_399 = arith.constant dense<0.000000e+00> : vector<2x128xf32>
    %331 = tpu.matmul %328, %330, %cst_399 {dimension_numbers = #tpu.dot_dimension_numbers<[1], [0], [0], [1], [0, 0, 1, 1], [], []>} : vector<2x128xbf16>, vector<128x128xbf16>, vector<2x128xf32> -> vector<2x128xf32>
    %332 = arith.addf %326, %331 : vector<2x128xf32>
    %c1_400 = arith.constant 1 : index
    %c3_401 = arith.constant 3 : index
    %c0_402 = arith.constant 0 : index
    %c0_403 = arith.constant 0 : index
    %333 = vector.load %arg1[%c1_400, %c3_401, %c0_402, %c0_403] : memref<5x5x2x128xbf16, #tpu.memory_space<vmem>>, vector<1x1x2x128xbf16>
    %334 = vector.shape_cast %333 : vector<1x1x2x128xbf16> to vector<2x128xbf16>
    %c1_404 = arith.constant 1 : index
    %c0_405 = arith.constant 0 : index
    %c0_406 = arith.constant 0 : index
    %335 = vector.load %arg2[%c1_404, %c0_405, %c0_406] : memref<9x128x128xbf16, #tpu.memory_space<vmem>>, vector<1x128x128xbf16>
    %336 = vector.shape_cast %335 : vector<1x128x128xbf16> to vector<128x128xbf16>
    %cst_407 = arith.constant dense<0.000000e+00> : vector<2x128xf32>
    %337 = tpu.matmul %334, %336, %cst_407 {dimension_numbers = #tpu.dot_dimension_numbers<[1], [0], [0], [1], [0, 0, 1, 1], [], []>} : vector<2x128xbf16>, vector<128x128xbf16>, vector<2x128xf32> -> vector<2x128xf32>
    %338 = arith.addf %332, %337 : vector<2x128xf32>
    %c1_408 = arith.constant 1 : index
    %c4_409 = arith.constant 4 : index
    %c0_410 = arith.constant 0 : index
    %c0_411 = arith.constant 0 : index
    %339 = vector.load %arg1[%c1_408, %c4_409, %c0_410, %c0_411] : memref<5x5x2x128xbf16, #tpu.memory_space<vmem>>, vector<1x1x2x128xbf16>
    %340 = vector.shape_cast %339 : vector<1x1x2x128xbf16> to vector<2x128xbf16>
    %c2_412 = arith.constant 2 : index
    %c0_413 = arith.constant 0 : index
    %c0_414 = arith.constant 0 : index
    %341 = vector.load %arg2[%c2_412, %c0_413, %c0_414] : memref<9x128x128xbf16, #tpu.memory_space<vmem>>, vector<1x128x128xbf16>
    %342 = vector.shape_cast %341 : vector<1x128x128xbf16> to vector<128x128xbf16>
    %cst_415 = arith.constant dense<0.000000e+00> : vector<2x128xf32>
    %343 = tpu.matmul %340, %342, %cst_415 {dimension_numbers = #tpu.dot_dimension_numbers<[1], [0], [0], [1], [0, 0, 1, 1], [], []>} : vector<2x128xbf16>, vector<128x128xbf16>, vector<2x128xf32> -> vector<2x128xf32>
    %344 = arith.addf %338, %343 : vector<2x128xf32>
    %c2_416 = arith.constant 2 : index
    %c2_417 = arith.constant 2 : index
    %c0_418 = arith.constant 0 : index
    %c0_419 = arith.constant 0 : index
    %345 = vector.load %arg1[%c2_416, %c2_417, %c0_418, %c0_419] : memref<5x5x2x128xbf16, #tpu.memory_space<vmem>>, vector<1x1x2x128xbf16>
    %346 = vector.shape_cast %345 : vector<1x1x2x128xbf16> to vector<2x128xbf16>
    %c3_420 = arith.constant 3 : index
    %c0_421 = arith.constant 0 : index
    %c0_422 = arith.constant 0 : index
    %347 = vector.load %arg2[%c3_420, %c0_421, %c0_422] : memref<9x128x128xbf16, #tpu.memory_space<vmem>>, vector<1x128x128xbf16>
    %348 = vector.shape_cast %347 : vector<1x128x128xbf16> to vector<128x128xbf16>
    %cst_423 = arith.constant dense<0.000000e+00> : vector<2x128xf32>
    %349 = tpu.matmul %346, %348, %cst_423 {dimension_numbers = #tpu.dot_dimension_numbers<[1], [0], [0], [1], [0, 0, 1, 1], [], []>} : vector<2x128xbf16>, vector<128x128xbf16>, vector<2x128xf32> -> vector<2x128xf32>
    %350 = arith.addf %344, %349 : vector<2x128xf32>
    %c2_424 = arith.constant 2 : index
    %c3_425 = arith.constant 3 : index
    %c0_426 = arith.constant 0 : index
    %c0_427 = arith.constant 0 : index
    %351 = vector.load %arg1[%c2_424, %c3_425, %c0_426, %c0_427] : memref<5x5x2x128xbf16, #tpu.memory_space<vmem>>, vector<1x1x2x128xbf16>
    %352 = vector.shape_cast %351 : vector<1x1x2x128xbf16> to vector<2x128xbf16>
    %c4_428 = arith.constant 4 : index
    %c0_429 = arith.constant 0 : index
    %c0_430 = arith.constant 0 : index
    %353 = vector.load %arg2[%c4_428, %c0_429, %c0_430] : memref<9x128x128xbf16, #tpu.memory_space<vmem>>, vector<1x128x128xbf16>
    %354 = vector.shape_cast %353 : vector<1x128x128xbf16> to vector<128x128xbf16>
    %cst_431 = arith.constant dense<0.000000e+00> : vector<2x128xf32>
    %355 = tpu.matmul %352, %354, %cst_431 {dimension_numbers = #tpu.dot_dimension_numbers<[1], [0], [0], [1], [0, 0, 1, 1], [], []>} : vector<2x128xbf16>, vector<128x128xbf16>, vector<2x128xf32> -> vector<2x128xf32>
    %356 = arith.addf %350, %355 : vector<2x128xf32>
    %c2_432 = arith.constant 2 : index
    %c4_433 = arith.constant 4 : index
    %c0_434 = arith.constant 0 : index
    %c0_435 = arith.constant 0 : index
    %357 = vector.load %arg1[%c2_432, %c4_433, %c0_434, %c0_435] : memref<5x5x2x128xbf16, #tpu.memory_space<vmem>>, vector<1x1x2x128xbf16>
    %358 = vector.shape_cast %357 : vector<1x1x2x128xbf16> to vector<2x128xbf16>
    %c5_436 = arith.constant 5 : index
    %c0_437 = arith.constant 0 : index
    %c0_438 = arith.constant 0 : index
    %359 = vector.load %arg2[%c5_436, %c0_437, %c0_438] : memref<9x128x128xbf16, #tpu.memory_space<vmem>>, vector<1x128x128xbf16>
    %360 = vector.shape_cast %359 : vector<1x128x128xbf16> to vector<128x128xbf16>
    %cst_439 = arith.constant dense<0.000000e+00> : vector<2x128xf32>
    %361 = tpu.matmul %358, %360, %cst_439 {dimension_numbers = #tpu.dot_dimension_numbers<[1], [0], [0], [1], [0, 0, 1, 1], [], []>} : vector<2x128xbf16>, vector<128x128xbf16>, vector<2x128xf32> -> vector<2x128xf32>
    %362 = arith.addf %356, %361 : vector<2x128xf32>
    %c3_440 = arith.constant 3 : index
    %c2_441 = arith.constant 2 : index
    %c0_442 = arith.constant 0 : index
    %c0_443 = arith.constant 0 : index
    %363 = vector.load %arg1[%c3_440, %c2_441, %c0_442, %c0_443] : memref<5x5x2x128xbf16, #tpu.memory_space<vmem>>, vector<1x1x2x128xbf16>
    %364 = vector.shape_cast %363 : vector<1x1x2x128xbf16> to vector<2x128xbf16>
    %c6_444 = arith.constant 6 : index
    %c0_445 = arith.constant 0 : index
    %c0_446 = arith.constant 0 : index
    %365 = vector.load %arg2[%c6_444, %c0_445, %c0_446] : memref<9x128x128xbf16, #tpu.memory_space<vmem>>, vector<1x128x128xbf16>
    %366 = vector.shape_cast %365 : vector<1x128x128xbf16> to vector<128x128xbf16>
    %cst_447 = arith.constant dense<0.000000e+00> : vector<2x128xf32>
    %367 = tpu.matmul %364, %366, %cst_447 {dimension_numbers = #tpu.dot_dimension_numbers<[1], [0], [0], [1], [0, 0, 1, 1], [], []>} : vector<2x128xbf16>, vector<128x128xbf16>, vector<2x128xf32> -> vector<2x128xf32>
    %368 = arith.addf %362, %367 : vector<2x128xf32>
    %c3_448 = arith.constant 3 : index
    %c3_449 = arith.constant 3 : index
    %c0_450 = arith.constant 0 : index
    %c0_451 = arith.constant 0 : index
    %369 = vector.load %arg1[%c3_448, %c3_449, %c0_450, %c0_451] : memref<5x5x2x128xbf16, #tpu.memory_space<vmem>>, vector<1x1x2x128xbf16>
    %370 = vector.shape_cast %369 : vector<1x1x2x128xbf16> to vector<2x128xbf16>
    %c7_452 = arith.constant 7 : index
    %c0_453 = arith.constant 0 : index
    %c0_454 = arith.constant 0 : index
    %371 = vector.load %arg2[%c7_452, %c0_453, %c0_454] : memref<9x128x128xbf16, #tpu.memory_space<vmem>>, vector<1x128x128xbf16>
    %372 = vector.shape_cast %371 : vector<1x128x128xbf16> to vector<128x128xbf16>
    %cst_455 = arith.constant dense<0.000000e+00> : vector<2x128xf32>
    %373 = tpu.matmul %370, %372, %cst_455 {dimension_numbers = #tpu.dot_dimension_numbers<[1], [0], [0], [1], [0, 0, 1, 1], [], []>} : vector<2x128xbf16>, vector<128x128xbf16>, vector<2x128xf32> -> vector<2x128xf32>
    %374 = arith.addf %368, %373 : vector<2x128xf32>
    %c3_456 = arith.constant 3 : index
    %c4_457 = arith.constant 4 : index
    %c0_458 = arith.constant 0 : index
    %c0_459 = arith.constant 0 : index
    %375 = vector.load %arg1[%c3_456, %c4_457, %c0_458, %c0_459] : memref<5x5x2x128xbf16, #tpu.memory_space<vmem>>, vector<1x1x2x128xbf16>
    %376 = vector.shape_cast %375 : vector<1x1x2x128xbf16> to vector<2x128xbf16>
    %c8_460 = arith.constant 8 : index
    %c0_461 = arith.constant 0 : index
    %c0_462 = arith.constant 0 : index
    %377 = vector.load %arg2[%c8_460, %c0_461, %c0_462] : memref<9x128x128xbf16, #tpu.memory_space<vmem>>, vector<1x128x128xbf16>
    %378 = vector.shape_cast %377 : vector<1x128x128xbf16> to vector<128x128xbf16>
    %cst_463 = arith.constant dense<0.000000e+00> : vector<2x128xf32>
    %379 = tpu.matmul %376, %378, %cst_463 {dimension_numbers = #tpu.dot_dimension_numbers<[1], [0], [0], [1], [0, 0, 1, 1], [], []>} : vector<2x128xbf16>, vector<128x128xbf16>, vector<2x128xf32> -> vector<2x128xf32>
    %380 = arith.addf %374, %379 : vector<2x128xf32>
    %c0_464 = arith.constant 0 : index
    %c0_465 = arith.constant 0 : index
    %381 = vector.load %arg3[%c0_464, %c0_465] : memref<1x128xf32, #tpu.memory_space<vmem>>, vector<1x128xf32>
    %382 = vector.broadcast %381 : vector<1x128xf32> to vector<2x128xf32>
    %383 = arith.addf %380, %382 : vector<2x128xf32>
    %cst_466 = arith.constant 0.000000e+00 : f32
    %384 = vector.broadcast %cst_466 : f32 to vector<2x128xf32>
    %385 = arith.maximumf %383, %384 : vector<2x128xf32>
    %386 = arith.truncf %385 : vector<2x128xf32> to vector<2x128xbf16>
    %c5_467 = arith.constant 5 : index
    %c0_468 = arith.constant 0 : index
    %c0_469 = arith.constant 0 : index
    %387 = vector.load %arg4[%c5_467, %c0_468, %c0_469] : memref<9x128x512xbf16, #tpu.memory_space<vmem>>, vector<1x128x512xbf16>
    %388 = vector.shape_cast %387 : vector<1x128x512xbf16> to vector<128x512xbf16>
    %cst_470 = arith.constant dense<0.000000e+00> : vector<2x512xf32>
    %389 = tpu.matmul %386, %388, %cst_470 {dimension_numbers = #tpu.dot_dimension_numbers<[1], [0], [0], [1], [0, 0, 1, 1], [], []>} : vector<2x128xbf16>, vector<128x512xbf16>, vector<2x512xf32> -> vector<2x512xf32>
    %390 = arith.addf %325, %389 : vector<2x512xf32>
    %cst_471 = arith.constant 0.000000e+00 : f32
    %391 = vector.broadcast %cst_471 : f32 to vector<2x128xf32>
    %c2_472 = arith.constant 2 : index
    %c0_473 = arith.constant 0 : index
    %c0_474 = arith.constant 0 : index
    %c0_475 = arith.constant 0 : index
    %392 = vector.load %arg1[%c2_472, %c0_473, %c0_474, %c0_475] : memref<5x5x2x128xbf16, #tpu.memory_space<vmem>>, vector<1x1x2x128xbf16>
    %393 = vector.shape_cast %392 : vector<1x1x2x128xbf16> to vector<2x128xbf16>
    %c0_476 = arith.constant 0 : index
    %c0_477 = arith.constant 0 : index
    %c0_478 = arith.constant 0 : index
    %394 = vector.load %arg2[%c0_476, %c0_477, %c0_478] : memref<9x128x128xbf16, #tpu.memory_space<vmem>>, vector<1x128x128xbf16>
    %395 = vector.shape_cast %394 : vector<1x128x128xbf16> to vector<128x128xbf16>
    %cst_479 = arith.constant dense<0.000000e+00> : vector<2x128xf32>
    %396 = tpu.matmul %393, %395, %cst_479 {dimension_numbers = #tpu.dot_dimension_numbers<[1], [0], [0], [1], [0, 0, 1, 1], [], []>} : vector<2x128xbf16>, vector<128x128xbf16>, vector<2x128xf32> -> vector<2x128xf32>
    %397 = arith.addf %391, %396 : vector<2x128xf32>
    %c2_480 = arith.constant 2 : index
    %c1_481 = arith.constant 1 : index
    %c0_482 = arith.constant 0 : index
    %c0_483 = arith.constant 0 : index
    %398 = vector.load %arg1[%c2_480, %c1_481, %c0_482, %c0_483] : memref<5x5x2x128xbf16, #tpu.memory_space<vmem>>, vector<1x1x2x128xbf16>
    %399 = vector.shape_cast %398 : vector<1x1x2x128xbf16> to vector<2x128xbf16>
    %c1_484 = arith.constant 1 : index
    %c0_485 = arith.constant 0 : index
    %c0_486 = arith.constant 0 : index
    %400 = vector.load %arg2[%c1_484, %c0_485, %c0_486] : memref<9x128x128xbf16, #tpu.memory_space<vmem>>, vector<1x128x128xbf16>
    %401 = vector.shape_cast %400 : vector<1x128x128xbf16> to vector<128x128xbf16>
    %cst_487 = arith.constant dense<0.000000e+00> : vector<2x128xf32>
    %402 = tpu.matmul %399, %401, %cst_487 {dimension_numbers = #tpu.dot_dimension_numbers<[1], [0], [0], [1], [0, 0, 1, 1], [], []>} : vector<2x128xbf16>, vector<128x128xbf16>, vector<2x128xf32> -> vector<2x128xf32>
    %403 = arith.addf %397, %402 : vector<2x128xf32>
    %c2_488 = arith.constant 2 : index
    %c2_489 = arith.constant 2 : index
    %c0_490 = arith.constant 0 : index
    %c0_491 = arith.constant 0 : index
    %404 = vector.load %arg1[%c2_488, %c2_489, %c0_490, %c0_491] : memref<5x5x2x128xbf16, #tpu.memory_space<vmem>>, vector<1x1x2x128xbf16>
    %405 = vector.shape_cast %404 : vector<1x1x2x128xbf16> to vector<2x128xbf16>
    %c2_492 = arith.constant 2 : index
    %c0_493 = arith.constant 0 : index
    %c0_494 = arith.constant 0 : index
    %406 = vector.load %arg2[%c2_492, %c0_493, %c0_494] : memref<9x128x128xbf16, #tpu.memory_space<vmem>>, vector<1x128x128xbf16>
    %407 = vector.shape_cast %406 : vector<1x128x128xbf16> to vector<128x128xbf16>
    %cst_495 = arith.constant dense<0.000000e+00> : vector<2x128xf32>
    %408 = tpu.matmul %405, %407, %cst_495 {dimension_numbers = #tpu.dot_dimension_numbers<[1], [0], [0], [1], [0, 0, 1, 1], [], []>} : vector<2x128xbf16>, vector<128x128xbf16>, vector<2x128xf32> -> vector<2x128xf32>
    %409 = arith.addf %403, %408 : vector<2x128xf32>
    %c3_496 = arith.constant 3 : index
    %c0_497 = arith.constant 0 : index
    %c0_498 = arith.constant 0 : index
    %c0_499 = arith.constant 0 : index
    %410 = vector.load %arg1[%c3_496, %c0_497, %c0_498, %c0_499] : memref<5x5x2x128xbf16, #tpu.memory_space<vmem>>, vector<1x1x2x128xbf16>
    %411 = vector.shape_cast %410 : vector<1x1x2x128xbf16> to vector<2x128xbf16>
    %c3_500 = arith.constant 3 : index
    %c0_501 = arith.constant 0 : index
    %c0_502 = arith.constant 0 : index
    %412 = vector.load %arg2[%c3_500, %c0_501, %c0_502] : memref<9x128x128xbf16, #tpu.memory_space<vmem>>, vector<1x128x128xbf16>
    %413 = vector.shape_cast %412 : vector<1x128x128xbf16> to vector<128x128xbf16>
    %cst_503 = arith.constant dense<0.000000e+00> : vector<2x128xf32>
    %414 = tpu.matmul %411, %413, %cst_503 {dimension_numbers = #tpu.dot_dimension_numbers<[1], [0], [0], [1], [0, 0, 1, 1], [], []>} : vector<2x128xbf16>, vector<128x128xbf16>, vector<2x128xf32> -> vector<2x128xf32>
    %415 = arith.addf %409, %414 : vector<2x128xf32>
    %c3_504 = arith.constant 3 : index
    %c1_505 = arith.constant 1 : index
    %c0_506 = arith.constant 0 : index
    %c0_507 = arith.constant 0 : index
    %416 = vector.load %arg1[%c3_504, %c1_505, %c0_506, %c0_507] : memref<5x5x2x128xbf16, #tpu.memory_space<vmem>>, vector<1x1x2x128xbf16>
    %417 = vector.shape_cast %416 : vector<1x1x2x128xbf16> to vector<2x128xbf16>
    %c4_508 = arith.constant 4 : index
    %c0_509 = arith.constant 0 : index
    %c0_510 = arith.constant 0 : index
    %418 = vector.load %arg2[%c4_508, %c0_509, %c0_510] : memref<9x128x128xbf16, #tpu.memory_space<vmem>>, vector<1x128x128xbf16>
    %419 = vector.shape_cast %418 : vector<1x128x128xbf16> to vector<128x128xbf16>
    %cst_511 = arith.constant dense<0.000000e+00> : vector<2x128xf32>
    %420 = tpu.matmul %417, %419, %cst_511 {dimension_numbers = #tpu.dot_dimension_numbers<[1], [0], [0], [1], [0, 0, 1, 1], [], []>} : vector<2x128xbf16>, vector<128x128xbf16>, vector<2x128xf32> -> vector<2x128xf32>
    %421 = arith.addf %415, %420 : vector<2x128xf32>
    %c3_512 = arith.constant 3 : index
    %c2_513 = arith.constant 2 : index
    %c0_514 = arith.constant 0 : index
    %c0_515 = arith.constant 0 : index
    %422 = vector.load %arg1[%c3_512, %c2_513, %c0_514, %c0_515] : memref<5x5x2x128xbf16, #tpu.memory_space<vmem>>, vector<1x1x2x128xbf16>
    %423 = vector.shape_cast %422 : vector<1x1x2x128xbf16> to vector<2x128xbf16>
    %c5_516 = arith.constant 5 : index
    %c0_517 = arith.constant 0 : index
    %c0_518 = arith.constant 0 : index
    %424 = vector.load %arg2[%c5_516, %c0_517, %c0_518] : memref<9x128x128xbf16, #tpu.memory_space<vmem>>, vector<1x128x128xbf16>
    %425 = vector.shape_cast %424 : vector<1x128x128xbf16> to vector<128x128xbf16>
    %cst_519 = arith.constant dense<0.000000e+00> : vector<2x128xf32>
    %426 = tpu.matmul %423, %425, %cst_519 {dimension_numbers = #tpu.dot_dimension_numbers<[1], [0], [0], [1], [0, 0, 1, 1], [], []>} : vector<2x128xbf16>, vector<128x128xbf16>, vector<2x128xf32> -> vector<2x128xf32>
    %427 = arith.addf %421, %426 : vector<2x128xf32>
    %c4_520 = arith.constant 4 : index
    %c0_521 = arith.constant 0 : index
    %c0_522 = arith.constant 0 : index
    %c0_523 = arith.constant 0 : index
    %428 = vector.load %arg1[%c4_520, %c0_521, %c0_522, %c0_523] : memref<5x5x2x128xbf16, #tpu.memory_space<vmem>>, vector<1x1x2x128xbf16>
    %429 = vector.shape_cast %428 : vector<1x1x2x128xbf16> to vector<2x128xbf16>
    %c6_524 = arith.constant 6 : index
    %c0_525 = arith.constant 0 : index
    %c0_526 = arith.constant 0 : index
    %430 = vector.load %arg2[%c6_524, %c0_525, %c0_526] : memref<9x128x128xbf16, #tpu.memory_space<vmem>>, vector<1x128x128xbf16>
    %431 = vector.shape_cast %430 : vector<1x128x128xbf16> to vector<128x128xbf16>
    %cst_527 = arith.constant dense<0.000000e+00> : vector<2x128xf32>
    %432 = tpu.matmul %429, %431, %cst_527 {dimension_numbers = #tpu.dot_dimension_numbers<[1], [0], [0], [1], [0, 0, 1, 1], [], []>} : vector<2x128xbf16>, vector<128x128xbf16>, vector<2x128xf32> -> vector<2x128xf32>
    %433 = arith.addf %427, %432 : vector<2x128xf32>
    %c4_528 = arith.constant 4 : index
    %c1_529 = arith.constant 1 : index
    %c0_530 = arith.constant 0 : index
    %c0_531 = arith.constant 0 : index
    %434 = vector.load %arg1[%c4_528, %c1_529, %c0_530, %c0_531] : memref<5x5x2x128xbf16, #tpu.memory_space<vmem>>, vector<1x1x2x128xbf16>
    %435 = vector.shape_cast %434 : vector<1x1x2x128xbf16> to vector<2x128xbf16>
    %c7_532 = arith.constant 7 : index
    %c0_533 = arith.constant 0 : index
    %c0_534 = arith.constant 0 : index
    %436 = vector.load %arg2[%c7_532, %c0_533, %c0_534] : memref<9x128x128xbf16, #tpu.memory_space<vmem>>, vector<1x128x128xbf16>
    %437 = vector.shape_cast %436 : vector<1x128x128xbf16> to vector<128x128xbf16>
    %cst_535 = arith.constant dense<0.000000e+00> : vector<2x128xf32>
    %438 = tpu.matmul %435, %437, %cst_535 {dimension_numbers = #tpu.dot_dimension_numbers<[1], [0], [0], [1], [0, 0, 1, 1], [], []>} : vector<2x128xbf16>, vector<128x128xbf16>, vector<2x128xf32> -> vector<2x128xf32>
    %439 = arith.addf %433, %438 : vector<2x128xf32>
    %c4_536 = arith.constant 4 : index
    %c2_537 = arith.constant 2 : index
    %c0_538 = arith.constant 0 : index
    %c0_539 = arith.constant 0 : index
    %440 = vector.load %arg1[%c4_536, %c2_537, %c0_538, %c0_539] : memref<5x5x2x128xbf16, #tpu.memory_space<vmem>>, vector<1x1x2x128xbf16>
    %441 = vector.shape_cast %440 : vector<1x1x2x128xbf16> to vector<2x128xbf16>
    %c8_540 = arith.constant 8 : index
    %c0_541 = arith.constant 0 : index
    %c0_542 = arith.constant 0 : index
    %442 = vector.load %arg2[%c8_540, %c0_541, %c0_542] : memref<9x128x128xbf16, #tpu.memory_space<vmem>>, vector<1x128x128xbf16>
    %443 = vector.shape_cast %442 : vector<1x128x128xbf16> to vector<128x128xbf16>
    %cst_543 = arith.constant dense<0.000000e+00> : vector<2x128xf32>
    %444 = tpu.matmul %441, %443, %cst_543 {dimension_numbers = #tpu.dot_dimension_numbers<[1], [0], [0], [1], [0, 0, 1, 1], [], []>} : vector<2x128xbf16>, vector<128x128xbf16>, vector<2x128xf32> -> vector<2x128xf32>
    %445 = arith.addf %439, %444 : vector<2x128xf32>
    %c0_544 = arith.constant 0 : index
    %c0_545 = arith.constant 0 : index
    %446 = vector.load %arg3[%c0_544, %c0_545] : memref<1x128xf32, #tpu.memory_space<vmem>>, vector<1x128xf32>
    %447 = vector.broadcast %446 : vector<1x128xf32> to vector<2x128xf32>
    %448 = arith.addf %445, %447 : vector<2x128xf32>
    %cst_546 = arith.constant 0.000000e+00 : f32
    %449 = vector.broadcast %cst_546 : f32 to vector<2x128xf32>
    %450 = arith.maximumf %448, %449 : vector<2x128xf32>
    %451 = arith.truncf %450 : vector<2x128xf32> to vector<2x128xbf16>
    %c6_547 = arith.constant 6 : index
    %c0_548 = arith.constant 0 : index
    %c0_549 = arith.constant 0 : index
    %452 = vector.load %arg4[%c6_547, %c0_548, %c0_549] : memref<9x128x512xbf16, #tpu.memory_space<vmem>>, vector<1x128x512xbf16>
    %453 = vector.shape_cast %452 : vector<1x128x512xbf16> to vector<128x512xbf16>
    %cst_550 = arith.constant dense<0.000000e+00> : vector<2x512xf32>
    %454 = tpu.matmul %451, %453, %cst_550 {dimension_numbers = #tpu.dot_dimension_numbers<[1], [0], [0], [1], [0, 0, 1, 1], [], []>} : vector<2x128xbf16>, vector<128x512xbf16>, vector<2x512xf32> -> vector<2x512xf32>
    %455 = arith.addf %390, %454 : vector<2x512xf32>
    %cst_551 = arith.constant 0.000000e+00 : f32
    %456 = vector.broadcast %cst_551 : f32 to vector<2x128xf32>
    %c2_552 = arith.constant 2 : index
    %c1_553 = arith.constant 1 : index
    %c0_554 = arith.constant 0 : index
    %c0_555 = arith.constant 0 : index
    %457 = vector.load %arg1[%c2_552, %c1_553, %c0_554, %c0_555] : memref<5x5x2x128xbf16, #tpu.memory_space<vmem>>, vector<1x1x2x128xbf16>
    %458 = vector.shape_cast %457 : vector<1x1x2x128xbf16> to vector<2x128xbf16>
    %c0_556 = arith.constant 0 : index
    %c0_557 = arith.constant 0 : index
    %c0_558 = arith.constant 0 : index
    %459 = vector.load %arg2[%c0_556, %c0_557, %c0_558] : memref<9x128x128xbf16, #tpu.memory_space<vmem>>, vector<1x128x128xbf16>
    %460 = vector.shape_cast %459 : vector<1x128x128xbf16> to vector<128x128xbf16>
    %cst_559 = arith.constant dense<0.000000e+00> : vector<2x128xf32>
    %461 = tpu.matmul %458, %460, %cst_559 {dimension_numbers = #tpu.dot_dimension_numbers<[1], [0], [0], [1], [0, 0, 1, 1], [], []>} : vector<2x128xbf16>, vector<128x128xbf16>, vector<2x128xf32> -> vector<2x128xf32>
    %462 = arith.addf %456, %461 : vector<2x128xf32>
    %c2_560 = arith.constant 2 : index
    %c2_561 = arith.constant 2 : index
    %c0_562 = arith.constant 0 : index
    %c0_563 = arith.constant 0 : index
    %463 = vector.load %arg1[%c2_560, %c2_561, %c0_562, %c0_563] : memref<5x5x2x128xbf16, #tpu.memory_space<vmem>>, vector<1x1x2x128xbf16>
    %464 = vector.shape_cast %463 : vector<1x1x2x128xbf16> to vector<2x128xbf16>
    %c1_564 = arith.constant 1 : index
    %c0_565 = arith.constant 0 : index
    %c0_566 = arith.constant 0 : index
    %465 = vector.load %arg2[%c1_564, %c0_565, %c0_566] : memref<9x128x128xbf16, #tpu.memory_space<vmem>>, vector<1x128x128xbf16>
    %466 = vector.shape_cast %465 : vector<1x128x128xbf16> to vector<128x128xbf16>
    %cst_567 = arith.constant dense<0.000000e+00> : vector<2x128xf32>
    %467 = tpu.matmul %464, %466, %cst_567 {dimension_numbers = #tpu.dot_dimension_numbers<[1], [0], [0], [1], [0, 0, 1, 1], [], []>} : vector<2x128xbf16>, vector<128x128xbf16>, vector<2x128xf32> -> vector<2x128xf32>
    %468 = arith.addf %462, %467 : vector<2x128xf32>
    %c2_568 = arith.constant 2 : index
    %c3_569 = arith.constant 3 : index
    %c0_570 = arith.constant 0 : index
    %c0_571 = arith.constant 0 : index
    %469 = vector.load %arg1[%c2_568, %c3_569, %c0_570, %c0_571] : memref<5x5x2x128xbf16, #tpu.memory_space<vmem>>, vector<1x1x2x128xbf16>
    %470 = vector.shape_cast %469 : vector<1x1x2x128xbf16> to vector<2x128xbf16>
    %c2_572 = arith.constant 2 : index
    %c0_573 = arith.constant 0 : index
    %c0_574 = arith.constant 0 : index
    %471 = vector.load %arg2[%c2_572, %c0_573, %c0_574] : memref<9x128x128xbf16, #tpu.memory_space<vmem>>, vector<1x128x128xbf16>
    %472 = vector.shape_cast %471 : vector<1x128x128xbf16> to vector<128x128xbf16>
    %cst_575 = arith.constant dense<0.000000e+00> : vector<2x128xf32>
    %473 = tpu.matmul %470, %472, %cst_575 {dimension_numbers = #tpu.dot_dimension_numbers<[1], [0], [0], [1], [0, 0, 1, 1], [], []>} : vector<2x128xbf16>, vector<128x128xbf16>, vector<2x128xf32> -> vector<2x128xf32>
    %474 = arith.addf %468, %473 : vector<2x128xf32>
    %c3_576 = arith.constant 3 : index
    %c1_577 = arith.constant 1 : index
    %c0_578 = arith.constant 0 : index
    %c0_579 = arith.constant 0 : index
    %475 = vector.load %arg1[%c3_576, %c1_577, %c0_578, %c0_579] : memref<5x5x2x128xbf16, #tpu.memory_space<vmem>>, vector<1x1x2x128xbf16>
    %476 = vector.shape_cast %475 : vector<1x1x2x128xbf16> to vector<2x128xbf16>
    %c3_580 = arith.constant 3 : index
    %c0_581 = arith.constant 0 : index
    %c0_582 = arith.constant 0 : index
    %477 = vector.load %arg2[%c3_580, %c0_581, %c0_582] : memref<9x128x128xbf16, #tpu.memory_space<vmem>>, vector<1x128x128xbf16>
    %478 = vector.shape_cast %477 : vector<1x128x128xbf16> to vector<128x128xbf16>
    %cst_583 = arith.constant dense<0.000000e+00> : vector<2x128xf32>
    %479 = tpu.matmul %476, %478, %cst_583 {dimension_numbers = #tpu.dot_dimension_numbers<[1], [0], [0], [1], [0, 0, 1, 1], [], []>} : vector<2x128xbf16>, vector<128x128xbf16>, vector<2x128xf32> -> vector<2x128xf32>
    %480 = arith.addf %474, %479 : vector<2x128xf32>
    %c3_584 = arith.constant 3 : index
    %c2_585 = arith.constant 2 : index
    %c0_586 = arith.constant 0 : index
    %c0_587 = arith.constant 0 : index
    %481 = vector.load %arg1[%c3_584, %c2_585, %c0_586, %c0_587] : memref<5x5x2x128xbf16, #tpu.memory_space<vmem>>, vector<1x1x2x128xbf16>
    %482 = vector.shape_cast %481 : vector<1x1x2x128xbf16> to vector<2x128xbf16>
    %c4_588 = arith.constant 4 : index
    %c0_589 = arith.constant 0 : index
    %c0_590 = arith.constant 0 : index
    %483 = vector.load %arg2[%c4_588, %c0_589, %c0_590] : memref<9x128x128xbf16, #tpu.memory_space<vmem>>, vector<1x128x128xbf16>
    %484 = vector.shape_cast %483 : vector<1x128x128xbf16> to vector<128x128xbf16>
    %cst_591 = arith.constant dense<0.000000e+00> : vector<2x128xf32>
    %485 = tpu.matmul %482, %484, %cst_591 {dimension_numbers = #tpu.dot_dimension_numbers<[1], [0], [0], [1], [0, 0, 1, 1], [], []>} : vector<2x128xbf16>, vector<128x128xbf16>, vector<2x128xf32> -> vector<2x128xf32>
    %486 = arith.addf %480, %485 : vector<2x128xf32>
    %c3_592 = arith.constant 3 : index
    %c3_593 = arith.constant 3 : index
    %c0_594 = arith.constant 0 : index
    %c0_595 = arith.constant 0 : index
    %487 = vector.load %arg1[%c3_592, %c3_593, %c0_594, %c0_595] : memref<5x5x2x128xbf16, #tpu.memory_space<vmem>>, vector<1x1x2x128xbf16>
    %488 = vector.shape_cast %487 : vector<1x1x2x128xbf16> to vector<2x128xbf16>
    %c5_596 = arith.constant 5 : index
    %c0_597 = arith.constant 0 : index
    %c0_598 = arith.constant 0 : index
    %489 = vector.load %arg2[%c5_596, %c0_597, %c0_598] : memref<9x128x128xbf16, #tpu.memory_space<vmem>>, vector<1x128x128xbf16>
    %490 = vector.shape_cast %489 : vector<1x128x128xbf16> to vector<128x128xbf16>
    %cst_599 = arith.constant dense<0.000000e+00> : vector<2x128xf32>
    %491 = tpu.matmul %488, %490, %cst_599 {dimension_numbers = #tpu.dot_dimension_numbers<[1], [0], [0], [1], [0, 0, 1, 1], [], []>} : vector<2x128xbf16>, vector<128x128xbf16>, vector<2x128xf32> -> vector<2x128xf32>
    %492 = arith.addf %486, %491 : vector<2x128xf32>
    %c4_600 = arith.constant 4 : index
    %c1_601 = arith.constant 1 : index
    %c0_602 = arith.constant 0 : index
    %c0_603 = arith.constant 0 : index
    %493 = vector.load %arg1[%c4_600, %c1_601, %c0_602, %c0_603] : memref<5x5x2x128xbf16, #tpu.memory_space<vmem>>, vector<1x1x2x128xbf16>
    %494 = vector.shape_cast %493 : vector<1x1x2x128xbf16> to vector<2x128xbf16>
    %c6_604 = arith.constant 6 : index
    %c0_605 = arith.constant 0 : index
    %c0_606 = arith.constant 0 : index
    %495 = vector.load %arg2[%c6_604, %c0_605, %c0_606] : memref<9x128x128xbf16, #tpu.memory_space<vmem>>, vector<1x128x128xbf16>
    %496 = vector.shape_cast %495 : vector<1x128x128xbf16> to vector<128x128xbf16>
    %cst_607 = arith.constant dense<0.000000e+00> : vector<2x128xf32>
    %497 = tpu.matmul %494, %496, %cst_607 {dimension_numbers = #tpu.dot_dimension_numbers<[1], [0], [0], [1], [0, 0, 1, 1], [], []>} : vector<2x128xbf16>, vector<128x128xbf16>, vector<2x128xf32> -> vector<2x128xf32>
    %498 = arith.addf %492, %497 : vector<2x128xf32>
    %c4_608 = arith.constant 4 : index
    %c2_609 = arith.constant 2 : index
    %c0_610 = arith.constant 0 : index
    %c0_611 = arith.constant 0 : index
    %499 = vector.load %arg1[%c4_608, %c2_609, %c0_610, %c0_611] : memref<5x5x2x128xbf16, #tpu.memory_space<vmem>>, vector<1x1x2x128xbf16>
    %500 = vector.shape_cast %499 : vector<1x1x2x128xbf16> to vector<2x128xbf16>
    %c7_612 = arith.constant 7 : index
    %c0_613 = arith.constant 0 : index
    %c0_614 = arith.constant 0 : index
    %501 = vector.load %arg2[%c7_612, %c0_613, %c0_614] : memref<9x128x128xbf16, #tpu.memory_space<vmem>>, vector<1x128x128xbf16>
    %502 = vector.shape_cast %501 : vector<1x128x128xbf16> to vector<128x128xbf16>
    %cst_615 = arith.constant dense<0.000000e+00> : vector<2x128xf32>
    %503 = tpu.matmul %500, %502, %cst_615 {dimension_numbers = #tpu.dot_dimension_numbers<[1], [0], [0], [1], [0, 0, 1, 1], [], []>} : vector<2x128xbf16>, vector<128x128xbf16>, vector<2x128xf32> -> vector<2x128xf32>
    %504 = arith.addf %498, %503 : vector<2x128xf32>
    %c4_616 = arith.constant 4 : index
    %c3_617 = arith.constant 3 : index
    %c0_618 = arith.constant 0 : index
    %c0_619 = arith.constant 0 : index
    %505 = vector.load %arg1[%c4_616, %c3_617, %c0_618, %c0_619] : memref<5x5x2x128xbf16, #tpu.memory_space<vmem>>, vector<1x1x2x128xbf16>
    %506 = vector.shape_cast %505 : vector<1x1x2x128xbf16> to vector<2x128xbf16>
    %c8_620 = arith.constant 8 : index
    %c0_621 = arith.constant 0 : index
    %c0_622 = arith.constant 0 : index
    %507 = vector.load %arg2[%c8_620, %c0_621, %c0_622] : memref<9x128x128xbf16, #tpu.memory_space<vmem>>, vector<1x128x128xbf16>
    %508 = vector.shape_cast %507 : vector<1x128x128xbf16> to vector<128x128xbf16>
    %cst_623 = arith.constant dense<0.000000e+00> : vector<2x128xf32>
    %509 = tpu.matmul %506, %508, %cst_623 {dimension_numbers = #tpu.dot_dimension_numbers<[1], [0], [0], [1], [0, 0, 1, 1], [], []>} : vector<2x128xbf16>, vector<128x128xbf16>, vector<2x128xf32> -> vector<2x128xf32>
    %510 = arith.addf %504, %509 : vector<2x128xf32>
    %c0_624 = arith.constant 0 : index
    %c0_625 = arith.constant 0 : index
    %511 = vector.load %arg3[%c0_624, %c0_625] : memref<1x128xf32, #tpu.memory_space<vmem>>, vector<1x128xf32>
    %512 = vector.broadcast %511 : vector<1x128xf32> to vector<2x128xf32>
    %513 = arith.addf %510, %512 : vector<2x128xf32>
    %cst_626 = arith.constant 0.000000e+00 : f32
    %514 = vector.broadcast %cst_626 : f32 to vector<2x128xf32>
    %515 = arith.maximumf %513, %514 : vector<2x128xf32>
    %516 = arith.truncf %515 : vector<2x128xf32> to vector<2x128xbf16>
    %c7_627 = arith.constant 7 : index
    %c0_628 = arith.constant 0 : index
    %c0_629 = arith.constant 0 : index
    %517 = vector.load %arg4[%c7_627, %c0_628, %c0_629] : memref<9x128x512xbf16, #tpu.memory_space<vmem>>, vector<1x128x512xbf16>
    %518 = vector.shape_cast %517 : vector<1x128x512xbf16> to vector<128x512xbf16>
    %cst_630 = arith.constant dense<0.000000e+00> : vector<2x512xf32>
    %519 = tpu.matmul %516, %518, %cst_630 {dimension_numbers = #tpu.dot_dimension_numbers<[1], [0], [0], [1], [0, 0, 1, 1], [], []>} : vector<2x128xbf16>, vector<128x512xbf16>, vector<2x512xf32> -> vector<2x512xf32>
    %520 = arith.addf %455, %519 : vector<2x512xf32>
    %cst_631 = arith.constant 0.000000e+00 : f32
    %521 = vector.broadcast %cst_631 : f32 to vector<2x128xf32>
    %c2_632 = arith.constant 2 : index
    %c2_633 = arith.constant 2 : index
    %c0_634 = arith.constant 0 : index
    %c0_635 = arith.constant 0 : index
    %522 = vector.load %arg1[%c2_632, %c2_633, %c0_634, %c0_635] : memref<5x5x2x128xbf16, #tpu.memory_space<vmem>>, vector<1x1x2x128xbf16>
    %523 = vector.shape_cast %522 : vector<1x1x2x128xbf16> to vector<2x128xbf16>
    %c0_636 = arith.constant 0 : index
    %c0_637 = arith.constant 0 : index
    %c0_638 = arith.constant 0 : index
    %524 = vector.load %arg2[%c0_636, %c0_637, %c0_638] : memref<9x128x128xbf16, #tpu.memory_space<vmem>>, vector<1x128x128xbf16>
    %525 = vector.shape_cast %524 : vector<1x128x128xbf16> to vector<128x128xbf16>
    %cst_639 = arith.constant dense<0.000000e+00> : vector<2x128xf32>
    %526 = tpu.matmul %523, %525, %cst_639 {dimension_numbers = #tpu.dot_dimension_numbers<[1], [0], [0], [1], [0, 0, 1, 1], [], []>} : vector<2x128xbf16>, vector<128x128xbf16>, vector<2x128xf32> -> vector<2x128xf32>
    %527 = arith.addf %521, %526 : vector<2x128xf32>
    %c2_640 = arith.constant 2 : index
    %c3_641 = arith.constant 3 : index
    %c0_642 = arith.constant 0 : index
    %c0_643 = arith.constant 0 : index
    %528 = vector.load %arg1[%c2_640, %c3_641, %c0_642, %c0_643] : memref<5x5x2x128xbf16, #tpu.memory_space<vmem>>, vector<1x1x2x128xbf16>
    %529 = vector.shape_cast %528 : vector<1x1x2x128xbf16> to vector<2x128xbf16>
    %c1_644 = arith.constant 1 : index
    %c0_645 = arith.constant 0 : index
    %c0_646 = arith.constant 0 : index
    %530 = vector.load %arg2[%c1_644, %c0_645, %c0_646] : memref<9x128x128xbf16, #tpu.memory_space<vmem>>, vector<1x128x128xbf16>
    %531 = vector.shape_cast %530 : vector<1x128x128xbf16> to vector<128x128xbf16>
    %cst_647 = arith.constant dense<0.000000e+00> : vector<2x128xf32>
    %532 = tpu.matmul %529, %531, %cst_647 {dimension_numbers = #tpu.dot_dimension_numbers<[1], [0], [0], [1], [0, 0, 1, 1], [], []>} : vector<2x128xbf16>, vector<128x128xbf16>, vector<2x128xf32> -> vector<2x128xf32>
    %533 = arith.addf %527, %532 : vector<2x128xf32>
    %c2_648 = arith.constant 2 : index
    %c4_649 = arith.constant 4 : index
    %c0_650 = arith.constant 0 : index
    %c0_651 = arith.constant 0 : index
    %534 = vector.load %arg1[%c2_648, %c4_649, %c0_650, %c0_651] : memref<5x5x2x128xbf16, #tpu.memory_space<vmem>>, vector<1x1x2x128xbf16>
    %535 = vector.shape_cast %534 : vector<1x1x2x128xbf16> to vector<2x128xbf16>
    %c2_652 = arith.constant 2 : index
    %c0_653 = arith.constant 0 : index
    %c0_654 = arith.constant 0 : index
    %536 = vector.load %arg2[%c2_652, %c0_653, %c0_654] : memref<9x128x128xbf16, #tpu.memory_space<vmem>>, vector<1x128x128xbf16>
    %537 = vector.shape_cast %536 : vector<1x128x128xbf16> to vector<128x128xbf16>
    %cst_655 = arith.constant dense<0.000000e+00> : vector<2x128xf32>
    %538 = tpu.matmul %535, %537, %cst_655 {dimension_numbers = #tpu.dot_dimension_numbers<[1], [0], [0], [1], [0, 0, 1, 1], [], []>} : vector<2x128xbf16>, vector<128x128xbf16>, vector<2x128xf32> -> vector<2x128xf32>
    %539 = arith.addf %533, %538 : vector<2x128xf32>
    %c3_656 = arith.constant 3 : index
    %c2_657 = arith.constant 2 : index
    %c0_658 = arith.constant 0 : index
    %c0_659 = arith.constant 0 : index
    %540 = vector.load %arg1[%c3_656, %c2_657, %c0_658, %c0_659] : memref<5x5x2x128xbf16, #tpu.memory_space<vmem>>, vector<1x1x2x128xbf16>
    %541 = vector.shape_cast %540 : vector<1x1x2x128xbf16> to vector<2x128xbf16>
    %c3_660 = arith.constant 3 : index
    %c0_661 = arith.constant 0 : index
    %c0_662 = arith.constant 0 : index
    %542 = vector.load %arg2[%c3_660, %c0_661, %c0_662] : memref<9x128x128xbf16, #tpu.memory_space<vmem>>, vector<1x128x128xbf16>
    %543 = vector.shape_cast %542 : vector<1x128x128xbf16> to vector<128x128xbf16>
    %cst_663 = arith.constant dense<0.000000e+00> : vector<2x128xf32>
    %544 = tpu.matmul %541, %543, %cst_663 {dimension_numbers = #tpu.dot_dimension_numbers<[1], [0], [0], [1], [0, 0, 1, 1], [], []>} : vector<2x128xbf16>, vector<128x128xbf16>, vector<2x128xf32> -> vector<2x128xf32>
    %545 = arith.addf %539, %544 : vector<2x128xf32>
    %c3_664 = arith.constant 3 : index
    %c3_665 = arith.constant 3 : index
    %c0_666 = arith.constant 0 : index
    %c0_667 = arith.constant 0 : index
    %546 = vector.load %arg1[%c3_664, %c3_665, %c0_666, %c0_667] : memref<5x5x2x128xbf16, #tpu.memory_space<vmem>>, vector<1x1x2x128xbf16>
    %547 = vector.shape_cast %546 : vector<1x1x2x128xbf16> to vector<2x128xbf16>
    %c4_668 = arith.constant 4 : index
    %c0_669 = arith.constant 0 : index
    %c0_670 = arith.constant 0 : index
    %548 = vector.load %arg2[%c4_668, %c0_669, %c0_670] : memref<9x128x128xbf16, #tpu.memory_space<vmem>>, vector<1x128x128xbf16>
    %549 = vector.shape_cast %548 : vector<1x128x128xbf16> to vector<128x128xbf16>
    %cst_671 = arith.constant dense<0.000000e+00> : vector<2x128xf32>
    %550 = tpu.matmul %547, %549, %cst_671 {dimension_numbers = #tpu.dot_dimension_numbers<[1], [0], [0], [1], [0, 0, 1, 1], [], []>} : vector<2x128xbf16>, vector<128x128xbf16>, vector<2x128xf32> -> vector<2x128xf32>
    %551 = arith.addf %545, %550 : vector<2x128xf32>
    %c3_672 = arith.constant 3 : index
    %c4_673 = arith.constant 4 : index
    %c0_674 = arith.constant 0 : index
    %c0_675 = arith.constant 0 : index
    %552 = vector.load %arg1[%c3_672, %c4_673, %c0_674, %c0_675] : memref<5x5x2x128xbf16, #tpu.memory_space<vmem>>, vector<1x1x2x128xbf16>
    %553 = vector.shape_cast %552 : vector<1x1x2x128xbf16> to vector<2x128xbf16>
    %c5_676 = arith.constant 5 : index
    %c0_677 = arith.constant 0 : index
    %c0_678 = arith.constant 0 : index
    %554 = vector.load %arg2[%c5_676, %c0_677, %c0_678] : memref<9x128x128xbf16, #tpu.memory_space<vmem>>, vector<1x128x128xbf16>
    %555 = vector.shape_cast %554 : vector<1x128x128xbf16> to vector<128x128xbf16>
    %cst_679 = arith.constant dense<0.000000e+00> : vector<2x128xf32>
    %556 = tpu.matmul %553, %555, %cst_679 {dimension_numbers = #tpu.dot_dimension_numbers<[1], [0], [0], [1], [0, 0, 1, 1], [], []>} : vector<2x128xbf16>, vector<128x128xbf16>, vector<2x128xf32> -> vector<2x128xf32>
    %557 = arith.addf %551, %556 : vector<2x128xf32>
    %c4_680 = arith.constant 4 : index
    %c2_681 = arith.constant 2 : index
    %c0_682 = arith.constant 0 : index
    %c0_683 = arith.constant 0 : index
    %558 = vector.load %arg1[%c4_680, %c2_681, %c0_682, %c0_683] : memref<5x5x2x128xbf16, #tpu.memory_space<vmem>>, vector<1x1x2x128xbf16>
    %559 = vector.shape_cast %558 : vector<1x1x2x128xbf16> to vector<2x128xbf16>
    %c6_684 = arith.constant 6 : index
    %c0_685 = arith.constant 0 : index
    %c0_686 = arith.constant 0 : index
    %560 = vector.load %arg2[%c6_684, %c0_685, %c0_686] : memref<9x128x128xbf16, #tpu.memory_space<vmem>>, vector<1x128x128xbf16>
    %561 = vector.shape_cast %560 : vector<1x128x128xbf16> to vector<128x128xbf16>
    %cst_687 = arith.constant dense<0.000000e+00> : vector<2x128xf32>
    %562 = tpu.matmul %559, %561, %cst_687 {dimension_numbers = #tpu.dot_dimension_numbers<[1], [0], [0], [1], [0, 0, 1, 1], [], []>} : vector<2x128xbf16>, vector<128x128xbf16>, vector<2x128xf32> -> vector<2x128xf32>
    %563 = arith.addf %557, %562 : vector<2x128xf32>
    %c4_688 = arith.constant 4 : index
    %c3_689 = arith.constant 3 : index
    %c0_690 = arith.constant 0 : index
    %c0_691 = arith.constant 0 : index
    %564 = vector.load %arg1[%c4_688, %c3_689, %c0_690, %c0_691] : memref<5x5x2x128xbf16, #tpu.memory_space<vmem>>, vector<1x1x2x128xbf16>
    %565 = vector.shape_cast %564 : vector<1x1x2x128xbf16> to vector<2x128xbf16>
    %c7_692 = arith.constant 7 : index
    %c0_693 = arith.constant 0 : index
    %c0_694 = arith.constant 0 : index
    %566 = vector.load %arg2[%c7_692, %c0_693, %c0_694] : memref<9x128x128xbf16, #tpu.memory_space<vmem>>, vector<1x128x128xbf16>
    %567 = vector.shape_cast %566 : vector<1x128x128xbf16> to vector<128x128xbf16>
    %cst_695 = arith.constant dense<0.000000e+00> : vector<2x128xf32>
    %568 = tpu.matmul %565, %567, %cst_695 {dimension_numbers = #tpu.dot_dimension_numbers<[1], [0], [0], [1], [0, 0, 1, 1], [], []>} : vector<2x128xbf16>, vector<128x128xbf16>, vector<2x128xf32> -> vector<2x128xf32>
    %569 = arith.addf %563, %568 : vector<2x128xf32>
    %c4_696 = arith.constant 4 : index
    %c4_697 = arith.constant 4 : index
    %c0_698 = arith.constant 0 : index
    %c0_699 = arith.constant 0 : index
    %570 = vector.load %arg1[%c4_696, %c4_697, %c0_698, %c0_699] : memref<5x5x2x128xbf16, #tpu.memory_space<vmem>>, vector<1x1x2x128xbf16>
    %571 = vector.shape_cast %570 : vector<1x1x2x128xbf16> to vector<2x128xbf16>
    %c8_700 = arith.constant 8 : index
    %c0_701 = arith.constant 0 : index
    %c0_702 = arith.constant 0 : index
    %572 = vector.load %arg2[%c8_700, %c0_701, %c0_702] : memref<9x128x128xbf16, #tpu.memory_space<vmem>>, vector<1x128x128xbf16>
    %573 = vector.shape_cast %572 : vector<1x128x128xbf16> to vector<128x128xbf16>
    %cst_703 = arith.constant dense<0.000000e+00> : vector<2x128xf32>
    %574 = tpu.matmul %571, %573, %cst_703 {dimension_numbers = #tpu.dot_dimension_numbers<[1], [0], [0], [1], [0, 0, 1, 1], [], []>} : vector<2x128xbf16>, vector<128x128xbf16>, vector<2x128xf32> -> vector<2x128xf32>
    %575 = arith.addf %569, %574 : vector<2x128xf32>
    %c0_704 = arith.constant 0 : index
    %c0_705 = arith.constant 0 : index
    %576 = vector.load %arg3[%c0_704, %c0_705] : memref<1x128xf32, #tpu.memory_space<vmem>>, vector<1x128xf32>
    %577 = vector.broadcast %576 : vector<1x128xf32> to vector<2x128xf32>
    %578 = arith.addf %575, %577 : vector<2x128xf32>
    %cst_706 = arith.constant 0.000000e+00 : f32
    %579 = vector.broadcast %cst_706 : f32 to vector<2x128xf32>
    %580 = arith.maximumf %578, %579 : vector<2x128xf32>
    %581 = arith.truncf %580 : vector<2x128xf32> to vector<2x128xbf16>
    %c8_707 = arith.constant 8 : index
    %c0_708 = arith.constant 0 : index
    %c0_709 = arith.constant 0 : index
    %582 = vector.load %arg4[%c8_707, %c0_708, %c0_709] : memref<9x128x512xbf16, #tpu.memory_space<vmem>>, vector<1x128x512xbf16>
    %583 = vector.shape_cast %582 : vector<1x128x512xbf16> to vector<128x512xbf16>
    %cst_710 = arith.constant dense<0.000000e+00> : vector<2x512xf32>
    %584 = tpu.matmul %581, %583, %cst_710 {dimension_numbers = #tpu.dot_dimension_numbers<[1], [0], [0], [1], [0, 0, 1, 1], [], []>} : vector<2x128xbf16>, vector<128x512xbf16>, vector<2x512xf32> -> vector<2x512xf32>
    %585 = arith.addf %520, %584 : vector<2x512xf32>
    %c0_711 = arith.constant 0 : index
    %c0_712 = arith.constant 0 : index
    %586 = vector.load %arg5[%c0_711, %c0_712] : memref<1x512xf32, #tpu.memory_space<vmem>>, vector<1x512xf32>
    %587 = vector.broadcast %586 : vector<1x512xf32> to vector<2x512xf32>
    %588 = arith.addf %585, %587 : vector<2x512xf32>
    %cst_713 = arith.constant 0.000000e+00 : f32
    %589 = vector.broadcast %cst_713 : f32 to vector<2x512xf32>
    %590 = arith.maximumf %588, %589 : vector<2x512xf32>
    %591 = arith.truncf %590 : vector<2x512xf32> to vector<2x512xbf16>
    %c0_714 = arith.constant 0 : index
    %c0_715 = arith.constant 0 : index
    %592 = vector.load %arg6[%c0_714, %c0_715] : memref<512x128xbf16, #tpu.memory_space<vmem>>, vector<512x128xbf16>
    %cst_716 = arith.constant dense<0.000000e+00> : vector<2x128xf32>
    %593 = tpu.matmul %591, %592, %cst_716 {dimension_numbers = #tpu.dot_dimension_numbers<[1], [0], [0], [1], [0, 0, 1, 1], [], []>} : vector<2x512xbf16>, vector<512x128xbf16>, vector<2x128xf32> -> vector<2x128xf32>
    %c0_717 = arith.constant 0 : index
    %c0_718 = arith.constant 0 : index
    %594 = vector.load %arg7[%c0_717, %c0_718] : memref<1x128xf32, #tpu.memory_space<vmem>>, vector<1x128xf32>
    %595 = vector.broadcast %594 : vector<1x128xf32> to vector<2x128xf32>
    %596 = arith.addf %593, %595 : vector<2x128xf32>
    %c0_719 = arith.constant 0 : index
    %c0_720 = arith.constant 0 : index
    %597 = vector.load %arg8[%c0_719, %c0_720] : memref<2x128xf32, #tpu.memory_space<vmem>>, vector<2x128xf32>
    tpu.vector_store %arg8[%c0_719, %c0_720], %596 {strides = array<i32>} : memref<2x128xf32, #tpu.memory_space<vmem>>, vector<2x128xf32>,
    return
  }
  func.func @transform_0(%arg0: i32) -> (i32, i32, i32, i32) {
    %c0_i32 = arith.constant 0 : i32
    %c0_i32_0 = arith.constant 0 : i32
    %c0_i32_1 = arith.constant 0 : i32
    %c0_i32_2 = arith.constant 0 : i32
    return %c0_i32, %c0_i32_0, %arg0, %c0_i32_1 : i32, i32, i32, i32
  }
  func.func @transform_1(%arg0: i32) -> (i32, i32, i32) {
    %c0_i32 = arith.constant 0 : i32
    %c0_i32_0 = arith.constant 0 : i32
    %c0_i32_1 = arith.constant 0 : i32
    %c0_i32_2 = arith.constant 0 : i32
    return %c0_i32, %c0_i32_0, %c0_i32_1 : i32, i32, i32
  }
  func.func @transform_2(%arg0: i32) -> (i32, i32) {
    %c0_i32 = arith.constant 0 : i32
    %c0_i32_0 = arith.constant 0 : i32
    %c0_i32_1 = arith.constant 0 : i32
    return %c0_i32, %c0_i32_0 : i32, i32
  }
  func.func @transform_3(%arg0: i32) -> (i32, i32, i32) {
    %c0_i32 = arith.constant 0 : i32
    %c0_i32_0 = arith.constant 0 : i32
    %c0_i32_1 = arith.constant 0 : i32
    %c0_i32_2 = arith.constant 0 : i32
    return %c0_i32, %c0_i32_0, %c0_i32_1 : i32, i32, i32
  }
  func.func @transform_4(%arg0: i32) -> (i32, i32) {
    %c0_i32 = arith.constant 0 : i32
    %c0_i32_0 = arith.constant 0 : i32
    %c0_i32_1 = arith.constant 0 : i32
    return %c0_i32, %c0_i32_0 : i32, i32
  }
  func.func @transform_5(%arg0: i32) -> (i32, i32) {
    %c0_i32 = arith.constant 0 : i32
    %c0_i32_0 = arith.constant 0 : i32
    %c0_i32_1 = arith.constant 0 : i32
    return %c0_i32, %c0_i32_0 : i32, i32
  }
  func.func @transform_6(%arg0: i32) -> (i32, i32) {
    %c0_i32 = arith.constant 0 : i32
    %c0_i32_0 = arith.constant 0 : i32
    %c0_i32_1 = arith.constant 0 : i32
    return %c0_i32, %c0_i32_0 : i32, i32
  }
  func.func @transform_7(%arg0: i32) -> (i32, i32) {
    %c0_i32 = arith.constant 0 : i32
    %c0_i32_0 = arith.constant 0 : i32
    return %arg0, %c0_i32 : i32, i32
  }
}

</mosaic_0001>

<bundles_post_ra>
// kernel: dqn_forward.3
= control target key start
LH: loop header
LB: loop body
LE: loop exit
PB: predicated region body
PF: predicated region fallthrough
CT: control target
= control target key end

     0   :  { %s1435_s1 = inlined_call_operand.vmem [shape: bf16[256,128], index: 1, kind: input, shape index: {}]   ;;  %s1436_s2 = inlined_call_operand.vmem [shape: f32[1,128], index: 2, kind: input, shape index: {}]   ;;  %s1437_s0 = inlined_call_operand.vmem [shape: bf16[288,256], index: 0, kind: input, shape index: {}]   ;;  %s1438_s3 = inlined_call_operand.vmem [shape: bf16[288,128], index: 3, kind: output, shape index: {}]  }
   0x1   :  { %v923_v0 = vld [vmem:[%s1435_s1 + $0x38] sm:$0xff]  ;;  %v922_v2 = vld [vmem:[%s1435_s1 + $0x30] sm:$0xff]  ;;  %v921_v4 = vld [vmem:[%s1435_s1 + $0x28] sm:$0xff] }
   0x2   :  { %v931_v1 = vld [vmem:[%s1435_s1 + $0x78] sm:$0xff]  ;;  %362 = vmatpush.bf16.msra.mxu0 %v923_v0  ;;  %1039 = vmatpush.bf16.msra.mxu2 %v923_v0  ;;  %v930_v3 = vld [vmem:[%s1435_s1 + $0x70] sm:$0xff]  ;;  %v929_v5 = vld [vmem:[%s1435_s1 + $0x68] sm:$0xff] }
   0x3   :  { %461 = vmatpush.bf16.msra.mxu1 %v931_v1  ;;  %1047 = vmatpush.bf16.msra.mxu3 %v931_v1  ;;  %v920_v6 = vld [vmem:[%s1435_s1 + $0x20] sm:$0xff]  ;;  %v919_v8 = vld [vmem:[%s1435_s1 + $0x18] sm:$0xff]  ;;  %v918_v10 = vld [vmem:[%s1435_s1 + $0x10] sm:$0xff] }
   0x4   :  { %v928_v7 = vld [vmem:[%s1435_s1 + $0x60] sm:$0xff]  ;;  %v927_v9 = vld [vmem:[%s1435_s1 + $0x58] sm:$0xff]  ;;  %v926_v11 = vld [vmem:[%s1435_s1 + $0x50] sm:$0xff] }
   0x5   :  { %v917_v12 = vld [vmem:[%s1435_s1 + $0x8] sm:$0xff]  ;;  %v916_v14 = vld [vmem:[%s1435_s1] sm:$0xff]  ;;  %v746_v18 = vld [vmem:[%s1437_s0 + $0x90] sm:$0xf] }
   0x6   :  { %363 = vmatpush.bf16.msra.mxu0 %v922_v2  ;;  %1040 = vmatpush.bf16.msra.mxu2 %v922_v2  ;;  %v925_v13 = vld [vmem:[%s1435_s1 + $0x48] sm:$0xff]  ;;  %v924_v15 = vld [vmem:[%s1435_s1 + $0x40] sm:$0xff]  ;;  %v899_v19 = vld [vmem:[%s1437_s0 + $0x94] sm:$0xf0] }
   0x7   :  { %462 = vmatpush.bf16.msra.mxu1 %v930_v3  ;;  %1048 = vmatpush.bf16.msra.mxu3 %v930_v3  ;;  %v674_v16 = vld [vmem:[%s1437_s0] sm:$0xf]  ;;  %v881_v17 = vld [vmem:[%s1437_s0 + $0x4] sm:$0xf0]  ;;  %v880_v20 = vld [vmem:[%s1437_s0 + $0x4] sm:$0xf]  ;;  %v747_v25 = vor.u32 %v899_v19, %v746_v18 }
   0x8   :  { %v676_v21 = vld [vmem:[%s1437_s0 + $0x8] sm:$0xf0]  ;;  %v898_v22 = vld [vmem:[%s1437_s0 + $0x94] sm:$0xf]  ;;  %v748_v23 = vld [vmem:[%s1437_s0 + $0x98] sm:$0xf0]  ;;  %v675_v24 = vor.u32 %v881_v17, %v674_v16 }
   0x9   :  { %v679_v26 = vor.u32 %v880_v20, %v676_v21  ;;  %v751_v27 = vor.u32 %v898_v22, %v748_v23  ;;  %v682_v28 = vld [vmem:[%s1437_s0 + $0x10] sm:$0xf]  ;;  %v883_v29 = vld [vmem:[%s1437_s0 + $0x14] sm:$0xf0]  ;;  %v754_v30 = vld [vmem:[%s1437_s0 + $0xa0] sm:$0xf] }
   0xa   :  { %364 = vmatpush.bf16.msra.mxu0 %v921_v4  ;;  %1041 = vmatpush.bf16.msra.mxu2 %v921_v4  ;;  %v901_v31 = vld [vmem:[%s1437_s0 + $0xa4] sm:$0xf0]  ;;  %v882_v32 = vld [vmem:[%s1437_s0 + $0x14] sm:$0xf]  ;;  %v684_v33 = vld [vmem:[%s1437_s0 + $0x18] sm:$0xf0]  ;;  %v683_v36 = vor.u32 %v883_v29, %v682_v28 }
   0xb   :  { %463 = vmatpush.bf16.msra.mxu1 %v929_v5  ;;  %1049 = vmatpush.bf16.msra.mxu3 %v929_v5  ;;  %v900_v34 = vld [vmem:[%s1437_s0 + $0xa4] sm:$0xf]  ;;  %v756_v35 = vld [vmem:[%s1437_s0 + $0xa8] sm:$0xf0]  ;;  %v755_v37 = vor.u32 %v901_v31, %v754_v30  ;;  %v687_v38 = vor.u32 %v882_v32, %v684_v33  ;;  %v690_v40 = vld [vmem:[%s1437_s0 + $0x20] sm:$0xf] }
   0xc   :  { %v759_v39 = vor.u32 %v900_v34, %v756_v35  ;;  %v885_v41 = vld [vmem:[%s1437_s0 + $0x24] sm:$0xf0]  ;;  %v762_v42 = vld [vmem:[%s1437_s0 + $0xb0] sm:$0xf]  ;;  %v903_v43 = vld [vmem:[%s1437_s0 + $0xb4] sm:$0xf0] }
   0xd   :  { %v884_v44 = vld [vmem:[%s1437_s0 + $0x24] sm:$0xf]  ;;  %v692_v45 = vld [vmem:[%s1437_s0 + $0x28] sm:$0xf0]  ;;  %v902_v46 = vld [vmem:[%s1437_s0 + $0xb4] sm:$0xf]  ;;  %v691_v48 = vor.u32 %v885_v41, %v690_v40  ;;  %v763_v49 = vor.u32 %v903_v43, %v762_v42 }
   0xe   :  { %365 = vmatpush.bf16.msra.mxu0 %v920_v6  ;;  %1042 = vmatpush.bf16.msra.mxu2 %v920_v6  ;;  %v764_v47 = vld [vmem:[%s1437_s0 + $0xb8] sm:$0xf0]  ;;  %v695_v50 = vor.u32 %v884_v44, %v692_v45  ;;  %v698_v52 = vld [vmem:[%s1437_s0 + $0x30] sm:$0xf]  ;;  %v887_v53 = vld [vmem:[%s1437_s0 + $0x34] sm:$0xf0] }
   0xf   :  { %464 = vmatpush.bf16.msra.mxu1 %v928_v7  ;;  %1050 = vmatpush.bf16.msra.mxu3 %v928_v7  ;;  %v767_v51 = vor.u32 %v902_v46, %v764_v47  ;;  %v770_v54 = vld [vmem:[%s1437_s0 + $0xc0] sm:$0xf]  ;;  %v905_v55 = vld [vmem:[%s1437_s0 + $0xc4] sm:$0xf0]  ;;  %v886_v56 = vld [vmem:[%s1437_s0 + $0x34] sm:$0xf]  ;;  %v699_v60 = vor.u32 %v887_v53, %v698_v52 }
  0x10   :  { %v700_v57 = vld [vmem:[%s1437_s0 + $0x38] sm:$0xf0]  ;;  %v904_v58 = vld [vmem:[%s1437_s0 + $0xc4] sm:$0xf]  ;;  %v772_v59 = vld [vmem:[%s1437_s0 + $0xc8] sm:$0xf0]  ;;  %v771_v61 = vor.u32 %v905_v55, %v770_v54 }
  0x11   :  { %v703_v62 = vor.u32 %v886_v56, %v700_v57  ;;  %v775_v63 = vor.u32 %v904_v58, %v772_v59  ;;  %v706_v0 = vld [vmem:[%s1437_s0 + $0x40] sm:$0xf]  ;;  %v889_v1 = vld [vmem:[%s1437_s0 + $0x44] sm:$0xf0]  ;;  %v778_v2 = vld [vmem:[%s1437_s0 + $0xd0] sm:$0xf] }
  0x12   :  { %366 = vmatpush.bf16.msra.mxu0 %v919_v8  ;;  %1043 = vmatpush.bf16.msra.mxu2 %v919_v8  ;;  %v907_v3 = vld [vmem:[%s1437_s0 + $0xd4] sm:$0xf0]  ;;  %v888_v4 = vld [vmem:[%s1437_s0 + $0x44] sm:$0xf]  ;;  %v708_v5 = vld [vmem:[%s1437_s0 + $0x48] sm:$0xf0]  ;;  %v707_v8 = vor.u32 %v889_v1, %v706_v0 }
  0x13   :  { %465 = vmatpush.bf16.msra.mxu1 %v927_v9  ;;  %1051 = vmatpush.bf16.msra.mxu3 %v927_v9  ;;  %v906_v6 = vld [vmem:[%s1437_s0 + $0xd4] sm:$0xf]  ;;  %v780_v7 = vld [vmem:[%s1437_s0 + $0xd8] sm:$0xf0]  ;;  %v779_v9 = vor.u32 %v907_v3, %v778_v2  ;;  %v908_v18 = vld [vmem:[%s1437_s0 + $0xe4] sm:$0xf] }
  0x14   :  { %v890_v16 = vld [vmem:[%s1437_s0 + $0x54] sm:$0xf]  ;;  %v716_v17 = vld [vmem:[%s1437_s0 + $0x58] sm:$0xf0]  ;;  %v788_v19 = vld [vmem:[%s1437_s0 + $0xe8] sm:$0xf0] }
  0x15   :  { %v719_v22 = vor.u32 %v890_v16, %v716_v17  ;;  %v791_v23 = vor.u32 %v908_v18, %v788_v19  ;;  %v892_v28 = vld [vmem:[%s1437_s0 + $0x64] sm:$0xf]  ;;  %v724_v29 = vld [vmem:[%s1437_s0 + $0x68] sm:$0xf0]  ;;  %v910_v30 = vld [vmem:[%s1437_s0 + $0xf4] sm:$0xf] }
  0x16   :  { %367 = vmatpush.bf16.msra.mxu0 %v918_v10  ;;  %1044 = vmatpush.bf16.msra.mxu2 %v918_v10  ;;  %v711_v10 = vor.u32 %v888_v4, %v708_v5  ;;  %v796_v31 = vld [vmem:[%s1437_s0 + $0xf8] sm:$0xf0]  ;;  %v727_v34 = vor.u32 %v892_v28, %v724_v29  ;;  %v894_v40 = vld [vmem:[%s1437_s0 + $0x74] sm:$0xf]  ;;  %v912_v42 = vld [vmem:[%s1437_s0 + $0x104] sm:$0xf] }
  0x17   :  { %466 = vmatpush.bf16.msra.mxu1 %v926_v11  ;;  %1052 = vmatpush.bf16.msra.mxu3 %v926_v11  ;;  %v783_v11 = vor.u32 %v906_v6, %v780_v7  ;;  %v799_v35 = vor.u32 %v910_v30, %v796_v31  ;;  %v732_v41 = vld [vmem:[%s1437_s0 + $0x78] sm:$0xf0]  ;;  %v804_v43 = vld [vmem:[%s1437_s0 + $0x108] sm:$0xf0]  ;;  %v896_v52 = vld [vmem:[%s1437_s0 + $0x84] sm:$0xf] }
  0x18   :  { %v735_v46 = vor.u32 %v894_v40, %v732_v41  ;;  %v807_v47 = vor.u32 %v912_v42, %v804_v43  ;;  %v740_v53 = vld [vmem:[%s1437_s0 + $0x88] sm:$0xf0]  ;;  %v914_v54 = vld [vmem:[%s1437_s0 + $0x114] sm:$0xf]  ;;  %v812_v55 = vld [vmem:[%s1437_s0 + $0x118] sm:$0xf0] }
  0x19   :  { %v743_v59 = vor.u32 %v896_v52, %v740_v53 }
  0x1a   :  { %368 = vmatpush.bf16.msra.mxu0 %v917_v12  ;;  %1045 = vmatpush.bf16.msra.mxu2 %v917_v12  ;;  %v714_v12 = vld [vmem:[%s1437_s0 + $0x50] sm:$0xf] }
  0x1b   :  { %467 = vmatpush.bf16.msra.mxu1 %v925_v13  ;;  %1053 = vmatpush.bf16.msra.mxu3 %v925_v13  ;;  %v891_v13 = vld [vmem:[%s1437_s0 + $0x54] sm:$0xf0] }
  0x1c   :  { %v715_v20 = vor.u32 %v891_v13, %v714_v12 }
  0x1e   :  { %369 = vmatpush.bf16.msra.mxu0 %v916_v14  ;;  %1046 = vmatpush.bf16.msra.mxu2 %v916_v14  ;;  %v786_v14 = vld [vmem:[%s1437_s0 + $0xe0] sm:$0xf] }
  0x1f   :  { %468 = vmatpush.bf16.msra.mxu1 %v924_v15  ;;  %1054 = vmatpush.bf16.msra.mxu3 %v924_v15  ;;  %v909_v15 = vld [vmem:[%s1437_s0 + $0xe4] sm:$0xf0] }
  0x20   :  { %v787_v21 = vor.u32 %v909_v15, %v786_v14 }
  0x21   :  { %370 = vmatmul.bf16.vlgmr.msra.gmra.mxu0 %v675_v24  ;;  %415 = vmatmul.bf16.vlgmr.msra.gmra.mxu2 %v747_v25  ;;  %v722_v24 = vld [vmem:[%s1437_s0 + $0x60] sm:$0xf]  ;;  %v893_v25 = vld [vmem:[%s1437_s0 + $0x64] sm:$0xf0] }
  0x22   :  { %469 = vmatmul.bf16.vlgmr.msra.gmra.mxu1 %v679_v26  ;;  %514 = vmatmul.bf16.vlgmr.msra.gmra.mxu3 %v751_v27  ;;  %v794_v26 = vld [vmem:[%s1437_s0 + $0xf0] sm:$0xf]  ;;  %v911_v27 = vld [vmem:[%s1437_s0 + $0xf4] sm:$0xf0]  ;;  %v723_v32 = vor.u32 %v893_v25, %v722_v24 }
  0x23   :  { %v795_v33 = vor.u32 %v911_v27, %v794_v26 }
  0x31   :  { %375 = vmatmul.bf16.gmra.mxu0 %v683_v36  ;;  %420 = vmatmul.bf16.gmra.mxu2 %v755_v37  ;;  %v730_v36 = vld [vmem:[%s1437_s0 + $0x70] sm:$0xf]  ;;  %v895_v37 = vld [vmem:[%s1437_s0 + $0x74] sm:$0xf0] }
  0x32   :  { %474 = vmatmul.bf16.gmra.mxu1 %v687_v38  ;;  %519 = vmatmul.bf16.gmra.mxu3 %v759_v39  ;;  %v802_v38 = vld [vmem:[%s1437_s0 + $0x100] sm:$0xf]  ;;  %v913_v39 = vld [vmem:[%s1437_s0 + $0x104] sm:$0xf0]  ;;  %v731_v44 = vor.u32 %v895_v37, %v730_v36 }
  0x33   :  { %v803_v45 = vor.u32 %v913_v39, %v802_v38 }
  0x41   :  { %380 = vmatmul.bf16.gmra.mxu0 %v691_v48  ;;  %425 = vmatmul.bf16.gmra.mxu2 %v763_v49  ;;  %v738_v48 = vld [vmem:[%s1437_s0 + $0x80] sm:$0xf]  ;;  %v897_v49 = vld [vmem:[%s1437_s0 + $0x84] sm:$0xf0] }
  0x42   :  { %479 = vmatmul.bf16.gmra.mxu1 %v695_v50  ;;  %524 = vmatmul.bf16.gmra.mxu3 %v767_v51  ;;  %v810_v50 = vld [vmem:[%s1437_s0 + $0x110] sm:$0xf]  ;;  %v915_v51 = vld [vmem:[%s1437_s0 + $0x114] sm:$0xf0]  ;;  %v739_v56 = vor.u32 %v897_v49, %v738_v48 }
  0x43   :  { %v811_v57 = vor.u32 %v915_v51, %v810_v50 }
  0x51   :  { %385 = vmatmul.bf16.gmra.mxu0 %v699_v60  ;;  %430 = vmatmul.bf16.gmra.mxu2 %v771_v61  ;;  %v815_v60 = vor.u32 %v914_v54, %v812_v55  ;;  %v1343_v61 = vld [vmem:[%s1436_s2] ss:$0 sm:$0xff] }
  0x52   :  { %484 = vmatmul.bf16.gmra.mxu1 %v703_v62  ;;  %529 = vmatmul.bf16.gmra.mxu3 %v775_v63 }
  0x61   :  { %390 = vmatmul.bf16.gmra.mxu0 %v707_v8  ;;  %435 = vmatmul.bf16.gmra.mxu2 %v779_v9 }
  0x62   :  { %489 = vmatmul.bf16.gmra.mxu1 %v711_v10  ;;  %534 = vmatmul.bf16.gmra.mxu3 %v783_v11 }
  0x71   :  { %395 = vmatmul.bf16.gmra.mxu0 %v715_v20  ;;  %440 = vmatmul.bf16.gmra.mxu2 %v787_v21 }
  0x72   :  { %494 = vmatmul.bf16.gmra.mxu1 %v719_v22  ;;  %539 = vmatmul.bf16.gmra.mxu3 %v791_v23 }
  0x81   :  { %400 = vmatmul.bf16.gmra.mxu0 %v723_v32  ;;  %445 = vmatmul.bf16.gmra.mxu2 %v795_v33 }
  0x82   :  { %499 = vmatmul.bf16.gmra.mxu1 %v727_v34  ;;  %544 = vmatmul.bf16.gmra.mxu3 %v799_v35 }
  0x91   :  { %405 = vmatmul.bf16.gmra.mxu0 %v731_v44  ;;  %450 = vmatmul.bf16.gmra.mxu2 %v803_v45 }
  0x92   :  { %504 = vmatmul.bf16.gmra.mxu1 %v735_v46  ;;  %549 = vmatmul.bf16.gmra.mxu3 %v807_v47 }
  0x9e   :  { %v371_v58 = vpop.f32.mrf.mxu0 }
  0x9f   :  { %v470_v62 = vpop.f32.mrf.mxu1  ;;  %v372_v63 = vadd.f32 %v1343_v61, %v371_v58 }
  0xa1   :  { %410 = vmatmul.bf16.gmra.mxu0 %v739_v56  ;;  %455 = vmatmul.bf16.gmra.mxu2 %v811_v57  ;;  %v471_v3 = vadd.f32 %v470_v62, %v372_v63 }
  0xa2   :  { %509 = vmatmul.bf16.gmra.mxu1 %v743_v59  ;;  %554 = vmatmul.bf16.gmra.mxu3 %v815_v60 }
  0xa3   :  { %v560_v8 = vmax.f32 %v471_v3, 0.0 }
  0xa4   :  { %v416_v0 = vpop.f32.mrf.mxu2 }
  0xa5   :  { %v515_v1 = vpop.f32.mrf.mxu3  ;;  %v417_v6 = vadd.f32 %v1343_v61, %v416_v0 }
  0xa6   :  { %v373_v2 = vpop.f32.mrf.mxu0 }
  0xa7   :  { %v374_v4 = vadd.f32 %v1343_v61, %v373_v2  ;;  %v472_v5 = vpop.f32.mrf.mxu1  ;;  %v516_v11 = vadd.f32 %v515_v1, %v417_v6 }
  0xa9   :  { %v473_v7 = vadd.f32 %v472_v5, %v374_v4  ;;  %v578_v18 = vmax.f32 %v516_v11, 0.0 }
  0xab   :  { %v561_v9 = vmax.f32 %v473_v7, 0.0 }
  0xac   :  { %v418_v10 = vpop.f32.mrf.mxu2 }
  0xad   :  { %v935_v12 = vpack.c.bf16 %v561_v9, %v560_v8  ;;  %v419_v13 = vadd.f32 %v1343_v61, %v418_v10  ;;  %v517_v14 = vpop.f32.mrf.mxu3 }
  0xae   :  { %v376_v15 = vpop.f32.mrf.mxu0 }
  0xaf   :  { %936 = vst [vmem:[%s1438_s3] sm:$0xff] %v935_v12   ;;  %v518_v16 = vadd.f32 %v517_v14, %v419_v13  ;;  %v475_v17 = vpop.f32.mrf.mxu1  ;;  %v377_v21 = vadd.f32 %v1343_v61, %v376_v15 }
  0xb1   :  { %v579_v19 = vmax.f32 %v518_v16, 0.0  ;;  %v476_v25 = vadd.f32 %v475_v17, %v377_v21 }
  0xb3   :  { %v980_v20 = vpack.c.bf16 %v579_v19, %v578_v18  ;;  %v562_v30 = vmax.f32 %v476_v25, 0.0 }
  0xb4   :  { %v421_v22 = vpop.f32.mrf.mxu2 }
  0xb5   :  { %1030 = vst [vmem:[%s1438_s3 + $0x48] sm:$0xff] %v980_v20   ;;  %v520_v23 = vpop.f32.mrf.mxu3  ;;  %v422_v28 = vadd.f32 %v1343_v61, %v421_v22 }
  0xb6   :  { %v378_v24 = vpop.f32.mrf.mxu0 }
  0xb7   :  { %v379_v26 = vadd.f32 %v1343_v61, %v378_v24  ;;  %v477_v27 = vpop.f32.mrf.mxu1  ;;  %v521_v33 = vadd.f32 %v520_v23, %v422_v28 }
  0xb9   :  { %v478_v29 = vadd.f32 %v477_v27, %v379_v26  ;;  %v580_v40 = vmax.f32 %v521_v33, 0.0 }
  0xbb   :  { %v563_v31 = vmax.f32 %v478_v29, 0.0 }
  0xbc   :  { %v423_v32 = vpop.f32.mrf.mxu2 }
  0xbd   :  { %v940_v34 = vpack.c.bf16 %v563_v31, %v562_v30  ;;  %v424_v35 = vadd.f32 %v1343_v61, %v423_v32  ;;  %v522_v36 = vpop.f32.mrf.mxu3 }
  0xbe   :  { %v381_v37 = vpop.f32.mrf.mxu0 }
  0xbf   :  { %1022 = vst [vmem:[%s1438_s3 + $0x8] sm:$0xff] %v940_v34   ;;  %v523_v38 = vadd.f32 %v522_v36, %v424_v35  ;;  %v480_v39 = vpop.f32.mrf.mxu1  ;;  %v382_v43 = vadd.f32 %v1343_v61, %v381_v37 }
  0xc1   :  { %v581_v41 = vmax.f32 %v523_v38, 0.0  ;;  %v481_v47 = vadd.f32 %v480_v39, %v382_v43 }
  0xc3   :  { %v985_v42 = vpack.c.bf16 %v581_v41, %v580_v40  ;;  %v564_v52 = vmax.f32 %v481_v47, 0.0 }
  0xc4   :  { %v426_v44 = vpop.f32.mrf.mxu2 }
  0xc5   :  { %1031 = vst [vmem:[%s1438_s3 + $0x50] sm:$0xff] %v985_v42   ;;  %v525_v45 = vpop.f32.mrf.mxu3  ;;  %v427_v50 = vadd.f32 %v1343_v61, %v426_v44 }
  0xc6   :  { %v383_v46 = vpop.f32.mrf.mxu0 }
  0xc7   :  { %v384_v48 = vadd.f32 %v1343_v61, %v383_v46  ;;  %v482_v49 = vpop.f32.mrf.mxu1  ;;  %v526_v55 = vadd.f32 %v525_v45, %v427_v50 }
  0xc9   :  { %v483_v51 = vadd.f32 %v482_v49, %v384_v48  ;;  %v582_v63 = vmax.f32 %v526_v55, 0.0 }
  0xcb   :  { %v565_v53 = vmax.f32 %v483_v51, 0.0 }
  0xcc   :  { %v428_v54 = vpop.f32.mrf.mxu2 }
  0xcd   :  { %v945_v56 = vpack.c.bf16 %v565_v53, %v564_v52  ;;  %v429_v57 = vadd.f32 %v1343_v61, %v428_v54  ;;  %v527_v58 = vpop.f32.mrf.mxu3 }
  0xce   :  { %v386_v59 = vpop.f32.mrf.mxu0 }
  0xcf   :  { %1023 = vst [vmem:[%s1438_s3 + $0x10] sm:$0xff] %v945_v56   ;;  %v528_v60 = vadd.f32 %v527_v58, %v429_v57  ;;  %v485_v62 = vpop.f32.mrf.mxu1  ;;  %v387_v2 = vadd.f32 %v1343_v61, %v386_v59 }
  0xd1   :  { %v583_v0 = vmax.f32 %v528_v60, 0.0  ;;  %v486_v6 = vadd.f32 %v485_v62, %v387_v2 }
  0xd3   :  { %v990_v1 = vpack.c.bf16 %v583_v0, %v582_v63  ;;  %v566_v11 = vmax.f32 %v486_v6, 0.0 }
  0xd4   :  { %v431_v3 = vpop.f32.mrf.mxu2 }
  0xd5   :  { %1032 = vst [vmem:[%s1438_s3 + $0x58] sm:$0xff] %v990_v1   ;;  %v530_v4 = vpop.f32.mrf.mxu3  ;;  %v432_v9 = vadd.f32 %v1343_v61, %v431_v3 }
  0xd6   :  { %v388_v5 = vpop.f32.mrf.mxu0 }
  0xd7   :  { %v389_v7 = vadd.f32 %v1343_v61, %v388_v5  ;;  %v487_v8 = vpop.f32.mrf.mxu1  ;;  %v531_v14 = vadd.f32 %v530_v4, %v432_v9 }
  0xd9   :  { %v488_v10 = vadd.f32 %v487_v8, %v389_v7  ;;  %v584_v21 = vmax.f32 %v531_v14, 0.0 }
  0xdb   :  { %v567_v12 = vmax.f32 %v488_v10, 0.0 }
  0xdc   :  { %v433_v13 = vpop.f32.mrf.mxu2 }
  0xdd   :  { %v950_v15 = vpack.c.bf16 %v567_v12, %v566_v11  ;;  %v434_v16 = vadd.f32 %v1343_v61, %v433_v13  ;;  %v532_v17 = vpop.f32.mrf.mxu3 }
  0xde   :  { %v391_v18 = vpop.f32.mrf.mxu0 }
  0xdf   :  { %1024 = vst [vmem:[%s1438_s3 + $0x18] sm:$0xff] %v950_v15   ;;  %v533_v19 = vadd.f32 %v532_v17, %v434_v16  ;;  %v490_v20 = vpop.f32.mrf.mxu1  ;;  %v392_v24 = vadd.f32 %v1343_v61, %v391_v18 }
  0xe1   :  { %v585_v22 = vmax.f32 %v533_v19, 0.0  ;;  %v491_v28 = vadd.f32 %v490_v20, %v392_v24 }
  0xe3   :  { %v995_v23 = vpack.c.bf16 %v585_v22, %v584_v21  ;;  %v568_v33 = vmax.f32 %v491_v28, 0.0 }
  0xe4   :  { %v436_v25 = vpop.f32.mrf.mxu2 }
  0xe5   :  { %1033 = vst [vmem:[%s1438_s3 + $0x60] sm:$0xff] %v995_v23   ;;  %v535_v26 = vpop.f32.mrf.mxu3  ;;  %v437_v31 = vadd.f32 %v1343_v61, %v436_v25 }
  0xe6   :  { %v393_v27 = vpop.f32.mrf.mxu0 }
  0xe7   :  { %v394_v29 = vadd.f32 %v1343_v61, %v393_v27  ;;  %v492_v30 = vpop.f32.mrf.mxu1  ;;  %v536_v36 = vadd.f32 %v535_v26, %v437_v31 }
  0xe9   :  { %v493_v32 = vadd.f32 %v492_v30, %v394_v29  ;;  %v586_v43 = vmax.f32 %v536_v36, 0.0 }
  0xeb   :  { %v569_v34 = vmax.f32 %v493_v32, 0.0 }
  0xec   :  { %v438_v35 = vpop.f32.mrf.mxu2 }
  0xed   :  { %v955_v37 = vpack.c.bf16 %v569_v34, %v568_v33  ;;  %v439_v38 = vadd.f32 %v1343_v61, %v438_v35  ;;  %v537_v39 = vpop.f32.mrf.mxu3 }
  0xee   :  { %v396_v40 = vpop.f32.mrf.mxu0 }
  0xef   :  { %1025 = vst [vmem:[%s1438_s3 + $0x20] sm:$0xff] %v955_v37   ;;  %v538_v41 = vadd.f32 %v537_v39, %v439_v38  ;;  %v495_v42 = vpop.f32.mrf.mxu1  ;;  %v397_v46 = vadd.f32 %v1343_v61, %v396_v40 }
  0xf1   :  { %v587_v44 = vmax.f32 %v538_v41, 0.0  ;;  %v496_v50 = vadd.f32 %v495_v42, %v397_v46 }
  0xf3   :  { %v1000_v45 = vpack.c.bf16 %v587_v44, %v586_v43  ;;  %v570_v55 = vmax.f32 %v496_v50, 0.0 }
  0xf4   :  { %v441_v47 = vpop.f32.mrf.mxu2 }
  0xf5   :  { %1034 = vst [vmem:[%s1438_s3 + $0x68] sm:$0xff] %v1000_v45   ;;  %v540_v48 = vpop.f32.mrf.mxu3  ;;  %v442_v53 = vadd.f32 %v1343_v61, %v441_v47 }
  0xf6   :  { %v398_v49 = vpop.f32.mrf.mxu0 }
  0xf7   :  { %v399_v51 = vadd.f32 %v1343_v61, %v398_v49  ;;  %v497_v52 = vpop.f32.mrf.mxu1  ;;  %v541_v58 = vadd.f32 %v540_v48, %v442_v53 }
  0xf9   :  { %v498_v54 = vadd.f32 %v497_v52, %v399_v51  ;;  %v588_v2 = vmax.f32 %v541_v58, 0.0 }
  0xfb   :  { %v571_v56 = vmax.f32 %v498_v54, 0.0 }
  0xfc   :  { %v443_v57 = vpop.f32.mrf.mxu2 }
  0xfd   :  { %v960_v59 = vpack.c.bf16 %v571_v56, %v570_v55  ;;  %v444_v60 = vadd.f32 %v1343_v61, %v443_v57  ;;  %v542_v62 = vpop.f32.mrf.mxu3 }
  0xfe   :  { %v401_v63 = vpop.f32.mrf.mxu0 }
  0xff   :  { %1026 = vst [vmem:[%s1438_s3 + $0x28] sm:$0xff] %v960_v59   ;;  %v543_v0 = vadd.f32 %v542_v62, %v444_v60  ;;  %v500_v1 = vpop.f32.mrf.mxu1  ;;  %v402_v5 = vadd.f32 %v1343_v61, %v401_v63 }
 0x101   :  { %v589_v3 = vmax.f32 %v543_v0, 0.0  ;;  %v501_v9 = vadd.f32 %v500_v1, %v402_v5 }
 0x103   :  { %v1005_v4 = vpack.c.bf16 %v589_v3, %v588_v2  ;;  %v572_v14 = vmax.f32 %v501_v9, 0.0 }
 0x104   :  { %v446_v6 = vpop.f32.mrf.mxu2 }
 0x105   :  { %1035 = vst [vmem:[%s1438_s3 + $0x70] sm:$0xff] %v1005_v4   ;;  %v545_v7 = vpop.f32.mrf.mxu3  ;;  %v447_v12 = vadd.f32 %v1343_v61, %v446_v6 }
 0x106   :  { %v403_v8 = vpop.f32.mrf.mxu0 }
 0x107   :  { %v404_v10 = vadd.f32 %v1343_v61, %v403_v8  ;;  %v502_v11 = vpop.f32.mrf.mxu1  ;;  %v546_v17 = vadd.f32 %v545_v7, %v447_v12 }
 0x109   :  { %v503_v13 = vadd.f32 %v502_v11, %v404_v10  ;;  %v590_v24 = vmax.f32 %v546_v17, 0.0 }
 0x10b   :  { %v573_v15 = vmax.f32 %v503_v13, 0.0 }
 0x10c   :  { %v448_v16 = vpop.f32.mrf.mxu2 }
 0x10d   :  { %v965_v18 = vpack.c.bf16 %v573_v15, %v572_v14  ;;  %v449_v19 = vadd.f32 %v1343_v61, %v448_v16  ;;  %v547_v20 = vpop.f32.mrf.mxu3 }
 0x10e   :  { %v406_v21 = vpop.f32.mrf.mxu0 }
 0x10f   :  { %1027 = vst [vmem:[%s1438_s3 + $0x30] sm:$0xff] %v965_v18   ;;  %v548_v22 = vadd.f32 %v547_v20, %v449_v19  ;;  %v505_v23 = vpop.f32.mrf.mxu1  ;;  %v407_v27 = vadd.f32 %v1343_v61, %v406_v21 }
 0x111   :  { %v591_v25 = vmax.f32 %v548_v22, 0.0  ;;  %v506_v31 = vadd.f32 %v505_v23, %v407_v27 }
 0x113   :  { %v1010_v26 = vpack.c.bf16 %v591_v25, %v590_v24  ;;  %v574_v36 = vmax.f32 %v506_v31, 0.0 }
 0x114   :  { %v451_v28 = vpop.f32.mrf.mxu2 }
 0x115   :  { %1036 = vst [vmem:[%s1438_s3 + $0x78] sm:$0xff] %v1010_v26   ;;  %v550_v29 = vpop.f32.mrf.mxu3  ;;  %v452_v34 = vadd.f32 %v1343_v61, %v451_v28 }
 0x116   :  { %v408_v30 = vpop.f32.mrf.mxu0 }
 0x117   :  { %v409_v32 = vadd.f32 %v1343_v61, %v408_v30  ;;  %v507_v33 = vpop.f32.mrf.mxu1  ;;  %v551_v39 = vadd.f32 %v550_v29, %v452_v34 }
 0x119   :  { %v508_v35 = vadd.f32 %v507_v33, %v409_v32  ;;  %v592_v46 = vmax.f32 %v551_v39, 0.0 }
 0x11b   :  { %v575_v37 = vmax.f32 %v508_v35, 0.0 }
 0x11c   :  { %v453_v38 = vpop.f32.mrf.mxu2 }
 0x11d   :  { %v970_v40 = vpack.c.bf16 %v575_v37, %v574_v36  ;;  %v454_v41 = vadd.f32 %v1343_v61, %v453_v38  ;;  %v552_v42 = vpop.f32.mrf.mxu3 }
 0x11e   :  { %v411_v43 = vpop.f32.mrf.mxu0 }
 0x11f   :  { %1028 = vst [vmem:[%s1438_s3 + $0x38] sm:$0xff] %v970_v40   ;;  %v553_v44 = vadd.f32 %v552_v42, %v454_v41  ;;  %v510_v45 = vpop.f32.mrf.mxu1  ;;  %v412_v49 = vadd.f32 %v1343_v61, %v411_v43 }
 0x121   :  { %v593_v47 = vmax.f32 %v553_v44, 0.0  ;;  %v511_v53 = vadd.f32 %v510_v45, %v412_v49 }
 0x123   :  { %v1015_v48 = vpack.c.bf16 %v593_v47, %v592_v46  ;;  %v576_v58 = vmax.f32 %v511_v53, 0.0 }
 0x124   :  { %v456_v50 = vpop.f32.mrf.mxu2 }
 0x125   :  { %1037 = vst [vmem:[%s1438_s3 + $0x80] sm:$0xff] %v1015_v48   ;;  %v555_v51 = vpop.f32.mrf.mxu3  ;;  %v457_v56 = vadd.f32 %v1343_v61, %v456_v50 }
 0x126   :  { %v413_v52 = vpop.f32.mrf.mxu0 }
 0x127   :  { %v414_v54 = vadd.f32 %v1343_v61, %v413_v52  ;;  %v512_v55 = vpop.f32.mrf.mxu1  ;;  %v556_v62 = vadd.f32 %v555_v51, %v457_v56 }
 0x129   :  { %v513_v57 = vadd.f32 %v512_v55, %v414_v54  ;;  %v594_v3 = vmax.f32 %v556_v62, 0.0 }
 0x12b   :  { %v577_v59 = vmax.f32 %v513_v57, 0.0 }
 0x12c   :  { %v458_v60 = vpop.f32.mrf.mxu2 }
 0x12d   :  { %v975_v63 = vpack.c.bf16 %v577_v59, %v576_v58  ;;  %v459_v0 = vadd.f32 %v1343_v61, %v458_v60  ;;  %v557_v1 = vpop.f32.mrf.mxu3 }
 0x12f   :  { %1029 = vst [vmem:[%s1438_s3 + $0x40] sm:$0xff] %v975_v63   ;;  %v558_v2 = vadd.f32 %v557_v1, %v459_v0 }
 0x131   :  { %v595_v4 = vmax.f32 %v558_v2, 0.0 }
 0x133   :  { %v1020_v5 = vpack.c.bf16 %v595_v4, %v594_v3 }
 0x135   :  { %1038 = vst [vmem:[%s1438_s3 + $0x88] sm:$0xff] %v1020_v5  }

// kernel: dqn_forward.4
= control target key start
LH: loop header
LB: loop body
LE: loop exit
PB: predicated region body
PF: predicated region fallthrough
CT: control target
= control target key end

     0   :  { %s3559_s1 = inlined_call_operand.vmem [shape: bf16[2048,128], index: 1, kind: input, shape index: {}]   ;;  %s3560_s2 = inlined_call_operand.vmem [shape: f32[1,128], index: 2, kind: input, shape index: {}]   ;;  %s3561_s0 = inlined_call_operand.vmem [shape: bf16[50,2048], index: 0, kind: input, shape index: {}]   ;;  %s3562_s3 = inlined_call_operand.vmem [shape: bf16[50,128], index: 3, kind: output, shape index: {}]  }
   0x1   :  { %v2626_v0 = vld [vmem:[%s3559_s1 + $0x38] sm:$0xff]  ;;  %v2625_v4 = vld [vmem:[%s3559_s1 + $0x30] sm:$0xff]  ;;  %v2624_v8 = vld [vmem:[%s3559_s1 + $0x28] sm:$0xff] }
   0x2   :  { %v2634_v1 = vld [vmem:[%s3559_s1 + $0x78] sm:$0xff]  ;;  %1394 = vmatpush.bf16.msra.mxu0 %v2626_v0  ;;  %v2633_v5 = vld [vmem:[%s3559_s1 + $0x70] sm:$0xff]  ;;  %v2632_v9 = vld [vmem:[%s3559_s1 + $0x68] sm:$0xff] }
   0x3   :  { %v2642_v2 = vld [vmem:[%s3559_s1 + $0xb8] sm:$0xff]  ;;  %1422 = vmatpush.bf16.msra.mxu1 %v2634_v1  ;;  %v2641_v6 = vld [vmem:[%s3559_s1 + $0xb0] sm:$0xff]  ;;  %v2640_v10 = vld [vmem:[%s3559_s1 + $0xa8] sm:$0xff] }
   0x4   :  { %v2650_v3 = vld [vmem:[%s3559_s1 + $0xf8] sm:$0xff]  ;;  %1450 = vmatpush.bf16.msra.mxu2 %v2642_v2  ;;  %v2649_v7 = vld [vmem:[%s3559_s1 + $0xf0] sm:$0xff]  ;;  %v2648_v11 = vld [vmem:[%s3559_s1 + $0xe8] sm:$0xff] }
   0x5   :  { %1478 = vmatpush.bf16.msra.mxu3 %v2650_v3  ;;  %v2623_v12 = vld [vmem:[%s3559_s1 + $0x20] sm:$0xff]  ;;  %v2622_v16 = vld [vmem:[%s3559_s1 + $0x18] sm:$0xff]  ;;  %v2621_v20 = vld [vmem:[%s3559_s1 + $0x10] sm:$0xff] }
   0x6   :  { %1395 = vmatpush.bf16.msra.mxu0 %v2625_v4  ;;  %v2631_v13 = vld [vmem:[%s3559_s1 + $0x60] sm:$0xff]  ;;  %v2630_v17 = vld [vmem:[%s3559_s1 + $0x58] sm:$0xff]  ;;  %v2629_v21 = vld [vmem:[%s3559_s1 + $0x50] sm:$0xff] }
   0x7   :  { %1423 = vmatpush.bf16.msra.mxu1 %v2633_v5  ;;  %v2639_v14 = vld [vmem:[%s3559_s1 + $0xa0] sm:$0xff]  ;;  %v2638_v18 = vld [vmem:[%s3559_s1 + $0x98] sm:$0xff]  ;;  %v2637_v22 = vld [vmem:[%s3559_s1 + $0x90] sm:$0xff] }
   0x8   :  { %1451 = vmatpush.bf16.msra.mxu2 %v2641_v6  ;;  %v2647_v15 = vld [vmem:[%s3559_s1 + $0xe0] sm:$0xff]  ;;  %v2646_v19 = vld [vmem:[%s3559_s1 + $0xd8] sm:$0xff]  ;;  %v2645_v23 = vld [vmem:[%s3559_s1 + $0xd0] sm:$0xff] }
   0x9   :  { %1479 = vmatpush.bf16.msra.mxu3 %v2649_v7  ;;  %v2620_v24 = vld [vmem:[%s3559_s1 + $0x8] sm:$0xff]  ;;  %v2619_v28 = vld [vmem:[%s3559_s1] sm:$0xff]  ;;  %v2674_v40 = vld [vmem:[%s3559_s1 + $0x1b8] sm:$0xff] }
   0xa   :  { %1396 = vmatpush.bf16.msra.mxu0 %v2624_v8  ;;  %v2628_v25 = vld [vmem:[%s3559_s1 + $0x48] sm:$0xff]  ;;  %v2627_v29 = vld [vmem:[%s3559_s1 + $0x40] sm:$0xff]  ;;  %v2682_v41 = vld [vmem:[%s3559_s1 + $0x1f8] sm:$0xff] }
   0xb   :  { %1424 = vmatpush.bf16.msra.mxu1 %v2632_v9  ;;  %v2636_v26 = vld [vmem:[%s3559_s1 + $0x88] sm:$0xff]  ;;  %v2635_v30 = vld [vmem:[%s3559_s1 + $0x80] sm:$0xff]  ;;  %v2658_v46 = vld [vmem:[%s3559_s1 + $0x138] sm:$0xff] }
   0xc   :  { %1452 = vmatpush.bf16.msra.mxu2 %v2640_v10  ;;  %v2644_v27 = vld [vmem:[%s3559_s1 + $0xc8] sm:$0xff]  ;;  %v2643_v31 = vld [vmem:[%s3559_s1 + $0xc0] sm:$0xff]  ;;  %v2666_v47 = vld [vmem:[%s3559_s1 + $0x178] sm:$0xff] }
   0xd   :  { %1480 = vmatpush.bf16.msra.mxu3 %v2648_v11  ;;  %v1869_v32 = vld [vmem:[%s3561_s0] sm:$0xf]  ;;  %v2571_v34 = vld [vmem:[%s3561_s0 + $0x4] sm:$0xf]  ;;  %v1877_v36 = vld [vmem:[%s3561_s0 + $0x8] sm:$0xf] }
   0xe   :  { %1397 = vmatpush.bf16.msra.mxu0 %v2623_v12  ;;  %v2579_v33 = vld [vmem:[%s3561_s0 + $0x3c] sm:$0xf0]  ;;  %v1871_v35 = vld [vmem:[%s3561_s0 + $0x40] sm:$0xf0]  ;;  %v2580_v37 = vld [vmem:[%s3561_s0 + $0x44] sm:$0xf0] }
   0xf   :  { %1425 = vmatpush.bf16.msra.mxu1 %v2631_v13  ;;  %v2572_v38 = vld [vmem:[%s3561_s0 + $0xc] sm:$0xf]  ;;  %v1870_v42 = vor.u32 %v2579_v33, %v1869_v32  ;;  %v1874_v43 = vor.u32 %v2571_v34, %v1871_v35  ;;  %v1878_v44 = vor.u32 %v2580_v37, %v1877_v36  ;;  %v2673_v48 = vld [vmem:[%s3559_s1 + $0x1b0] sm:$0xff]  ;;  %v1933_v56 = vld [vmem:[%s3561_s0 + $0x80] sm:$0xf] }
  0x10   :  { %1453 = vmatpush.bf16.msra.mxu2 %v2639_v14  ;;  %v1879_v39 = vld [vmem:[%s3561_s0 + $0x48] sm:$0xf0]  ;;  %v2681_v49 = vld [vmem:[%s3559_s1 + $0x1f0] sm:$0xff]  ;;  %v2671_v57 = vld [vmem:[%s3559_s1 + $0x1a0] sm:$0xff] }
  0x11   :  { %1481 = vmatpush.bf16.msra.mxu3 %v2647_v15  ;;  %v1882_v45 = vor.u32 %v2572_v38, %v1879_v39  ;;  %v2657_v50 = vld [vmem:[%s3559_s1 + $0x130] sm:$0xff]  ;;  %v2672_v52 = vld [vmem:[%s3559_s1 + $0x1a8] sm:$0xff]  ;;  %v2679_v58 = vld [vmem:[%s3559_s1 + $0x1e0] sm:$0xff] }
  0x12   :  { %1398 = vmatpush.bf16.msra.mxu0 %v2622_v16  ;;  %v2665_v51 = vld [vmem:[%s3559_s1 + $0x170] sm:$0xff]  ;;  %v2680_v53 = vld [vmem:[%s3559_s1 + $0x1e8] sm:$0xff]  ;;  %v2595_v59 = vld [vmem:[%s3561_s0 + $0xbc] sm:$0xf0] }
  0x13   :  { %1426 = vmatpush.bf16.msra.mxu1 %v2630_v17  ;;  %v2656_v54 = vld [vmem:[%s3559_s1 + $0x128] sm:$0xff]  ;;  %v2587_v60 = vld [vmem:[%s3561_s0 + $0x84] sm:$0xf]  ;;  %v2670_v4 = vld [vmem:[%s3559_s1 + $0x198] sm:$0xff]  ;;  %v1934_v6 = vor.u32 %v2595_v59, %v1933_v56 }
  0x14   :  { %1454 = vmatpush.bf16.msra.mxu2 %v2638_v18  ;;  %v2664_v55 = vld [vmem:[%s3559_s1 + $0x168] sm:$0xff]  ;;  %v1935_v61 = vld [vmem:[%s3561_s0 + $0xc0] sm:$0xf0]  ;;  %v2678_v5 = vld [vmem:[%s3559_s1 + $0x1d8] sm:$0xff] }
  0x15   :  { %1482 = vmatpush.bf16.msra.mxu3 %v2646_v19  ;;  %v1941_v62 = vld [vmem:[%s3561_s0 + $0x88] sm:$0xf]  ;;  %v2588_v0 = vld [vmem:[%s3561_s0 + $0x8c] sm:$0xf]  ;;  %v2655_v2 = vld [vmem:[%s3559_s1 + $0x120] sm:$0xff]  ;;  %v1938_v7 = vor.u32 %v2587_v60, %v1935_v61 }
  0x16   :  { %1399 = vmatpush.bf16.msra.mxu0 %v2621_v20  ;;  %v2596_v63 = vld [vmem:[%s3561_s0 + $0xc4] sm:$0xf0]  ;;  %v1943_v1 = vld [vmem:[%s3561_s0 + $0xc8] sm:$0xf0]  ;;  %v2663_v3 = vld [vmem:[%s3559_s1 + $0x160] sm:$0xff] }
  0x17   :  { %1427 = vmatpush.bf16.msra.mxu1 %v2629_v21  ;;  %v1942_v8 = vor.u32 %v2596_v63, %v1941_v62  ;;  %v1946_v9 = vor.u32 %v2588_v0, %v1943_v1  ;;  %v2654_v10 = vld [vmem:[%s3559_s1 + $0x118] sm:$0xff]  ;;  %v2669_v12 = vld [vmem:[%s3559_s1 + $0x190] sm:$0xff]  ;;  %v2668_v16 = vld [vmem:[%s3559_s1 + $0x188] sm:$0xff] }
  0x18   :  { %1455 = vmatpush.bf16.msra.mxu2 %v2637_v22  ;;  %v2662_v11 = vld [vmem:[%s3559_s1 + $0x158] sm:$0xff]  ;;  %v2677_v13 = vld [vmem:[%s3559_s1 + $0x1d0] sm:$0xff]  ;;  %v2676_v17 = vld [vmem:[%s3559_s1 + $0x1c8] sm:$0xff] }
  0x19   :  { %1483 = vmatpush.bf16.msra.mxu3 %v2645_v23  ;;  %v2653_v14 = vld [vmem:[%s3559_s1 + $0x110] sm:$0xff]  ;;  %v2652_v18 = vld [vmem:[%s3559_s1 + $0x108] sm:$0xff]  ;;  %v1997_v20 = vld [vmem:[%s3561_s0 + $0x100] sm:$0xf] }
  0x1a   :  { %1400 = vmatpush.bf16.msra.mxu0 %v2620_v24  ;;  %v2661_v15 = vld [vmem:[%s3559_s1 + $0x150] sm:$0xff]  ;;  %v2660_v19 = vld [vmem:[%s3559_s1 + $0x148] sm:$0xff]  ;;  %v2667_v21 = vld [vmem:[%s3559_s1 + $0x180] sm:$0xff] }
  0x1b   :  { %1428 = vmatpush.bf16.msra.mxu1 %v2628_v25  ;;  %v2675_v22 = vld [vmem:[%s3559_s1 + $0x1c0] sm:$0xff]  ;;  %v2706_v36 = vld [vmem:[%s3559_s1 + $0x2b8] sm:$0xff]  ;;  %v2688_v56 = vld [vmem:[%s3559_s1 + $0x228] sm:$0xff] }
  0x1c   :  { %1456 = vmatpush.bf16.msra.mxu2 %v2636_v26  ;;  %v2611_v23 = vld [vmem:[%s3561_s0 + $0x13c] sm:$0xf0]  ;;  %v2603_v24 = vld [vmem:[%s3561_s0 + $0x104] sm:$0xf]  ;;  %v2005_v26 = vld [vmem:[%s3561_s0 + $0x108] sm:$0xf] }
  0x1d   :  { %1484 = vmatpush.bf16.msra.mxu3 %v2644_v27  ;;  %v1999_v25 = vld [vmem:[%s3561_s0 + $0x140] sm:$0xf0]  ;;  %v2612_v27 = vld [vmem:[%s3561_s0 + $0x144] sm:$0xf0]  ;;  %v1998_v32 = vor.u32 %v2611_v23, %v1997_v20  ;;  %v2714_v37 = vld [vmem:[%s3559_s1 + $0x2f8] sm:$0xff] }
  0x1e   :  { %1401 = vmatpush.bf16.msra.mxu0 %v2619_v28  ;;  %v2604_v28 = vld [vmem:[%s3561_s0 + $0x10c] sm:$0xf]  ;;  %v2002_v33 = vor.u32 %v2603_v24, %v1999_v25  ;;  %v2006_v34 = vor.u32 %v2612_v27, %v2005_v26  ;;  %v2690_v38 = vld [vmem:[%s3559_s1 + $0x238] sm:$0xff]  ;;  %v2711_v59 = vld [vmem:[%s3559_s1 + $0x2e0] sm:$0xff] }
  0x1f   :  { %1429 = vmatpush.bf16.msra.mxu1 %v2627_v29  ;;  %v2007_v29 = vld [vmem:[%s3561_s0 + $0x148] sm:$0xf0]  ;;  %v2698_v39 = vld [vmem:[%s3559_s1 + $0x278] sm:$0xff]  ;;  %v2687_v60 = vld [vmem:[%s3559_s1 + $0x220] sm:$0xff] }
  0x20   :  { %1457 = vmatpush.bf16.msra.mxu2 %v2635_v30  ;;  %v2651_v30 = vld [vmem:[%s3559_s1 + $0x100] sm:$0xff]  ;;  %v2010_v35 = vor.u32 %v2604_v28, %v2007_v29  ;;  %v1885_v62 = vld [vmem:[%s3561_s0 + $0x10] sm:$0xf]  ;;  %v2573_v0 = vld [vmem:[%s3561_s0 + $0x14] sm:$0xf] }
  0x21   :  { %1485 = vmatpush.bf16.msra.mxu3 %v2643_v31  ;;  %1402 = vmatmul.bf16.vlgmr.msra.gmra.mxu0 %v1870_v42  ;;  %v2659_v31 = vld [vmem:[%s3559_s1 + $0x140] sm:$0xff]  ;;  %v2689_v42 = vld [vmem:[%s3559_s1 + $0x230] sm:$0xff]  ;;  %v2598_v23 = vld [vmem:[%s3561_s0 + $0xd4] sm:$0xf0] }
  0x22   :  { %1430 = vmatmul.bf16.vlgmr.msra.gmra.mxu1 %v1874_v43  ;;  %1506 = vmatpush.bf16.msrb.mxu0 %v2658_v46  ;;  %v2697_v43 = vld [vmem:[%s3559_s1 + $0x270] sm:$0xff]  ;;  %v2695_v61 = vld [vmem:[%s3559_s1 + $0x260] sm:$0xff]  ;;  %v2590_v24 = vld [vmem:[%s3561_s0 + $0x9c] sm:$0xf] }
  0x23   :  { %1458 = vmatmul.bf16.vlgmr.msra.gmra.mxu2 %v1878_v44  ;;  %1534 = vmatpush.bf16.msrb.mxu1 %v2666_v47  ;;  %v62_v44 = vld [vmem:[%s3561_s0 + $0x180] sm:$0x11]  ;;  %v2581_v63 = vld [vmem:[%s3561_s0 + $0x4c] sm:$0xf0]  ;;  %v1887_v1 = vld [vmem:[%s3561_s0 + $0x50] sm:$0xf0] }
  0x24   :  { %1562 = vmatpush.bf16.msrb.mxu2 %v2674_v40  ;;  %1486 = vmatmul.bf16.vlgmr.msra.gmra.mxu3 %v1882_v45  ;;  %v2705_v40 = vld [vmem:[%s3559_s1 + $0x2b0] sm:$0xff]  ;;  %v63_v45 = vld [vmem:[%s3561_s0 + $0x188] sm:$0x11]  ;;  %v482_v46 = vunpack.c.l.b16 %v62_v44  ;;  %v483_v47 = vunpack.c.h.b16 %v62_v44  ;;  %v1959_v25 = vld [vmem:[%s3561_s0 + $0xd8] sm:$0xf0] }
  0x25   :  { %1590 = vmatpush.bf16.msrb.mxu3 %v2682_v41  ;;  %v2713_v41 = vld [vmem:[%s3559_s1 + $0x2f0] sm:$0xff]  ;;  %v1962_v29 = vor.u32 %v2590_v24, %v1959_v25  ;;  %v2606_v44 = vld [vmem:[%s3561_s0 + $0x11c] sm:$0xf] }
  0x26   :  { %1507 = vmatpush.bf16.msrb.mxu0 %v2657_v50  ;;  %v546_v50 = vpack.c.b16 %v482_v46, %v482_v46  ;;  %v2589_v20 = vld [vmem:[%s3561_s0 + $0x94] sm:$0xf] }
  0x27   :  { %1535 = vmatpush.bf16.msrb.mxu1 %v2665_v51  ;;  %v547_v51 = vpack.c.b16 %v483_v47, %v483_v47 }
  0x28   :  { %1563 = vmatpush.bf16.msrb.mxu2 %v2673_v48  ;;  %v484_v48 = vunpack.c.l.b16 %v63_v45 }
  0x29   :  { %1591 = vmatpush.bf16.msrb.mxu3 %v2681_v49  ;;  %v485_v49 = vunpack.c.h.b16 %v63_v45  ;;  %v2023_v45 = vld [vmem:[%s3561_s0 + $0x158] sm:$0xf0] }
  0x2a   :  { %1508 = vmatpush.bf16.msrb.mxu0 %v2656_v54  ;;  %v2704_v54 = vld [vmem:[%s3559_s1 + $0x2a8] sm:$0xff] }
  0x2b   :  { %1536 = vmatpush.bf16.msrb.mxu1 %v2664_v55  ;;  %v2712_v55 = vld [vmem:[%s3559_s1 + $0x2e8] sm:$0xff] }
  0x2c   :  { %1564 = vmatpush.bf16.msrb.mxu2 %v2672_v52  ;;  %v548_v52 = vpack.c.b16 %v484_v48, %v484_v48 }
  0x2d   :  { %1592 = vmatpush.bf16.msrb.mxu3 %v2680_v53  ;;  %v549_v53 = vpack.c.b16 %v485_v49, %v485_v49  ;;  %v2026_v49 = vor.u32 %v2606_v44, %v2023_v45  ;;  %v2741_v44 = vld [vmem:[%s3559_s1 + $0x3d0] sm:$0xff] }
  0x2e   :  { %1509 = vmatpush.bf16.msrb.mxu0 %v2655_v2  ;;  %v1893_v2 = vld [vmem:[%s3561_s0 + $0x18] sm:$0xf]  ;;  %v2717_v45 = vld [vmem:[%s3559_s1 + $0x310] sm:$0xff] }
  0x2f   :  { %1537 = vmatpush.bf16.msrb.mxu1 %v2663_v3  ;;  %v2582_v3 = vld [vmem:[%s3561_s0 + $0x54] sm:$0xf0] }
  0x30   :  { %1565 = vmatpush.bf16.msrb.mxu2 %v2671_v57  ;;  %v2696_v57 = vld [vmem:[%s3559_s1 + $0x268] sm:$0xff] }
  0x31   :  { %1593 = vmatpush.bf16.msrb.mxu3 %v2679_v58  ;;  %1407 = vmatmul.bf16.gmra.mxu0 %v1934_v6  ;;  %v2703_v58 = vld [vmem:[%s3559_s1 + $0x2a0] sm:$0xff]  ;;  %v1886_v6 = vor.u32 %v2581_v63, %v1885_v62 }
  0x32   :  { %1435 = vmatmul.bf16.gmra.mxu1 %v1938_v7  ;;  %1510 = vmatpush.bf16.msrb.mxu0 %v2654_v10  ;;  %v1890_v7 = vor.u32 %v2573_v0, %v1887_v1  ;;  %v2702_v10 = vld [vmem:[%s3559_s1 + $0x298] sm:$0xff] }
  0x33   :  { %1463 = vmatmul.bf16.gmra.mxu2 %v1942_v8  ;;  %1538 = vmatpush.bf16.msrb.mxu1 %v2662_v11  ;;  %v1894_v8 = vor.u32 %v2582_v3, %v1893_v2  ;;  %v2710_v11 = vld [vmem:[%s3559_s1 + $0x2d8] sm:$0xff]  ;;  %v2729_v3 = vld [vmem:[%s3559_s1 + $0x370] sm:$0xff] }
  0x34   :  { %1566 = vmatpush.bf16.msrb.mxu2 %v2670_v4  ;;  %1491 = vmatmul.bf16.gmra.mxu3 %v1946_v9  ;;  %v2574_v4 = vld [vmem:[%s3561_s0 + $0x1c] sm:$0xf] }
  0x35   :  { %1594 = vmatpush.bf16.msrb.mxu3 %v2678_v5  ;;  %v1895_v5 = vld [vmem:[%s3561_s0 + $0x58] sm:$0xf0] }
  0x36   :  { %1511 = vmatpush.bf16.msrb.mxu0 %v2653_v14  ;;  %v1898_v9 = vor.u32 %v2574_v4, %v1895_v5  ;;  %v2701_v14 = vld [vmem:[%s3559_s1 + $0x290] sm:$0xff]  ;;  %v2736_v4 = vld [vmem:[%s3559_s1 + $0x3a8] sm:$0xff] }
  0x37   :  { %1539 = vmatpush.bf16.msrb.mxu1 %v2661_v15  ;;  %v2709_v15 = vld [vmem:[%s3559_s1 + $0x2d0] sm:$0xff]  ;;  %v2744_v5 = vld [vmem:[%s3559_s1 + $0x3e8] sm:$0xff] }
  0x38   :  { %1567 = vmatpush.bf16.msrb.mxu2 %v2669_v12  ;;  %v2686_v12 = vld [vmem:[%s3559_s1 + $0x218] sm:$0xff] }
  0x39   :  { %1595 = vmatpush.bf16.msrb.mxu3 %v2677_v13  ;;  %v2694_v13 = vld [vmem:[%s3559_s1 + $0x258] sm:$0xff] }
  0x3a   :  { %1512 = vmatpush.bf16.msrb.mxu0 %v2652_v18  ;;  %v1949_v18 = vld [vmem:[%s3561_s0 + $0x90] sm:$0xf] }
  0x3b   :  { %1540 = vmatpush.bf16.msrb.mxu1 %v2660_v19  ;;  %v2597_v19 = vld [vmem:[%s3561_s0 + $0xcc] sm:$0xf0] }
  0x3c   :  { %1568 = vmatpush.bf16.msrb.mxu2 %v2668_v16  ;;  %v2685_v16 = vld [vmem:[%s3559_s1 + $0x210] sm:$0xff]  ;;  %v1950_v26 = vor.u32 %v2597_v19, %v1949_v18  ;;  %v2576_v18 = vld [vmem:[%s3561_s0 + $0x2c] sm:$0xf] }
  0x3d   :  { %1596 = vmatpush.bf16.msrb.mxu3 %v2676_v17  ;;  %v2693_v17 = vld [vmem:[%s3559_s1 + $0x250] sm:$0xff]  ;;  %v1911_v19 = vld [vmem:[%s3561_s0 + $0x68] sm:$0xf0] }
  0x3e   :  { %1513 = vmatpush.bf16.msrb.mxu0 %v2651_v30  ;;  %v2700_v30 = vld [vmem:[%s3559_s1 + $0x288] sm:$0xff]  ;;  %v1914_v25 = vor.u32 %v2576_v18, %v1911_v19  ;;  %v2715_v18 = vld [vmem:[%s3559_s1 + $0x300] sm:$0xff] }
  0x3f   :  { %1541 = vmatpush.bf16.msrb.mxu1 %v2659_v31  ;;  %v2708_v31 = vld [vmem:[%s3559_s1 + $0x2c8] sm:$0xff]  ;;  %v2607_v19 = vld [vmem:[%s3561_s0 + $0x124] sm:$0xf] }
  0x40   :  { %1569 = vmatpush.bf16.msrb.mxu2 %v2667_v21  ;;  %v1951_v21 = vld [vmem:[%s3561_s0 + $0xd0] sm:$0xf0] }
  0x41   :  { %1597 = vmatpush.bf16.msrb.mxu3 %v2675_v22  ;;  %1412 = vmatmul.bf16.gmra.mxu0 %v1998_v32  ;;  %v1957_v22 = vld [vmem:[%s3561_s0 + $0x98] sm:$0xf]  ;;  %v1954_v27 = vor.u32 %v2589_v20, %v1951_v21  ;;  %v2684_v32 = vld [vmem:[%s3559_s1 + $0x208] sm:$0xff] }
  0x42   :  { %1440 = vmatmul.bf16.gmra.mxu1 %v2002_v33  ;;  %1618 = vmatpush.bf16.msra.mxu0 %v2690_v38  ;;  %v1958_v28 = vor.u32 %v2598_v23, %v1957_v22  ;;  %v2692_v33 = vld [vmem:[%s3559_s1 + $0x248] sm:$0xff]  ;;  %v2013_v38 = vld [vmem:[%s3561_s0 + $0x110] sm:$0xf] }
  0x43   :  { %1468 = vmatmul.bf16.gmra.mxu2 %v2006_v34  ;;  %1646 = vmatpush.bf16.msra.mxu1 %v2698_v39  ;;  %v2699_v34 = vld [vmem:[%s3559_s1 + $0x280] sm:$0xff]  ;;  %v2613_v39 = vld [vmem:[%s3561_s0 + $0x14c] sm:$0xf0] }
  0x44   :  { %1496 = vmatmul.bf16.gmra.mxu3 %v2010_v35  ;;  %1674 = vmatpush.bf16.msra.mxu2 %v2706_v36  ;;  %v2707_v35 = vld [vmem:[%s3559_s1 + $0x2c0] sm:$0xff]  ;;  %v2014_v46 = vor.u32 %v2613_v39, %v2013_v38 }
  0x45   :  { %1702 = vmatpush.bf16.msra.mxu3 %v2714_v37  ;;  %v2683_v36 = vld [vmem:[%s3559_s1 + $0x200] sm:$0xff] }
  0x46   :  { %1619 = vmatpush.bf16.msra.mxu0 %v2689_v42  ;;  %v2691_v37 = vld [vmem:[%s3559_s1 + $0x240] sm:$0xff]  ;;  %v2021_v42 = vld [vmem:[%s3561_s0 + $0x118] sm:$0xf] }
  0x47   :  { %1647 = vmatpush.bf16.msra.mxu1 %v2697_v43  ;;  %v2614_v43 = vld [vmem:[%s3561_s0 + $0x154] sm:$0xf0]  ;;  %v1965_v39 = vld [vmem:[%s3561_s0 + $0xa0] sm:$0xf] }
  0x48   :  { %1675 = vmatpush.bf16.msra.mxu2 %v2705_v40  ;;  %v2605_v40 = vld [vmem:[%s3561_s0 + $0x114] sm:$0xf]  ;;  %v2022_v48 = vor.u32 %v2614_v43, %v2021_v42 }
  0x49   :  { %1703 = vmatpush.bf16.msra.mxu3 %v2713_v41  ;;  %v2015_v41 = vld [vmem:[%s3561_s0 + $0x150] sm:$0xf0] }
  0x4a   :  { %1620 = vmatpush.bf16.msra.mxu0 %v2688_v56  ;;  %v2018_v47 = vor.u32 %v2605_v40, %v2015_v41  ;;  %v2599_v40 = vld [vmem:[%s3561_s0 + $0xdc] sm:$0xf0]  ;;  %v2726_v41 = vld [vmem:[%s3559_s1 + $0x358] sm:$0xff]  ;;  %v2733_v43 = vld [vmem:[%s3559_s1 + $0x390] sm:$0xff] }
  0x4b   :  { %1648 = vmatpush.bf16.msra.mxu1 %v2696_v57 }
  0x4c   :  { %1676 = vmatpush.bf16.msra.mxu2 %v2704_v54  ;;  %v65_v54 = vld [vmem:[%s3561_s0 + $0x198] sm:$0x11] }
  0x4d   :  { %1704 = vmatpush.bf16.msra.mxu3 %v2712_v55  ;;  %v2730_v55 = vld [vmem:[%s3559_s1 + $0x378] sm:$0xff]  ;;  %v489_v62 = vunpack.c.h.b16 %v65_v54 }
  0x4e   :  { %1621 = vmatpush.bf16.msra.mxu0 %v2687_v60  ;;  %v2721_v60 = vld [vmem:[%s3559_s1 + $0x330] sm:$0xff] }
  0x4f   :  { %1649 = vmatpush.bf16.msra.mxu1 %v2695_v61  ;;  %v488_v61 = vunpack.c.l.b16 %v65_v54  ;;  %v553_v2 = vpack.c.b16 %v489_v62, %v489_v62  ;;  %v1966_v54 = vor.u32 %v2599_v40, %v1965_v39 }
  0x50   :  { %1677 = vmatpush.bf16.msra.mxu2 %v2703_v58  ;;  %v2737_v58 = vld [vmem:[%s3559_s1 + $0x3b0] sm:$0xff] }
  0x51   :  { %1417 = vmatmul.bf16.gmra.mxu0 %v546_v50  ;;  %1705 = vmatpush.bf16.msra.mxu3 %v2711_v59  ;;  %v2738_v50 = vld [vmem:[%s3559_s1 + $0x3b8] sm:$0xff]  ;;  %v2745_v59 = vld [vmem:[%s3559_s1 + $0x3f0] sm:$0xff]  ;;  %v552_v1 = vpack.c.b16 %v488_v61, %v488_v61 }
  0x52   :  { %1445 = vmatmul.bf16.gmra.mxu1 %v547_v51  ;;  %1622 = vmatpush.bf16.msra.mxu0 %v2686_v12  ;;  %v2746_v51 = vld [vmem:[%s3559_s1 + $0x3f8] sm:$0xff]  ;;  %v2743_v12 = vld [vmem:[%s3559_s1 + $0x3e0] sm:$0xff] }
  0x53   :  { %1473 = vmatmul.bf16.gmra.mxu2 %v548_v52  ;;  %1650 = vmatpush.bf16.msra.mxu1 %v2694_v13  ;;  %v2722_v52 = vld [vmem:[%s3559_s1 + $0x338] sm:$0xff]  ;;  %v2719_v13 = vld [vmem:[%s3559_s1 + $0x320] sm:$0xff] }
  0x54   :  { %1501 = vmatmul.bf16.gmra.mxu3 %v549_v53  ;;  %1678 = vmatpush.bf16.msra.mxu2 %v2702_v10  ;;  %v64_v53 = vld [vmem:[%s3561_s0 + $0x190] sm:$0x11]  ;;  %v3274_v10 = vld [vmem:[%s3560_s2] ss:$0 sm:$0xff] }
  0x55   :  { %1706 = vmatpush.bf16.msra.mxu3 %v2710_v11  ;;  %v486_v56 = vunpack.c.l.b16 %v64_v53  ;;  %v487_v57 = vunpack.c.h.b16 %v64_v53  ;;  %v2735_v11 = vld [vmem:[%s3559_s1 + $0x3a0] sm:$0xff] }
  0x56   :  { %1623 = vmatpush.bf16.msra.mxu0 %v2685_v16  ;;  %v1909_v16 = vld [vmem:[%s3561_s0 + $0x28] sm:$0xf] }
  0x57   :  { %1651 = vmatpush.bf16.msra.mxu1 %v2693_v17  ;;  %v550_v63 = vpack.c.b16 %v486_v56, %v486_v56  ;;  %v551_v0 = vpack.c.b16 %v487_v57, %v487_v57  ;;  %v2584_v17 = vld [vmem:[%s3561_s0 + $0x64] sm:$0xf0] }
  0x58   :  { %1679 = vmatpush.bf16.msra.mxu2 %v2701_v14  ;;  %v2575_v14 = vld [vmem:[%s3561_s0 + $0x24] sm:$0xf]  ;;  %v1910_v24 = vor.u32 %v2584_v17, %v1909_v16  ;;  %v2029_v16 = vld [vmem:[%s3561_s0 + $0x120] sm:$0xf] }
  0x59   :  { %1707 = vmatpush.bf16.msra.mxu3 %v2709_v15  ;;  %v1903_v15 = vld [vmem:[%s3561_s0 + $0x60] sm:$0xf0]  ;;  %v2615_v17 = vld [vmem:[%s3561_s0 + $0x15c] sm:$0xf0] }
  0x5a   :  { %1624 = vmatpush.bf16.msra.mxu0 %v2684_v32  ;;  %v1906_v21 = vor.u32 %v2575_v14, %v1903_v15  ;;  %v2739_v14 = vld [vmem:[%s3559_s1 + $0x3c0] sm:$0xff] }
  0x5b   :  { %1652 = vmatpush.bf16.msra.mxu1 %v2692_v33 }
  0x5c   :  { %1680 = vmatpush.bf16.msra.mxu2 %v2700_v30  ;;  %v2742_v30 = vld [vmem:[%s3559_s1 + $0x3d8] sm:$0xff] }
  0x5d   :  { %1708 = vmatpush.bf16.msra.mxu3 %v2708_v31  ;;  %v2718_v31 = vld [vmem:[%s3559_s1 + $0x318] sm:$0xff] }
  0x5e   :  { %1625 = vmatpush.bf16.msra.mxu0 %v2683_v36 }
  0x5f   :  { %1653 = vmatpush.bf16.msra.mxu1 %v2691_v37 }
  0x60   :  { %1681 = vmatpush.bf16.msra.mxu2 %v2699_v34 }
  0x61   :  { %1514 = vmatmul.bf16.vlgmr.msrb.gmra.mxu0 %v1886_v6  ;;  %1709 = vmatpush.bf16.msra.mxu3 %v2707_v35  ;;  %v2720_v6 = vld [vmem:[%s3559_s1 + $0x328] sm:$0xff] }
  0x62   :  { %1542 = vmatmul.bf16.vlgmr.msrb.gmra.mxu1 %v1890_v7  ;;  %1730 = vmatpush.bf16.msrb.mxu0 %v2722_v52  ;;  %v1901_v7 = vld [vmem:[%s3561_s0 + $0x20] sm:$0xf] }
  0x63   :  { %1570 = vmatmul.bf16.vlgmr.msrb.gmra.mxu2 %v1894_v8  ;;  %1758 = vmatpush.bf16.msrb.mxu1 %v2730_v55  ;;  %v2583_v8 = vld [vmem:[%s3561_s0 + $0x5c] sm:$0xf0] }
  0x64   :  { %1598 = vmatmul.bf16.vlgmr.msrb.gmra.mxu3 %v1898_v9  ;;  %1786 = vmatpush.bf16.msrb.mxu2 %v2738_v50  ;;  %v2728_v9 = vld [vmem:[%s3559_s1 + $0x368] sm:$0xff]  ;;  %v1902_v20 = vor.u32 %v2583_v8, %v1901_v7 }
  0x65   :  { %1814 = vmatpush.bf16.msrb.mxu3 %v2746_v51  ;;  %v2592_v50 = vld [vmem:[%s3561_s0 + $0xac] sm:$0xf] }
  0x66   :  { %1731 = vmatpush.bf16.msrb.mxu0 %v2721_v60  ;;  %v1975_v51 = vld [vmem:[%s3561_s0 + $0xe8] sm:$0xf0] }
  0x67   :  { %1759 = vmatpush.bf16.msrb.mxu1 %v2729_v3  ;;  %v1978_v60 = vor.u32 %v2592_v50, %v1975_v51  ;;  %v2716_v3 = vld [vmem:[%s3559_s1 + $0x308] sm:$0xff] }
  0x68   :  { %1787 = vmatpush.bf16.msrb.mxu2 %v2737_v58 }
  0x69   :  { %1815 = vmatpush.bf16.msrb.mxu3 %v2745_v59 }
  0x6a   :  { %1732 = vmatpush.bf16.msrb.mxu0 %v2720_v6 }
  0x6b   :  { %1760 = vmatpush.bf16.msrb.mxu1 %v2728_v9 }
  0x6c   :  { %1788 = vmatpush.bf16.msrb.mxu2 %v2736_v4 }
  0x6d   :  { %1816 = vmatpush.bf16.msrb.mxu3 %v2744_v5 }
  0x6e   :  { %1733 = vmatpush.bf16.msrb.mxu0 %v2719_v13  ;;  %v2731_v13 = vld [vmem:[%s3559_s1 + $0x380] sm:$0xff] }
  0x70   :  { %1789 = vmatpush.bf16.msrb.mxu2 %v2735_v11 }
  0x71   :  { %1519 = vmatmul.bf16.gmra.mxu0 %v1950_v26  ;;  %1817 = vmatpush.bf16.msrb.mxu3 %v2743_v12  ;;  %v2724_v12 = vld [vmem:[%s3559_s1 + $0x348] sm:$0xff] }
  0x72   :  { %1547 = vmatmul.bf16.gmra.mxu1 %v1954_v27  ;;  %v2727_v27 = vld [vmem:[%s3559_s1 + $0x360] sm:$0xff]  ;;  %1734 = vmatpush.bf16.msrb.mxu0 %v2718_v31 }
  0x73   :  { %1575 = vmatmul.bf16.gmra.mxu2 %v1958_v28  ;;  %1761 = vmatpush.bf16.msrb.mxu1 %v2727_v27  ;;  %v2030_v27 = vor.u32 %v2615_v17, %v2029_v16  ;;  %v1927_v16 = vld [vmem:[%s3561_s0 + $0x78] sm:$0xf0] }
  0x74   :  { %1603 = vmatmul.bf16.gmra.mxu3 %v1962_v29  ;;  %v2734_v29 = vld [vmem:[%s3559_s1 + $0x398] sm:$0xff] }
  0x75   :  { %1790 = vmatpush.bf16.msrb.mxu2 %v2734_v29  ;;  %1818 = vmatpush.bf16.msrb.mxu3 %v2742_v30  ;;  %v2723_v29 = vld [vmem:[%s3559_s1 + $0x340] sm:$0xff] }
  0x76   :  { %1735 = vmatpush.bf16.msrb.mxu0 %v2717_v45 }
  0x77   :  { %1762 = vmatpush.bf16.msrb.mxu1 %v2726_v41 }
  0x79   :  { %1791 = vmatpush.bf16.msrb.mxu2 %v2733_v43  ;;  %1819 = vmatpush.bf16.msrb.mxu3 %v2741_v44  ;;  %v66_v44 = vld [vmem:[%s3561_s0 + $0x1a0] sm:$0x11] }
  0x7a   :  { %1736 = vmatpush.bf16.msrb.mxu0 %v2716_v3  ;;  %v491_v50 = vunpack.c.h.b16 %v66_v44 }
  0x7e   :  { %1737 = vmatpush.bf16.msrb.mxu0 %v2715_v18 }
  0x81   :  { %1524 = vmatmul.bf16.gmra.mxu0 %v2014_v46  ;;  %v2591_v46 = vld [vmem:[%s3561_s0 + $0xa4] sm:$0xf] }
  0x82   :  { %1552 = vmatmul.bf16.gmra.mxu1 %v2018_v47  ;;  %v1967_v47 = vld [vmem:[%s3561_s0 + $0xe0] sm:$0xf0] }
  0x83   :  { %1580 = vmatmul.bf16.gmra.mxu2 %v2022_v48  ;;  %v1973_v48 = vld [vmem:[%s3561_s0 + $0xa8] sm:$0xf]  ;;  %v1970_v55 = vor.u32 %v2591_v46, %v1967_v47 }
  0x84   :  { %1608 = vmatmul.bf16.gmra.mxu3 %v2026_v49  ;;  %v2600_v49 = vld [vmem:[%s3561_s0 + $0xe4] sm:$0xf0] }
  0x85   :  { %v1974_v59 = vor.u32 %v2600_v49, %v1973_v48  ;;  %v67_v46 = vld [vmem:[%s3561_s0 + $0x1a8] sm:$0x11]  ;;  %v490_v49 = vunpack.c.l.b16 %v66_v44 }
  0x86   :  { %v492_v51 = vunpack.c.l.b16 %v67_v46 }
  0x91   :  { %1529 = vmatmul.bf16.gmra.mxu0 %v550_v63  ;;  %v2725_v63 = vld [vmem:[%s3559_s1 + $0x350] sm:$0xff] }
  0x92   :  { %1557 = vmatmul.bf16.gmra.mxu1 %v551_v0 }
  0x93   :  { %1585 = vmatmul.bf16.gmra.mxu2 %v552_v1  ;;  %v2732_v1 = vld [vmem:[%s3559_s1 + $0x388] sm:$0xff]  ;;  %1763 = vmatpush.bf16.msrb.mxu1 %v2725_v63 }
  0x94   :  { %1613 = vmatmul.bf16.gmra.mxu3 %v553_v2  ;;  %v2740_v2 = vld [vmem:[%s3559_s1 + $0x3c8] sm:$0xff]  ;;  %1792 = vmatpush.bf16.msrb.mxu2 %v2732_v1 }
  0x95   :  { %1820 = vmatpush.bf16.msrb.mxu3 %v2740_v2 }
  0x97   :  { %1764 = vmatpush.bf16.msrb.mxu1 %v2724_v12  ;;  %v1919_v12 = vld [vmem:[%s3561_s0 + $0x70] sm:$0xf0] }
  0x98   :  { %1793 = vmatpush.bf16.msrb.mxu2 %v2731_v13  ;;  %v1925_v13 = vld [vmem:[%s3561_s0 + $0x38] sm:$0xf] }
  0x99   :  { %1821 = vmatpush.bf16.msrb.mxu3 %v2739_v14  ;;  %v2586_v14 = vld [vmem:[%s3561_s0 + $0x74] sm:$0xf0] }
  0x9b   :  { %1765 = vmatpush.bf16.msrb.mxu1 %v2723_v29 }
  0x9e   :  { %v1403_v22 = vpop.f32.mrf.mxu0 }
  0x9f   :  { %v1431_v23 = vpop.f32.mrf.mxu1  ;;  %v1404_v26 = vadd.f32 %v3274_v10, %v1403_v22  ;;  %v2616_v22 = vld [vmem:[%s3561_s0 + $0x164] sm:$0xf0] }
  0xa1   :  { %v1432_v28 = vadd.f32 %v1431_v23, %v1404_v26  ;;  %1626 = vmatmul.bf16.vlgmr.msra.gmra.mxu0 %v1902_v20  ;;  %v2031_v20 = vld [vmem:[%s3561_s0 + $0x160] sm:$0xf0]  ;;  %v2608_v23 = vld [vmem:[%s3561_s0 + $0x12c] sm:$0xf] }
  0xa2   :  { %1654 = vmatmul.bf16.vlgmr.msra.gmra.mxu1 %v1906_v21  ;;  %v2037_v21 = vld [vmem:[%s3561_s0 + $0x128] sm:$0xf] }
  0xa3   :  { %1682 = vmatmul.bf16.vlgmr.msra.gmra.mxu2 %v1910_v24  ;;  %v2039_v24 = vld [vmem:[%s3561_s0 + $0x168] sm:$0xf0] }
  0xa4   :  { %1710 = vmatmul.bf16.vlgmr.msra.gmra.mxu3 %v1914_v25 }
  0xa6   :  { %v1459_v32 = vpop.f32.mrf.mxu2  ;;  %v1405_v35 = vpop.f32.mrf.mxu0 }
  0xa7   :  { %v1487_v33 = vpop.f32.mrf.mxu3  ;;  %v1460_v34 = vadd.f32 %v1459_v32, %v1432_v28  ;;  %v1433_v36 = vpop.f32.mrf.mxu1  ;;  %v1406_v37 = vadd.f32 %v3274_v10, %v1405_v35  ;;  %v2034_v28 = vor.u32 %v2607_v19, %v2031_v20 }
  0xa9   :  { %v3317_v38 = vadd.f32 %v1487_v33, %v1460_v34  ;;  %v1434_v42 = vadd.f32 %v1433_v36, %v1406_v37  ;;  %v2038_v33 = vor.u32 %v2616_v22, %v2037_v21  ;;  %v2042_v34 = vor.u32 %v2608_v23, %v2039_v24 }
  0xaa   :  { %v1926_v23 = vor.u32 %v2586_v14, %v1925_v13 }
  0xae   :  { %v1461_v52 = vpop.f32.mrf.mxu2  ;;  %v1408_v57 = vpop.f32.mrf.mxu0 }
  0xaf   :  { %v1489_v53 = vpop.f32.mrf.mxu3  ;;  %v1462_v56 = vadd.f32 %v1461_v52, %v1434_v42  ;;  %v1436_v58 = vpop.f32.mrf.mxu1  ;;  %v1409_v61 = vadd.f32 %v3274_v10, %v1408_v57  ;;  %v493_v52 = vunpack.c.h.b16 %v67_v46 }
  0xb1   :  { %v3356_v62 = vadd.f32 %v1489_v53, %v1462_v56  ;;  %v1437_v0 = vadd.f32 %v1436_v58, %v1409_v61  ;;  %1631 = vmatmul.bf16.gmra.mxu0 %v1966_v54  ;;  %v555_v56 = vpack.c.b16 %v491_v50, %v491_v50  ;;  %v557_v61 = vpack.c.b16 %v493_v52, %v493_v52 }
  0xb2   :  { %1659 = vmatmul.bf16.gmra.mxu1 %v1970_v55  ;;  %v554_v55 = vpack.c.b16 %v490_v49, %v490_v49 }
  0xb3   :  { %1687 = vmatmul.bf16.gmra.mxu2 %v1974_v59 }
  0xb4   :  { %1715 = vmatmul.bf16.gmra.mxu3 %v1978_v60  ;;  %v556_v60 = vpack.c.b16 %v492_v51, %v492_v51 }
  0xb6   :  { %v1464_v4 = vpop.f32.mrf.mxu2  ;;  %v1410_v7 = vpop.f32.mrf.mxu0 }
  0xb7   :  { %v1492_v5 = vpop.f32.mrf.mxu3  ;;  %v1465_v6 = vadd.f32 %v1464_v4, %v1437_v0  ;;  %v1438_v8 = vpop.f32.mrf.mxu1  ;;  %v1411_v9 = vadd.f32 %v3274_v10, %v1410_v7 }
  0xb9   :  { %v3371_v11 = vadd.f32 %v1492_v5, %v1465_v6  ;;  %v1439_v15 = vadd.f32 %v1438_v8, %v1411_v9  ;;  %v1917_v8 = vld [vmem:[%s3561_s0 + $0x30] sm:$0xf]  ;;  %v2577_v9 = vld [vmem:[%s3561_s0 + $0x34] sm:$0xf] }
  0xba   :  { %v1922_v20 = vor.u32 %v2577_v9, %v1919_v12 }
  0xbe   :  { %v1466_v25 = vpop.f32.mrf.mxu2  ;;  %v1413_v31 = vpop.f32.mrf.mxu0 }
  0xbf   :  { %v1494_v26 = vpop.f32.mrf.mxu3  ;;  %v1467_v30 = vadd.f32 %v1466_v25, %v1439_v15  ;;  %v1441_v32 = vpop.f32.mrf.mxu1  ;;  %v1414_v35 = vadd.f32 %v3274_v10, %v1413_v31  ;;  %v2578_v15 = vld [vmem:[%s3561_s0 + $0x3c] sm:$0xf] }
  0xc0   :  { %v1930_v24 = vor.u32 %v2578_v15, %v1927_v16 }
  0xc1   :  { %v3413_v36 = vadd.f32 %v1494_v26, %v1467_v30  ;;  %v1442_v37 = vadd.f32 %v1441_v32, %v1414_v35  ;;  %1636 = vmatmul.bf16.gmra.mxu0 %v2030_v27  ;;  %v1981_v35 = vld [vmem:[%s3561_s0 + $0xb0] sm:$0xf] }
  0xc2   :  { %1664 = vmatmul.bf16.gmra.mxu1 %v2034_v28 }
  0xc3   :  { %1692 = vmatmul.bf16.gmra.mxu2 %v2038_v33 }
  0xc4   :  { %1720 = vmatmul.bf16.gmra.mxu3 %v2042_v34 }
  0xc6   :  { %v1469_v39 = vpop.f32.mrf.mxu2  ;;  %v1415_v42 = vpop.f32.mrf.mxu0 }
  0xc7   :  { %v1497_v40 = vpop.f32.mrf.mxu3  ;;  %v1470_v41 = vadd.f32 %v1469_v39, %v1442_v37  ;;  %v1443_v43 = vpop.f32.mrf.mxu1  ;;  %v1416_v45 = vadd.f32 %v3274_v10, %v1415_v42  ;;  %v2593_v37 = vld [vmem:[%s3561_s0 + $0xb4] sm:$0xf]  ;;  %v1991_v42 = vld [vmem:[%s3561_s0 + $0xf8] sm:$0xf0] }
  0xc8   :  { %v1983_v39 = vld [vmem:[%s3561_s0 + $0xf0] sm:$0xf0] }
  0xc9   :  { %v3422_v47 = vadd.f32 %v1497_v40, %v1470_v41  ;;  %v1444_v48 = vadd.f32 %v1443_v43, %v1416_v45  ;;  %v2602_v40 = vld [vmem:[%s3561_s0 + $0xf4] sm:$0xf0]  ;;  %v2594_v41 = vld [vmem:[%s3561_s0 + $0xbc] sm:$0xf]  ;;  %v1986_v46 = vor.u32 %v2593_v37, %v1983_v39 }
  0xca   :  { %v1994_v52 = vor.u32 %v2594_v41, %v1991_v42 }
  0xce   :  { %v1471_v53 = vpop.f32.mrf.mxu2  ;;  %v1418_v58 = vpop.f32.mrf.mxu0 }
  0xcf   :  { %v1499_v54 = vpop.f32.mrf.mxu3  ;;  %v1472_v57 = vadd.f32 %v1471_v53, %v1444_v48  ;;  %v1446_v59 = vpop.f32.mrf.mxu1  ;;  %v1419_v63 = vadd.f32 %v3274_v10, %v1418_v58  ;;  %v2585_v10 = vld [vmem:[%s3561_s0 + $0x6c] sm:$0xf0] }
  0xd0   :  { %v1918_v19 = vor.u32 %v2585_v10, %v1917_v8  ;;  %v2055_v8 = vld [vmem:[%s3561_s0 + $0x178] sm:$0xf0] }
  0xd1   :  { %v3425_v0 = vadd.f32 %v1499_v54, %v1472_v57  ;;  %v1447_v1 = vadd.f32 %v1446_v59, %v1419_v63  ;;  %1641 = vmatmul.bf16.gmra.mxu0 %v554_v55 }
  0xd2   :  { %1669 = vmatmul.bf16.gmra.mxu1 %v555_v56 }
  0xd3   :  { %1697 = vmatmul.bf16.gmra.mxu2 %v556_v60 }
  0xd4   :  { %1725 = vmatmul.bf16.gmra.mxu3 %v557_v61 }
  0xd6   :  { %v1474_v2 = vpop.f32.mrf.mxu2  ;;  %v1420_v5 = vpop.f32.mrf.mxu0 }
  0xd7   :  { %v1502_v3 = vpop.f32.mrf.mxu3  ;;  %v1475_v4 = vadd.f32 %v1474_v2, %v1447_v1  ;;  %v1448_v6 = vpop.f32.mrf.mxu1  ;;  %v2617_v2 = vld [vmem:[%s3561_s0 + $0x16c] sm:$0xf0]  ;;  %v2618_v5 = vld [vmem:[%s3561_s0 + $0x174] sm:$0xf0] }
  0xd8   :  { %v2610_v6 = vld [vmem:[%s3561_s0 + $0x13c] sm:$0xf] }
  0xd9   :  { %v3427_v7 = vadd.f32 %v1502_v3, %v1475_v4  ;;  %v2609_v3 = vld [vmem:[%s3561_s0 + $0x134] sm:$0xf] }
  0xda   :  { %v2047_v4 = vld [vmem:[%s3561_s0 + $0x170] sm:$0xf0] }
  0xdb   :  { %v2050_v13 = vor.u32 %v2609_v3, %v2047_v4 }
  0xde   :  { %v1476_v17 = vpop.f32.mrf.mxu2  ;;  %v1515_v21 = vpop.f32.mrf.mxu0 }
  0xdf   :  { %v1504_v18 = vpop.f32.mrf.mxu3  ;;  %v1543_v22 = vpop.f32.mrf.mxu1  ;;  %v1516_v25 = vadd.f32 %v1515_v21, %v3317_v38  ;;  %v2601_v38 = vld [vmem:[%s3561_s0 + $0xec] sm:$0xf0] }
  0xe0   :  { %v1982_v45 = vor.u32 %v2601_v38, %v1981_v35  ;;  %v2058_v18 = vor.u32 %v2610_v6, %v2055_v8 }
  0xe1   :  { %v1544_v26 = vadd.f32 %v1543_v22, %v1516_v25  ;;  %1738 = vmatmul.bf16.vlgmr.msrb.gmra.mxu0 %v1918_v19 }
  0xe2   :  { %1766 = vmatmul.bf16.vlgmr.msrb.gmra.mxu1 %v1922_v20 }
  0xe3   :  { %1794 = vmatmul.bf16.vlgmr.msrb.gmra.mxu2 %v1926_v23 }
  0xe4   :  { %1822 = vmatmul.bf16.vlgmr.msrb.gmra.mxu3 %v1930_v24 }
  0xe6   :  { %v1571_v27 = vpop.f32.mrf.mxu2  ;;  %v1517_v30 = vpop.f32.mrf.mxu0 }
  0xe7   :  { %v1599_v28 = vpop.f32.mrf.mxu3  ;;  %v1572_v29 = vadd.f32 %v1571_v27, %v1544_v26  ;;  %v1545_v31 = vpop.f32.mrf.mxu1  ;;  %v1518_v32 = vadd.f32 %v1517_v30, %v3356_v62  ;;  %v1989_v62 = vld [vmem:[%s3561_s0 + $0xb8] sm:$0xf]  ;;  %v68_v27 = vld [vmem:[%s3561_s0 + $0x1b0] sm:$0x11] }
  0xe8   :  { %v1990_v51 = vor.u32 %v2602_v40, %v1989_v62 }
  0xe9   :  { %v3455_v33 = vadd.f32 %v1599_v28, %v1572_v29  ;;  %v1546_v34 = vadd.f32 %v1545_v31, %v1518_v32  ;;  %v494_v31 = vunpack.c.l.b16 %v68_v27  ;;  %v495_v32 = vunpack.c.h.b16 %v68_v27 }
  0xeb   :  { %v558_v39 = vpack.c.b16 %v494_v31, %v494_v31  ;;  %v559_v62 = vpack.c.b16 %v495_v32, %v495_v32 }
  0xee   :  { %v1573_v43 = vpop.f32.mrf.mxu2  ;;  %v1520_v49 = vpop.f32.mrf.mxu0 }
  0xef   :  { %v1601_v44 = vpop.f32.mrf.mxu3  ;;  %v1574_v48 = vadd.f32 %v1573_v43, %v1546_v34  ;;  %v1548_v50 = vpop.f32.mrf.mxu1  ;;  %v1521_v53 = vadd.f32 %v1520_v49, %v3371_v11  ;;  %v2045_v11 = vld [vmem:[%s3561_s0 + $0x130] sm:$0xf] }
  0xf0   :  { %v2046_v12 = vor.u32 %v2617_v2, %v2045_v11 }
  0xf1   :  { %v3482_v54 = vadd.f32 %v1601_v44, %v1574_v48  ;;  %v1549_v55 = vadd.f32 %v1548_v50, %v1521_v53  ;;  %1743 = vmatmul.bf16.gmra.mxu0 %v1982_v45 }
  0xf2   :  { %1771 = vmatmul.bf16.gmra.mxu1 %v1986_v46 }
  0xf3   :  { %1799 = vmatmul.bf16.gmra.mxu2 %v1990_v51 }
  0xf4   :  { %1827 = vmatmul.bf16.gmra.mxu3 %v1994_v52 }
  0xf6   :  { %v1576_v56 = vpop.f32.mrf.mxu2  ;;  %v1522_v59 = vpop.f32.mrf.mxu0 }
  0xf7   :  { %v1604_v57 = vpop.f32.mrf.mxu3  ;;  %v1577_v58 = vadd.f32 %v1576_v56, %v1549_v55  ;;  %v1550_v60 = vpop.f32.mrf.mxu1  ;;  %v1523_v61 = vadd.f32 %v1522_v59, %v3413_v36  ;;  %v2053_v36 = vld [vmem:[%s3561_s0 + $0x138] sm:$0xf] }
  0xf8   :  { %v2054_v17 = vor.u32 %v2618_v5, %v2053_v36 }
  0xf9   :  { %v3485_v63 = vadd.f32 %v1604_v57, %v1577_v58  ;;  %v1551_v1 = vadd.f32 %v1550_v60, %v1523_v61 }
  0xfe   :  { %v1578_v10 = vpop.f32.mrf.mxu2  ;;  %v1525_v15 = vpop.f32.mrf.mxu0 }
  0xff   :  { %v1606_v9 = vpop.f32.mrf.mxu3  ;;  %v1579_v14 = vadd.f32 %v1578_v10, %v1551_v1  ;;  %v1553_v16 = vpop.f32.mrf.mxu1  ;;  %v1526_v19 = vadd.f32 %v1525_v15, %v3422_v47  ;;  %v69_v47 = vld [vmem:[%s3561_s0 + $0x1b8] sm:$0x11] }
 0x100   :  { %v496_v34 = vunpack.c.l.b16 %v69_v47  ;;  %v497_v35 = vunpack.c.h.b16 %v69_v47 }
 0x101   :  { %v3512_v20 = vadd.f32 %v1606_v9, %v1579_v14  ;;  %v1554_v21 = vadd.f32 %v1553_v16, %v1526_v19  ;;  %1748 = vmatmul.bf16.gmra.mxu0 %v2046_v12 }
 0x102   :  { %1776 = vmatmul.bf16.gmra.mxu1 %v2050_v13  ;;  %v560_v43 = vpack.c.b16 %v496_v34, %v496_v34  ;;  %v561_v44 = vpack.c.b16 %v497_v35, %v497_v35 }
 0x103   :  { %1804 = vmatmul.bf16.gmra.mxu2 %v2054_v17 }
 0x104   :  { %1832 = vmatmul.bf16.gmra.mxu3 %v2058_v18 }
 0x106   :  { %v1581_v22 = vpop.f32.mrf.mxu2  ;;  %v1527_v25 = vpop.f32.mrf.mxu0 }
 0x107   :  { %v1609_v23 = vpop.f32.mrf.mxu3  ;;  %v1582_v24 = vadd.f32 %v1581_v22, %v1554_v21  ;;  %v1555_v26 = vpop.f32.mrf.mxu1  ;;  %v1528_v28 = vadd.f32 %v1527_v25, %v3425_v0 }
 0x109   :  { %v1610_v29 = vadd.f32 %v1609_v23, %v1582_v24  ;;  %v1556_v30 = vadd.f32 %v1555_v26, %v1528_v28 }
 0x10e   :  { %v1583_v38 = vpop.f32.mrf.mxu2  ;;  %v1530_v41 = vpop.f32.mrf.mxu0 }
 0x10f   :  { %v1611_v37 = vpop.f32.mrf.mxu3  ;;  %v1584_v40 = vadd.f32 %v1583_v38, %v1556_v30  ;;  %v1558_v42 = vpop.f32.mrf.mxu1  ;;  %v1531_v0 = vadd.f32 %v1530_v41, %v3427_v7 }
 0x111   :  { %v3522_v45 = vadd.f32 %v1611_v37, %v1584_v40  ;;  %v1559_v46 = vadd.f32 %v1558_v42, %v1531_v0  ;;  %1753 = vmatmul.bf16.gmra.mxu0 %v558_v39 }
 0x112   :  { %1781 = vmatmul.bf16.gmra.mxu1 %v559_v62 }
 0x113   :  { %1809 = vmatmul.bf16.gmra.mxu2 %v560_v43 }
 0x114   :  { %1837 = vmatmul.bf16.gmra.mxu3 %v561_v44 }
 0x116   :  { %v1586_v48 = vpop.f32.mrf.mxu2  ;;  %v1532_v51 = vpop.f32.mrf.mxu0 }
 0x117   :  { %v1614_v49 = vpop.f32.mrf.mxu3  ;;  %v1587_v50 = vadd.f32 %v1586_v48, %v1559_v46  ;;  %v1560_v52 = vpop.f32.mrf.mxu1 }
 0x119   :  { %v3524_v53 = vadd.f32 %v1614_v49, %v1587_v50 }
 0x11e   :  { %v1588_v55 = vpop.f32.mrf.mxu2  ;;  %v1627_v57 = vpop.f32.mrf.mxu0 }
 0x11f   :  { %v1616_v56 = vpop.f32.mrf.mxu3  ;;  %v1655_v58 = vpop.f32.mrf.mxu1  ;;  %v1628_v7 = vadd.f32 %v1627_v57, %v3455_v33 }
 0x121   :  { %v1656_v59 = vadd.f32 %v1655_v58, %v1628_v7 }
 0x126   :  { %v1683_v60 = vpop.f32.mrf.mxu2  ;;  %v1629_v11 = vpop.f32.mrf.mxu0 }
 0x127   :  { %v1711_v61 = vpop.f32.mrf.mxu3  ;;  %v1684_v1 = vadd.f32 %v1683_v60, %v1656_v59  ;;  %v1657_v2 = vpop.f32.mrf.mxu1  ;;  %v1630_v38 = vadd.f32 %v1629_v11, %v3482_v54 }
 0x129   :  { %v1712_v3 = vadd.f32 %v1711_v61, %v1684_v1  ;;  %v1658_v41 = vadd.f32 %v1657_v2, %v1630_v38 }
 0x12e   :  { %v1685_v4 = vpop.f32.mrf.mxu2  ;;  %v1632_v5 = vpop.f32.mrf.mxu0 }
 0x12f   :  { %v1713_v36 = vpop.f32.mrf.mxu3  ;;  %v1660_v6 = vpop.f32.mrf.mxu1  ;;  %v1633_v8 = vadd.f32 %v1632_v5, %v3485_v63  ;;  %v1686_v42 = vadd.f32 %v1685_v4, %v1658_v41 }
 0x131   :  { %v1661_v10 = vadd.f32 %v1660_v6, %v1633_v8  ;;  %v1714_v46 = vadd.f32 %v1713_v36, %v1686_v42 }
 0x136   :  { %v1688_v9 = vpop.f32.mrf.mxu2  ;;  %v1634_v14 = vpop.f32.mrf.mxu0 }
 0x137   :  { %v1716_v12 = vpop.f32.mrf.mxu3  ;;  %v1689_v13 = vadd.f32 %v1688_v9, %v1661_v10  ;;  %v1662_v15 = vpop.f32.mrf.mxu1  ;;  %v1635_v55 = vadd.f32 %v1634_v14, %v3512_v20 }
 0x139   :  { %v1717_v33 = vadd.f32 %v1716_v12, %v1689_v13  ;;  %v1663_v61 = vadd.f32 %v1662_v15, %v1635_v55 }
 0x13e   :  { %v1690_v16 = vpop.f32.mrf.mxu2  ;;  %v1637_v18 = vpop.f32.mrf.mxu0 }
 0x13f   :  { %v1718_v17 = vpop.f32.mrf.mxu3  ;;  %v1665_v19 = vpop.f32.mrf.mxu1  ;;  %v1638_v21 = vadd.f32 %v1637_v18, %v1610_v29  ;;  %v1691_v11 = vadd.f32 %v1690_v16, %v1663_v61 }
 0x141   :  { %v1666_v22 = vadd.f32 %v1665_v19, %v1638_v21  ;;  %v1719_v8 = vadd.f32 %v1718_v17, %v1691_v11 }
 0x146   :  { %v1693_v23 = vpop.f32.mrf.mxu2  ;;  %v1639_v26 = vpop.f32.mrf.mxu0 }
 0x147   :  { %v1721_v24 = vpop.f32.mrf.mxu3  ;;  %v1694_v25 = vadd.f32 %v1693_v23, %v1666_v22  ;;  %v1667_v27 = vpop.f32.mrf.mxu1  ;;  %v1640_v14 = vadd.f32 %v1639_v26, %v3522_v45 }
 0x149   :  { %v3528_v28 = vadd.f32 %v1721_v24, %v1694_v25  ;;  %v1668_v23 = vadd.f32 %v1667_v27, %v1640_v14 }
 0x14e   :  { %v1695_v63 = vpop.f32.mrf.mxu2  ;;  %v1642_v30 = vpop.f32.mrf.mxu0 }
 0x14f   :  { %v3530_v47 = vpop.f32.mrf.mxu3  ;;  %v3532_v31 = vpop.f32.mrf.mxu1  ;;  %v1696_v24 = vadd.f32 %v1695_v63, %v1668_v23 }
 0x151   :  { %v1724_v45 = vadd.f32 %v3530_v47, %v1696_v24 }
 0x156   :  { %v3534_v32 = vpop.f32.mrf.mxu2  ;;  %v1644_v35 = vpop.f32.mrf.mxu0 }
 0x157   :  { %v3536_v34 = vpop.f32.mrf.mxu3  ;;  %v1672_v29 = vpop.f32.mrf.mxu1 }
 0x158   :  { %v1643_v29 = vadd.f32 %v1642_v30, %v3524_v53 }
 0x15a   :  { %v1671_v27 = vadd.f32 %v3532_v31, %v1643_v29 }
 0x15c   :  { %v1699_v42 = vadd.f32 %v3534_v32, %v1671_v27 }
 0x15e   :  { %v1700_v37 = vpop.f32.mrf.mxu2  ;;  %v1739_v62 = vpop.f32.mrf.mxu0 }
 0x15f   :  { %v1728_v39 = vpop.f32.mrf.mxu3  ;;  %v1767_v40 = vpop.f32.mrf.mxu1  ;;  %v1740_v43 = vadd.f32 %v1739_v62, %v1712_v3 }
 0x161   :  { %v1768_v50 = vadd.f32 %v1767_v40, %v1740_v43 }
 0x166   :  { %v1795_v44 = vpop.f32.mrf.mxu2  ;;  %v1741_v48 = vpop.f32.mrf.mxu0 }
 0x167   :  { %v1823_v0 = vpop.f32.mrf.mxu3  ;;  %v1769_v49 = vpop.f32.mrf.mxu1  ;;  %v1742_v51 = vadd.f32 %v1741_v48, %v1714_v46  ;;  %v1796_v52 = vadd.f32 %v1795_v44, %v1768_v50  ;;  %v1727_v44 = vadd.f32 %v3536_v34, %v1699_v42 }
 0x169   :  { %v1770_v56 = vadd.f32 %v1769_v49, %v1742_v51  ;;  %v1824_v58 = vadd.f32 %v1823_v0, %v1796_v52 }
 0x16b   :  { %v1842_v2 = vmax.f32 %v1824_v58, 0.0 }
 0x16e   :  { %v1797_v57 = vpop.f32.mrf.mxu2  ;;  %v1744_v59 = vpop.f32.mrf.mxu0 }
 0x16f   :  { %v1825_v54 = vpop.f32.mrf.mxu3  ;;  %v1798_v7 = vadd.f32 %v1797_v57, %v1770_v56  ;;  %v1772_v60 = vpop.f32.mrf.mxu1  ;;  %v1745_v36 = vadd.f32 %v1744_v59, %v1717_v33 }
 0x171   :  { %v1826_v1 = vadd.f32 %v1825_v54, %v1798_v7  ;;  %v1773_v9 = vadd.f32 %v1772_v60, %v1745_v36 }
 0x173   :  { %v1843_v3 = vmax.f32 %v1826_v1, 0.0 }
 0x175   :  { %v2750_v4 = vpack.c.bf16 %v1843_v3, %v1842_v2 }
 0x176   :  { %v1800_v5 = vpop.f32.mrf.mxu2  ;;  %v1746_v20 = vpop.f32.mrf.mxu0 }
 0x177   :  { %v1828_v6 = vpop.f32.mrf.mxu3  ;;  %2751 = vst [vmem:[%s3562_s3] sm:$0xff] %v2750_v4   ;;  %v1774_v10 = vpop.f32.mrf.mxu1  ;;  %v1747_v12 = vadd.f32 %v1746_v20, %v1719_v8  ;;  %v1801_v13 = vadd.f32 %v1800_v5, %v1773_v9 }
 0x179   :  { %v1775_v15 = vadd.f32 %v1774_v10, %v1747_v12  ;;  %v1829_v19 = vadd.f32 %v1828_v6, %v1801_v13 }
 0x17b   :  { %v1844_v25 = vmax.f32 %v1829_v19, 0.0 }
 0x17e   :  { %v1802_v16 = vpop.f32.mrf.mxu2  ;;  %v1749_v33 = vpop.f32.mrf.mxu0 }
 0x17f   :  { %v1830_v18 = vpop.f32.mrf.mxu3  ;;  %v1803_v21 = vadd.f32 %v1802_v16, %v1775_v15  ;;  %v1777_v22 = vpop.f32.mrf.mxu1  ;;  %v1750_v37 = vadd.f32 %v1749_v33, %v3528_v28 }
 0x181   :  { %v1831_v17 = vadd.f32 %v1830_v18, %v1803_v21  ;;  %v1778_v63 = vadd.f32 %v1777_v22, %v1750_v37 }
 0x183   :  { %v1845_v35 = vmax.f32 %v1831_v17, 0.0 }
 0x185   :  { %v2755_v38 = vpack.c.bf16 %v1845_v35, %v1844_v25 }
 0x186   :  { %v1805_v39 = vpop.f32.mrf.mxu2  ;;  %v1751_v26 = vpop.f32.mrf.mxu0 }
 0x187   :  { %v1833_v62 = vpop.f32.mrf.mxu3  ;;  %2762 = vst [vmem:[%s3562_s3 + $0x8] sm:$0xff] %v2755_v38   ;;  %v1779_v40 = vpop.f32.mrf.mxu1  ;;  %v1752_v41 = vadd.f32 %v1751_v26, %v1724_v45  ;;  %v1806_v53 = vadd.f32 %v1805_v39, %v1778_v63 }
 0x189   :  { %v1780_v30 = vadd.f32 %v1779_v40, %v1752_v41  ;;  %v1834_v0 = vadd.f32 %v1833_v62, %v1806_v53 }
 0x18b   :  { %v1846_v51 = vmax.f32 %v1834_v0, 0.0 }
 0x18e   :  { %v1807_v43 = vpop.f32.mrf.mxu2  ;;  %v1754_v46 = vpop.f32.mrf.mxu0 }
 0x18f   :  { %v1835_v28 = vpop.f32.mrf.mxu3  ;;  %v1808_v47 = vadd.f32 %v1807_v43, %v1780_v30  ;;  %v1782_v48 = vpop.f32.mrf.mxu1  ;;  %v1755_v50 = vadd.f32 %v1754_v46, %v1727_v44 }
 0x191   :  { %v1836_v49 = vadd.f32 %v1835_v28, %v1808_v47  ;;  %v1783_v31 = vadd.f32 %v1782_v48, %v1755_v50 }
 0x193   :  { %v1847_v52 = vmax.f32 %v1836_v49, 0.0 }
 0x195   :  { %v2760_v55 = vpack.c.bf16 %v1847_v52, %v1846_v51 }
 0x196   :  { %v1810_v56 = vpop.f32.mrf.mxu2  ;;  %v1756_v54 = vpop.f32.mrf.mxu0 }
 0x197   :  { %v1838_v57 = vpop.f32.mrf.mxu3  ;;  %2763 = vst [vmem:[%s3562_s3 + $0x10] sm:$0xff] %v2760_v55   ;;  %v1811_v32 = vadd.f32 %v1810_v56, %v1783_v31  ;;  %v1784_v58 = vpop.f32.mrf.mxu1 }
 0x199   :  { %v1839_v34 = vadd.f32 %v1838_v57, %v1811_v32 }
 0x19b   :  { %v1848_v7 = vmax.f32 %v1839_v34, 0.0 }
 0x19d   :  { %v1855_v59 = vpack.c.bf16 %v1848_v7, %v1848_v7 }
 0x19e   :  { %v1812_v60 = vpop.f32.mrf.mxu2 }
 0x19f   :  { %v1840_v61 = vpop.f32.mrf.mxu3  ;;  %1862 = vst [vmem:[%s3562_s3 + $0x18] sm:$0x1] %v1855_v59 }

// kernel: dqn_forward.5
= control target key start
LH: loop header
LB: loop body
LE: loop exit
PB: predicated region body
PF: predicated region fallthrough
CT: control target
= control target key end

     0   :  { %s11284_s0 = inlined_call_operand.vmem [shape: bf16[5,5,2,128], index: 0, kind: input, shape index: {}]   ;;  %s11285_s1 = inlined_call_operand.vmem [shape: bf16[9,128,128], index: 1, kind: input, shape index: {}]   ;;  %s11286_s2 = inlined_call_operand.vmem [shape: f32[1,128], index: 2, kind: input, shape index: {}]   ;;  %s11287_s3 = inlined_call_operand.vmem [shape: bf16[9,128,512], index: 3, kind: input, shape index: {}]   ;;  %s11288_s4 = inlined_call_operand.vmem [shape: f32[1,512], index: 4, kind: input, shape index: {}]   ;;  %s11289_s5 = inlined_call_operand.vmem [shape: bf16[512,128], index: 5, kind: input, shape index: {}]   ;;  %s11290_s6 = inlined_call_operand.vmem [shape: f32[1,128], index: 6, kind: input, shape index: {}]   ;;  %s11291_s7 = inlined_call_operand.hbm [shape: f32[2,128], index: 7, kind: output, shape index: {}]  }
   0x1   :  { %v7062_v0 = vld [vmem:[%s11285_s1 + $0x78] sm:$0xff]  ;;  %v7084_v4 = vld [vmem:[%s11285_s1 + $0x70] sm:$0xff]  ;;  %v7108_v8 = vld [vmem:[%s11285_s1 + $0x68] sm:$0xff] }
   0x2   :  { %v7067_v1 = vld [vmem:[%s11285_s1 + $0x38] sm:$0xff]  ;;  %111 = vmatpush.bf16.msra.mxu0 %v7062_v0  ;;  %v7089_v5 = vld [vmem:[%s11285_s1 + $0x30] sm:$0xff]  ;;  %v7113_v9 = vld [vmem:[%s11285_s1 + $0x28] sm:$0xff] }
   0x3   :  { %v7072_v2 = vld [vmem:[%s11285_s1 + $0xb8] sm:$0xff]  ;;  %172 = vmatpush.bf16.msra.mxu1 %v7067_v1  ;;  %v7096_v6 = vld [vmem:[%s11285_s1 + $0xb0] sm:$0xff]  ;;  %v7120_v10 = vld [vmem:[%s11285_s1 + $0xa8] sm:$0xff] }
   0x4   :  { %v7077_v3 = vld [vmem:[%s11285_s1 + $0xf8] sm:$0xff]  ;;  %252 = vmatpush.bf16.msra.mxu2 %v7072_v2  ;;  %v7101_v7 = vld [vmem:[%s11285_s1 + $0xf0] sm:$0xff]  ;;  %v7125_v11 = vld [vmem:[%s11285_s1 + $0xe8] sm:$0xff] }
   0x5   :  { %333 = vmatpush.bf16.msra.mxu3 %v7077_v3  ;;  %v7132_v12 = vld [vmem:[%s11285_s1 + $0x60] sm:$0xff]  ;;  %v7156_v16 = vld [vmem:[%s11285_s1 + $0x58] sm:$0xff]  ;;  %v7180_v20 = vld [vmem:[%s11285_s1 + $0x50] sm:$0xff] }
   0x6   :  { %112 = vmatpush.bf16.msra.mxu0 %v7084_v4  ;;  %v7137_v13 = vld [vmem:[%s11285_s1 + $0x20] sm:$0xff]  ;;  %v7161_v17 = vld [vmem:[%s11285_s1 + $0x18] sm:$0xff]  ;;  %v7185_v21 = vld [vmem:[%s11285_s1 + $0x10] sm:$0xff] }
   0x7   :  { %173 = vmatpush.bf16.msra.mxu1 %v7089_v5  ;;  %v7144_v14 = vld [vmem:[%s11285_s1 + $0xa0] sm:$0xff]  ;;  %v7168_v18 = vld [vmem:[%s11285_s1 + $0x98] sm:$0xff]  ;;  %v7190_v22 = vld [vmem:[%s11285_s1 + $0x90] sm:$0xff] }
   0x8   :  { %253 = vmatpush.bf16.msra.mxu2 %v7096_v6  ;;  %v7149_v15 = vld [vmem:[%s11285_s1 + $0xe0] sm:$0xff]  ;;  %v7173_v19 = vld [vmem:[%s11285_s1 + $0xd8] sm:$0xff]  ;;  %v7197_v23 = vld [vmem:[%s11285_s1 + $0xd0] sm:$0xff] }
   0x9   :  { %334 = vmatpush.bf16.msra.mxu3 %v7101_v7 }
   0xa   :  { %113 = vmatpush.bf16.msra.mxu0 %v7108_v8 }
   0xb   :  { %174 = vmatpush.bf16.msra.mxu1 %v7113_v9 }
   0xc   :  { %254 = vmatpush.bf16.msra.mxu2 %v7120_v10 }
   0xd   :  { %335 = vmatpush.bf16.msra.mxu3 %v7125_v11 }
   0xe   :  { %114 = vmatpush.bf16.msra.mxu0 %v7132_v12 }
   0xf   :  { %175 = vmatpush.bf16.msra.mxu1 %v7137_v13 }
  0x10   :  { %255 = vmatpush.bf16.msra.mxu2 %v7144_v14 }
  0x11   :  { %336 = vmatpush.bf16.msra.mxu3 %v7149_v15 }
  0x12   :  { %115 = vmatpush.bf16.msra.mxu0 %v7156_v16 }
  0x13   :  { %176 = vmatpush.bf16.msra.mxu1 %v7161_v17 }
  0x14   :  { %256 = vmatpush.bf16.msra.mxu2 %v7168_v18 }
  0x15   :  { %337 = vmatpush.bf16.msra.mxu3 %v7173_v19 }
  0x16   :  { %12 = vsyncpa [#allocation3], 0  ;;  %116 = vmatpush.bf16.msra.mxu0 %v7180_v20  ;;  %v7204_v24 = vld [vmem:[%s11285_s1 + $0x48] sm:$0xff]  ;;  %v7228_v28 = vld [vmem:[%s11285_s1 + $0x40] sm:$0xff]  ;;  %s7018_s17 = smov [#allocation2]   ;;  %s4381_s21 = sshll.u32 %s11291_s7, 4  ;;  %s4382_s21 = int_to_ptr.hbm [resolvable:$true] %s4381_s21 }
  0x17   :  { %177 = vmatpush.bf16.msra.mxu1 %v7185_v21  ;;  %v7209_v25 = vld [vmem:[%s11285_s1 + $0x8] sm:$0xff]  ;;  %v7233_v29 = vld [vmem:[%s11285_s1] sm:$0xff]  ;;  %v7245_v31 = vld [vmem:[%s11285_s1 + $0x138] sm:$0xff]  ;;  %s4379_s18 = sshll.u32 %s7018_s17, 4  ;;  %s4380_s18 = int_to_ptr.vmem [resolvable:$true] %s4379_s18 }
  0x18   :  { %257 = vmatpush.bf16.msra.mxu2 %v7190_v22  ;;  %v7216_v26 = vld [vmem:[%s11285_s1 + $0x88] sm:$0xff]  ;;  %v7240_v30 = vld [vmem:[%s11285_s1 + $0x80] sm:$0xff]  ;;  %v7250_v32 = vld [vmem:[%s11285_s1 + $0x178] sm:$0xff] }
  0x19   :  { %338 = vmatpush.bf16.msra.mxu3 %v7197_v23  ;;  %v7221_v27 = vld [vmem:[%s11285_s1 + $0xc8] sm:$0xff]  ;;  %v7255_v33 = vld [vmem:[%s11285_s1 + $0x1b8] sm:$0xff]  ;;  %v7260_v34 = vld [vmem:[%s11285_s1 + $0xc0] sm:$0xff] }
  0x1a   :  { %117 = vmatpush.bf16.msra.mxu0 %v7204_v24  ;;  %v7267_v35 = vld [vmem:[%s11285_s1 + $0x1f8] sm:$0xff]  ;;  %v7272_v36 = vld [vmem:[%s11284_s0 + $0x1] sm:$0x1]  ;;  %v7279_v37 = vld [vmem:[%s11285_s1 + $0x130] sm:$0xff] }
  0x1b   :  { %178 = vmatpush.bf16.msra.mxu1 %v7209_v25  ;;  %v7284_v38 = vld [vmem:[%s11284_s0 + $0x2] sm:$0x1]  ;;  %v7291_v39 = vld [vmem:[%s11285_s1 + $0x170] sm:$0xff]  ;;  %v27_v41 = vld [vmem:[%s11284_s0] sm:$0x1] }
  0x1c   :  { %258 = vmatpush.bf16.msra.mxu2 %v7216_v26  ;;  %v7296_v40 = vld [vmem:[%s11285_s1 + $0x1b0] sm:$0xff]  ;;  %v4520_v43 = vld [vmem:[%s11284_s0 + $0x5] sm:$0x1]  ;;  %v7317_v44 = vld [vmem:[%s11285_s1 + $0x128] sm:$0xff] }
  0x1d   :  { %339 = vmatpush.bf16.msra.mxu3 %v7221_v27  ;;  %v7307_v42 = vld [vmem:[%s11285_s1 + $0x1f0] sm:$0xff]  ;;  %v7324_v45 = vld [vmem:[%s11285_s1 + $0x168] sm:$0xff]  ;;  %v7341_v48 = vld [vmem:[%s11285_s1 + $0x120] sm:$0xff] }
  0x1e   :  { %118 = vmatpush.bf16.msra.mxu0 %v7228_v28  ;;  %11381 = vst [vmem:[#allocation5_spill] sm:$0xff] %v7307_v42  ;;  %v7329_v46 = vld [vmem:[%s11285_s1 + $0x1a8] sm:$0xff]  ;;  %v7348_v49 = vld [vmem:[%s11285_s1 + $0x160] sm:$0xff]  ;;  %v7365_v52 = vld [vmem:[%s11285_s1 + $0x118] sm:$0xff] }
  0x1f   :  { %179 = vmatpush.bf16.msra.mxu1 %v7233_v29  ;;  %v7335_v47 = vld [vmem:[%s11285_s1 + $0x1e8] sm:$0xff]  ;;  %v7353_v50 = vld [vmem:[%s11285_s1 + $0x1a0] sm:$0xff]  ;;  %v7372_v53 = vld [vmem:[%s11285_s1 + $0x158] sm:$0xff] }
  0x20   :  { %259 = vmatpush.bf16.msra.mxu2 %v7240_v30  ;;  %11382 = vst [vmem:[#allocation6_spill] sm:$0xff] %v7335_v47  ;;  %v7359_v51 = vld [vmem:[%s11285_s1 + $0x1e0] sm:$0xff]  ;;  %v7377_v54 = vld [vmem:[%s11285_s1 + $0x198] sm:$0xff]  ;;  %v7389_v56 = vld [vmem:[%s11285_s1 + $0x110] sm:$0xff] }
  0x21   :  { %340 = vmatpush.bf16.msra.mxu3 %v7260_v34  ;;  %119 = vmatmul.bf16.vlgmr.msra.gmra.mxu0 %v7272_v36  ;;  %11383 = vst [vmem:[#allocation7_spill] sm:$0xff] %v7359_v51  ;;  %v7383_v55 = vld [vmem:[%s11285_s1 + $0x1d8] sm:$0xff]  ;;  %v7396_v57 = vld [vmem:[%s11285_s1 + $0x150] sm:$0xff]  ;;  %v7413_v60 = vld [vmem:[%s11285_s1 + $0x108] sm:$0xff] }
  0x22   :  { %414 = vmatpush.bf16.msrb.mxu0 %v7245_v31  ;;  %180 = vmatmul.bf16.vlgmr.msra.gmra.mxu1 %v27_v41  ;;  %11384 = vst [vmem:[#allocation8_spill] sm:$0xff] %v7383_v55  ;;  %v7401_v58 = vld [vmem:[%s11285_s1 + $0x190] sm:$0xff]  ;;  %v7420_v61 = vld [vmem:[%s11285_s1 + $0x148] sm:$0xff]  ;;  %v7437_v41 = vld [vmem:[%s11285_s1 + $0x100] sm:$0xff] }
  0x23   :  { %495 = vmatpush.bf16.msrb.mxu1 %v7250_v32  ;;  %260 = vmatmul.bf16.vlgmr.msra.gmra.mxu2 %v7284_v38  ;;  %v7407_v59 = vld [vmem:[%s11285_s1 + $0x1d0] sm:$0xff]  ;;  %v7425_v62 = vld [vmem:[%s11285_s1 + $0x188] sm:$0xff] }
  0x24   :  { %576 = vmatpush.bf16.msrb.mxu2 %v7255_v33  ;;  %341 = vmatmul.bf16.vlgmr.msra.gmra.mxu3 %v4520_v43  ;;  %11385 = vst [vmem:[#allocation9_spill] sm:$0xff] %v7407_v59  ;;  %v7431_v63 = vld [vmem:[%s11285_s1 + $0x1c8] sm:$0xff]  ;;  %v7444_v43 = vld [vmem:[%s11285_s1 + $0x140] sm:$0xff] }
  0x25   :  { %657 = vmatpush.bf16.msrb.mxu3 %v7267_v35  ;;  %11386 = vst [vmem:[#allocation10_spill] sm:$0xff] %v7431_v63 }
  0x26   :  { %415 = vmatpush.bf16.msrb.mxu0 %v7279_v37 }
  0x27   :  { %496 = vmatpush.bf16.msrb.mxu1 %v7291_v39 }
  0x28   :  { %577 = vmatpush.bf16.msrb.mxu2 %v7296_v40 }
  0x29   :  { %658 = vmatpush.bf16.msrb.mxu3 %v7307_v42  ;;  %v7478_v42 = vld [vmem:[%s11284_s0 + $0x6] sm:$0x1] }
  0x2a   :  { %416 = vmatpush.bf16.msrb.mxu0 %v7317_v44 }
  0x2b   :  { %497 = vmatpush.bf16.msrb.mxu1 %v7324_v45 }
  0x2c   :  { %578 = vmatpush.bf16.msrb.mxu2 %v7329_v46 }
  0x2d   :  { %659 = vmatpush.bf16.msrb.mxu3 %v7335_v47  ;;  %v4667_v47 = vld [vmem:[%s11284_s0 + $0xa] sm:$0x1] }
  0x2e   :  { %417 = vmatpush.bf16.msrb.mxu0 %v7341_v48 }
  0x2f   :  { %498 = vmatpush.bf16.msrb.mxu1 %v7348_v49 }
  0x30   :  { %579 = vmatpush.bf16.msrb.mxu2 %v7353_v50 }
  0x31   :  { %660 = vmatpush.bf16.msrb.mxu3 %v7359_v51  ;;  %v7460_v51 = vld [vmem:[%s11285_s1 + $0x1c0] sm:$0xff] }
  0x32   :  { %418 = vmatpush.bf16.msrb.mxu0 %v7365_v52 }
  0x33   :  { %499 = vmatpush.bf16.msrb.mxu1 %v7372_v53 }
  0x34   :  { %580 = vmatpush.bf16.msrb.mxu2 %v7377_v54 }
  0x35   :  { %661 = vmatpush.bf16.msrb.mxu3 %v7383_v55  ;;  %v7454_v55 = vld [vmem:[%s11285_s1 + $0x238] sm:$0xff] }
  0x36   :  { %419 = vmatpush.bf16.msrb.mxu0 %v7389_v56 }
  0x37   :  { %500 = vmatpush.bf16.msrb.mxu1 %v7396_v57 }
  0x38   :  { %581 = vmatpush.bf16.msrb.mxu2 %v7401_v58 }
  0x39   :  { %662 = vmatpush.bf16.msrb.mxu3 %v7407_v59  ;;  %v7449_v59 = vld [vmem:[%s11285_s1 + $0x180] sm:$0xff] }
  0x3a   :  { %420 = vmatpush.bf16.msrb.mxu0 %v7413_v60  ;;  %11387 = vst [vmem:[#allocation11_spill] sm:$0xff] %v7449_v59 }
  0x3b   :  { %501 = vmatpush.bf16.msrb.mxu1 %v7420_v61 }
  0x3c   :  { %582 = vmatpush.bf16.msrb.mxu2 %v7425_v62 }
  0x3d   :  { %663 = vmatpush.bf16.msrb.mxu3 %v7431_v63  ;;  %v7473_v63 = vld [vmem:[%s11285_s1 + $0x230] sm:$0xff] }
  0x3e   :  { %421 = vmatpush.bf16.msrb.mxu0 %v7437_v41 }
  0x3f   :  { %502 = vmatpush.bf16.msrb.mxu1 %v7444_v43 }
  0x40   :  { %583 = vmatpush.bf16.msrb.mxu2 %v7449_v59  ;;  %v7483_v59 = vld [vmem:[%s11284_s0 + $0x7] sm:$0x1] }
  0x41   :  { %664 = vmatpush.bf16.msrb.mxu3 %v7460_v51  ;;  %422 = vmatmul.bf16.vlgmr.msrb.gmra.mxu0 %v7478_v42 }
  0x42   :  { %738 = vmatpush.bf16.msra.mxu0 %v7454_v55  ;;  %503 = vmatmul.bf16.vlgmr.msrb.gmra.mxu1 %v7483_v59 }
  0x43   :  { %791 = vmatpush.bf16.msra.mxu1 %v7062_v0  ;;  %584 = vmatmul.bf16.vlgmr.msrb.gmra.mxu2 %v4667_v47  ;;  %v7491_v0 = vld [vmem:[%s11284_s0 + $0xb] sm:$0x1]  ;;  %v4949_v47 = vld [vmem:[%s11287_s3 + $0x1d0] sm:$0xf0] }
  0x44   :  { %804 = vmatpush.bf16.msra.mxu2 %v7067_v1  ;;  %v7500_v1 = vld [vmem:[%s11285_s1 + $0x228] sm:$0xff]  ;;  %665 = vmatmul.bf16.vlgmr.msrb.gmra.mxu3 %v7491_v0 }
  0x45   :  { %819 = vmatpush.bf16.msra.mxu3 %v7072_v2  ;;  %v7510_v2 = vld [vmem:[%s11285_s1 + $0x220] sm:$0xff] }
  0x46   :  { %739 = vmatpush.bf16.msra.mxu0 %v7473_v63 }
  0x47   :  { %792 = vmatpush.bf16.msra.mxu1 %v7084_v4  ;;  %v7519_v4 = vld [vmem:[%s11285_s1 + $0x218] sm:$0xff] }
  0x48   :  { %805 = vmatpush.bf16.msra.mxu2 %v7089_v5  ;;  %v7528_v5 = vld [vmem:[%s11285_s1 + $0x210] sm:$0xff] }
  0x49   :  { %820 = vmatpush.bf16.msra.mxu3 %v7096_v6  ;;  %v7537_v6 = vld [vmem:[%s11285_s1 + $0x208] sm:$0xff] }
  0x4a   :  { %740 = vmatpush.bf16.msra.mxu0 %v7500_v1 }
  0x4b   :  { %793 = vmatpush.bf16.msra.mxu1 %v7108_v8  ;;  %v7546_v8 = vld [vmem:[%s11285_s1 + $0x200] sm:$0xff] }
  0x4c   :  { %806 = vmatpush.bf16.msra.mxu2 %v7113_v9  ;;  %v7555_v9 = vld [vmem:[%s11284_s0 + $0xc] sm:$0x1] }
  0x4d   :  { %821 = vmatpush.bf16.msra.mxu3 %v7120_v10  ;;  %v7568_v10 = vld [vmem:[%s11284_s0 + $0x3] sm:$0x1] }
  0x4e   :  { %741 = vmatpush.bf16.msra.mxu0 %v7510_v2 }
  0x4f   :  { %794 = vmatpush.bf16.msra.mxu1 %v7132_v12  ;;  %v11390_v12 = vld [vmem:[#allocation6_spill] sm:$0xff] }
  0x50   :  { %807 = vmatpush.bf16.msra.mxu2 %v7137_v13  ;;  %v11391_v13 = vld [vmem:[#allocation7_spill] sm:$0xff] }
  0x51   :  { %822 = vmatpush.bf16.msra.mxu3 %v7144_v14  ;;  %v11392_v14 = vld [vmem:[#allocation8_spill] sm:$0xff] }
  0x52   :  { %742 = vmatpush.bf16.msra.mxu0 %v7519_v4 }
  0x53   :  { %795 = vmatpush.bf16.msra.mxu1 %v7156_v16  ;;  %v11394_v16 = vld [vmem:[#allocation10_spill] sm:$0xff] }
  0x54   :  { %808 = vmatpush.bf16.msra.mxu2 %v7161_v17  ;;  %v7628_v17 = vld [vmem:[%s11284_s0 + $0xd] sm:$0x1] }
  0x55   :  { %823 = vmatpush.bf16.msra.mxu3 %v7168_v18 }
  0x56   :  { %743 = vmatpush.bf16.msra.mxu0 %v7528_v5 }
  0x57   :  { %796 = vmatpush.bf16.msra.mxu1 %v7180_v20 }
  0x58   :  { %809 = vmatpush.bf16.msra.mxu2 %v7185_v21 }
  0x59   :  { %824 = vmatpush.bf16.msra.mxu3 %v7190_v22 }
  0x5a   :  { %744 = vmatpush.bf16.msra.mxu0 %v7537_v6 }
  0x5b   :  { %797 = vmatpush.bf16.msra.mxu1 %v7204_v24 }
  0x5c   :  { %810 = vmatpush.bf16.msra.mxu2 %v7209_v25 }
  0x5d   :  { %825 = vmatpush.bf16.msra.mxu3 %v7216_v26 }
  0x5e   :  { %745 = vmatpush.bf16.msra.mxu0 %v7546_v8 }
  0x5f   :  { %798 = vmatpush.bf16.msra.mxu1 %v7228_v28 }
  0x60   :  { %811 = vmatpush.bf16.msra.mxu2 %v7233_v29 }
  0x61   :  { %746 = vmatmul.bf16.vlgmr.msra.gmra.mxu0 %v7555_v9  ;;  %826 = vmatpush.bf16.msra.mxu3 %v7240_v30 }
  0x62   :  { %833 = vmatpush.bf16.msrb.mxu0 %v7077_v3  ;;  %799 = vmatmul.bf16.vlgmr.msra.gmra.mxu1 %v7284_v38  ;;  %v7602_v3 = vld [vmem:[%s11284_s0 + $0x8] sm:$0x1]  ;;  %v6498_v38 = vld [vmem:[%s11287_s3 + $0x1e4] sm:$0xf] }
  0x63   :  { %847 = vmatpush.bf16.msrb.mxu1 %v7245_v31  ;;  %812 = vmatmul.bf16.vlgmr.msra.gmra.mxu2 %v7272_v36 }
  0x64   :  { %863 = vmatpush.bf16.msrb.mxu2 %v7250_v32  ;;  %827 = vmatmul.bf16.vlgmr.msra.gmra.mxu3 %v7568_v10 }
  0x65   :  { %877 = vmatpush.bf16.msrb.mxu3 %v7255_v33  ;;  %v4963_v33 = vld [vmem:[%s11287_s3 + $0x1e0] sm:$0xf] }
  0x66   :  { %834 = vmatpush.bf16.msrb.mxu0 %v7101_v7  ;;  %v11388_v7 = vld [vmem:[#allocation11_spill] sm:$0xff] }
  0x67   :  { %848 = vmatpush.bf16.msrb.mxu1 %v7279_v37  ;;  %v6496_v37 = vld [vmem:[%s11287_s3 + $0x1cc] sm:$0xf0] }
  0x68   :  { %864 = vmatpush.bf16.msrb.mxu2 %v7291_v39  ;;  %v4965_v39 = vld [vmem:[%s11287_s3 + $0x1f0] sm:$0xf0] }
  0x69   :  { %878 = vmatpush.bf16.msrb.mxu3 %v7296_v40 }
  0x6a   :  { %835 = vmatpush.bf16.msrb.mxu0 %v7125_v11  ;;  %v11389_v11 = vld [vmem:[#allocation5_spill] sm:$0xff] }
  0x6b   :  { %849 = vmatpush.bf16.msrb.mxu1 %v7317_v44  ;;  %v6494_v44 = vld [vmem:[%s11287_s3 + $0x1c4] sm:$0xf] }
  0x6c   :  { %865 = vmatpush.bf16.msrb.mxu2 %v7324_v45 }
  0x6d   :  { %879 = vmatpush.bf16.msrb.mxu3 %v7329_v46 }
  0x6e   :  { %836 = vmatpush.bf16.msrb.mxu0 %v7149_v15  ;;  %v11393_v15 = vld [vmem:[#allocation9_spill] sm:$0xff] }
  0x6f   :  { %850 = vmatpush.bf16.msrb.mxu1 %v7341_v48  ;;  %v4931_v48 = vld [vmem:[%s11287_s3 + $0x1a0] sm:$0xf] }
  0x70   :  { %866 = vmatpush.bf16.msrb.mxu2 %v7348_v49  ;;  %v6492_v49 = vld [vmem:[%s11287_s3 + $0x1ac] sm:$0xf0] }
  0x71   :  { %880 = vmatpush.bf16.msrb.mxu3 %v7353_v50  ;;  %v4952_v50 = vor.u32 %v6494_v44, %v4949_v47  ;;  %v4941_v47 = vld [vmem:[%s11287_s3 + $0x1b8] sm:$0xf0] }
  0x72   :  { %837 = vmatpush.bf16.msrb.mxu0 %v7173_v19 }
  0x73   :  { %851 = vmatpush.bf16.msrb.mxu1 %v7365_v52  ;;  %v6490_v52 = vld [vmem:[%s11287_s3 + $0x1a4] sm:$0xf] }
  0x74   :  { %867 = vmatpush.bf16.msrb.mxu2 %v7372_v53 }
  0x75   :  { %881 = vmatpush.bf16.msrb.mxu3 %v7377_v54 }
  0x76   :  { %838 = vmatpush.bf16.msrb.mxu0 %v7197_v23 }
  0x77   :  { %852 = vmatpush.bf16.msrb.mxu1 %v7389_v56  ;;  %v4933_v56 = vld [vmem:[%s11287_s3 + $0x1b0] sm:$0xf0] }
  0x78   :  { %868 = vmatpush.bf16.msrb.mxu2 %v7396_v57  ;;  %v4971_v57 = vld [vmem:[%s11287_s3 + $0x1e8] sm:$0xf] }
  0x79   :  { %882 = vmatpush.bf16.msrb.mxu3 %v7401_v58  ;;  %v6501_v58 = vld [vmem:[%s11287_s3 + $0x1f4] sm:$0xf0] }
  0x7a   :  { %839 = vmatpush.bf16.msrb.mxu0 %v7221_v27 }
  0x7b   :  { %853 = vmatpush.bf16.msrb.mxu1 %v7413_v60 }
  0x7c   :  { %869 = vmatpush.bf16.msrb.mxu2 %v7420_v61 }
  0x7d   :  { %883 = vmatpush.bf16.msrb.mxu3 %v7425_v62 }
  0x7e   :  { %840 = vmatpush.bf16.msrb.mxu0 %v7260_v34  ;;  %v6500_v34 = vld [vmem:[%s11287_s3 + $0x1ec] sm:$0xf0] }
  0x7f   :  { %854 = vmatpush.bf16.msrb.mxu1 %v7437_v41  ;;  %v4964_v36 = vor.u32 %v6500_v34, %v4963_v33 }
  0x80   :  { %870 = vmatpush.bf16.msrb.mxu2 %v7444_v43 }
  0x81   :  { %884 = vmatpush.bf16.msrb.mxu3 %v11388_v7  ;;  %841 = vmatmul.bf16.vlgmr.msrb.gmra.mxu0 %v7478_v42  ;;  %v4968_v42 = vor.u32 %v6498_v38, %v4965_v39  ;;  %v6482_v39 = vld [vmem:[%s11287_s3 + $0x164] sm:$0xf] }
  0x82   :  { %891 = vmatpush.bf16.msra.mxu0 %v7267_v35  ;;  %855 = vmatmul.bf16.vlgmr.msrb.gmra.mxu1 %v7483_v59  ;;  %v4947_v35 = vld [vmem:[%s11287_s3 + $0x1c0] sm:$0xf] }
  0x83   :  { %907 = vmatpush.bf16.msra.mxu1 %v7454_v55  ;;  %871 = vmatmul.bf16.vlgmr.msrb.gmra.mxu2 %v7602_v3  ;;  %v4948_v46 = vor.u32 %v6496_v37, %v4947_v35  ;;  %v6480_v37 = vld [vmem:[%s11287_s3 + $0x14c] sm:$0xf0] }
  0x84   :  { %885 = vmatmul.bf16.vlgmr.msrb.gmra.mxu3 %v7491_v0  ;;  %1117 = vmatpush.bf16.msra.mxu2 %v4964_v36  ;;  %v4883_v36 = vld [vmem:[%s11287_s3 + $0x140] sm:$0xf] }
  0x85   :  { %1130 = vmatpush.bf16.msra.mxu3 %v4968_v42  ;;  %v4884_v38 = vor.u32 %v6480_v37, %v4883_v36  ;;  %v4939_v42 = vld [vmem:[%s11287_s3 + $0x1a8] sm:$0xf]  ;;  %v4853_v37 = vld [vmem:[%s11287_s3 + $0x110] sm:$0xf0] }
  0x86   :  { %892 = vmatpush.bf16.msra.mxu0 %v11389_v11  ;;  %v4972_v11 = vor.u32 %v6501_v58, %v4971_v57  ;;  %v6478_v58 = vld [vmem:[%s11287_s3 + $0x144] sm:$0xf] }
  0x87   :  { %908 = vmatpush.bf16.msra.mxu1 %v7473_v63 }
  0x88   :  { %1118 = vmatpush.bf16.msra.mxu2 %v4948_v46  ;;  %v6491_v46 = vld [vmem:[%s11287_s3 + $0x1ac] sm:$0xf] }
  0x89   :  { %1131 = vmatpush.bf16.msra.mxu3 %v4952_v50  ;;  %v4944_v50 = vor.u32 %v6491_v46, %v4941_v47  ;;  %v5075_v46 = vld [vmem:[%s11287_s3 + $0xc0] sm:$0xf]  ;;  %v6464_v47 = vld [vmem:[%s11287_s3 + $0xcc] sm:$0xf0] }
  0x8a   :  { %893 = vmatpush.bf16.msra.mxu0 %v11390_v12  ;;  %v6499_v12 = vld [vmem:[%s11287_s3 + $0x1ec] sm:$0xf] }
  0x8b   :  { %909 = vmatpush.bf16.msra.mxu1 %v7500_v1 }
  0x8e   :  { %894 = vmatpush.bf16.msra.mxu0 %v11391_v13  ;;  %v4973_v13 = vld [vmem:[%s11287_s3 + $0x1f8] sm:$0xf0] }
  0x8f   :  { %910 = vmatpush.bf16.msra.mxu1 %v7510_v2 }
  0x92   :  { %895 = vmatpush.bf16.msra.mxu0 %v11392_v14  ;;  %v4932_v14 = vor.u32 %v6492_v49, %v4931_v48 }
  0x93   :  { %911 = vmatpush.bf16.msra.mxu1 %v7519_v4 }
  0x94   :  { %1119 = vmatpush.bf16.msra.mxu2 %v4932_v14  ;;  %v4925_v14 = vld [vmem:[%s11287_s3 + $0x198] sm:$0xf0] }
  0x96   :  { %896 = vmatpush.bf16.msra.mxu0 %v11393_v15  ;;  %v4915_v15 = vld [vmem:[%s11287_s3 + $0x180] sm:$0xf] }
  0x97   :  { %912 = vmatpush.bf16.msra.mxu1 %v7528_v5 }
  0x9a   :  { %897 = vmatpush.bf16.msra.mxu0 %v11394_v16 }
  0x9b   :  { %913 = vmatpush.bf16.msra.mxu1 %v7537_v6 }
  0x9e   :  { %898 = vmatpush.bf16.msra.mxu0 %v7460_v51  ;;  %v120_v18 = vpop.f32.mrf.mxu0 }
  0x9f   :  { %914 = vmatpush.bf16.msra.mxu1 %v7546_v8  ;;  %v181_v19 = vpop.f32.mrf.mxu1 }
  0xa0   :  { %v182_v20 = vadd.f32 %v181_v19, %v120_v18  ;;  %v6488_v18 = vld [vmem:[%s11287_s3 + $0x18c] sm:$0xf0]  ;;  %v4976_v19 = vor.u32 %v6499_v12, %v4973_v13  ;;  %v6489_v12 = vld [vmem:[%s11287_s3 + $0x194] sm:$0xf0]  ;;  %v6487_v13 = vld [vmem:[%s11287_s3 + $0x18c] sm:$0xf] }
  0xa1   :  { %899 = vmatmul.bf16.vlgmr.msra.gmra.mxu0 %v7555_v9 }
  0xa2   :  { %915 = vmatmul.bf16.vlgmr.msra.gmra.mxu1 %v7628_v17  ;;  %1143 = vmatpush.bf16.msrb.mxu0 %v4972_v11  ;;  %v4923_v11 = vld [vmem:[%s11287_s3 + $0x188] sm:$0xf] }
  0xa3   :  { %1156 = vmatpush.bf16.msrb.mxu1 %v4976_v19  ;;  %v4851_v19 = vld [vmem:[%s11287_s3 + $0x100] sm:$0xf] }
  0xa6   :  { %v261_v21 = vpop.f32.mrf.mxu2  ;;  %v122_v23 = vpop.f32.mrf.mxu0 }
  0xa7   :  { %v265_v22 = vadd.f32 %v261_v21, %v182_v20  ;;  %v342_v24 = vpop.f32.mrf.mxu3  ;;  %v183_v25 = vpop.f32.mrf.mxu1  ;;  %v4936_v20 = vor.u32 %v6490_v52, %v4933_v56  ;;  %v6486_v21 = vld [vmem:[%s11287_s3 + $0x184] sm:$0xf]  ;;  %v4955_v23 = vld [vmem:[%s11287_s3 + $0x1c8] sm:$0xf]  ;;  %v4867_v52 = vld [vmem:[%s11287_s3 + $0x120] sm:$0xf] }
  0xa8   :  { %v6495_v25 = vld [vmem:[%s11287_s3 + $0x1cc] sm:$0xf] }
  0xa9   :  { %v346_v26 = vadd.f32 %v342_v24, %v265_v22  ;;  %v4917_v22 = vld [vmem:[%s11287_s3 + $0x190] sm:$0xf0]  ;;  %v6497_v24 = vld [vmem:[%s11287_s3 + $0x1d4] sm:$0xf0]  ;;  %1132 = vmatpush.bf16.msra.mxu3 %v4936_v20  ;;  %v6472_v20 = vld [vmem:[%s11287_s3 + $0x10c] sm:$0xf0] }
  0xaa   :  { %v4920_v33 = vor.u32 %v6486_v21, %v4917_v22  ;;  %v4852_v21 = vor.u32 %v6472_v20, %v4851_v19  ;;  %v6474_v22 = vld [vmem:[%s11287_s3 + $0x124] sm:$0xf]  ;;  %v5077_v20 = vld [vmem:[%s11287_s3 + $0xd0] sm:$0xf0] }
  0xab   :  { %v6462_v19 = vld [vmem:[%s11287_s3 + $0xc4] sm:$0xf] }
  0xad   :  { %1133 = vmatpush.bf16.msra.mxu3 %v4920_v33  ;;  %v6483_v33 = vld [vmem:[%s11287_s3 + $0x16c] sm:$0xf] }
  0xae   :  { %v263_v27 = vpop.f32.mrf.mxu2 }
  0xaf   :  { %v344_v28 = vpop.f32.mrf.mxu3 }
  0xb0   :  { %v4956_v28 = vor.u32 %v6497_v24, %v4955_v23  ;;  %v4869_v23 = vld [vmem:[%s11287_s3 + $0x130] sm:$0xf0]  ;;  %v4907_v24 = vld [vmem:[%s11287_s3 + $0x168] sm:$0xf] }
  0xb2   :  { %1144 = vmatpush.bf16.msrb.mxu0 %v4956_v28  ;;  %v5091_v28 = vld [vmem:[%s11287_s3 + $0xe0] sm:$0xf] }
  0xbe   :  { %v423_v29 = vpop.f32.mrf.mxu0 }
  0xbf   :  { %v504_v30 = vpop.f32.mrf.mxu1  ;;  %v427_v31 = vadd.f32 %v423_v29, %v346_v26  ;;  %v4957_v26 = vld [vmem:[%s11287_s3 + $0x1d8] sm:$0xf0] }
  0xc0   :  { %v4960_v29 = vor.u32 %v6495_v25, %v4957_v26  ;;  %v4872_v26 = vor.u32 %v6474_v22, %v4869_v23 }
  0xc1   :  { %v508_v32 = vadd.f32 %v504_v30, %v427_v31  ;;  %v4916_v30 = vor.u32 %v6488_v18, %v4915_v15  ;;  %v4899_v31 = vld [vmem:[%s11287_s3 + $0x160] sm:$0xf]  ;;  %v4924_v15 = vor.u32 %v6489_v12, %v4923_v11  ;;  %v4928_v18 = vor.u32 %v6487_v13, %v4925_v14  ;;  %v6477_v11 = vld [vmem:[%s11287_s3 + $0x134] sm:$0xf0]  ;;  %v6460_v12 = vld [vmem:[%s11287_s3 + $0xac] sm:$0xf0] }
  0xc2   :  { %1157 = vmatpush.bf16.msrb.mxu1 %v4960_v29  ;;  %v6468_v29 = vld [vmem:[%s11287_s3 + $0xec] sm:$0xf0]  ;;  %v6475_v13 = vld [vmem:[%s11287_s3 + $0x12c] sm:$0xf]  ;;  %v4877_v14 = vld [vmem:[%s11287_s3 + $0x138] sm:$0xf0] }
  0xc3   :  { %1120 = vmatpush.bf16.msra.mxu2 %v4916_v30  ;;  %v4880_v23 = vor.u32 %v6475_v13, %v4877_v14  ;;  %v5011_v13 = vld [vmem:[%s11287_s3 + $0x40] sm:$0xf]  ;;  %v6448_v14 = vld [vmem:[%s11287_s3 + $0x4c] sm:$0xf0] }
  0xc6   :  { %v585_v40 = vpop.f32.mrf.mxu2  ;;  %v425_v54 = vpop.f32.mrf.mxu0  ;;  %1158 = vmatpush.bf16.msrb.mxu1 %v4944_v50  ;;  %v4893_v50 = vld [vmem:[%s11287_s3 + $0x158] sm:$0xf0] }
  0xc7   :  { %v589_v45 = vadd.f32 %v585_v40, %v508_v32  ;;  %v666_v53 = vpop.f32.mrf.mxu3  ;;  %v506_v0 = vpop.f32.mrf.mxu1  ;;  %v6484_v32 = vld [vmem:[%s11287_s3 + $0x16c] sm:$0xf0]  ;;  %v4901_v40 = vld [vmem:[%s11287_s3 + $0x170] sm:$0xf0] }
  0xc8   :  { %v4900_v35 = vor.u32 %v6484_v32, %v4899_v31  ;;  %v4904_v44 = vor.u32 %v6482_v39, %v4901_v40  ;;  %v4885_v0 = vld [vmem:[%s11287_s3 + $0x150] sm:$0xf0]  ;;  %v5092_v32 = vor.u32 %v6468_v29, %v5091_v28  ;;  %v6481_v39 = vld [vmem:[%s11287_s3 + $0x154] sm:$0xf0]  ;;  %v6456_v28 = vld [vmem:[%s11287_s3 + $0x8c] sm:$0xf0] }
  0xc9   :  { %v670_v60 = vadd.f32 %v666_v53, %v589_v45  ;;  %v6493_v45 = vld [vmem:[%s11287_s3 + $0x1b4] sm:$0xf0]  ;;  %v6476_v53 = vld [vmem:[%s11287_s3 + $0x12c] sm:$0xf0]  ;;  %v6471_v29 = vld [vmem:[%s11287_s3 + $0x10c] sm:$0xf] }
  0xca   :  { %1121 = vmatpush.bf16.msra.mxu2 %v4900_v35  ;;  %v4940_v49 = vor.u32 %v6493_v45, %v4939_v42  ;;  %1134 = vmatpush.bf16.msra.mxu3 %v4904_v44  ;;  %v4868_v56 = vor.u32 %v6476_v53, %v4867_v52  ;;  %v6470_v35 = vld [vmem:[%s11287_s3 + $0x104] sm:$0xf]  ;;  %v5093_v53 = vld [vmem:[%s11287_s3 + $0xf0] sm:$0xf0] }
  0xcb   :  { %1159 = vmatpush.bf16.msrb.mxu1 %v4928_v18  ;;  %v4856_v44 = vor.u32 %v6470_v35, %v4853_v37  ;;  %v6466_v52 = vld [vmem:[%s11287_s3 + $0xe4] sm:$0xf] }
  0xcc   :  { %1145 = vmatpush.bf16.msrb.mxu0 %v4940_v49  ;;  %v5076_v49 = vor.u32 %v6464_v47, %v5075_v46  ;;  %v6452_v46 = vld [vmem:[%s11287_s3 + $0x6c] sm:$0xf0] }
  0xce   :  { %v587_v27 = vpop.f32.mrf.mxu2  ;;  %1122 = vmatpush.bf16.msra.mxu2 %v4884_v38  ;;  %v4891_v38 = vld [vmem:[%s11287_s3 + $0x148] sm:$0xf] }
  0xcf   :  { %v668_v34 = vpop.f32.mrf.mxu3  ;;  %v6485_v27 = vld [vmem:[%s11287_s3 + $0x174] sm:$0xf0]  ;;  %v4892_v45 = vor.u32 %v6481_v39, %v4891_v38  ;;  %v6467_v38 = vld [vmem:[%s11287_s3 + $0xec] sm:$0xf]  ;;  %v5101_v39 = vld [vmem:[%s11287_s3 + $0xf8] sm:$0xf0] }
  0xd0   :  { %1146 = vmatpush.bf16.msrb.mxu0 %v4924_v15  ;;  %v4908_v31 = vor.u32 %v6485_v27, %v4907_v24  ;;  %v4909_v34 = vld [vmem:[%s11287_s3 + $0x178] sm:$0xf0]  ;;  %v5080_v24 = vor.u32 %v6462_v19, %v5077_v20  ;;  %v5043_v27 = vld [vmem:[%s11287_s3 + $0x80] sm:$0xf]  ;;  %v5029_v19 = vld [vmem:[%s11287_s3 + $0x70] sm:$0xf0] }
  0xd1   :  { %v4912_v36 = vor.u32 %v6483_v33, %v4909_v34  ;;  %v5099_v33 = vld [vmem:[%s11287_s3 + $0xe8] sm:$0xf]  ;;  %v6469_v34 = vld [vmem:[%s11287_s3 + $0xf4] sm:$0xf0]  ;;  %v5044_v37 = vor.u32 %v6456_v28, %v5043_v27 }
  0xd2   :  { %1123 = vmatpush.bf16.msra.mxu2 %v4868_v56  ;;  %v5100_v47 = vor.u32 %v6469_v34, %v5099_v33  ;;  %v5067_v20 = vld [vmem:[%s11287_s3 + $0xa8] sm:$0xf]  ;;  %v6446_v33 = vld [vmem:[%s11287_s3 + $0x44] sm:$0xf]  ;;  %v5013_v34 = vld [vmem:[%s11287_s3 + $0x50] sm:$0xf0] }
  0xd3   :  { %1160 = vmatpush.bf16.msrb.mxu1 %v4912_v36 }
  0xd4   :  { %1147 = vmatpush.bf16.msrb.mxu0 %v4908_v31  ;;  %v6458_v31 = vld [vmem:[%s11287_s3 + $0xa4] sm:$0xf] }
  0xd6   :  { %1124 = vmatpush.bf16.msra.mxu2 %v4852_v21  ;;  %v4859_v21 = vld [vmem:[%s11287_s3 + $0x108] sm:$0xf] }
  0xd8   :  { %1148 = vmatpush.bf16.msrb.mxu0 %v4892_v45  ;;  %v5027_v45 = vld [vmem:[%s11287_s3 + $0x60] sm:$0xf] }
  0xda   :  { %1329 = vmatpush.bf16.msrb.mxu2 %v5092_v32  ;;  %v5061_v32 = vld [vmem:[%s11287_s3 + $0xb0] sm:$0xf0] }
  0xde   :  { %v747_v48 = vpop.f32.mrf.mxu0  ;;  %1330 = vmatpush.bf16.msrb.mxu2 %v5076_v49  ;;  %v6454_v49 = vld [vmem:[%s11287_s3 + $0x84] sm:$0xf] }
  0xdf   :  { %v7740_v54 = vadd.f32 %v747_v48, %v670_v60  ;;  %v7742_v57 = vpop.f32.mrf.mxu1  ;;  %v4888_v60 = vor.u32 %v6478_v58, %v4885_v0  ;;  %v6479_v48 = vld [vmem:[%s11287_s3 + $0x14c] sm:$0xf]  ;;  %v5096_v58 = vor.u32 %v6466_v52, %v5093_v53  ;;  %v4875_v0 = vld [vmem:[%s11287_s3 + $0x128] sm:$0xf]  ;;  %v6465_v53 = vld [vmem:[%s11287_s3 + $0xd4] sm:$0xf0] }
  0xe0   :  { %v4896_v56 = vor.u32 %v6479_v48, %v4893_v50  ;;  %v4876_v15 = vor.u32 %v6477_v11, %v4875_v0  ;;  %v5104_v48 = vor.u32 %v6467_v38, %v5101_v39  ;;  %v5045_v50 = vld [vmem:[%s11287_s3 + $0x90] sm:$0xf0]  ;;  %v5083_v52 = vld [vmem:[%s11287_s3 + $0xc8] sm:$0xf]  ;;  %v6463_v11 = vld [vmem:[%s11287_s3 + $0xcc] sm:$0xf] }
  0xe1   :  { %1135 = vmatpush.bf16.msra.mxu3 %v4888_v60  ;;  %v5059_v60 = vld [vmem:[%s11287_s3 + $0xa0] sm:$0xf]  ;;  %v5084_v0 = vor.u32 %v6465_v53, %v5083_v52  ;;  %v6455_v38 = vld [vmem:[%s11287_s3 + $0x8c] sm:$0xf]  ;;  %v5053_v39 = vld [vmem:[%s11287_s3 + $0x98] sm:$0xf0] }
  0xe2   :  { %v5060_v18 = vor.u32 %v6460_v12, %v5059_v60  ;;  %1161 = vmatpush.bf16.msrb.mxu1 %v4896_v56  ;;  %1149 = vmatpush.bf16.msrb.mxu0 %v4876_v15  ;;  %v5028_v56 = vor.u32 %v6452_v46, %v5027_v45  ;;  %v5085_v60 = vld [vmem:[%s11287_s3 + $0xd8] sm:$0xf0]  ;;  %v5012_v15 = vor.u32 %v6448_v14, %v5011_v13  ;;  %v4979_v45 = vld [vmem:[%s11287_s3] sm:$0xf]  ;;  %v6440_v46 = vld [vmem:[%s11287_s3 + $0xc] sm:$0xf0] }
  0xe3   :  { %v5088_v12 = vor.u32 %v6463_v11, %v5085_v60  ;;  %v5035_v52 = vld [vmem:[%s11287_s3 + $0x68] sm:$0xf]  ;;  %v5037_v13 = vld [vmem:[%s11287_s3 + $0x78] sm:$0xf0] }
  0xe4   :  { %1331 = vmatpush.bf16.msrb.mxu2 %v5060_v18  ;;  %v6450_v18 = vld [vmem:[%s11287_s3 + $0x64] sm:$0xf] }
  0xe5   :  { %1136 = vmatpush.bf16.msra.mxu3 %v4872_v26  ;;  %v6473_v26 = vld [vmem:[%s11287_s3 + $0x114] sm:$0xf0] }
  0xe6   :  { %v7777_v25 = vpop.f32.mrf.mxu2  ;;  %v749_v30 = vpop.f32.mrf.mxu0  ;;  %v4860_v36 = vor.u32 %v6473_v26, %v4859_v21  ;;  %1162 = vmatpush.bf16.msrb.mxu1 %v4880_v23  ;;  %v5032_v21 = vor.u32 %v6450_v18, %v5029_v19  ;;  %v6459_v23 = vld [vmem:[%s11287_s3 + $0xac] sm:$0xf]  ;;  %v6438_v18 = vld [vmem:[%s11287_s3 + $0x4] sm:$0xf] }
  0xe7   :  { %v7806_v40 = vpop.f32.mrf.mxu3  ;;  %v802_v42 = vpop.f32.mrf.mxu1  ;;  %v4861_v30 = vld [vmem:[%s11287_s3 + $0x118] sm:$0xf0] }
  0xe8   :  { %v4864_v42 = vor.u32 %v6471_v29, %v4861_v30  ;;  %1150 = vmatpush.bf16.msrb.mxu0 %v4860_v36  ;;  %1332 = vmatpush.bf16.msrb.mxu2 %v5044_v37  ;;  %v4995_v30 = vld [vmem:[%s11287_s3 + $0x20] sm:$0xf]  ;;  %v5016_v36 = vor.u32 %v6446_v33, %v5013_v34  ;;  %v6457_v37 = vld [vmem:[%s11287_s3 + $0x94] sm:$0xf0]  ;;  %v6443_v33 = vld [vmem:[%s11287_s3 + $0x2c] sm:$0xf] }
  0xe9   :  { %1137 = vmatpush.bf16.msra.mxu3 %v4856_v44  ;;  %v5064_v44 = vor.u32 %v6458_v31, %v5061_v32  ;;  %v6444_v31 = vld [vmem:[%s11287_s3 + $0x2c] sm:$0xf0]  ;;  %v5005_v34 = vld [vmem:[%s11287_s3 + $0x38] sm:$0xf0] }
  0xea   :  { %1163 = vmatpush.bf16.msrb.mxu1 %v4864_v42  ;;  %v4996_v32 = vor.u32 %v6444_v31, %v4995_v30  ;;  %v5003_v30 = vld [vmem:[%s11287_s3 + $0x28] sm:$0xf] }
  0xec   :  { %1355 = vmatpush.bf16.msra.mxu0 %v5100_v47  ;;  %1333 = vmatpush.bf16.msrb.mxu2 %v5028_v56  ;;  %v4980_v47 = vor.u32 %v6440_v46, %v4979_v45 }
  0xed   :  { %1342 = vmatpush.bf16.msrb.mxu3 %v5096_v58  ;;  %v5048_v58 = vor.u32 %v6454_v49, %v5045_v50  ;;  %v6442_v49 = vld [vmem:[%s11287_s3 + $0x24] sm:$0xf]  ;;  %v4997_v50 = vld [vmem:[%s11287_s3 + $0x30] sm:$0xf0] }
  0xee   :  { %v815_v22 = vpop.f32.mrf.mxu2  ;;  %1368 = vmatpush.bf16.msra.mxu1 %v5104_v48  ;;  %v5000_v56 = vor.u32 %v6442_v49, %v4997_v50 }
  0xef   :  { %v830_v35 = vpop.f32.mrf.mxu3  ;;  %v6461_v22 = vld [vmem:[%s11287_s3 + $0xb4] sm:$0xf0] }
  0xf0   :  { %1356 = vmatpush.bf16.msra.mxu0 %v5084_v0  ;;  %v5068_v27 = vor.u32 %v6461_v22, %v5067_v20  ;;  %1334 = vmatpush.bf16.msrb.mxu2 %v5012_v15  ;;  %v5051_v35 = vld [vmem:[%s11287_s3 + $0x88] sm:$0xf]  ;;  %v814_v0 = vadd.f32 %v7777_v25, %v7742_v57  ;;  %v4981_v57 = vld [vmem:[%s11287_s3 + $0x10] sm:$0xf0]  ;;  %v6449_v20 = vld [vmem:[%s11287_s3 + $0x54] sm:$0xf0] }
  0xf1   :  { %1343 = vmatpush.bf16.msrb.mxu3 %v5080_v24  ;;  %v5069_v24 = vld [vmem:[%s11287_s3 + $0xb8] sm:$0xf0]  ;;  %v5052_v42 = vor.u32 %v6457_v37, %v5051_v35  ;;  %v5019_v25 = vld [vmem:[%s11287_s3 + $0x48] sm:$0xf]  ;;  %v4984_v19 = vor.u32 %v6438_v18, %v4981_v57  ;;  %v8065_v18 = vld [vmem:[%s11285_s1 + $0x70] sm:$0xff] }
  0xf2   :  { %1369 = vmatpush.bf16.msra.mxu1 %v5088_v12  ;;  %v5072_v28 = vor.u32 %v6459_v23, %v5069_v24  ;;  %v6451_v12 = vld [vmem:[%s11287_s3 + $0x6c] sm:$0xf]  ;;  %v5020_v22 = vor.u32 %v6449_v20, %v5019_v25  ;;  %v5021_v24 = vld [vmem:[%s11287_s3 + $0x58] sm:$0xf0]  ;;  %v4987_v37 = vld [vmem:[%s11287_s3 + $0x8] sm:$0xf] }
  0xf3   :  { %v5040_v15 = vor.u32 %v6451_v12, %v5037_v13  ;;  %v6447_v23 = vld [vmem:[%s11287_s3 + $0x4c] sm:$0xf]  ;;  %v8045_v12 = vld [vmem:[%s11285_s1 + $0x38] sm:$0xff]  ;;  %v8071_v57 = vld [vmem:[%s11285_s1 + $0x30] sm:$0xff] }
  0xf4   :  { %1357 = vmatpush.bf16.msra.mxu0 %v5068_v27  ;;  %1335 = vmatpush.bf16.msrb.mxu2 %v4996_v32  ;;  %v5024_v27 = vor.u32 %v6447_v23, %v5021_v24  ;;  %v8051_v13 = vld [vmem:[%s11285_s1 + $0xb8] sm:$0xff]  ;;  %v8077_v25 = vld [vmem:[%s11285_s1 + $0xb0] sm:$0xff]  ;;  %v8089_v20 = vld [vmem:[%s11285_s1 + $0x68] sm:$0xff] }
  0xf5   :  { %1344 = vmatpush.bf16.msrb.mxu3 %v5064_v44  ;;  %v5056_v44 = vor.u32 %v6455_v38, %v5053_v39  ;;  %v6441_v38 = vld [vmem:[%s11287_s3 + $0x14] sm:$0xf0]  ;;  %v8107_v23 = vld [vmem:[%s11285_s1 + $0xe8] sm:$0xff] }
  0xf6   :  { %1370 = vmatpush.bf16.msra.mxu1 %v5072_v28 }
  0xf8   :  { %1358 = vmatpush.bf16.msra.mxu0 %v5052_v42  ;;  %1336 = vmatpush.bf16.msrb.mxu2 %v4980_v47  ;;  %v6439_v42 = vld [vmem:[%s11287_s3 + $0xc] sm:$0xf] }
  0xf9   :  { %1345 = vmatpush.bf16.msrb.mxu3 %v5048_v58  ;;  %v6453_v58 = vld [vmem:[%s11287_s3 + $0x74] sm:$0xf0] }
  0xfa   :  { %1371 = vmatpush.bf16.msra.mxu1 %v5056_v44  ;;  %v5036_v60 = vor.u32 %v6453_v58, %v5035_v52  ;;  %v4989_v44 = vld [vmem:[%s11287_s3 + $0x18] sm:$0xf0] }
  0xfb   :  { %v4992_v45 = vor.u32 %v6439_v42, %v4989_v44  ;;  %v8197_v42 = vld [vmem:[%s11285_s1 + $0x88] sm:$0xff] }
  0xfc   :  { %1359 = vmatpush.bf16.msra.mxu0 %v5036_v60  ;;  %v8203_v44 = vld [vmem:[%s11285_s1 + $0xc8] sm:$0xff] }
  0xfd   :  { %1346 = vmatpush.bf16.msrb.mxu3 %v5032_v21  ;;  %v832_v21 = vadd.f32 %v7806_v40, %v814_v0  ;;  %v6445_v40 = vld [vmem:[%s11287_s3 + $0x34] sm:$0xf0] }
  0xfe   :  { %v842_v26 = vpop.f32.mrf.mxu0  ;;  %1372 = vmatpush.bf16.msra.mxu1 %v5040_v15  ;;  %v5004_v31 = vor.u32 %v6445_v40, %v5003_v30  ;;  %v8125_v30 = vld [vmem:[%s11285_s1 + $0xa0] sm:$0xff] }
  0xff   :  { %v7934_v29 = vpop.f32.mrf.mxu1  ;;  %v846_v32 = vadd.f32 %v842_v26, %v832_v21  ;;  %v4988_v26 = vor.u32 %v6441_v38, %v4987_v37  ;;  %v8095_v21 = vld [vmem:[%s11285_s1 + $0x28] sm:$0xff]  ;;  %v8131_v40 = vld [vmem:[%s11285_s1 + $0xe0] sm:$0xff]  ;;  %v8173_v37 = vld [vmem:[%s11285_s1 + $0x90] sm:$0xff] }
 0x100   :  { %1360 = vmatpush.bf16.msra.mxu0 %v5020_v22  ;;  %v8101_v22 = vld [vmem:[%s11285_s1 + $0xa8] sm:$0xff]  ;;  %v8179_v38 = vld [vmem:[%s11285_s1 + $0xd0] sm:$0xff] }
 0x101   :  { %1347 = vmatpush.bf16.msrb.mxu3 %v5016_v36  ;;  %v5008_v36 = vor.u32 %v6443_v33, %v5005_v34  ;;  %v860_v39 = vadd.f32 %v7934_v29, %v846_v32  ;;  %v8033_v29 = vld [vmem:[%s11286_s2] ss:$0 sm:$0xff]  ;;  %v8143_v32 = vld [vmem:[%s11285_s1 + $0x18] sm:$0xff] }
 0x102   :  { %1373 = vmatpush.bf16.msra.mxu1 %v5024_v27  ;;  %v756_v15 = vadd.f32 %v8033_v29, %v7740_v54  ;;  %v8083_v54 = vld [vmem:[%s11285_s1 + $0xf0] sm:$0xff]  ;;  %v8113_v27 = vld [vmem:[%s11285_s1 + $0x60] sm:$0xff]  ;;  %v8149_v33 = vld [vmem:[%s11285_s1 + $0x98] sm:$0xff] }
 0x103   :  { %v8155_v34 = vld [vmem:[%s11285_s1 + $0xd8] sm:$0xff] }
 0x104   :  { %1361 = vmatpush.bf16.msra.mxu0 %v5004_v31  ;;  %v8137_v31 = vld [vmem:[%s11285_s1 + $0x58] sm:$0xff] }
 0x105   :  { %1348 = vmatpush.bf16.msrb.mxu3 %v5000_v56 }
 0x106   :  { %v872_v48 = vpop.f32.mrf.mxu2  ;;  %v844_v53 = vpop.f32.mrf.mxu0  ;;  %1374 = vmatpush.bf16.msra.mxu1 %v5008_v36  ;;  %v8167_v36 = vld [vmem:[%s11285_s1 + $0x10] sm:$0xff] }
 0x107   :  { %v858_v11 = vpop.f32.mrf.mxu1  ;;  %v886_v14 = vpop.f32.mrf.mxu3  ;;  %v876_v46 = vadd.f32 %v872_v48, %v860_v39  ;;  %v8039_v48 = vld [vmem:[%s11285_s1 + $0x78] sm:$0xff]  ;;  %v8191_v39 = vld [vmem:[%s11285_s1 + $0x8] sm:$0xff] }
 0x108   :  { %1362 = vmatpush.bf16.msra.mxu0 %v4988_v26  ;;  %11395 = vst [vmem:[#allocation11_spill] sm:$0xff] %v8039_v48  ;;  %v8185_v26 = vld [vmem:[%s11285_s1 + $0x48] sm:$0xff] }
 0x109   :  { %1349 = vmatpush.bf16.msrb.mxu3 %v4984_v19  ;;  %v890_v47 = vadd.f32 %v886_v14, %v876_v46  ;;  %v8057_v14 = vld [vmem:[%s11285_s1 + $0xf8] sm:$0xff]  ;;  %v757_v19 = vmax.f32 %v756_v15, 0.0  ;;  %v8215_v46 = vld [vmem:[%s11285_s1] sm:$0xff]  ;;  %v8283_v15 = vld [vmem:[%s11285_s1 + $0x1f0] sm:$0xff] }
 0x10a   :  { %1375 = vmatpush.bf16.msra.mxu1 %v4992_v45  ;;  %v8209_v45 = vld [vmem:[%s11285_s1 + $0x40] sm:$0xff] }
 0x10b   :  { %v758_v24 = vpack.c.bf16 %v757_v19, %v757_v19  ;;  %v8289_v19 = vld [vmem:[%s11285_s1 + $0x128] sm:$0xff] }
 0x10e   :  { %v874_v28 = vpop.f32.mrf.mxu2 }
 0x10f   :  { %v888_v35 = vpop.f32.mrf.mxu3  ;;  %v8119_v28 = vld [vmem:[%s11285_s1 + $0x20] sm:$0xff] }
 0x110   :  { %v8161_v35 = vld [vmem:[%s11285_s1 + $0x50] sm:$0xff] }
 0x11e   :  { %v900_v49 = vpop.f32.mrf.mxu0 }
 0x11f   :  { %v916_v50 = vpop.f32.mrf.mxu1  ;;  %v904_v52 = vadd.f32 %v900_v49, %v890_v47  ;;  %v8221_v47 = vld [vmem:[%s11285_s1 + $0x138] sm:$0xff] }
 0x120   :  { %v8227_v49 = vld [vmem:[%s11285_s1 + $0x178] sm:$0xff] }
 0x121   :  { %v920_v53 = vadd.f32 %v916_v50, %v904_v52  ;;  %v8233_v50 = vld [vmem:[%s11285_s1 + $0x80] sm:$0xff] }
 0x122   :  { %v8239_v52 = vld [vmem:[%s11285_s1 + $0xc0] sm:$0xff] }
 0x123   :  { %v921_v56 = vadd.f32 %v8033_v29, %v920_v53  ;;  %v8245_v53 = vld [vmem:[%s11285_s1 + $0x1b8] sm:$0xff] }
 0x125   :  { %v922_v58 = vmax.f32 %v921_v56, 0.0  ;;  %v8251_v56 = vld [vmem:[%s11285_s1 + $0x1f8] sm:$0xff] }
 0x126   :  { %v902_v0 = vpop.f32.mrf.mxu0 }
 0x127   :  { %v918_v11 = vpop.f32.mrf.mxu1  ;;  %v923_v60 = vpack.c.bf16 %v922_v58, %v922_v58  ;;  %v5105_v58 = vld [vmem:[%s11284_s0 + $0x4] sm:$0x1]  ;;  %v6797_v0 = vld [vmem:[%s11284_s0 + $0x2] sm:$0x1] }
 0x128   :  { %v8264_v11 = vld [vmem:[%s11285_s1 + $0x130] sm:$0xff] }
 0x129   :  { %1125 = vmatmul.bf16.vlgmr.msra.gmra.mxu2 %v923_v60  ;;  %1138 = vmatmul.bf16.vlgmr.msra.gmra.mxu3 %v923_v60 }
 0x12a   :  { %1151 = vmatmul.bf16.vlgmr.msrb.gmra.mxu0 %v923_v60  ;;  %1164 = vmatmul.bf16.vlgmr.msrb.gmra.mxu1 %v923_v60  ;;  %v8270_v60 = vld [vmem:[%s11285_s1 + $0x170] sm:$0xff] }
 0x12b   :  { %1381 = vmatpush.bf16.msra.mxu2 %v8039_v48  ;;  %1394 = vmatpush.bf16.msra.mxu3 %v8045_v12 }
 0x12c   :  { %1409 = vmatpush.bf16.msrb.mxu0 %v8051_v13  ;;  %1423 = vmatpush.bf16.msrb.mxu1 %v8057_v14 }
 0x12f   :  { %1382 = vmatpush.bf16.msra.mxu2 %v8065_v18  ;;  %1395 = vmatpush.bf16.msra.mxu3 %v8071_v57 }
 0x130   :  { %1410 = vmatpush.bf16.msrb.mxu0 %v8077_v25  ;;  %1424 = vmatpush.bf16.msrb.mxu1 %v8083_v54 }
 0x133   :  { %1383 = vmatpush.bf16.msra.mxu2 %v8089_v20  ;;  %1396 = vmatpush.bf16.msra.mxu3 %v8095_v21 }
 0x134   :  { %1411 = vmatpush.bf16.msrb.mxu0 %v8101_v22  ;;  %1425 = vmatpush.bf16.msrb.mxu1 %v8107_v23 }
 0x137   :  { %1384 = vmatpush.bf16.msra.mxu2 %v8113_v27  ;;  %1397 = vmatpush.bf16.msra.mxu3 %v8119_v28 }
 0x138   :  { %1412 = vmatpush.bf16.msrb.mxu0 %v8125_v30  ;;  %1426 = vmatpush.bf16.msrb.mxu1 %v8131_v40 }
 0x139   :  { %1337 = vmatmul.bf16.vlgmr.msrb.gmra.mxu2 %v758_v24  ;;  %1350 = vmatmul.bf16.vlgmr.msrb.gmra.mxu3 %v758_v24 }
 0x13a   :  { %1363 = vmatmul.bf16.vlgmr.msra.gmra.mxu0 %v758_v24  ;;  %1376 = vmatmul.bf16.vlgmr.msra.gmra.mxu1 %v758_v24  ;;  %v8301_v24 = vld [vmem:[%s11285_s1 + $0x1a8] sm:$0xff] }
 0x13b   :  { %1385 = vmatpush.bf16.msra.mxu2 %v8137_v31  ;;  %1398 = vmatpush.bf16.msra.mxu3 %v8143_v32  ;;  %11397 = vst [vmem:[#allocation6_spill] sm:$0xff] %v8301_v24 }
 0x13c   :  { %1413 = vmatpush.bf16.msrb.mxu0 %v8149_v33  ;;  %1427 = vmatpush.bf16.msrb.mxu1 %v8155_v34 }
 0x13f   :  { %1386 = vmatpush.bf16.msra.mxu2 %v8161_v35  ;;  %1399 = vmatpush.bf16.msra.mxu3 %v8167_v36 }
 0x140   :  { %1414 = vmatpush.bf16.msrb.mxu0 %v8173_v37  ;;  %1428 = vmatpush.bf16.msrb.mxu1 %v8179_v38 }
 0x143   :  { %1387 = vmatpush.bf16.msra.mxu2 %v8185_v26  ;;  %1400 = vmatpush.bf16.msra.mxu3 %v8191_v39 }
 0x144   :  { %1415 = vmatpush.bf16.msrb.mxu0 %v8197_v42  ;;  %1429 = vmatpush.bf16.msrb.mxu1 %v8203_v44 }
 0x147   :  { %1388 = vmatpush.bf16.msra.mxu2 %v8209_v45  ;;  %1401 = vmatpush.bf16.msra.mxu3 %v8215_v46 }
 0x148   :  { %1416 = vmatpush.bf16.msrb.mxu0 %v8233_v50  ;;  %1430 = vmatpush.bf16.msrb.mxu1 %v8239_v52 }
 0x14a   :  { %1389 = vmatmul.bf16.vlgmr.msra.gmra.mxu2 %v7568_v10  ;;  %1402 = vmatmul.bf16.vlgmr.msra.gmra.mxu3 %v6797_v0  ;;  %v8277_v10 = vld [vmem:[%s11285_s1 + $0x1b0] sm:$0xff]  ;;  %v8313_v0 = vld [vmem:[%s11285_s1 + $0x120] sm:$0xff] }
 0x14b   :  { %1437 = vmatpush.bf16.msrb.mxu2 %v8221_v47  ;;  %1453 = vmatpush.bf16.msrb.mxu3 %v8227_v49  ;;  %11399 = vst [vmem:[#allocation8_spill] sm:$0xff] %v8313_v0 }
 0x14c   :  { %1467 = vmatpush.bf16.msra.mxu0 %v8245_v53  ;;  %1481 = vmatpush.bf16.msra.mxu1 %v8251_v56 }
 0x14d   :  { %1417 = vmatmul.bf16.vlgmr.msrb.gmra.mxu0 %v5105_v58  ;;  %1431 = vmatmul.bf16.vlgmr.msrb.gmra.mxu1 %v7483_v59  ;;  %v8295_v59 = vld [vmem:[%s11285_s1 + $0x168] sm:$0xff] }
 0x14e   :  { %11396 = vst [vmem:[#allocation5_spill] sm:$0xff] %v8295_v59  ;;  %v8307_v58 = vld [vmem:[%s11285_s1 + $0x1e8] sm:$0xff] }
 0x14f   :  { %1438 = vmatpush.bf16.msrb.mxu2 %v8264_v11  ;;  %1454 = vmatpush.bf16.msrb.mxu3 %v8270_v60  ;;  %11398 = vst [vmem:[#allocation7_spill] sm:$0xff] %v8307_v58 }
 0x150   :  { %1468 = vmatpush.bf16.msra.mxu0 %v8277_v10  ;;  %1482 = vmatpush.bf16.msra.mxu1 %v8283_v15 }
 0x153   :  { %1439 = vmatpush.bf16.msrb.mxu2 %v8289_v19  ;;  %1455 = vmatpush.bf16.msrb.mxu3 %v8295_v59  ;;  %v8319_v59 = vld [vmem:[%s11285_s1 + $0x160] sm:$0xff] }
 0x154   :  { %1469 = vmatpush.bf16.msra.mxu0 %v8301_v24  ;;  %1483 = vmatpush.bf16.msra.mxu1 %v8307_v58  ;;  %11400 = vst [vmem:[#allocation9_spill] sm:$0xff] %v8319_v59  ;;  %v8325_v24 = vld [vmem:[%s11285_s1 + $0x1a0] sm:$0xff] }
 0x155   :  { %11401 = vst [vmem:[#allocation10_spill] sm:$0xff] %v8325_v24  ;;  %v8331_v58 = vld [vmem:[%s11285_s1 + $0x1e0] sm:$0xff] }
 0x156   :  { %11402 = vst [vmem:[#allocation12_spill] sm:$0xff] %v8331_v58 }
 0x157   :  { %1440 = vmatpush.bf16.msrb.mxu2 %v8313_v0  ;;  %1456 = vmatpush.bf16.msrb.mxu3 %v8319_v59  ;;  %v8337_v0 = vld [vmem:[%s11285_s1 + $0x118] sm:$0xff] }
 0x158   :  { %1470 = vmatpush.bf16.msra.mxu0 %v8325_v24  ;;  %1484 = vmatpush.bf16.msra.mxu1 %v8331_v58  ;;  %11403 = vst [vmem:[#allocation13_spill] sm:$0xff] %v8337_v0  ;;  %v8343_v59 = vld [vmem:[%s11285_s1 + $0x158] sm:$0xff] }
 0x159   :  { %11404 = vst [vmem:[#allocation14_spill] sm:$0xff] %v8343_v59  ;;  %v8349_v24 = vld [vmem:[%s11285_s1 + $0x198] sm:$0xff] }
 0x15a   :  { %11405 = vst [vmem:[#allocation15_spill] sm:$0xff] %v8349_v24  ;;  %v8355_v58 = vld [vmem:[%s11285_s1 + $0x1d8] sm:$0xff] }
 0x15b   :  { %1441 = vmatpush.bf16.msrb.mxu2 %v8337_v0  ;;  %1457 = vmatpush.bf16.msrb.mxu3 %v8343_v59  ;;  %11406 = vst [vmem:[#allocation16_spill] sm:$0xff] %v8355_v58  ;;  %v8361_v0 = vld [vmem:[%s11285_s1 + $0x110] sm:$0xff] }
 0x15c   :  { %1471 = vmatpush.bf16.msra.mxu0 %v8349_v24  ;;  %1485 = vmatpush.bf16.msra.mxu1 %v8355_v58  ;;  %11407 = vst [vmem:[#allocation17_spill] sm:$0xff] %v8361_v0  ;;  %v8367_v59 = vld [vmem:[%s11285_s1 + $0x150] sm:$0xff] }
 0x15d   :  { %v8373_v24 = vld [vmem:[%s11285_s1 + $0x190] sm:$0xff] }
 0x15e   :  { %11408 = vst [vmem:[#allocation18_spill] sm:$0xff] %v8373_v24  ;;  %v8379_v58 = vld [vmem:[%s11285_s1 + $0x1d0] sm:$0xff] }
 0x15f   :  { %1442 = vmatpush.bf16.msrb.mxu2 %v8361_v0  ;;  %1458 = vmatpush.bf16.msrb.mxu3 %v8367_v59  ;;  %v8385_v0 = vld [vmem:[%s11285_s1 + $0x108] sm:$0xff] }
 0x160   :  { %1472 = vmatpush.bf16.msra.mxu0 %v8373_v24  ;;  %1486 = vmatpush.bf16.msra.mxu1 %v8379_v58  ;;  %v5106_v24 = vld [vmem:[%s11284_s0 + $0x9] sm:$0x1] }
 0x163   :  { %1443 = vmatpush.bf16.msrb.mxu2 %v8385_v0  ;;  %1459 = vmatpush.bf16.msrb.mxu3 %v7420_v61  ;;  %v6532_v61 = vld [vmem:[%s11287_s3 + $0x2ec] sm:$0xf0] }
 0x164   :  { %1473 = vmatpush.bf16.msra.mxu0 %v7425_v62  ;;  %1487 = vmatpush.bf16.msra.mxu1 %v11394_v16  ;;  %v5238_v62 = vld [vmem:[%s11287_s3 + $0x2c0] sm:$0xf]  ;;  %v6531_v16 = vld [vmem:[%s11287_s3 + $0x2ec] sm:$0xf] }
 0x167   :  { %1444 = vmatpush.bf16.msrb.mxu2 %v7437_v41  ;;  %1460 = vmatpush.bf16.msrb.mxu3 %v7444_v43  ;;  %v6528_v41 = vld [vmem:[%s11287_s3 + $0x2cc] sm:$0xf0] }
 0x168   :  { %1474 = vmatpush.bf16.msra.mxu0 %v11388_v7  ;;  %1488 = vmatpush.bf16.msra.mxu1 %v7460_v51  ;;  %v5107_v51 = vld [vmem:[%s11284_s0 + $0xe] sm:$0x1] }
 0x16a   :  { %1445 = vmatmul.bf16.vlgmr.msrb.gmra.mxu2 %v7602_v3  ;;  %1461 = vmatmul.bf16.vlgmr.msrb.gmra.mxu3 %v5106_v24 }
 0x16b   :  { %1497 = vmatpush.bf16.msra.mxu2 %v7454_v55  ;;  %1475 = vmatmul.bf16.vlgmr.msra.gmra.mxu0 %v7555_v9  ;;  %v5254_v55 = vld [vmem:[%s11287_s3 + $0x2e0] sm:$0xf] }
 0x16c   :  { %1489 = vmatmul.bf16.vlgmr.msra.gmra.mxu1 %v7628_v17  ;;  %v5264_v17 = vld [vmem:[%s11287_s3 + $0x2f8] sm:$0xf0] }
 0x16d   :  { %v5267_v24 = vor.u32 %v6531_v16, %v5264_v17  ;;  %v5248_v16 = vld [vmem:[%s11287_s3 + $0x2d8] sm:$0xf0] }
 0x16f   :  { %1498 = vmatpush.bf16.msra.mxu2 %v7473_v63  ;;  %v5255_v63 = vor.u32 %v6532_v61, %v5254_v55  ;;  %v5256_v55 = vld [vmem:[%s11287_s3 + $0x2f0] sm:$0xf0]  ;;  %v5206_v61 = vld [vmem:[%s11287_s3 + $0x280] sm:$0xf] }
 0x171   :  { %1707 = vmatpush.bf16.msra.mxu3 %v5255_v63  ;;  %v6520_v63 = vld [vmem:[%s11287_s3 + $0x28c] sm:$0xf0] }
 0x173   :  { %1499 = vmatpush.bf16.msra.mxu2 %v7500_v1 }
 0x177   :  { %1500 = vmatpush.bf16.msra.mxu2 %v7510_v2  ;;  %v5239_v2 = vor.u32 %v6528_v41, %v5238_v62  ;;  %v5207_v41 = vor.u32 %v6520_v63, %v5206_v61 }
 0x179   :  { %1708 = vmatpush.bf16.msra.mxu3 %v5239_v2  ;;  %v5262_v2 = vld [vmem:[%s11287_s3 + $0x2e8] sm:$0xf] }
 0x17b   :  { %1501 = vmatpush.bf16.msra.mxu2 %v7519_v4 }
 0x17f   :  { %1502 = vmatpush.bf16.msra.mxu2 %v7528_v5 }
 0x183   :  { %1503 = vmatpush.bf16.msra.mxu2 %v7537_v6  ;;  %v5222_v6 = vld [vmem:[%s11287_s3 + $0x2a0] sm:$0xf] }
 0x187   :  { %1504 = vmatpush.bf16.msra.mxu2 %v7546_v8  ;;  %v6524_v8 = vld [vmem:[%s11287_s3 + $0x2ac] sm:$0xf0] }
 0x188   :  { %v5223_v7 = vor.u32 %v6524_v8, %v5222_v6  ;;  %v6533_v6 = vld [vmem:[%s11287_s3 + $0x2f4] sm:$0xf0]  ;;  %v6527_v8 = vld [vmem:[%s11287_s3 + $0x2cc] sm:$0xf] }
 0x189   :  { %v5251_v17 = vor.u32 %v6527_v8, %v5248_v16  ;;  %v6523_v16 = vld [vmem:[%s11287_s3 + $0x2ac] sm:$0xf] }
 0x18a   :  { %1505 = vmatmul.bf16.vlgmr.msra.gmra.mxu2 %v5107_v51  ;;  %1709 = vmatpush.bf16.msra.mxu3 %v5223_v7  ;;  %v6530_v51 = vld [vmem:[%s11287_s3 + $0x2e4] sm:$0xf]  ;;  %v5263_v7 = vor.u32 %v6533_v6, %v5262_v2  ;;  %v5246_v2 = vld [vmem:[%s11287_s3 + $0x2c8] sm:$0xf]  ;;  %v6529_v6 = vld [vmem:[%s11287_s3 + $0x2d4] sm:$0xf0] }
 0x18b   :  { %1746 = vmatpush.bf16.msrb.mxu2 %v5267_v24  ;;  %v5259_v62 = vor.u32 %v6530_v51, %v5256_v55  ;;  %v6526_v24 = vld [vmem:[%s11287_s3 + $0x2c4] sm:$0xf]  ;;  %v5240_v51 = vld [vmem:[%s11287_s3 + $0x2d0] sm:$0xf0]  ;;  %v5190_v55 = vld [vmem:[%s11287_s3 + $0x260] sm:$0xf] }
 0x18c   :  { %1733 = vmatpush.bf16.msrb.mxu1 %v5263_v7  ;;  %v5243_v63 = vor.u32 %v6526_v24, %v5240_v51  ;;  %v5247_v7 = vor.u32 %v6529_v6, %v5246_v2  ;;  %v6522_v24 = vld [vmem:[%s11287_s3 + $0x2a4] sm:$0xf]  ;;  %v6519_v2 = vld [vmem:[%s11287_s3 + $0x28c] sm:$0xf] }
 0x18d   :  { %1720 = vmatpush.bf16.msrb.mxu0 %v5259_v62 }
 0x18e   :  { %1710 = vmatpush.bf16.msra.mxu3 %v5207_v41  ;;  %v6516_v41 = vld [vmem:[%s11287_s3 + $0x26c] sm:$0xf0] }
 0x18f   :  { %1747 = vmatpush.bf16.msrb.mxu2 %v5251_v17  ;;  %v5232_v17 = vld [vmem:[%s11287_s3 + $0x2b8] sm:$0xf0] }
 0x190   :  { %v5235_v51 = vor.u32 %v6523_v16, %v5232_v17  ;;  %1734 = vmatpush.bf16.msrb.mxu1 %v5247_v7 }
 0x191   :  { %1721 = vmatpush.bf16.msrb.mxu0 %v5243_v63  ;;  %v5230_v63 = vld [vmem:[%s11287_s3 + $0x2a8] sm:$0xf] }
 0x193   :  { %1748 = vmatpush.bf16.msrb.mxu2 %v5235_v51 }
 0x1a7   :  { %v1152_v43 = vpop.f32.mrf.mxu0  ;;  %v1165_v1 = vpop.f32.mrf.mxu1 }
 0x1ac   :  { %v8424_v4 = vpop.f32.mrf.mxu2  ;;  %v8426_v5 = vpop.f32.mrf.mxu3 }
 0x1af   :  { %v1154_v9 = vpop.f32.mrf.mxu0  ;;  %v1167_v3 = vpop.f32.mrf.mxu1 }
 0x1b4   :  { %v1128_v9 = vpop.f32.mrf.mxu2  ;;  %v1141_v3 = vpop.f32.mrf.mxu3 }
 0x1b5   :  { %v5191_v3 = vor.u32 %v6516_v41, %v5190_v55  ;;  %v6512_v55 = vld [vmem:[%s11287_s3 + $0x24c] sm:$0xf0]  ;;  %v6525_v41 = vld [vmem:[%s11287_s3 + $0x2b4] sm:$0xf0] }
 0x1b6   :  { %v5231_v6 = vor.u32 %v6525_v41, %v5230_v63 }
 0x1b7   :  { %v1364_v61 = vpop.f32.mrf.mxu0  ;;  %v1377_v62 = vpop.f32.mrf.mxu1  ;;  %1711 = vmatpush.bf16.msra.mxu3 %v5191_v3  ;;  %v5216_v3 = vld [vmem:[%s11287_s3 + $0x298] sm:$0xf0] }
 0x1b8   :  { %v8482_v8 = vadd.f32 %v1364_v61, %v1152_v43  ;;  %v8484_v9 = vadd.f32 %v1377_v62, %v1165_v1  ;;  %v5224_v43 = vld [vmem:[%s11287_s3 + $0x2b0] sm:$0xf0]  ;;  %v5174_v1 = vld [vmem:[%s11287_s3 + $0x240] sm:$0xf]  ;;  %v5219_v17 = vor.u32 %v6519_v2, %v5216_v3  ;;  %1735 = vmatpush.bf16.msrb.mxu1 %v5231_v6  ;;  %v6508_v2 = vld [vmem:[%s11287_s3 + $0x22c] sm:$0xf0] }
 0x1b9   :  { %v5227_v61 = vor.u32 %v6522_v24, %v5224_v43  ;;  %v5175_v62 = vor.u32 %v6512_v55, %v5174_v1  ;;  %v5214_v3 = vld [vmem:[%s11287_s3 + $0x288] sm:$0xf] }
 0x1ba   :  { %11409 = vst [vmem:[#allocation19_spill] sm:$0xff] %v8482_v8  ;;  %1749 = vmatpush.bf16.msrb.mxu2 %v5219_v17 }
 0x1bb   :  { %11410 = vst [vmem:[#allocation20_spill] sm:$0xff] %v8484_v9  ;;  %1722 = vmatpush.bf16.msrb.mxu0 %v5227_v61  ;;  %1712 = vmatpush.bf16.msra.mxu3 %v5175_v62  ;;  %v5158_v62 = vld [vmem:[%s11287_s3 + $0x220] sm:$0xf] }
 0x1bc   :  { %v1338_v7 = vpop.f32.mrf.mxu2  ;;  %v1351_v16 = vpop.f32.mrf.mxu3  ;;  %v5159_v6 = vor.u32 %v6508_v2, %v5158_v62  ;;  %v5142_v62 = vld [vmem:[%s11287_s3 + $0x200] sm:$0xf]  ;;  %v6504_v2 = vld [vmem:[%s11287_s3 + $0x20c] sm:$0xf0] }
 0x1bd   :  { %v8517_v24 = vadd.f32 %v1338_v7, %v8424_v4  ;;  %v8520_v43 = vadd.f32 %v1351_v16, %v8426_v5  ;;  %v6518_v4 = vld [vmem:[%s11287_s3 + $0x284] sm:$0xf]  ;;  %v5208_v5 = vld [vmem:[%s11287_s3 + $0x290] sm:$0xf0]  ;;  %v6521_v7 = vld [vmem:[%s11287_s3 + $0x294] sm:$0xf0] }
 0x1be   :  { %v5211_v61 = vor.u32 %v6518_v4, %v5208_v5  ;;  %v6515_v16 = vld [vmem:[%s11287_s3 + $0x26c] sm:$0xf]  ;;  %v5215_v17 = vor.u32 %v6521_v7, %v5214_v3  ;;  %v6514_v4 = vld [vmem:[%s11287_s3 + $0x264] sm:$0xf]  ;;  %v5192_v5 = vld [vmem:[%s11287_s3 + $0x270] sm:$0xf0] }
 0x1bf   :  { %11411 = vst [vmem:[#allocation21_spill] sm:$0xff] %v8517_v24  ;;  %v1366_v1 = vpop.f32.mrf.mxu0  ;;  %v1379_v55 = vpop.f32.mrf.mxu1  ;;  %1713 = vmatpush.bf16.msra.mxu3 %v5159_v6  ;;  %v5143_v6 = vor.u32 %v6504_v2, %v5142_v62  ;;  %v5198_v3 = vld [vmem:[%s11287_s3 + $0x268] sm:$0xf]  ;;  %v6517_v7 = vld [vmem:[%s11287_s3 + $0x274] sm:$0xf0] }
 0x1c0   :  { %1723 = vmatpush.bf16.msrb.mxu0 %v5211_v61  ;;  %v5200_v1 = vld [vmem:[%s11287_s3 + $0x278] sm:$0xf0]  ;;  %1736 = vmatpush.bf16.msrb.mxu1 %v5215_v17  ;;  %v5195_v61 = vor.u32 %v6514_v4, %v5192_v5  ;;  %v5199_v17 = vor.u32 %v6517_v7, %v5198_v3  ;;  %v5176_v4 = vld [vmem:[%s11287_s3 + $0x250] sm:$0xf0]  ;;  %v6513_v3 = vld [vmem:[%s11287_s3 + $0x254] sm:$0xf0] }
 0x1c1   :  { %v6507_v7 = vld [vmem:[%s11287_s3 + $0x22c] sm:$0xf] }
 0x1c3   :  { %1714 = vmatpush.bf16.msra.mxu3 %v5143_v6  ;;  %v5168_v6 = vld [vmem:[%s11287_s3 + $0x238] sm:$0xf0] }
 0x1c4   :  { %v1340_v51 = vpop.f32.mrf.mxu2  ;;  %v1353_v63 = vpop.f32.mrf.mxu3  ;;  %1724 = vmatpush.bf16.msrb.mxu0 %v5195_v61  ;;  %v5182_v61 = vld [vmem:[%s11287_s3 + $0x248] sm:$0xf]  ;;  %1737 = vmatpush.bf16.msrb.mxu1 %v5199_v17 }
 0x1c5   :  { %v5203_v63 = vor.u32 %v6515_v16, %v5200_v1  ;;  %v6511_v16 = vld [vmem:[%s11287_s3 + $0x24c] sm:$0xf]  ;;  %v5184_v1 = vld [vmem:[%s11287_s3 + $0x258] sm:$0xf0]  ;;  %v5166_v17 = vld [vmem:[%s11287_s3 + $0x228] sm:$0xf] }
 0x1c6   :  { %v5187_v2 = vor.u32 %v6511_v16, %v5184_v1  ;;  %v6506_v16 = vld [vmem:[%s11287_s3 + $0x224] sm:$0xf]  ;;  %v5160_v1 = vld [vmem:[%s11287_s3 + $0x230] sm:$0xf0] }
 0x1c7   :  { %1750 = vmatpush.bf16.msrb.mxu2 %v5203_v63  ;;  %v6510_v63 = vld [vmem:[%s11287_s3 + $0x244] sm:$0xf]  ;;  %1763 = vmatpush.bf16.msrb.mxu3 %v8039_v48  ;;  %v5144_v48 = vld [vmem:[%s11287_s3 + $0x210] sm:$0xf0] }
 0x1c8   :  { %v5179_v24 = vor.u32 %v6510_v63, %v5176_v4  ;;  %v5171_v63 = vor.u32 %v6507_v7, %v5168_v6  ;;  %v6509_v4 = vld [vmem:[%s11287_s3 + $0x234] sm:$0xf0]  ;;  %v6502_v6 = vld [vmem:[%s11287_s3 + $0x204] sm:$0xf] }
 0x1ca   :  { %v8522_v41 = vpop.f32.mrf.mxu0  ;;  %v8524_v9 = vpop.f32.mrf.mxu1  ;;  %1725 = vmatpush.bf16.msrb.mxu0 %v5179_v24  ;;  %v5167_v24 = vor.u32 %v6509_v4, %v5166_v17 }
 0x1cb   :  { %1751 = vmatpush.bf16.msrb.mxu2 %v5187_v2  ;;  %1764 = vmatpush.bf16.msrb.mxu3 %v8065_v18 }
 0x1cd   :  { %v8550_v55 = vpop.f32.mrf.mxu2  ;;  %v8552_v51 = vpop.f32.mrf.mxu3 }
 0x1ce   :  { %v1404_v17 = vadd.f32 %v8552_v51, %v8550_v55 }
 0x1cf   :  { %1752 = vmatpush.bf16.msrb.mxu2 %v5171_v63  ;;  %1765 = vmatpush.bf16.msrb.mxu3 %v8089_v20 }
 0x1d2   :  { %v1420_v5 = vpop.f32.mrf.mxu0  ;;  %v1434_v62 = vpop.f32.mrf.mxu1 }
 0x1d3   :  { %v5183_v5 = vor.u32 %v6513_v3, %v5182_v61  ;;  %v5163_v62 = vor.u32 %v6506_v16, %v5160_v1  ;;  %v6503_v61 = vld [vmem:[%s11287_s3 + $0x20c] sm:$0xf]  ;;  %v5152_v3 = vld [vmem:[%s11287_s3 + $0x218] sm:$0xf0]  ;;  %v5150_v1 = vld [vmem:[%s11287_s3 + $0x208] sm:$0xf]  ;;  %1766 = vmatpush.bf16.msrb.mxu3 %v8113_v27 }
 0x1d4   :  { %v5155_v16 = vor.u32 %v6503_v61, %v5152_v3  ;;  %v1422_v61 = vadd.f32 %v8522_v41, %v1404_v17 }
 0x1d5   :  { %v1392_v2 = vpop.f32.mrf.mxu2  ;;  %v1405_v7 = vpop.f32.mrf.mxu3  ;;  %1738 = vmatpush.bf16.msrb.mxu1 %v5183_v5  ;;  %1726 = vmatpush.bf16.msrb.mxu0 %v5163_v62 }
 0x1d6   :  { %v6505_v2 = vld [vmem:[%s11287_s3 + $0x214] sm:$0xf0]  ;;  %v5147_v7 = vor.u32 %v6502_v6, %v5144_v48  ;;  %1753 = vmatpush.bf16.msrb.mxu2 %v5155_v16  ;;  %v1436_v55 = vadd.f32 %v8524_v9, %v1422_v61  ;;  %v11423_v61 = vld [vmem:[#allocation17_spill] sm:$0xff] }
 0x1d7   :  { %v5151_v8 = vor.u32 %v6505_v2, %v5150_v1  ;;  %1767 = vmatpush.bf16.msrb.mxu3 %v8137_v31 }
 0x1d9   :  { %1739 = vmatpush.bf16.msrb.mxu1 %v5167_v24  ;;  %1727 = vmatpush.bf16.msrb.mxu0 %v5147_v7 }
 0x1da   :  { %1803 = vmatpush.bf16.msra.mxu2 %v8057_v14 }
 0x1db   :  { %1768 = vmatpush.bf16.msrb.mxu3 %v8161_v35 }
 0x1dd   :  { %1776 = vmatpush.bf16.msra.mxu0 %v8045_v12  ;;  %1740 = vmatpush.bf16.msrb.mxu1 %v5151_v8 }
 0x1de   :  { %1804 = vmatpush.bf16.msra.mxu2 %v8083_v54 }
 0x1df   :  { %1769 = vmatpush.bf16.msrb.mxu3 %v8185_v26 }
 0x1e1   :  { %1789 = vmatpush.bf16.msra.mxu1 %v8051_v13  ;;  %1777 = vmatpush.bf16.msra.mxu0 %v8071_v57 }
 0x1e2   :  { %1805 = vmatpush.bf16.msra.mxu2 %v8107_v23 }
 0x1e3   :  { %1770 = vmatpush.bf16.msrb.mxu3 %v8209_v45 }
 0x1e5   :  { %1790 = vmatpush.bf16.msra.mxu1 %v8077_v25  ;;  %1778 = vmatpush.bf16.msra.mxu0 %v8095_v21 }
 0x1e6   :  { %1806 = vmatpush.bf16.msra.mxu2 %v8131_v40 }
 0x1e8   :  { %v1476_v48 = vpop.f32.mrf.mxu0 }
 0x1e9   :  { %v1490_v5 = vpop.f32.mrf.mxu1  ;;  %1791 = vmatpush.bf16.msra.mxu1 %v8101_v22  ;;  %1779 = vmatpush.bf16.msra.mxu0 %v8119_v28 }
 0x1ea   :  { %1807 = vmatpush.bf16.msra.mxu2 %v8155_v34 }
 0x1ed   :  { %v1446_v8 = vpop.f32.mrf.mxu2  ;;  %v1462_v63 = vpop.f32.mrf.mxu3  ;;  %1792 = vmatpush.bf16.msra.mxu1 %v8125_v30  ;;  %1780 = vmatpush.bf16.msra.mxu0 %v8143_v32 }
 0x1ee   :  { %1808 = vmatpush.bf16.msra.mxu2 %v8179_v38  ;;  %v1450_v51 = vadd.f32 %v1446_v8, %v1436_v55  ;;  %v11420_v8 = vld [vmem:[#allocation16_spill] sm:$0xff]  ;;  %v8715_v55 = vld [vmem:[%s11285_s1 + $0x148] sm:$0xff] }
 0x1f0   :  { %v1478_v4 = vpop.f32.mrf.mxu0  ;;  %v1466_v41 = vadd.f32 %v1462_v63, %v1450_v51  ;;  %v11421_v63 = vld [vmem:[#allocation14_spill] sm:$0xff] }
 0x1f1   :  { %v1492_v62 = vpop.f32.mrf.mxu1  ;;  %1793 = vmatpush.bf16.msra.mxu1 %v8149_v33  ;;  %1781 = vmatpush.bf16.msra.mxu0 %v8167_v36  ;;  %v8739_v51 = vld [vmem:[%s11284_s0 + $0x10] sm:$0x1] }
 0x1f2   :  { %1809 = vmatpush.bf16.msra.mxu2 %v8203_v44  ;;  %v1480_v24 = vadd.f32 %v1476_v48, %v1466_v41  ;;  %v11413_v48 = vld [vmem:[#allocation5_spill] sm:$0xff]  ;;  %v11422_v62 = vld [vmem:[#allocation15_spill] sm:$0xff] }
 0x1f3   :  { %v8744_v41 = vld [vmem:[%s11285_s1 + $0x238] sm:$0xff] }
 0x1f4   :  { %v1494_v16 = vadd.f32 %v1490_v5, %v1480_v24  ;;  %v11419_v5 = vld [vmem:[#allocation13_spill] sm:$0xff] }
 0x1f5   :  { %v1448_v3 = vpop.f32.mrf.mxu2  ;;  %v1464_v6 = vpop.f32.mrf.mxu3  ;;  %1794 = vmatpush.bf16.msra.mxu1 %v8173_v37  ;;  %1782 = vmatpush.bf16.msra.mxu0 %v8191_v39  ;;  %v8750_v24 = vld [vmem:[%s11285_s1 + $0x140] sm:$0xff] }
 0x1f6   :  { %1810 = vmatpush.bf16.msra.mxu2 %v8239_v52  ;;  %v11424_v3 = vld [vmem:[#allocation18_spill] sm:$0xff] }
 0x1f7   :  { %v8709_v6 = vld [vmem:[%s11285_s1 + $0x1c8] sm:$0xff] }
 0x1f9   :  { %1795 = vmatpush.bf16.msra.mxu1 %v8197_v42  ;;  %1783 = vmatpush.bf16.msra.mxu0 %v8215_v46 }
 0x1fd   :  { %1796 = vmatpush.bf16.msra.mxu1 %v8233_v50 }
 0x20d   :  { %v1506_v1 = vpop.f32.mrf.mxu2 }
 0x20e   :  { %v1510_v2 = vadd.f32 %v1506_v1, %v1494_v16  ;;  %v8756_v16 = vld [vmem:[%s11285_s1 + $0x180] sm:$0xff]  ;;  %v5268_v1 = vld [vmem:[%s11284_s0 + $0xf] sm:$0x1] }
 0x210   :  { %v1511_v7 = vadd.f32 %v8033_v29, %v1510_v2  ;;  %v11412_v29 = vld [vmem:[#allocation7_spill] sm:$0xff]  ;;  %v8765_v2 = vld [vmem:[%s11284_s0 + $0xb] sm:$0x1] }
 0x212   :  { %v1512_v17 = vmax.f32 %v1511_v7, 0.0  ;;  %v8772_v7 = vld [vmem:[%s11284_s0 + $0xc] sm:$0x1] }
 0x214   :  { %v1513_v9 = vpack.c.bf16 %v1512_v17, %v1512_v17  ;;  %v8778_v17 = vld [vmem:[%s11285_s1 + $0x230] sm:$0xff] }
 0x215   :  { %v1508_v4 = vpop.f32.mrf.mxu2 }
 0x216   :  { %1715 = vmatmul.bf16.vlgmr.msra.gmra.mxu3 %v1513_v9  ;;  %1728 = vmatmul.bf16.vlgmr.msrb.gmra.mxu0 %v1513_v9  ;;  %v8790_v4 = vld [vmem:[%s11285_s1 + $0x220] sm:$0xff] }
 0x217   :  { %1741 = vmatmul.bf16.vlgmr.msrb.gmra.mxu1 %v1513_v9  ;;  %1754 = vmatmul.bf16.vlgmr.msrb.gmra.mxu2 %v1513_v9  ;;  %v8784_v9 = vld [vmem:[%s11285_s1 + $0x228] sm:$0xff] }
 0x218   :  { %1817 = vmatpush.bf16.msra.mxu3 %v8221_v47  ;;  %1863 = vmatpush.bf16.msrb.mxu2 %v8251_v56  ;;  %v11414_v47 = vld [vmem:[#allocation6_spill] sm:$0xff]  ;;  %v11415_v56 = vld [vmem:[#allocation8_spill] sm:$0xff] }
 0x219   :  { %1831 = vmatpush.bf16.msrb.mxu0 %v8227_v49  ;;  %1847 = vmatpush.bf16.msrb.mxu1 %v8245_v53  ;;  %v11416_v49 = vld [vmem:[#allocation12_spill] sm:$0xff]  ;;  %v11417_v53 = vld [vmem:[#allocation9_spill] sm:$0xff] }
 0x21c   :  { %1818 = vmatpush.bf16.msra.mxu3 %v8264_v11  ;;  %1864 = vmatpush.bf16.msrb.mxu2 %v8283_v15  ;;  %v11418_v11 = vld [vmem:[#allocation10_spill] sm:$0xff] }
 0x21d   :  { %1832 = vmatpush.bf16.msrb.mxu0 %v8270_v60  ;;  %1848 = vmatpush.bf16.msrb.mxu1 %v8277_v10  ;;  %v8682_v60 = vld [vmem:[%s11284_s0 + $0x6] sm:$0x1]  ;;  %v6820_v10 = vld [vmem:[%s11284_s0 + $0x5] sm:$0x1]  ;;  %v6821_v15 = vld [vmem:[%s11284_s0 + $0xa] sm:$0x1] }
 0x220   :  { %1819 = vmatpush.bf16.msra.mxu3 %v8289_v19  ;;  %1865 = vmatpush.bf16.msrb.mxu2 %v11412_v29  ;;  %v8694_v19 = vld [vmem:[%s11284_s0 + $0x7] sm:$0x1]  ;;  %v8796_v29 = vld [vmem:[%s11285_s1 + $0x218] sm:$0xff] }
 0x221   :  { %1833 = vmatpush.bf16.msrb.mxu0 %v11413_v48  ;;  %1849 = vmatpush.bf16.msrb.mxu1 %v11414_v47  ;;  %11425 = vst [vmem:[#allocation7_spill] sm:$0xff] %v8796_v29  ;;  %v8802_v48 = vld [vmem:[%s11285_s1 + $0x210] sm:$0xff]  ;;  %v8808_v47 = vld [vmem:[%s11285_s1 + $0x208] sm:$0xff] }
 0x222   :  { %11426 = vst [vmem:[#allocation5_spill] sm:$0xff] %v8802_v48 }
 0x223   :  { %11427 = vst [vmem:[#allocation6_spill] sm:$0xff] %v8808_v47 }
 0x224   :  { %1820 = vmatpush.bf16.msra.mxu3 %v11415_v56  ;;  %1866 = vmatpush.bf16.msrb.mxu2 %v11416_v49  ;;  %v8814_v56 = vld [vmem:[%s11285_s1 + $0x200] sm:$0xff]  ;;  %v8820_v49 = vld [vmem:[%s11284_s0 + $0x11] sm:$0x1] }
 0x225   :  { %1834 = vmatpush.bf16.msrb.mxu0 %v11417_v53  ;;  %1850 = vmatpush.bf16.msrb.mxu1 %v11418_v11  ;;  %11428 = vst [vmem:[#allocation8_spill] sm:$0xff] %v8814_v56  ;;  %v5417_v53 = vld [vmem:[%s11287_s3 + $0x3e0] sm:$0xf]  ;;  %v6564_v11 = vld [vmem:[%s11287_s3 + $0x3ec] sm:$0xf0] }
 0x226   :  { %1771 = vmatmul.bf16.vlgmr.msrb.gmra.mxu3 %v8682_v60  ;;  %1784 = vmatmul.bf16.vlgmr.msra.gmra.mxu0 %v6820_v10  ;;  %v5425_v10 = vld [vmem:[%s11287_s3 + $0x3e8] sm:$0xf] }
 0x227   :  { %1811 = vmatmul.bf16.vlgmr.msra.gmra.mxu2 %v6821_v15  ;;  %1797 = vmatmul.bf16.vlgmr.msra.gmra.mxu1 %v8694_v19  ;;  %v5418_v15 = vor.u32 %v6564_v11, %v5417_v53  ;;  %v6562_v53 = vld [vmem:[%s11287_s3 + $0x3e4] sm:$0xf] }
 0x228   :  { %1821 = vmatpush.bf16.msra.mxu3 %v11419_v5  ;;  %1867 = vmatpush.bf16.msrb.mxu2 %v11420_v8  ;;  %v6565_v5 = vld [vmem:[%s11287_s3 + $0x3f4] sm:$0xf0]  ;;  %v6563_v8 = vld [vmem:[%s11287_s3 + $0x3ec] sm:$0xf] }
 0x229   :  { %1835 = vmatpush.bf16.msrb.mxu0 %v11421_v63  ;;  %1851 = vmatpush.bf16.msrb.mxu1 %v11422_v62  ;;  %v5427_v63 = vld [vmem:[%s11287_s3 + $0x3f8] sm:$0xf0]  ;;  %v5426_v62 = vor.u32 %v6565_v5, %v5425_v10  ;;  %v5409_v10 = vld [vmem:[%s11287_s3 + $0x3c8] sm:$0xf]  ;;  %v6561_v5 = vld [vmem:[%s11287_s3 + $0x3d4] sm:$0xf0] }
 0x22c   :  { %1822 = vmatpush.bf16.msra.mxu3 %v11423_v61  ;;  %1868 = vmatpush.bf16.msrb.mxu2 %v8379_v58  ;;  %v8727_v58 = vld [vmem:[%s11285_s1 + $0x100] sm:$0xff]  ;;  %v5430_v61 = vor.u32 %v6563_v8, %v5427_v63  ;;  %v5410_v63 = vor.u32 %v6561_v5, %v5409_v10  ;;  %v5393_v10 = vld [vmem:[%s11287_s3 + $0x3a8] sm:$0xf]  ;;  %v6557_v5 = vld [vmem:[%s11287_s3 + $0x3b4] sm:$0xf0] }
 0x22d   :  { %1836 = vmatpush.bf16.msrb.mxu0 %v8367_v59  ;;  %1852 = vmatpush.bf16.msrb.mxu1 %v11424_v3  ;;  %v8721_v59 = vld [vmem:[%s11285_s1 + $0x188] sm:$0xff]  ;;  %v5401_v3 = vld [vmem:[%s11287_s3 + $0x3c0] sm:$0xf] }
 0x230   :  { %1823 = vmatpush.bf16.msra.mxu3 %v8385_v0  ;;  %1869 = vmatpush.bf16.msrb.mxu2 %v8709_v6  ;;  %v8733_v0 = vld [vmem:[%s11285_s1 + $0x1c0] sm:$0xff] }
 0x231   :  { %1837 = vmatpush.bf16.msrb.mxu0 %v8715_v55  ;;  %1853 = vmatpush.bf16.msrb.mxu1 %v8721_v59 }
 0x234   :  { %1824 = vmatpush.bf16.msra.mxu3 %v8727_v58  ;;  %1870 = vmatpush.bf16.msrb.mxu2 %v8733_v0 }
 0x235   :  { %1838 = vmatpush.bf16.msrb.mxu0 %v8750_v24  ;;  %1854 = vmatpush.bf16.msrb.mxu1 %v8756_v16 }
 0x237   :  { %1825 = vmatmul.bf16.vlgmr.msra.gmra.mxu3 %v8765_v2  ;;  %1871 = vmatmul.bf16.vlgmr.msrb.gmra.mxu2 %v8739_v51 }
 0x238   :  { %1879 = vmatpush.bf16.msrb.mxu3 %v8744_v41  ;;  %1839 = vmatmul.bf16.vlgmr.msrb.gmra.mxu0 %v8772_v7 }
 0x239   :  { %1855 = vmatmul.bf16.vlgmr.msrb.gmra.mxu1 %v5268_v1  ;;  %v6560_v1 = vld [vmem:[%s11287_s3 + $0x3cc] sm:$0xf0]  ;;  %2089 = vmatpush.bf16.msra.mxu0 %v5418_v15  ;;  %v6559_v15 = vld [vmem:[%s11287_s3 + $0x3cc] sm:$0xf] }
 0x23a   :  { %v5402_v11 = vor.u32 %v6560_v1, %v5401_v3  ;;  %2115 = vmatpush.bf16.msra.mxu2 %v5426_v62  ;;  %v5411_v3 = vld [vmem:[%s11287_s3 + $0x3d8] sm:$0xf0]  ;;  %v5385_v1 = vld [vmem:[%s11287_s3 + $0x3a0] sm:$0xf]  ;;  %v6558_v62 = vld [vmem:[%s11287_s3 + $0x3c4] sm:$0xf] }
 0x23c   :  { %1880 = vmatpush.bf16.msrb.mxu3 %v8778_v17 }
 0x23d   :  { %2090 = vmatpush.bf16.msra.mxu0 %v5402_v11 }
 0x23e   :  { %2116 = vmatpush.bf16.msra.mxu2 %v5410_v63  ;;  %v6555_v63 = vld [vmem:[%s11287_s3 + $0x3ac] sm:$0xf] }
 0x240   :  { %1881 = vmatpush.bf16.msrb.mxu3 %v8784_v9 }
 0x244   :  { %1882 = vmatpush.bf16.msrb.mxu3 %v8790_v4 }
 0x248   :  { %1883 = vmatpush.bf16.msrb.mxu3 %v8796_v29 }
 0x24c   :  { %1884 = vmatpush.bf16.msrb.mxu3 %v8802_v48 }
 0x250   :  { %1885 = vmatpush.bf16.msrb.mxu3 %v8808_v47  ;;  %v5414_v47 = vor.u32 %v6559_v15, %v5411_v3  ;;  %v5395_v15 = vld [vmem:[%s11287_s3 + $0x3b8] sm:$0xf0]  ;;  %v5369_v3 = vld [vmem:[%s11287_s3 + $0x380] sm:$0xf] }
 0x254   :  { %1886 = vmatpush.bf16.msrb.mxu3 %v8814_v56  ;;  %v5419_v56 = vld [vmem:[%s11287_s3 + $0x3f0] sm:$0xf0] }
 0x255   :  { %v5422_v8 = vor.u32 %v6562_v53, %v5419_v56  ;;  %v6556_v56 = vld [vmem:[%s11287_s3 + $0x3ac] sm:$0xf0] }
 0x256   :  { %v5386_v53 = vor.u32 %v6556_v56, %v5385_v1  ;;  %v5398_v1 = vor.u32 %v6555_v63, %v5395_v15  ;;  %v5379_v63 = vld [vmem:[%s11287_s3 + $0x398] sm:$0xf0]  ;;  %v5353_v15 = vld [vmem:[%s11287_s3 + $0x360] sm:$0xf] }
 0x257   :  { %1887 = vmatmul.bf16.vlgmr.msrb.gmra.mxu3 %v8820_v49  ;;  %2102 = vmatpush.bf16.msra.mxu1 %v5422_v8  ;;  %v5394_v8 = vor.u32 %v6557_v5, %v5393_v10  ;;  %v6553_v10 = vld [vmem:[%s11287_s3 + $0x394] sm:$0xf0] }
 0x258   :  { %2128 = vmatpush.bf16.msra.mxu3 %v5430_v61  ;;  %v5403_v61 = vld [vmem:[%s11287_s3 + $0x3d0] sm:$0xf0]  ;;  %2091 = vmatpush.bf16.msra.mxu0 %v5386_v53  ;;  %v5377_v53 = vld [vmem:[%s11287_s3 + $0x388] sm:$0xf] }
 0x259   :  { %v5406_v11 = vor.u32 %v6558_v62, %v5403_v61  ;;  %2117 = vmatpush.bf16.msra.mxu2 %v5394_v8  ;;  %v6554_v62 = vld [vmem:[%s11287_s3 + $0x3a4] sm:$0xf]  ;;  %v5387_v61 = vld [vmem:[%s11287_s3 + $0x3b0] sm:$0xf0]  ;;  %v5378_v5 = vor.u32 %v6553_v10, %v5377_v53  ;;  %v6551_v8 = vld [vmem:[%s11287_s3 + $0x38c] sm:$0xf] }
 0x25a   :  { %v6549_v10 = vld [vmem:[%s11287_s3 + $0x374] sm:$0xf0] }
 0x25b   :  { %2103 = vmatpush.bf16.msra.mxu1 %v5406_v11  ;;  %v5390_v11 = vor.u32 %v6554_v62, %v5387_v61 }
 0x25c   :  { %2129 = vmatpush.bf16.msra.mxu3 %v5414_v47  ;;  %v6552_v47 = vld [vmem:[%s11287_s3 + $0x38c] sm:$0xf0] }
 0x25d   :  { %v5370_v56 = vor.u32 %v6552_v47, %v5369_v3  ;;  %2118 = vmatpush.bf16.msra.mxu2 %v5378_v5  ;;  %v5382_v3 = vor.u32 %v6551_v8, %v5379_v63  ;;  %v6550_v47 = vld [vmem:[%s11287_s3 + $0x384] sm:$0xf]  ;;  %v6547_v5 = vld [vmem:[%s11287_s3 + $0x36c] sm:$0xf] }
 0x25f   :  { %2092 = vmatpush.bf16.msra.mxu0 %v5370_v56  ;;  %2104 = vmatpush.bf16.msra.mxu1 %v5390_v11  ;;  %v5371_v56 = vld [vmem:[%s11287_s3 + $0x390] sm:$0xf0]  ;;  %v5361_v11 = vld [vmem:[%s11287_s3 + $0x368] sm:$0xf] }
 0x260   :  { %2130 = vmatpush.bf16.msra.mxu3 %v5398_v1  ;;  %v6548_v1 = vld [vmem:[%s11287_s3 + $0x36c] sm:$0xf0]  ;;  %v5374_v53 = vor.u32 %v6550_v47, %v5371_v56  ;;  %v5362_v48 = vor.u32 %v6549_v10, %v5361_v11  ;;  %v5355_v11 = vld [vmem:[%s11287_s3 + $0x370] sm:$0xf0]  ;;  %v5345_v10 = vld [vmem:[%s11287_s3 + $0x348] sm:$0xf] }
 0x261   :  { %v5354_v61 = vor.u32 %v6548_v1, %v5353_v15  ;;  %v5363_v15 = vld [vmem:[%s11287_s3 + $0x378] sm:$0xf0]  ;;  %v5337_v1 = vld [vmem:[%s11287_s3 + $0x340] sm:$0xf]  ;;  %v6544_v47 = vld [vmem:[%s11287_s3 + $0x34c] sm:$0xf0] }
 0x262   :  { %v11430_v56 = vld [vmem:[#allocation19_spill] sm:$0xff]  ;;  %2119 = vmatpush.bf16.msra.mxu2 %v5362_v48  ;;  %v5347_v48 = vld [vmem:[%s11287_s3 + $0x358] sm:$0xf0] }
 0x263   :  { %2093 = vmatpush.bf16.msra.mxu0 %v5354_v61  ;;  %2105 = vmatpush.bf16.msra.mxu1 %v5374_v53  ;;  %v6545_v61 = vld [vmem:[%s11287_s3 + $0x354] sm:$0xf0] }
 0x264   :  { %2131 = vmatpush.bf16.msra.mxu3 %v5382_v3  ;;  %v5338_v3 = vor.u32 %v6544_v47, %v5337_v1  ;;  %v5346_v53 = vor.u32 %v6545_v61, %v5345_v10  ;;  %v6543_v47 = vld [vmem:[%s11287_s3 + $0x34c] sm:$0xf] }
 0x266   :  { %2120 = vmatpush.bf16.msra.mxu2 %v5346_v53  ;;  %v6542_v53 = vld [vmem:[%s11287_s3 + $0x344] sm:$0xf] }
 0x267   :  { %2094 = vmatpush.bf16.msra.mxu0 %v5338_v3  ;;  %v6540_v3 = vld [vmem:[%s11287_s3 + $0x32c] sm:$0xf0] }
 0x293   :  { %v1729_v62 = vpop.f32.mrf.mxu0 }
 0x294   :  { %v8935_v8 = vadd.f32 %v1729_v62, %v8520_v43  ;;  %v1742_v63 = vpop.f32.mrf.mxu1  ;;  %v5366_v43 = vor.u32 %v6547_v5, %v5363_v15  ;;  %v6546_v62 = vld [vmem:[%s11287_s3 + $0x364] sm:$0xf] }
 0x295   :  { %v8947_v29 = vadd.f32 %v1742_v63, %v11430_v56  ;;  %v11432_v63 = vld [vmem:[#allocation21_spill] sm:$0xff]  ;;  %v11433_v56 = vld [vmem:[#allocation20_spill] sm:$0xff] }
 0x296   :  { %11429 = vst [vmem:[#allocation12_spill] sm:$0xff] %v8935_v8  ;;  %v5358_v8 = vor.u32 %v6546_v62, %v5355_v11  ;;  %2132 = vmatpush.bf16.msra.mxu3 %v5366_v43  ;;  %v5350_v11 = vor.u32 %v6543_v47, %v5347_v48  ;;  %v6541_v47 = vld [vmem:[%s11287_s3 + $0x334] sm:$0xf0] }
 0x297   :  { %11431 = vst [vmem:[#allocation9_spill] sm:$0xff] %v8947_v29 }
 0x298   :  { %2106 = vmatpush.bf16.msra.mxu1 %v5358_v8  ;;  %v5321_v8 = vld [vmem:[%s11287_s3 + $0x320] sm:$0xf] }
 0x299   :  { %v1716_v5 = vpop.f32.mrf.mxu3  ;;  %v5322_v61 = vor.u32 %v6540_v3, %v5321_v8  ;;  %v6536_v3 = vld [vmem:[%s11287_s3 + $0x30c] sm:$0xf0] }
 0x29a   :  { %v8962_v15 = vadd.f32 %v1716_v5, %v11432_v63  ;;  %v1755_v1 = vpop.f32.mrf.mxu2  ;;  %v5339_v5 = vld [vmem:[%s11287_s3 + $0x350] sm:$0xf0]  ;;  %v5329_v63 = vld [vmem:[%s11287_s3 + $0x328] sm:$0xf]  ;;  %2133 = vmatpush.bf16.msra.mxu3 %v5350_v11  ;;  %v5305_v11 = vld [vmem:[%s11287_s3 + $0x300] sm:$0xf] }
 0x29b   :  { %v8971_v62 = vadd.f32 %v1755_v1, %v11433_v56  ;;  %v1731_v43 = vpop.f32.mrf.mxu0  ;;  %v5342_v1 = vor.u32 %v6542_v53, %v5339_v5  ;;  %2095 = vmatpush.bf16.msra.mxu0 %v5322_v61  ;;  %v5330_v48 = vor.u32 %v6541_v47, %v5329_v63  ;;  %v6539_v56 = vld [vmem:[%s11287_s3 + $0x32c] sm:$0xf]  ;;  %v6538_v61 = vld [vmem:[%s11287_s3 + $0x324] sm:$0xf]  ;;  %v5323_v53 = vld [vmem:[%s11287_s3 + $0x330] sm:$0xf0] }
 0x29c   :  { %v1744_v10 = vpop.f32.mrf.mxu1  ;;  %v5331_v43 = vld [vmem:[%s11287_s3 + $0x338] sm:$0xf0]  ;;  %v5313_v5 = vld [vmem:[%s11287_s3 + $0x308] sm:$0xf]  ;;  %v6537_v47 = vld [vmem:[%s11287_s3 + $0x314] sm:$0xf0] }
 0x29d   :  { %11434 = vst [vmem:[#allocation10_spill] sm:$0xff] %v8971_v62  ;;  %2107 = vmatpush.bf16.msra.mxu1 %v5342_v1  ;;  %v5334_v8 = vor.u32 %v6539_v56, %v5331_v43  ;;  %2121 = vmatpush.bf16.msra.mxu2 %v5330_v48  ;;  %v5306_v10 = vor.u32 %v6536_v3, %v5305_v11  ;;  %v6535_v48 = vld [vmem:[%s11287_s3 + $0x30c] sm:$0xf]  ;;  %v5315_v56 = vld [vmem:[%s11287_s3 + $0x318] sm:$0xf0] }
 0x29e   :  { %v5326_v1 = vor.u32 %v6538_v61, %v5323_v53  ;;  %v5314_v11 = vor.u32 %v6537_v47, %v5313_v5  ;;  %v5318_v3 = vor.u32 %v6535_v48, %v5315_v56  ;;  %v5307_v61 = vld [vmem:[%s11287_s3 + $0x310] sm:$0xf0]  ;;  %v9122_v48 = vld [vmem:[%s11285_s1 + $0x1a8] sm:$0xff] }
 0x29f   :  { %2134 = vmatpush.bf16.msra.mxu3 %v5334_v8  ;;  %2096 = vmatpush.bf16.msra.mxu0 %v5306_v10  ;;  %v6534_v8 = vld [vmem:[%s11287_s3 + $0x304] sm:$0xf]  ;;  %v9128_v56 = vld [vmem:[%s11285_s1 + $0x1e8] sm:$0xff] }
 0x2a0   :  { %v5310_v62 = vor.u32 %v6534_v8, %v5307_v61  ;;  %v9152_v8 = vld [vmem:[%s11285_s1 + $0x1e0] sm:$0xff] }
 0x2a1   :  { %v1718_v63 = vpop.f32.mrf.mxu3  ;;  %2108 = vmatpush.bf16.msra.mxu1 %v5326_v1  ;;  %2122 = vmatpush.bf16.msra.mxu2 %v5314_v11  ;;  %v9140_v11 = vld [vmem:[%s11285_s1 + $0x120] sm:$0xff] }
 0x2a2   :  { %v1757_v43 = vpop.f32.mrf.mxu2  ;;  %v11435_v63 = vld [vmem:[#allocation11_spill] sm:$0xff]  ;;  %v9158_v61 = vld [vmem:[%s11285_s1 + $0x160] sm:$0xff] }
 0x2a3   :  { %v1785_v53 = vpop.f32.mrf.mxu0  ;;  %2145 = vmatpush.bf16.msrb.mxu0 %v11435_v63  ;;  %2135 = vmatpush.bf16.msra.mxu3 %v5318_v3  ;;  %v9134_v43 = vld [vmem:[%s11285_s1 + $0x168] sm:$0xff]  ;;  %v9146_v3 = vld [vmem:[%s11285_s1 + $0x1a0] sm:$0xff]  ;;  %v9173_v63 = vld [vmem:[%s11285_s1 + $0x118] sm:$0xff] }
 0x2a4   :  { %v1798_v29 = vpop.f32.mrf.mxu1 }
 0x2a5   :  { %2171 = vmatpush.bf16.msrb.mxu2 %v8051_v13  ;;  %2109 = vmatpush.bf16.msra.mxu1 %v5310_v62  ;;  %v9116_v62 = vld [vmem:[%s11285_s1 + $0x128] sm:$0xff] }
 0x2a7   :  { %2185 = vmatpush.bf16.msrb.mxu3 %v8057_v14  ;;  %2146 = vmatpush.bf16.msrb.mxu0 %v8065_v18 }
 0x2a9   :  { %2158 = vmatpush.bf16.msrb.mxu1 %v8045_v12  ;;  %v1772_v10 = vpop.f32.mrf.mxu3  ;;  %2172 = vmatpush.bf16.msrb.mxu2 %v8077_v25 }
 0x2aa   :  { %v1812_v5 = vpop.f32.mrf.mxu2 }
 0x2ab   :  { %2186 = vmatpush.bf16.msrb.mxu3 %v8083_v54  ;;  %v1787_v1 = vpop.f32.mrf.mxu0  ;;  %2147 = vmatpush.bf16.msrb.mxu0 %v8089_v20  ;;  %v1786_v20 = vadd.f32 %v1785_v53, %v1772_v10  ;;  %v9166_v53 = vld [vmem:[%s11284_s0 + $0x8] sm:$0x1]  ;;  %v9185_v10 = vld [vmem:[%s11285_s1 + $0x1d8] sm:$0xff] }
 0x2ac   :  { %v1800_v47 = vpop.f32.mrf.mxu1  ;;  %v9203_v1 = vld [vmem:[%s11285_s1 + $0x190] sm:$0xff] }
 0x2ad   :  { %2159 = vmatpush.bf16.msrb.mxu1 %v8071_v57  ;;  %2173 = vmatpush.bf16.msrb.mxu2 %v8101_v22  ;;  %v1802_v22 = vadd.f32 %v1798_v29, %v1786_v20  ;;  %v9110_v29 = vld [vmem:[%s11285_s1 + $0x170] sm:$0xff] }
 0x2ae   :  { %v9209_v47 = vld [vmem:[%s11285_s1 + $0x1d0] sm:$0xff] }
 0x2af   :  { %2187 = vmatpush.bf16.msrb.mxu3 %v8107_v23  ;;  %2148 = vmatpush.bf16.msrb.mxu0 %v8113_v27 }
 0x2b1   :  { %2160 = vmatpush.bf16.msrb.mxu1 %v8095_v21  ;;  %v1774_v12 = vpop.f32.mrf.mxu3  ;;  %2174 = vmatpush.bf16.msrb.mxu2 %v8125_v30 }
 0x2b2   :  { %v1814_v13 = vpop.f32.mrf.mxu2  ;;  %v9215_v12 = vld [vmem:[%s11285_s1 + $0x150] sm:$0xff] }
 0x2b3   :  { %2188 = vmatpush.bf16.msrb.mxu3 %v8131_v40  ;;  %2149 = vmatpush.bf16.msrb.mxu0 %v8137_v31  ;;  %v9221_v13 = vld [vmem:[%s11285_s1 + $0x108] sm:$0xff] }
 0x2b5   :  { %2161 = vmatpush.bf16.msrb.mxu1 %v8119_v28  ;;  %v1840_v14 = vpop.f32.mrf.mxu0  ;;  %2175 = vmatpush.bf16.msrb.mxu2 %v8149_v33  ;;  %v1816_v28 = vadd.f32 %v1812_v5, %v1802_v22  ;;  %v9197_v5 = vld [vmem:[%s11285_s1 + $0x110] sm:$0xff] }
 0x2b6   :  { %v1856_v18 = vpop.f32.mrf.mxu1 }
 0x2b7   :  { %2189 = vmatpush.bf16.msrb.mxu3 %v8155_v34  ;;  %2150 = vmatpush.bf16.msrb.mxu0 %v8161_v35  ;;  %v9062_v35 = vld [vmem:[%s11286_s2] ss:$0 sm:$0xff] }
 0x2b9   :  { %2162 = vmatpush.bf16.msrb.mxu1 %v8143_v32  ;;  %2176 = vmatpush.bf16.msrb.mxu2 %v8173_v37 }
 0x2ba   :  { %v1826_v57 = vpop.f32.mrf.mxu3  ;;  %v1872_v25 = vpop.f32.mrf.mxu2 }
 0x2bb   :  { %2190 = vmatpush.bf16.msrb.mxu3 %v8179_v38  ;;  %2151 = vmatpush.bf16.msrb.mxu0 %v8185_v26  ;;  %v1830_v30 = vadd.f32 %v1826_v57, %v1816_v28  ;;  %v5578_v57 = vld [vmem:[%s11287_s3 + $0x4e0] sm:$0xf] }
 0x2bd   :  { %2163 = vmatpush.bf16.msrb.mxu1 %v8167_v36  ;;  %v1842_v54 = vpop.f32.mrf.mxu0  ;;  %2177 = vmatpush.bf16.msrb.mxu2 %v8197_v42  ;;  %v1844_v40 = vadd.f32 %v1840_v14, %v1830_v30  ;;  %v9074_v42 = vld [vmem:[%s11285_s1 + $0x1b8] sm:$0xff]  ;;  %v5562_v30 = vld [vmem:[%s11287_s3 + $0x4c0] sm:$0xf] }
 0x2be   :  { %v1858_v21 = vpop.f32.mrf.mxu1  ;;  %v11439_v14 = vld [vmem:[#allocation8_spill] sm:$0xff]  ;;  %v6594_v54 = vld [vmem:[%s11287_s3 + $0x4e4] sm:$0xf] }
 0x2bf   :  { %2191 = vmatpush.bf16.msrb.mxu3 %v8203_v44  ;;  %2152 = vmatpush.bf16.msrb.mxu0 %v8209_v45  ;;  %v1860_v31 = vadd.f32 %v1856_v18, %v1844_v40  ;;  %v9080_v44 = vld [vmem:[%s11285_s1 + $0x1f8] sm:$0xff]  ;;  %v9251_v18 = vld [vmem:[%s11284_s0 + $0x12] sm:$0x1]  ;;  %v5580_v21 = vld [vmem:[%s11287_s3 + $0x4f0] sm:$0xf0] }
 0x2c0   :  { %v9086_v45 = vld [vmem:[%s11285_s1 + $0x178] sm:$0xff]  ;;  %v5583_v22 = vor.u32 %v6594_v54, %v5580_v21  ;;  %v6592_v40 = vld [vmem:[%s11287_s3 + $0x4cc] sm:$0xf0]  ;;  %v5548_v54 = vld [vmem:[%s11287_s3 + $0x4b0] sm:$0xf0] }
 0x2c1   :  { %2164 = vmatpush.bf16.msrb.mxu1 %v8191_v39  ;;  %2178 = vmatpush.bf16.msrb.mxu2 %v8233_v50  ;;  %v1876_v32 = vadd.f32 %v1872_v25, %v1860_v31  ;;  %v9068_v39 = vld [vmem:[%s11285_s1 + $0x138] sm:$0xff]  ;;  %v9098_v50 = vld [vmem:[%s11285_s1 + $0x1b0] sm:$0xff]  ;;  %v5563_v31 = vor.u32 %v6592_v40, %v5562_v30  ;;  %v5530_v40 = vld [vmem:[%s11287_s3 + $0x480] sm:$0xf] }
 0x2c2   :  { %v1828_v23 = vpop.f32.mrf.mxu3  ;;  %v1874_v27 = vpop.f32.mrf.mxu2  ;;  %v6596_v25 = vld [vmem:[%s11287_s3 + $0x4ec] sm:$0xf0]  ;;  %v5588_v30 = vld [vmem:[%s11287_s3 + $0x4f8] sm:$0xf0] }
 0x2c3   :  { %2192 = vmatpush.bf16.msrb.mxu3 %v8239_v52  ;;  %v9104_v52 = vld [vmem:[%s11285_s1 + $0x1f0] sm:$0xff]  ;;  %v5579_v20 = vor.u32 %v6596_v25, %v5578_v57  ;;  %v5586_v23 = vld [vmem:[%s11287_s3 + $0x4e8] sm:$0xf]  ;;  %v6597_v27 = vld [vmem:[%s11287_s3 + $0x4f4] sm:$0xf0] }
 0x2c4   :  { %v5587_v28 = vor.u32 %v6597_v27, %v5586_v23  ;;  %v6588_v57 = vld [vmem:[%s11287_s3 + $0x4ac] sm:$0xf0]  ;;  %v6586_v25 = vld [vmem:[%s11287_s3 + $0x4a4] sm:$0xf]  ;;  %v6589_v23 = vld [vmem:[%s11287_s3 + $0x4b4] sm:$0xf0] }
 0x2c5   :  { %2165 = vmatpush.bf16.msrb.mxu1 %v8215_v46  ;;  %v9092_v46 = vld [vmem:[%s11285_s1 + $0x130] sm:$0xff]  ;;  %v5551_v21 = vor.u32 %v6586_v25, %v5548_v54  ;;  %v6595_v27 = vld [vmem:[%s11287_s3 + $0x4ec] sm:$0xf]  ;;  %v5572_v54 = vld [vmem:[%s11287_s3 + $0x4d8] sm:$0xf0] }
 0x2da   :  { %v1888_v33 = vpop.f32.mrf.mxu3 }
 0x2db   :  { %v1892_v34 = vadd.f32 %v1888_v33, %v1876_v32  ;;  %v6590_v32 = vld [vmem:[%s11287_s3 + $0x4c4] sm:$0xf]  ;;  %v5564_v33 = vld [vmem:[%s11287_s3 + $0x4d0] sm:$0xf0] }
 0x2dd   :  { %v1893_v36 = vadd.f32 %v9062_v35, %v1892_v34  ;;  %v5567_v34 = vor.u32 %v6590_v32, %v5564_v33  ;;  %v5591_v32 = vor.u32 %v6595_v27, %v5588_v30  ;;  %v6578_v27 = vld [vmem:[%s11287_s3 + $0x464] sm:$0xf] }
 0x2df   :  { %v1894_v37 = vmax.f32 %v1893_v36, 0.0  ;;  %v5570_v36 = vld [vmem:[%s11287_s3 + $0x4c8] sm:$0xf] }
 0x2e1   :  { %v1895_v38 = vpack.c.bf16 %v1894_v37, %v1894_v37  ;;  %v6593_v37 = vld [vmem:[%s11287_s3 + $0x4d4] sm:$0xf0] }
 0x2e2   :  { %v1890_v26 = vpop.f32.mrf.mxu3 }
 0x2e3   :  { %2097 = vmatmul.bf16.vlgmr.msra.gmra.mxu0 %v1895_v38  ;;  %2110 = vmatmul.bf16.vlgmr.msra.gmra.mxu1 %v1895_v38  ;;  %v5571_v26 = vor.u32 %v6593_v37, %v5570_v36  ;;  %v5532_v36 = vld [vmem:[%s11287_s3 + $0x490] sm:$0xf0] }
 0x2e4   :  { %2123 = vmatmul.bf16.vlgmr.msra.gmra.mxu2 %v1895_v38  ;;  %2136 = vmatmul.bf16.vlgmr.msra.gmra.mxu3 %v1895_v38  ;;  %v5546_v38 = vld [vmem:[%s11287_s3 + $0x4a0] sm:$0xf] }
 0x2e5   :  { %2199 = vmatpush.bf16.msra.mxu0 %v9068_v39  ;;  %2227 = vmatpush.bf16.msra.mxu2 %v9074_v42 }
 0x2e6   :  { %2241 = vmatpush.bf16.msra.mxu3 %v9080_v44  ;;  %2213 = vmatpush.bf16.msra.mxu1 %v9086_v45 }
 0x2e9   :  { %2200 = vmatpush.bf16.msra.mxu0 %v9092_v46  ;;  %2228 = vmatpush.bf16.msra.mxu2 %v9098_v50 }
 0x2ea   :  { %2242 = vmatpush.bf16.msra.mxu3 %v9104_v52  ;;  %2214 = vmatpush.bf16.msra.mxu1 %v9110_v29 }
 0x2ed   :  { %2201 = vmatpush.bf16.msra.mxu0 %v9116_v62  ;;  %2229 = vmatpush.bf16.msra.mxu2 %v9122_v48 }
 0x2ee   :  { %2243 = vmatpush.bf16.msra.mxu3 %v9128_v56  ;;  %2215 = vmatpush.bf16.msra.mxu1 %v9134_v43 }
 0x2f1   :  { %2202 = vmatpush.bf16.msra.mxu0 %v9140_v11  ;;  %2230 = vmatpush.bf16.msra.mxu2 %v9146_v3 }
 0x2f2   :  { %2244 = vmatpush.bf16.msra.mxu3 %v9152_v8  ;;  %2216 = vmatpush.bf16.msra.mxu1 %v9158_v61 }
 0x2f3   :  { %2153 = vmatmul.bf16.vlgmr.msrb.gmra.mxu0 %v8694_v19  ;;  %2166 = vmatmul.bf16.vlgmr.msrb.gmra.mxu1 %v8682_v60  ;;  %v9179_v60 = vld [vmem:[%s11285_s1 + $0x198] sm:$0xff] }
 0x2f4   :  { %2179 = vmatmul.bf16.vlgmr.msrb.gmra.mxu2 %v9166_v53  ;;  %2193 = vmatmul.bf16.vlgmr.msrb.gmra.mxu3 %v8765_v2  ;;  %v9191_v2 = vld [vmem:[%s11285_s1 + $0x158] sm:$0xff] }
 0x2f5   :  { %2203 = vmatpush.bf16.msra.mxu0 %v9173_v63  ;;  %2231 = vmatpush.bf16.msra.mxu2 %v9179_v60 }
 0x2f6   :  { %2245 = vmatpush.bf16.msra.mxu3 %v9185_v10  ;;  %2217 = vmatpush.bf16.msra.mxu1 %v9191_v2 }
 0x2f9   :  { %2204 = vmatpush.bf16.msra.mxu0 %v9197_v5  ;;  %2232 = vmatpush.bf16.msra.mxu2 %v9203_v1 }
 0x2fa   :  { %2246 = vmatpush.bf16.msra.mxu3 %v9209_v47  ;;  %2218 = vmatpush.bf16.msra.mxu1 %v9215_v12 }
 0x2fd   :  { %2205 = vmatpush.bf16.msra.mxu0 %v9221_v13  ;;  %2233 = vmatpush.bf16.msra.mxu2 %v8721_v59 }
 0x2fe   :  { %2247 = vmatpush.bf16.msra.mxu3 %v8709_v6  ;;  %2219 = vmatpush.bf16.msra.mxu1 %v8715_v55  ;;  %v9239_v6 = vld [vmem:[%s11284_s0 + $0xd] sm:$0x1] }
 0x301   :  { %2206 = vmatpush.bf16.msra.mxu0 %v8727_v58  ;;  %2234 = vmatpush.bf16.msra.mxu2 %v8756_v16  ;;  %v11436_v58 = vld [vmem:[#allocation7_spill] sm:$0xff] }
 0x302   :  { %2248 = vmatpush.bf16.msra.mxu3 %v8733_v0  ;;  %2220 = vmatpush.bf16.msra.mxu1 %v8750_v24  ;;  %v11437_v0 = vld [vmem:[#allocation5_spill] sm:$0xff] }
 0x304   :  { %2235 = vmatmul.bf16.vlgmr.msra.gmra.mxu2 %v8739_v51  ;;  %2207 = vmatmul.bf16.vlgmr.msra.gmra.mxu0 %v8772_v7  ;;  %v11438_v51 = vld [vmem:[#allocation6_spill] sm:$0xff] }
 0x305   :  { %2257 = vmatpush.bf16.msrb.mxu0 %v8744_v41  ;;  %2249 = vmatmul.bf16.vlgmr.msra.gmra.mxu3 %v8820_v49 }
 0x306   :  { %2221 = vmatmul.bf16.vlgmr.msra.gmra.mxu1 %v9239_v6  ;;  %2480 = vmatpush.bf16.msrb.mxu2 %v5583_v22  ;;  %v5554_v22 = vld [vmem:[%s11287_s3 + $0x4a8] sm:$0xf] }
 0x307   :  { %2467 = vmatpush.bf16.msrb.mxu1 %v5579_v20  ;;  %2493 = vmatpush.bf16.msrb.mxu3 %v5587_v28  ;;  %v5547_v20 = vor.u32 %v6588_v57, %v5546_v38  ;;  %v5555_v28 = vor.u32 %v6589_v23, %v5554_v22  ;;  %v5538_v38 = vld [vmem:[%s11287_s3 + $0x488] sm:$0xf]  ;;  %v6591_v57 = vld [vmem:[%s11287_s3 + $0x4cc] sm:$0xf] }
 0x308   :  { %v5575_v22 = vor.u32 %v6591_v57, %v5572_v54  ;;  %v6574_v57 = vld [vmem:[%s11287_s3 + $0x444] sm:$0xf] }
 0x309   :  { %2258 = vmatpush.bf16.msrb.mxu0 %v8778_v17 }
 0x30a   :  { %2481 = vmatpush.bf16.msrb.mxu2 %v5567_v34  ;;  %v6582_v34 = vld [vmem:[%s11287_s3 + $0x484] sm:$0xf] }
 0x30b   :  { %2468 = vmatpush.bf16.msrb.mxu1 %v5563_v31  ;;  %2494 = vmatpush.bf16.msrb.mxu3 %v5571_v26  ;;  %v6584_v31 = vld [vmem:[%s11287_s3 + $0x48c] sm:$0xf0]  ;;  %v5535_v37 = vor.u32 %v6582_v34, %v5532_v36  ;;  %v6585_v26 = vld [vmem:[%s11287_s3 + $0x494] sm:$0xf0]  ;;  %v5556_v34 = vld [vmem:[%s11287_s3 + $0x4b8] sm:$0xf0] }
 0x30c   :  { %v5531_v33 = vor.u32 %v6584_v31, %v5530_v40  ;;  %v5539_v25 = vor.u32 %v6585_v26, %v5538_v38  ;;  %v5522_v40 = vld [vmem:[%s11287_s3 + $0x468] sm:$0xf]  ;;  %v6581_v31 = vld [vmem:[%s11287_s3 + $0x474] sm:$0xf0]  ;;  %v5498_v36 = vld [vmem:[%s11287_s3 + $0x440] sm:$0xf] }
 0x30d   :  { %2259 = vmatpush.bf16.msrb.mxu0 %v8784_v9 }
 0x30e   :  { %2482 = vmatpush.bf16.msrb.mxu2 %v5551_v21  ;;  %v6580_v21 = vld [vmem:[%s11287_s3 + $0x46c] sm:$0xf0] }
 0x30f   :  { %2469 = vmatpush.bf16.msrb.mxu1 %v5547_v20  ;;  %2495 = vmatpush.bf16.msrb.mxu3 %v5555_v28  ;;  %v5514_v20 = vld [vmem:[%s11287_s3 + $0x460] sm:$0xf]  ;;  %v5516_v28 = vld [vmem:[%s11287_s3 + $0x470] sm:$0xf0] }
 0x310   :  { %v5515_v23 = vor.u32 %v6580_v21, %v5514_v20  ;;  %v5519_v30 = vor.u32 %v6578_v27, %v5516_v28  ;;  %v5506_v28 = vld [vmem:[%s11287_s3 + $0x448] sm:$0xf] }
 0x311   :  { %2260 = vmatpush.bf16.msrb.mxu0 %v8790_v4 }
 0x312   :  { %2483 = vmatpush.bf16.msrb.mxu2 %v5535_v37  ;;  %v6576_v37 = vld [vmem:[%s11287_s3 + $0x44c] sm:$0xf0] }
 0x313   :  { %2470 = vmatpush.bf16.msrb.mxu1 %v5531_v33  ;;  %2496 = vmatpush.bf16.msrb.mxu3 %v5539_v25  ;;  %v5523_v33 = vor.u32 %v6581_v31, %v5522_v40  ;;  %v5499_v26 = vor.u32 %v6576_v37, %v5498_v36  ;;  %v5500_v25 = vld [vmem:[%s11287_s3 + $0x450] sm:$0xf0]  ;;  %v6583_v40 = vld [vmem:[%s11287_s3 + $0x48c] sm:$0xf]  ;;  %v5540_v31 = vld [vmem:[%s11287_s3 + $0x498] sm:$0xf0] }
 0x314   :  { %v5503_v21 = vor.u32 %v6574_v57, %v5500_v25  ;;  %v6570_v37 = vld [vmem:[%s11287_s3 + $0x424] sm:$0xf]  ;;  %v5490_v57 = vld [vmem:[%s11287_s3 + $0x428] sm:$0xf]  ;;  %v6573_v25 = vld [vmem:[%s11287_s3 + $0x434] sm:$0xf0] }
 0x315   :  { %2261 = vmatpush.bf16.msrb.mxu0 %v11436_v58 }
 0x316   :  { %2484 = vmatpush.bf16.msrb.mxu2 %v5519_v30  ;;  %v6577_v30 = vld [vmem:[%s11287_s3 + $0x454] sm:$0xf0] }
 0x317   :  { %2471 = vmatpush.bf16.msrb.mxu1 %v5515_v23  ;;  %2497 = vmatpush.bf16.msrb.mxu3 %v5523_v33  ;;  %v11440_v23 = vld [vmem:[#allocation12_spill] sm:$0xff]  ;;  %v6572_v33 = vld [vmem:[%s11287_s3 + $0x42c] sm:$0xf0] }
 0x319   :  { %2262 = vmatpush.bf16.msrb.mxu0 %v11437_v0 }
 0x31a   :  { %2485 = vmatpush.bf16.msrb.mxu2 %v5503_v21  ;;  %v5524_v21 = vld [vmem:[%s11287_s3 + $0x478] sm:$0xf0] }
 0x31b   :  { %2472 = vmatpush.bf16.msrb.mxu1 %v5499_v26 }
 0x31d   :  { %2263 = vmatpush.bf16.msrb.mxu0 %v11438_v51 }
 0x321   :  { %2264 = vmatpush.bf16.msrb.mxu0 %v11439_v14 }
 0x324   :  { %2265 = vmatmul.bf16.vlgmr.msrb.gmra.mxu0 %v9251_v18 }
 0x325   :  { %2506 = vmatpush.bf16.msra.mxu0 %v5591_v32  ;;  %v6587_v32 = vld [vmem:[%s11287_s3 + $0x4ac] sm:$0xf] }
 0x326   :  { %v5559_v38 = vor.u32 %v6587_v32, %v5556_v34  ;;  %v5482_v32 = vld [vmem:[%s11287_s3 + $0x420] sm:$0xf]  ;;  %v5543_v34 = vor.u32 %v6583_v40, %v5540_v31 }
 0x327   :  { %v5483_v36 = vor.u32 %v6572_v33, %v5482_v32  ;;  %v6566_v32 = vld [vmem:[%s11287_s3 + $0x404] sm:$0xf]  ;;  %v5468_v33 = vld [vmem:[%s11287_s3 + $0x410] sm:$0xf0] }
 0x329   :  { %2507 = vmatpush.bf16.msra.mxu0 %v5575_v22  ;;  %2473 = vmatpush.bf16.msrb.mxu1 %v5483_v36 }
 0x32d   :  { %2508 = vmatpush.bf16.msra.mxu0 %v5559_v38  ;;  %v5484_v38 = vld [vmem:[%s11287_s3 + $0x430] sm:$0xf0] }
 0x32e   :  { %v5487_v26 = vor.u32 %v6570_v37, %v5484_v38  ;;  %v11444_v37 = vld [vmem:[#allocation10_spill] sm:$0xff] }
 0x330   :  { %2486 = vmatpush.bf16.msrb.mxu2 %v5487_v26 }
 0x331   :  { %2509 = vmatpush.bf16.msra.mxu0 %v5543_v34  ;;  %v11442_v34 = vld [vmem:[#allocation9_spill] sm:$0xff] }
 0x360   :  { %v2098_v54 = vpop.f32.mrf.mxu0  ;;  %v2111_v20 = vpop.f32.mrf.mxu1 }
 0x361   :  { %v9375_v22 = vadd.f32 %v2098_v54, %v8962_v15  ;;  %v9378_v27 = vadd.f32 %v2111_v20, %v11440_v23  ;;  %v5507_v15 = vor.u32 %v6577_v30, %v5506_v28  ;;  %v6579_v54 = vld [vmem:[%s11287_s3 + $0x46c] sm:$0xf]  ;;  %v5491_v20 = vor.u32 %v6573_v25, %v5490_v57  ;;  %v5466_v23 = vld [vmem:[%s11287_s3 + $0x400] sm:$0xf]  ;;  %v6568_v28 = vld [vmem:[%s11287_s3 + $0x40c] sm:$0xf0] }
 0x362   :  { %v5467_v31 = vor.u32 %v6568_v28, %v5466_v23  ;;  %v5471_v25 = vor.u32 %v6566_v32, %v5468_v33  ;;  %v6575_v23 = vld [vmem:[%s11287_s3 + $0x44c] sm:$0xf]  ;;  %v9467_v33 = vld [vmem:[%s11285_s1 + $0xb8] sm:$0xff] }
 0x363   :  { %11441 = vst [vmem:[#allocation13_spill] sm:$0xff] %v9378_v27  ;;  %2498 = vmatpush.bf16.msrb.mxu3 %v5507_v15  ;;  %v5527_v15 = vor.u32 %v6579_v54, %v5524_v21  ;;  %v5474_v54 = vld [vmem:[%s11287_s3 + $0x408] sm:$0xf]  ;;  %v6569_v21 = vld [vmem:[%s11287_s3 + $0x414] sm:$0xf0] }
 0x364   :  { %2474 = vmatpush.bf16.msrb.mxu1 %v5467_v31  ;;  %2487 = vmatpush.bf16.msrb.mxu2 %v5471_v25  ;;  %v5475_v28 = vor.u32 %v6569_v21, %v5474_v54  ;;  %v9461_v31 = vld [vmem:[%s11285_s1 + $0x38] sm:$0xff]  ;;  %11447 = vst [vmem:[#allocation17_spill] sm:$0xff] %v9467_v33  ;;  %v9485_v21 = vld [vmem:[%s11285_s1 + $0x30] sm:$0xff] }
 0x365   :  { %2510 = vmatpush.bf16.msra.mxu0 %v5527_v15  ;;  %v5492_v15 = vld [vmem:[%s11287_s3 + $0x438] sm:$0xf0]  ;;  %11446 = vst [vmem:[#allocation15_spill] sm:$0xff] %v9461_v31 }
 0x366   :  { %11449 = vst [vmem:[#allocation19_spill] sm:$0xff] %v9485_v21 }
 0x367   :  { %v2124_v30 = vpop.f32.mrf.mxu2  ;;  %v2137_v40 = vpop.f32.mrf.mxu3  ;;  %2499 = vmatpush.bf16.msrb.mxu3 %v5491_v20  ;;  %v9446_v20 = vld [vmem:[%s11285_s1 + $0x78] sm:$0xff] }
 0x368   :  { %v9429_v36 = vadd.f32 %v2124_v30, %v11442_v34  ;;  %v9432_v38 = vadd.f32 %v2137_v40, %v11444_v37  ;;  %v2100_v26 = vpop.f32.mrf.mxu0  ;;  %v2113_v57 = vpop.f32.mrf.mxu1  ;;  %11445 = vst [vmem:[#allocation14_spill] sm:$0xff] %v9446_v20  ;;  %2523 = vmatpush.bf16.msra.mxu1 %v9446_v20  ;;  %v5508_v30 = vld [vmem:[%s11287_s3 + $0x458] sm:$0xf0]  ;;  %v6571_v40 = vld [vmem:[%s11287_s3 + $0x42c] sm:$0xf]  ;;  %2536 = vmatpush.bf16.msra.mxu2 %v9461_v31  ;;  %v9473_v37 = vld [vmem:[%s11285_s1 + $0x70] sm:$0xff] }
 0x369   :  { %v5511_v32 = vor.u32 %v6575_v23, %v5508_v30  ;;  %v5495_v34 = vor.u32 %v6571_v40, %v5492_v15  ;;  %11448 = vst [vmem:[#allocation18_spill] sm:$0xff] %v9473_v37  ;;  %v6567_v26 = vld [vmem:[%s11287_s3 + $0x40c] sm:$0xf]  ;;  %v5476_v57 = vld [vmem:[%s11287_s3 + $0x418] sm:$0xf0]  ;;  %v9491_v30 = vld [vmem:[%s11285_s1 + $0xb0] sm:$0xff] }
 0x36a   :  { %11443 = vst [vmem:[#allocation16_spill] sm:$0xff] %v9429_v36  ;;  %v5479_v40 = vor.u32 %v6567_v26, %v5476_v57  ;;  %v9497_v15 = vld [vmem:[%s11285_s1 + $0x68] sm:$0xff]  ;;  %v9515_v26 = vld [vmem:[%s11285_s1 + $0xf8] sm:$0xff]  ;;  %v9521_v57 = vld [vmem:[%s11285_s1 + $0x60] sm:$0xff] }
 0x36b   :  { %2500 = vmatpush.bf16.msrb.mxu3 %v5475_v28  ;;  %2511 = vmatpush.bf16.msra.mxu0 %v5511_v32  ;;  %11450 = vst [vmem:[#allocation21_spill] sm:$0xff] %v9491_v30  ;;  %v9503_v32 = vld [vmem:[%s11285_s1 + $0x28] sm:$0xff] }
 0x36c   :  { %2524 = vmatpush.bf16.msra.mxu1 %v9473_v37  ;;  %2537 = vmatpush.bf16.msra.mxu2 %v9485_v21  ;;  %11451 = vst [vmem:[#allocation20_spill] sm:$0xff] %v9497_v15 }
 0x36d   :  { %11452 = vst [vmem:[#allocation11_spill] sm:$0xff] %v9503_v32 }
 0x36e   :  { %11454 = vst [vmem:[#allocation5_spill] sm:$0xff] %v9515_v26 }
 0x36f   :  { %2549 = vmatpush.bf16.msra.mxu3 %v9467_v33  ;;  %v2126_v25 = vpop.f32.mrf.mxu2  ;;  %v2139_v54 = vpop.f32.mrf.mxu3  ;;  %2512 = vmatpush.bf16.msra.mxu0 %v5495_v34  ;;  %v9509_v34 = vld [vmem:[%s11285_s1 + $0xa8] sm:$0xff]  ;;  %11455 = vst [vmem:[#allocation6_spill] sm:$0xff] %v9521_v57  ;;  %v9539_v33 = vld [vmem:[%s11285_s1 + $0xf0] sm:$0xff] }
 0x370   :  { %v2154_v23 = vpop.f32.mrf.mxu0  ;;  %v2167_v28 = vpop.f32.mrf.mxu1  ;;  %2525 = vmatpush.bf16.msra.mxu1 %v9497_v15  ;;  %2538 = vmatpush.bf16.msra.mxu2 %v9503_v32  ;;  %11453 = vst [vmem:[#allocation7_spill] sm:$0xff] %v9509_v34 }
 0x371   :  { %11458 = vst [vmem:[#allocation9_spill] sm:$0xff] %v9539_v33 }
 0x373   :  { %2550 = vmatpush.bf16.msra.mxu3 %v9491_v30  ;;  %2513 = vmatpush.bf16.msra.mxu0 %v5479_v40  ;;  %v9527_v40 = vld [vmem:[%s11285_s1 + $0x20] sm:$0xff] }
 0x374   :  { %2526 = vmatpush.bf16.msra.mxu1 %v9521_v57  ;;  %11456 = vst [vmem:[#allocation8_spill] sm:$0xff] %v9527_v40  ;;  %2539 = vmatpush.bf16.msra.mxu2 %v9527_v40  ;;  %v9545_v40 = vld [vmem:[%s11285_s1 + $0x58] sm:$0xff]  ;;  %v9617_v57 = vld [vmem:[%s11285_s1 + $0x40] sm:$0xff] }
 0x375   :  { %11459 = vst [vmem:[#allocation10_spill] sm:$0xff] %v9545_v40 }
 0x376   :  { %11471 = vst [vmem:[#allocation33_spill] sm:$0xff] %v9617_v57 }
 0x377   :  { %2551 = vmatpush.bf16.msra.mxu3 %v9509_v34  ;;  %2563 = vmatpush.bf16.msrb.mxu0 %v9515_v26  ;;  %v2180_v25 = vpop.f32.mrf.mxu2  ;;  %v2194_v54 = vpop.f32.mrf.mxu3  ;;  %v9533_v26 = vld [vmem:[%s11285_s1 + $0xa0] sm:$0xff] }
 0x378   :  { %v2156_v34 = vpop.f32.mrf.mxu0  ;;  %v2169_v30 = vpop.f32.mrf.mxu1  ;;  %11457 = vst [vmem:[#allocation12_spill] sm:$0xff] %v9533_v26  ;;  %2527 = vmatpush.bf16.msra.mxu1 %v9545_v40 }
 0x379   :  { %v9551_v30 = vld [vmem:[%s11285_s1 + $0x18] sm:$0xff] }
 0x37a   :  { %11460 = vst [vmem:[#allocation22_spill] sm:$0xff] %v9551_v30  ;;  %2540 = vmatpush.bf16.msra.mxu2 %v9551_v30  ;;  %v9557_v34 = vld [vmem:[%s11285_s1 + $0x98] sm:$0xff] }
 0x37b   :  { %2552 = vmatpush.bf16.msra.mxu3 %v9533_v26  ;;  %2564 = vmatpush.bf16.msrb.mxu0 %v9539_v33  ;;  %11461 = vst [vmem:[#allocation23_spill] sm:$0xff] %v9557_v34  ;;  %v9563_v26 = vld [vmem:[%s11285_s1 + $0xe8] sm:$0xff]  ;;  %v9569_v33 = vld [vmem:[%s11285_s1 + $0x50] sm:$0xff] }
 0x37c   :  { %11462 = vst [vmem:[#allocation24_spill] sm:$0xff] %v9563_v26  ;;  %2528 = vmatpush.bf16.msra.mxu1 %v9569_v33 }
 0x37d   :  { %11463 = vst [vmem:[#allocation25_spill] sm:$0xff] %v9569_v33  ;;  %v9599_v33 = vld [vmem:[%s11285_s1 + $0x8] sm:$0xff] }
 0x37e   :  { %11468 = vst [vmem:[#allocation30_spill] sm:$0xff] %v9599_v33 }
 0x37f   :  { %2553 = vmatpush.bf16.msra.mxu3 %v9557_v34  ;;  %2565 = vmatpush.bf16.msrb.mxu0 %v9563_v26  ;;  %v2182_v30 = vpop.f32.mrf.mxu2  ;;  %v2196_v40 = vpop.f32.mrf.mxu3  ;;  %v9575_v34 = vld [vmem:[%s11285_s1 + $0x10] sm:$0xff] }
 0x380   :  { %11464 = vst [vmem:[#allocation26_spill] sm:$0xff] %v9575_v34  ;;  %2541 = vmatpush.bf16.msra.mxu2 %v9575_v34  ;;  %v9581_v26 = vld [vmem:[%s11285_s1 + $0x90] sm:$0xff]  ;;  %v9587_v30 = vld [vmem:[%s11285_s1 + $0xe0] sm:$0xff]  ;;  %v9593_v40 = vld [vmem:[%s11285_s1 + $0x48] sm:$0xff] }
 0x381   :  { %v2208_v32 = vpop.f32.mrf.mxu0  ;;  %11465 = vst [vmem:[#allocation27_spill] sm:$0xff] %v9581_v26  ;;  %2529 = vmatpush.bf16.msra.mxu1 %v9593_v40 }
 0x382   :  { %11466 = vst [vmem:[#allocation28_spill] sm:$0xff] %v9587_v30 }
 0x383   :  { %2554 = vmatpush.bf16.msra.mxu3 %v9581_v26  ;;  %2566 = vmatpush.bf16.msrb.mxu0 %v9587_v30  ;;  %11467 = vst [vmem:[#allocation29_spill] sm:$0xff] %v9593_v40  ;;  %v2222_v34 = vpop.f32.mrf.mxu1  ;;  %v2168_v26 = vadd.f32 %v2167_v28, %v2154_v23  ;;  %v9605_v30 = vld [vmem:[%s11285_s1 + $0x88] sm:$0xff]  ;;  %v9611_v40 = vld [vmem:[%s11285_s1 + $0xd8] sm:$0xff]  ;;  %v9623_v28 = vld [vmem:[%s11285_s1] sm:$0xff] }
 0x384   :  { %2542 = vmatpush.bf16.msra.mxu2 %v9599_v33  ;;  %11469 = vst [vmem:[#allocation31_spill] sm:$0xff] %v9605_v30 }
 0x385   :  { %11470 = vst [vmem:[#allocation32_spill] sm:$0xff] %v9611_v40  ;;  %2530 = vmatpush.bf16.msra.mxu1 %v9617_v57  ;;  %v2184_v33 = vadd.f32 %v2180_v25, %v2168_v26  ;;  %v9635_v57 = vld [vmem:[%s11285_s1 + $0xd0] sm:$0xff] }
 0x386   :  { %11472 = vst [vmem:[#allocation34_spill] sm:$0xff] %v9623_v28 }
 0x387   :  { %2555 = vmatpush.bf16.msra.mxu3 %v9605_v30  ;;  %2567 = vmatpush.bf16.msrb.mxu0 %v9611_v40  ;;  %v2236_v23 = vpop.f32.mrf.mxu2  ;;  %v9629_v40 = vld [vmem:[%s11285_s1 + $0x80] sm:$0xff]  ;;  %11474 = vst [vmem:[#allocation36_spill] sm:$0xff] %v9635_v57  ;;  %v2198_v31 = vadd.f32 %v2194_v54, %v2184_v33 }
 0x388   :  { %2543 = vmatpush.bf16.msra.mxu2 %v9623_v28  ;;  %v2250_v30 = vpop.f32.mrf.mxu3  ;;  %11473 = vst [vmem:[#allocation35_spill] sm:$0xff] %v9629_v40 }
 0x389   :  { %v2210_v21 = vpop.f32.mrf.mxu0  ;;  %v2212_v28 = vadd.f32 %v2208_v32, %v2198_v31  ;;  %v5691_v31 = vld [vmem:[%s11287_s3 + $0x580] sm:$0xf] }
 0x38a   :  { %v9641_v21 = vld [vmem:[%s11285_s1 + $0xc8] sm:$0xff] }
 0x38b   :  { %2556 = vmatpush.bf16.msra.mxu3 %v9629_v40  ;;  %2568 = vmatpush.bf16.msrb.mxu0 %v9635_v57  ;;  %v2224_v15 = vpop.f32.mrf.mxu1  ;;  %11475 = vst [vmem:[#allocation37_spill] sm:$0xff] %v9641_v21  ;;  %v9647_v40 = vld [vmem:[%s11285_s1 + $0xc0] sm:$0xff]  ;;  %v2226_v57 = vadd.f32 %v2222_v34, %v2212_v28  ;;  %v5709_v34 = vld [vmem:[%s11287_s3 + $0x5b0] sm:$0xf0]  ;;  %v6629_v28 = vld [vmem:[%s11287_s3 + $0x5f4] sm:$0xf0] }
 0x38d   :  { %v2240_v15 = vadd.f32 %v2236_v23, %v2226_v57  ;;  %v6618_v57 = vld [vmem:[%s11287_s3 + $0x5a4] sm:$0xf] }
 0x38e   :  { %v5712_v23 = vor.u32 %v6618_v57, %v5709_v34  ;;  %v6619_v34 = vld [vmem:[%s11287_s3 + $0x5ac] sm:$0xf] }
 0x38f   :  { %2569 = vmatpush.bf16.msrb.mxu0 %v9641_v21  ;;  %v2238_v26 = vpop.f32.mrf.mxu2  ;;  %v2254_v33 = vadd.f32 %v2250_v30, %v2240_v15  ;;  %v5747_v30 = vld [vmem:[%s11287_s3 + $0x5e8] sm:$0xf] }
 0x390   :  { %v2252_v25 = vpop.f32.mrf.mxu3  ;;  %v6627_v26 = vld [vmem:[%s11287_s3 + $0x5ec] sm:$0xf] }
 0x391   :  { %v5749_v25 = vld [vmem:[%s11287_s3 + $0x5f8] sm:$0xf0] }
 0x392   :  { %v5752_v15 = vor.u32 %v6627_v26, %v5749_v25  ;;  %v6606_v26 = vld [vmem:[%s11287_s3 + $0x544] sm:$0xf] }
 0x393   :  { %2570 = vmatpush.bf16.msrb.mxu0 %v9647_v40 }
 0x3a1   :  { %v2266_v54 = vpop.f32.mrf.mxu0 }
 0x3a2   :  { %v2270_v37 = vadd.f32 %v2266_v54, %v2254_v33  ;;  %v5675_v33 = vld [vmem:[%s11287_s3 + $0x560] sm:$0xf]  ;;  %v6612_v54 = vld [vmem:[%s11287_s3 + $0x56c] sm:$0xf0] }
 0x3a4   :  { %v2271_v20 = vadd.f32 %v9062_v35, %v2270_v37  ;;  %v6616_v37 = vld [vmem:[%s11287_s3 + $0x58c] sm:$0xf0] }
 0x3a5   :  { %v5692_v32 = vor.u32 %v6616_v37, %v5691_v31  ;;  %v6621_v31 = vld [vmem:[%s11287_s3 + $0x5b4] sm:$0xf0] }
 0x3a6   :  { %v2272_v36 = vmax.f32 %v2271_v20, 0.0 }
 0x3a8   :  { %v2273_v27 = vpack.c.bf16 %v2272_v36, %v2272_v36  ;;  %v5725_v36 = vld [vmem:[%s11287_s3 + $0x5d0] sm:$0xf0] }
 0x3a9   :  { %v2268_v21 = vpop.f32.mrf.mxu0 }
 0x3aa   :  { %2475 = vmatmul.bf16.vlgmr.msrb.gmra.mxu1 %v2273_v27  ;;  %2488 = vmatmul.bf16.vlgmr.msrb.gmra.mxu2 %v2273_v27  ;;  %v5748_v21 = vor.u32 %v6629_v28, %v5747_v30  ;;  %v5717_v30 = vld [vmem:[%s11287_s3 + $0x5b8] sm:$0xf0] }
 0x3ab   :  { %2501 = vmatmul.bf16.vlgmr.msrb.gmra.mxu3 %v2273_v27  ;;  %2514 = vmatmul.bf16.vlgmr.msra.gmra.mxu0 %v2273_v27  ;;  %v6900_v27 = vld [vmem:[%s11284_s0 + $0x9] sm:$0x1]  ;;  %v5720_v28 = vor.u32 %v6619_v34, %v5717_v30  ;;  %v6611_v34 = vld [vmem:[%s11287_s3 + $0x56c] sm:$0xf]  ;;  %v5685_v30 = vld [vmem:[%s11287_s3 + $0x578] sm:$0xf0] }
 0x3ac   :  { %2577 = vmatpush.bf16.msrb.mxu1 %v9068_v39  ;;  %2591 = vmatpush.bf16.msrb.mxu2 %v9086_v45 }
 0x3ad   :  { %2605 = vmatpush.bf16.msrb.mxu3 %v9074_v42  ;;  %2619 = vmatpush.bf16.msra.mxu0 %v9080_v44 }
 0x3b0   :  { %2578 = vmatpush.bf16.msrb.mxu1 %v9092_v46  ;;  %2592 = vmatpush.bf16.msrb.mxu2 %v9110_v29 }
 0x3b1   :  { %2606 = vmatpush.bf16.msrb.mxu3 %v9098_v50  ;;  %2620 = vmatpush.bf16.msra.mxu0 %v9104_v52 }
 0x3b4   :  { %2579 = vmatpush.bf16.msrb.mxu1 %v9116_v62  ;;  %2593 = vmatpush.bf16.msrb.mxu2 %v9134_v43 }
 0x3b5   :  { %2607 = vmatpush.bf16.msrb.mxu3 %v9122_v48  ;;  %2621 = vmatpush.bf16.msra.mxu0 %v9128_v56 }
 0x3b8   :  { %2580 = vmatpush.bf16.msrb.mxu1 %v9140_v11  ;;  %2594 = vmatpush.bf16.msrb.mxu2 %v9158_v61 }
 0x3b9   :  { %2608 = vmatpush.bf16.msrb.mxu3 %v9146_v3  ;;  %2622 = vmatpush.bf16.msra.mxu0 %v9152_v8 }
 0x3ba   :  { %2544 = vmatmul.bf16.vlgmr.msra.gmra.mxu2 %v8694_v19  ;;  %2531 = vmatmul.bf16.vlgmr.msra.gmra.mxu1 %v9166_v53  ;;  %v9687_v19 = vld [vmem:[%s11285_s1 + $0x1c8] sm:$0xff]  ;;  %v6626_v53 = vld [vmem:[%s11287_s3 + $0x5e4] sm:$0xf] }
 0x3bb   :  { %2557 = vmatmul.bf16.vlgmr.msra.gmra.mxu3 %v6900_v27  ;;  %2571 = vmatmul.bf16.vlgmr.msrb.gmra.mxu0 %v8772_v7  ;;  %v9693_v7 = vld [vmem:[%s11285_s1 + $0x100] sm:$0xff]  ;;  %v5676_v27 = vor.u32 %v6612_v54, %v5675_v33  ;;  %v6617_v33 = vld [vmem:[%s11287_s3 + $0x594] sm:$0xf0] }
 0x3bc   :  { %2581 = vmatpush.bf16.msrb.mxu1 %v9173_v63  ;;  %2595 = vmatpush.bf16.msrb.mxu2 %v9191_v2 }
 0x3bd   :  { %2609 = vmatpush.bf16.msrb.mxu3 %v9179_v60  ;;  %2623 = vmatpush.bf16.msra.mxu0 %v9185_v10 }
 0x3c0   :  { %2582 = vmatpush.bf16.msrb.mxu1 %v9197_v5  ;;  %2596 = vmatpush.bf16.msrb.mxu2 %v9215_v12 }
 0x3c1   :  { %2610 = vmatpush.bf16.msrb.mxu3 %v9203_v1  ;;  %2624 = vmatpush.bf16.msra.mxu0 %v9209_v47 }
 0x3c4   :  { %2583 = vmatpush.bf16.msrb.mxu1 %v9221_v13  ;;  %2597 = vmatpush.bf16.msrb.mxu2 %v8715_v55  ;;  %v9702_v55 = vld [vmem:[%s11285_s1 + $0x1c0] sm:$0xff] }
 0x3c5   :  { %2611 = vmatpush.bf16.msrb.mxu3 %v8721_v59  ;;  %2625 = vmatpush.bf16.msra.mxu0 %v9687_v19  ;;  %v6904_v59 = vld [vmem:[%s11284_s0 + $0xe] sm:$0x1] }
 0x3c8   :  { %2584 = vmatpush.bf16.msrb.mxu1 %v9693_v7  ;;  %2598 = vmatpush.bf16.msrb.mxu2 %v8750_v24  ;;  %v5739_v24 = vld [vmem:[%s11287_s3 + $0x5e0] sm:$0xf] }
 0x3c9   :  { %2612 = vmatpush.bf16.msrb.mxu3 %v8756_v16  ;;  %2626 = vmatpush.bf16.msra.mxu0 %v9702_v55  ;;  %v6628_v16 = vld [vmem:[%s11287_s3 + $0x5ec] sm:$0xf0] }
 0x3cb   :  { %2599 = vmatmul.bf16.vlgmr.msrb.gmra.mxu2 %v6904_v59  ;;  %2585 = vmatmul.bf16.vlgmr.msrb.gmra.mxu1 %v9239_v6  ;;  %v5741_v6 = vld [vmem:[%s11287_s3 + $0x5f0] sm:$0xf0]  ;;  %v6614_v59 = vld [vmem:[%s11287_s3 + $0x584] sm:$0xf] }
 0x3cc   :  { %2635 = vmatpush.bf16.msra.mxu1 %v8744_v41  ;;  %2613 = vmatmul.bf16.vlgmr.msrb.gmra.mxu3 %v8820_v49  ;;  %v5592_v41 = vld [vmem:[%s11284_s0 + $0x13] sm:$0x1] }
 0x3cd   :  { %2627 = vmatmul.bf16.vlgmr.msra.gmra.mxu0 %v9251_v18 }
 0x3ce   :  { %2871 = vmatpush.bf16.msrb.mxu0 %v5748_v21  ;;  %v6604_v21 = vld [vmem:[%s11287_s3 + $0x52c] sm:$0xf0] }
 0x3d0   :  { %2636 = vmatpush.bf16.msra.mxu1 %v8778_v17  ;;  %v5740_v17 = vor.u32 %v6628_v16, %v5739_v24  ;;  %v5731_v24 = vld [vmem:[%s11287_s3 + $0x5c8] sm:$0xf] }
 0x3d2   :  { %2845 = vmatpush.bf16.msra.mxu2 %v5740_v17  ;;  %v6625_v17 = vld [vmem:[%s11287_s3 + $0x5d4] sm:$0xf0] }
 0x3d4   :  { %2637 = vmatpush.bf16.msra.mxu1 %v8784_v9  ;;  %v5723_v9 = vld [vmem:[%s11287_s3 + $0x5c0] sm:$0xf] }
 0x3d8   :  { %2638 = vmatpush.bf16.msra.mxu1 %v8790_v4  ;;  %v6624_v4 = vld [vmem:[%s11287_s3 + $0x5cc] sm:$0xf0] }
 0x3d9   :  { %v5724_v49 = vor.u32 %v6624_v4, %v5723_v9  ;;  %v5732_v9 = vor.u32 %v6625_v17, %v5731_v24  ;;  %v6623_v4 = vld [vmem:[%s11287_s3 + $0x5cc] sm:$0xf]  ;;  %v5627_v17 = vld [vmem:[%s11287_s3 + $0x500] sm:$0xf] }
 0x3db   :  { %2846 = vmatpush.bf16.msra.mxu2 %v5724_v49  ;;  %v5733_v49 = vld [vmem:[%s11287_s3 + $0x5d8] sm:$0xf0]  ;;  %2872 = vmatpush.bf16.msrb.mxu0 %v5732_v9  ;;  %v6600_v9 = vld [vmem:[%s11287_s3 + $0x50c] sm:$0xf0] }
 0x3dc   :  { %2639 = vmatpush.bf16.msra.mxu1 %v11436_v58  ;;  %v5744_v58 = vor.u32 %v6626_v53, %v5741_v6  ;;  %v5736_v53 = vor.u32 %v6623_v4, %v5733_v49  ;;  %v5659_v6 = vld [vmem:[%s11287_s3 + $0x540] sm:$0xf] }
 0x3dd   :  { %v11476_v4 = vld [vmem:[#allocation13_spill] sm:$0xff] }
 0x3de   :  { %2858 = vmatpush.bf16.msra.mxu3 %v5744_v58  ;;  %v6608_v58 = vld [vmem:[%s11287_s3 + $0x54c] sm:$0xf0] }
 0x3e0   :  { %2640 = vmatpush.bf16.msra.mxu1 %v11437_v0  ;;  %v5707_v0 = vld [vmem:[%s11287_s3 + $0x5a0] sm:$0xf] }
 0x3e4   :  { %2641 = vmatpush.bf16.msra.mxu1 %v11438_v51  ;;  %v6620_v51 = vld [vmem:[%s11287_s3 + $0x5ac] sm:$0xf0] }
 0x3e5   :  { %v5708_v18 = vor.u32 %v6620_v51, %v5707_v0  ;;  %v5660_v0 = vor.u32 %v6608_v58, %v5659_v6  ;;  %v6610_v51 = vld [vmem:[%s11287_s3 + $0x564] sm:$0xf]  ;;  %v5628_v6 = vor.u32 %v6600_v9, %v5627_v17  ;;  %v11479_v9 = vld [vmem:[#allocation18_spill] sm:$0xff] }
 0x3e6   :  { %v6602_v58 = vld [vmem:[%s11287_s3 + $0x524] sm:$0xf] }
 0x3e7   :  { %2847 = vmatpush.bf16.msra.mxu2 %v5708_v18  ;;  %v5715_v18 = vld [vmem:[%s11287_s3 + $0x5a8] sm:$0xf] }
 0x3e8   :  { %2642 = vmatpush.bf16.msra.mxu1 %v11439_v14  ;;  %v6622_v14 = vld [vmem:[%s11287_s3 + $0x5c4] sm:$0xf]  ;;  %v5716_v57 = vor.u32 %v6621_v31, %v5715_v18  ;;  %v6613_v31 = vld [vmem:[%s11287_s3 + $0x574] sm:$0xf0] }
 0x3e9   :  { %v5728_v20 = vor.u32 %v6622_v14, %v5725_v36  ;;  %v5677_v14 = vld [vmem:[%s11287_s3 + $0x570] sm:$0xf0] }
 0x3ea   :  { %2873 = vmatpush.bf16.msrb.mxu0 %v5716_v57 }
 0x3eb   :  { %2643 = vmatmul.bf16.vlgmr.msra.gmra.mxu1 %v5592_v41  ;;  %2859 = vmatpush.bf16.msra.mxu3 %v5728_v20  ;;  %v5693_v41 = vld [vmem:[%s11287_s3 + $0x590] sm:$0xf0]  ;;  %v5680_v20 = vor.u32 %v6610_v51, %v5677_v14  ;;  %v5683_v51 = vld [vmem:[%s11287_s3 + $0x568] sm:$0xf]  ;;  %v11477_v14 = vld [vmem:[#allocation16_spill] sm:$0xff] }
 0x3ec   :  { %2848 = vmatpush.bf16.msra.mxu2 %v5692_v32  ;;  %2884 = vmatpush.bf16.msrb.mxu1 %v5752_v15  ;;  %v5696_v16 = vor.u32 %v6614_v59, %v5693_v41  ;;  %v5699_v15 = vld [vmem:[%s11287_s3 + $0x588] sm:$0xf]  ;;  %v6615_v59 = vld [vmem:[%s11287_s3 + $0x58c] sm:$0xf]  ;;  %v5701_v41 = vld [vmem:[%s11287_s3 + $0x598] sm:$0xf0]  ;;  %v5684_v57 = vor.u32 %v6613_v31, %v5683_v51 }
 0x3ed   :  { %v6599_v31 = vld [vmem:[%s11287_s3 + $0x50c] sm:$0xf] }
 0x3ef   :  { %2860 = vmatpush.bf16.msra.mxu3 %v5712_v23 }
 0x3f0   :  { %2849 = vmatpush.bf16.msra.mxu2 %v5676_v27  ;;  %2885 = vmatpush.bf16.msrb.mxu1 %v5736_v53  ;;  %v5700_v27 = vor.u32 %v6617_v33, %v5699_v15  ;;  %v6609_v15 = vld [vmem:[%s11287_s3 + $0x554] sm:$0xf0]  ;;  %v6607_v33 = vld [vmem:[%s11287_s3 + $0x54c] sm:$0xf] }
 0x3f2   :  { %2874 = vmatpush.bf16.msrb.mxu0 %v5700_v27 }
 0x3f3   :  { %2861 = vmatpush.bf16.msra.mxu3 %v5696_v16  ;;  %v5704_v16 = vor.u32 %v6615_v59, %v5701_v41  ;;  %v5651_v41 = vld [vmem:[%s11287_s3 + $0x528] sm:$0xf] }
 0x3f4   :  { %2850 = vmatpush.bf16.msra.mxu2 %v5660_v0  ;;  %2886 = vmatpush.bf16.msrb.mxu1 %v5720_v28  ;;  %v5645_v0 = vld [vmem:[%s11287_s3 + $0x530] sm:$0xf0]  ;;  %v11478_v28 = vld [vmem:[#allocation14_spill] sm:$0xff] }
 0x3f6   :  { %2875 = vmatpush.bf16.msrb.mxu0 %v5684_v57  ;;  %v11481_v57 = vld [vmem:[#allocation20_spill] sm:$0xff] }
 0x3f7   :  { %2862 = vmatpush.bf16.msra.mxu3 %v5680_v20  ;;  %v5648_v20 = vor.u32 %v6602_v58, %v5645_v0 }
 0x3f8   :  { %2887 = vmatpush.bf16.msrb.mxu1 %v5704_v16  ;;  %v6603_v16 = vld [vmem:[%s11287_s3 + $0x52c] sm:$0xf] }
 0x427   :  { %v2476_v36 = vpop.f32.mrf.mxu1 }
 0x428   :  { %v9818_v37 = vadd.f32 %v2476_v36, %v9375_v22  ;;  %v2515_v32 = vpop.f32.mrf.mxu0  ;;  %v5643_v22 = vld [vmem:[%s11287_s3 + $0x520] sm:$0xf] }
 0x429   :  { %v9827_v23 = vadd.f32 %v2515_v32, %v9432_v38  ;;  %v5644_v25 = vor.u32 %v6604_v21, %v5643_v22  ;;  %v5661_v38 = vld [vmem:[%s11287_s3 + $0x550] sm:$0xf0]  ;;  %v5688_v22 = vor.u32 %v6611_v34, %v5685_v30  ;;  %v6598_v21 = vld [vmem:[%s11287_s3 + $0x504] sm:$0xf] }
 0x42a   :  { %v5664_v54 = vor.u32 %v6606_v26, %v5661_v38  ;;  %v5629_v26 = vld [vmem:[%s11287_s3 + $0x510] sm:$0xf0] }
 0x42b   :  { %2851 = vmatpush.bf16.msra.mxu2 %v5644_v25  ;;  %v5667_v25 = vld [vmem:[%s11287_s3 + $0x548] sm:$0xf]  ;;  %2888 = vmatpush.bf16.msrb.mxu1 %v5688_v22  ;;  %v5632_v38 = vor.u32 %v6598_v21, %v5629_v26  ;;  %v11482_v34 = vld [vmem:[#allocation19_spill] sm:$0xff] }
 0x42c   :  { %2863 = vmatpush.bf16.msra.mxu3 %v5664_v54  ;;  %v5669_v54 = vld [vmem:[%s11287_s3 + $0x558] sm:$0xf0]  ;;  %v5668_v27 = vor.u32 %v6609_v15, %v5667_v25  ;;  %v11483_v26 = vld [vmem:[#allocation6_spill] sm:$0xff] }
 0x42d   :  { %v2489_v24 = vpop.f32.mrf.mxu2  ;;  %v5672_v59 = vor.u32 %v6607_v33, %v5669_v54  ;;  %v11485_v33 = vld [vmem:[#allocation17_spill] sm:$0xff] }
 0x42e   :  { %v9860_v49 = vadd.f32 %v2489_v24, %v11476_v4  ;;  %v2502_v53 = vpop.f32.mrf.mxu3  ;;  %v6605_v24 = vld [vmem:[%s11287_s3 + $0x534] sm:$0xf0]  ;;  %v5653_v4 = vld [vmem:[%s11287_s3 + $0x538] sm:$0xf0]  ;;  %2876 = vmatpush.bf16.msrb.mxu0 %v5668_v27  ;;  %v11486_v27 = vld [vmem:[#allocation5_spill] sm:$0xff] }
 0x42f   :  { %v9872_v18 = vadd.f32 %v2502_v53, %v11477_v14  ;;  %v2478_v36 = vpop.f32.mrf.mxu1  ;;  %2852 = vmatpush.bf16.msra.mxu2 %v5628_v6  ;;  %v11480_v6 = vld [vmem:[#allocation15_spill] sm:$0xff]  ;;  %v5652_v58 = vor.u32 %v6605_v24, %v5651_v41  ;;  %2889 = vmatpush.bf16.msrb.mxu1 %v5672_v59  ;;  %v5656_v51 = vor.u32 %v6603_v16, %v5653_v4  ;;  %v5635_v14 = vld [vmem:[%s11287_s3 + $0x508] sm:$0xf]  ;;  %v11488_v41 = vld [vmem:[#allocation8_spill] sm:$0xff] }
 0x430   :  { %v2517_v32 = vpop.f32.mrf.mxu0  ;;  %2864 = vmatpush.bf16.msra.mxu3 %v5648_v20  ;;  %v6601_v36 = vld [vmem:[%s11287_s3 + $0x514] sm:$0xf0]  ;;  %v11487_v59 = vld [vmem:[#allocation10_spill] sm:$0xff]  ;;  %v11489_v24 = vld [vmem:[#allocation21_spill] sm:$0xff] }
 0x431   :  { %v5637_v32 = vld [vmem:[%s11287_s3 + $0x518] sm:$0xf0]  ;;  %v5636_v30 = vor.u32 %v6601_v36, %v5635_v14  ;;  %v11490_v16 = vld [vmem:[#allocation9_spill] sm:$0xff] }
 0x432   :  { %2877 = vmatpush.bf16.msrb.mxu0 %v5652_v58  ;;  %v5640_v22 = vor.u32 %v6599_v31, %v5637_v32  ;;  %v11491_v4 = vld [vmem:[#allocation25_spill] sm:$0xff]  ;;  %v11493_v58 = vld [vmem:[#allocation7_spill] sm:$0xff]  ;;  %v11494_v14 = vld [vmem:[#allocation24_spill] sm:$0xff] }
 0x433   :  { %2901 = vmatpush.bf16.msrb.mxu2 %v11478_v28  ;;  %2890 = vmatpush.bf16.msrb.mxu1 %v5656_v51  ;;  %v11495_v36 = vld [vmem:[#allocation29_spill] sm:$0xff]  ;;  %v11496_v32 = vld [vmem:[#allocation26_spill] sm:$0xff] }
 0x434   :  { %2865 = vmatpush.bf16.msra.mxu3 %v5632_v38  ;;  %v11484_v38 = vld [vmem:[#allocation11_spill] sm:$0xff] }
 0x435   :  { %v2491_v17 = vpop.f32.mrf.mxu2 }
 0x436   :  { %v2504_v53 = vpop.f32.mrf.mxu3  ;;  %2878 = vmatpush.bf16.msrb.mxu0 %v5636_v30  ;;  %v11498_v30 = vld [vmem:[#allocation28_spill] sm:$0xff] }
 0x437   :  { %2902 = vmatpush.bf16.msrb.mxu2 %v11479_v9  ;;  %v2532_v0 = vpop.f32.mrf.mxu1  ;;  %2891 = vmatpush.bf16.msrb.mxu1 %v5640_v22  ;;  %v11499_v22 = vld [vmem:[#allocation33_spill] sm:$0xff] }
 0x438   :  { %2914 = vmatpush.bf16.msrb.mxu3 %v11480_v6  ;;  %v2572_v20 = vpop.f32.mrf.mxu0  ;;  %v11492_v6 = vld [vmem:[#allocation22_spill] sm:$0xff] }
 0x43a   :  { %2927 = vmatpush.bf16.msra.mxu0 %v11485_v33  ;;  %v11500_v33 = vld [vmem:[#allocation30_spill] sm:$0xff] }
 0x43b   :  { %2903 = vmatpush.bf16.msrb.mxu2 %v11481_v57  ;;  %2941 = vmatpush.bf16.msra.mxu1 %v11486_v27 }
 0x43c   :  { %2915 = vmatpush.bf16.msrb.mxu3 %v11482_v34  ;;  %v11497_v34 = vld [vmem:[#allocation12_spill] sm:$0xff] }
 0x43d   :  { %v2545_v21 = vpop.f32.mrf.mxu2 }
 0x43e   :  { %v2558_v25 = vpop.f32.mrf.mxu3  ;;  %2928 = vmatpush.bf16.msra.mxu0 %v11489_v24 }
 0x43f   :  { %2904 = vmatpush.bf16.msrb.mxu2 %v11483_v26  ;;  %v2534_v15 = vpop.f32.mrf.mxu1  ;;  %2942 = vmatpush.bf16.msra.mxu1 %v11490_v16 }
 0x440   :  { %2916 = vmatpush.bf16.msrb.mxu3 %v11484_v38  ;;  %v2574_v54 = vpop.f32.mrf.mxu0  ;;  %v2546_v38 = vadd.f32 %v2545_v21, %v2532_v0  ;;  %v11506_v21 = vld [vmem:[#allocation31_spill] sm:$0xff] }
 0x442   :  { %2929 = vmatpush.bf16.msra.mxu0 %v11493_v58  ;;  %v11503_v58 = vld [vmem:[#allocation34_spill] sm:$0xff] }
 0x443   :  { %2905 = vmatpush.bf16.msrb.mxu2 %v11487_v59  ;;  %2943 = vmatpush.bf16.msra.mxu1 %v11494_v14 }
 0x444   :  { %2917 = vmatpush.bf16.msrb.mxu3 %v11488_v41  ;;  %v11501_v41 = vld [vmem:[#allocation23_spill] sm:$0xff] }
 0x445   :  { %v2547_v17 = vpop.f32.mrf.mxu2 }
 0x446   :  { %v2560_v53 = vpop.f32.mrf.mxu3  ;;  %2930 = vmatpush.bf16.msra.mxu0 %v11497_v34  ;;  %v11502_v17 = vld [vmem:[#allocation32_spill] sm:$0xff] }
 0x447   :  { %2906 = vmatpush.bf16.msrb.mxu2 %v11491_v4  ;;  %2944 = vmatpush.bf16.msra.mxu1 %v11498_v30  ;;  %v2562_v53 = vadd.f32 %v2558_v25, %v2546_v38  ;;  %v11505_v34 = vld [vmem:[#allocation36_spill] sm:$0xff] }
 0x448   :  { %2918 = vmatpush.bf16.msrb.mxu3 %v11492_v6  ;;  %v2586_v51 = vpop.f32.mrf.mxu1 }
 0x44a   :  { %v2628_v31 = vpop.f32.mrf.mxu0  ;;  %2931 = vmatpush.bf16.msra.mxu0 %v11501_v41  ;;  %v11508_v41 = vld [vmem:[#allocation35_spill] sm:$0xff] }
 0x44b   :  { %2907 = vmatpush.bf16.msrb.mxu2 %v11495_v36  ;;  %2945 = vmatpush.bf16.msra.mxu1 %v11502_v17  ;;  %v2576_v36 = vadd.f32 %v2572_v20, %v2562_v53  ;;  %v6658_v53 = vld [vmem:[%s11287_s3 + $0x6e4] sm:$0xf] }
 0x44c   :  { %2919 = vmatpush.bf16.msrb.mxu3 %v11496_v32  ;;  %v11504_v32 = vld [vmem:[#allocation27_spill] sm:$0xff] }
 0x44d   :  { %v2590_v30 = vadd.f32 %v2586_v51, %v2576_v36  ;;  %v5870_v51 = vld [vmem:[%s11287_s3 + $0x6a0] sm:$0xf]  ;;  %v6652_v36 = vld [vmem:[%s11287_s3 + $0x6ac] sm:$0xf0] }
 0x44e   :  { %v2600_v15 = vpop.f32.mrf.mxu2  ;;  %2932 = vmatpush.bf16.msra.mxu0 %v11504_v32 }
 0x44f   :  { %2908 = vmatpush.bf16.msrb.mxu2 %v11499_v22  ;;  %v2614_v54 = vpop.f32.mrf.mxu3  ;;  %2946 = vmatpush.bf16.msra.mxu1 %v11505_v34 }
 0x450   :  { %2920 = vmatpush.bf16.msrb.mxu3 %v11500_v33  ;;  %v2588_v24 = vpop.f32.mrf.mxu1  ;;  %v11507_v33 = vld [vmem:[#allocation37_spill] sm:$0xff] }
 0x451   :  { %v2604_v24 = vadd.f32 %v2600_v15, %v2590_v30  ;;  %v6659_v30 = vld [vmem:[%s11287_s3 + $0x6ec] sm:$0xf]  ;;  %v5912_v15 = vld [vmem:[%s11287_s3 + $0x6f8] sm:$0xf0] }
 0x452   :  { %v2630_v6 = vpop.f32.mrf.mxu0  ;;  %2933 = vmatpush.bf16.msra.mxu0 %v11506_v21 }
 0x453   :  { %2947 = vmatpush.bf16.msra.mxu1 %v11507_v33  ;;  %v2618_v25 = vadd.f32 %v2614_v54, %v2604_v24  ;;  %v5915_v54 = vor.u32 %v6659_v30, %v5912_v15 }
 0x454   :  { %2921 = vmatpush.bf16.msrb.mxu3 %v11503_v58 }
 0x455   :  { %v2632_v38 = vadd.f32 %v2628_v31, %v2618_v25  ;;  %v5871_v31 = vor.u32 %v6652_v36, %v5870_v51  ;;  %v5910_v25 = vld [vmem:[%s11287_s3 + $0x6e8] sm:$0xf]  ;;  %v5880_v51 = vld [vmem:[%s11287_s3 + $0x6b8] sm:$0xf0]  ;;  %v6650_v36 = vld [vmem:[%s11287_s3 + $0x6a4] sm:$0xf] }
 0x456   :  { %v2602_v22 = vpop.f32.mrf.mxu2  ;;  %2934 = vmatpush.bf16.msra.mxu0 %v11508_v41  ;;  %v6648_v41 = vld [vmem:[%s11287_s3 + $0x68c] sm:$0xf0] }
 0x457   :  { %v2616_v0 = vpop.f32.mrf.mxu3  ;;  %2948 = vmatpush.bf16.msra.mxu1 %v9647_v40 }
 0x458   :  { %v5854_v0 = vld [vmem:[%s11287_s3 + $0x680] sm:$0xf] }
 0x459   :  { %v5855_v24 = vor.u32 %v6648_v41, %v5854_v0 }
 0x468   :  { %v2644_v6 = vpop.f32.mrf.mxu1 }
 0x469   :  { %v2648_v58 = vadd.f32 %v2644_v6, %v2632_v38  ;;  %v6661_v38 = vld [vmem:[%s11287_s3 + $0x6f4] sm:$0xf0]  ;;  %v6655_v6 = vld [vmem:[%s11287_s3 + $0x6cc] sm:$0xf] }
 0x46b   :  { %v2649_v32 = vadd.f32 %v9062_v35, %v2648_v58  ;;  %v9977_v35 = vld [vmem:[%s11284_s0 + $0xb] sm:$0x1]  ;;  %v5911_v58 = vor.u32 %v6661_v38, %v5910_v25  ;;  %v6653_v25 = vld [vmem:[%s11287_s3 + $0x6b4] sm:$0xf0]  ;;  %v6647_v38 = vld [vmem:[%s11287_s3 + $0x68c] sm:$0xf] }
 0x46d   :  { %v2650_v34 = vmax.f32 %v2649_v32, 0.0  ;;  %v5896_v32 = vld [vmem:[%s11287_s3 + $0x6d8] sm:$0xf0] }
 0x46f   :  { %v2651_v20 = vpack.c.bf16 %v2650_v34, %v2650_v34  ;;  %v5904_v34 = vld [vmem:[%s11287_s3 + $0x6f0] sm:$0xf0] }
 0x470   :  { %v2646_v22 = vpop.f32.mrf.mxu1  ;;  %v5907_v21 = vor.u32 %v6658_v53, %v5904_v34  ;;  %v5822_v53 = vld [vmem:[%s11287_s3 + $0x640] sm:$0xf]  ;;  %v6640_v34 = vld [vmem:[%s11287_s3 + $0x64c] sm:$0xf0] }
 0x471   :  { %2853 = vmatmul.bf16.vlgmr.msra.gmra.mxu2 %v2651_v20  ;;  %2866 = vmatmul.bf16.vlgmr.msra.gmra.mxu3 %v2651_v20  ;;  %v6654_v22 = vld [vmem:[%s11287_s3 + $0x6c4] sm:$0xf] }
 0x472   :  { %2879 = vmatmul.bf16.vlgmr.msrb.gmra.mxu0 %v2651_v20  ;;  %2892 = vmatmul.bf16.vlgmr.msrb.gmra.mxu1 %v2651_v20  ;;  %v5899_v20 = vor.u32 %v6655_v6, %v5896_v32 }
 0x473   :  { %2955 = vmatpush.bf16.msra.mxu2 %v9068_v39  ;;  %2969 = vmatpush.bf16.msra.mxu3 %v9086_v45  ;;  %v6906_v39 = vld [vmem:[%s11284_s0 + $0xa] sm:$0x1] }
 0x474   :  { %2985 = vmatpush.bf16.msrb.mxu0 %v9074_v42  ;;  %3001 = vmatpush.bf16.msrb.mxu1 %v9080_v44  ;;  %v9986_v42 = vld [vmem:[%s11284_s0 + $0xc] sm:$0x1]  ;;  %v6908_v44 = vld [vmem:[%s11284_s0 + $0xf] sm:$0x1] }
 0x475   :  { %v10004_v45 = vld [vmem:[%s11285_s1 + $0x148] sm:$0xff] }
 0x477   :  { %2956 = vmatpush.bf16.msra.mxu2 %v9092_v46  ;;  %2970 = vmatpush.bf16.msra.mxu3 %v9110_v29  ;;  %v10010_v46 = vld [vmem:[%s11285_s1 + $0x188] sm:$0xff]  ;;  %v10030_v29 = vld [vmem:[%s11285_s1 + $0x180] sm:$0xff] }
 0x478   :  { %2986 = vmatpush.bf16.msrb.mxu0 %v9098_v50  ;;  %3002 = vmatpush.bf16.msrb.mxu1 %v9104_v52  ;;  %v10018_v50 = vld [vmem:[%s11285_s1 + $0x140] sm:$0xff]  ;;  %v10024_v52 = vld [vmem:[%s11285_s1 + $0x238] sm:$0xff] }
 0x47b   :  { %2957 = vmatpush.bf16.msra.mxu2 %v9116_v62  ;;  %2971 = vmatpush.bf16.msra.mxu3 %v9134_v43  ;;  %v5753_v62 = vld [vmem:[%s11284_s0 + $0x14] sm:$0x1]  ;;  %v10051_v43 = vld [vmem:[%s11284_s0 + $0x11] sm:$0x1] }
 0x47c   :  { %2987 = vmatpush.bf16.msrb.mxu0 %v9122_v48  ;;  %3003 = vmatpush.bf16.msrb.mxu1 %v9128_v56  ;;  %v10040_v48 = vld [vmem:[%s11284_s0 + $0x15] sm:$0x1]  ;;  %v10045_v56 = vld [vmem:[%s11284_s0 + $0x10] sm:$0x1] }
 0x47f   :  { %2958 = vmatpush.bf16.msra.mxu2 %v9140_v11  ;;  %2972 = vmatpush.bf16.msra.mxu3 %v9158_v61  ;;  %v10057_v11 = vld [vmem:[%s11285_s1 + $0x230] sm:$0xff]  ;;  %v10076_v61 = vld [vmem:[%s11285_s1 + $0x218] sm:$0xff] }
 0x480   :  { %2988 = vmatpush.bf16.msrb.mxu0 %v9146_v3  ;;  %3004 = vmatpush.bf16.msrb.mxu1 %v9152_v8  ;;  %11509 = vst [vmem:[#allocation13_spill] sm:$0xff] %v10057_v11  ;;  %v10064_v3 = vld [vmem:[%s11285_s1 + $0x228] sm:$0xff]  ;;  %v10070_v8 = vld [vmem:[%s11285_s1 + $0x220] sm:$0xff] }
 0x481   :  { %2909 = vmatmul.bf16.vlgmr.msrb.gmra.mxu2 %v9977_v35  ;;  %2922 = vmatmul.bf16.vlgmr.msrb.gmra.mxu3 %v6906_v39  ;;  %11510 = vst [vmem:[#allocation16_spill] sm:$0xff] %v10064_v3  ;;  %v5888_v39 = vld [vmem:[%s11287_s3 + $0x6d0] sm:$0xf0] }
 0x482   :  { %2935 = vmatmul.bf16.vlgmr.msra.gmra.mxu0 %v9986_v42  ;;  %2949 = vmatmul.bf16.vlgmr.msra.gmra.mxu1 %v6908_v44  ;;  %11511 = vst [vmem:[#allocation14_spill] sm:$0xff] %v10070_v8  ;;  %v5838_v44 = vld [vmem:[%s11287_s3 + $0x660] sm:$0xf] }
 0x483   :  { %2959 = vmatpush.bf16.msra.mxu2 %v9173_v63  ;;  %2973 = vmatpush.bf16.msra.mxu3 %v9191_v2  ;;  %11512 = vst [vmem:[#allocation18_spill] sm:$0xff] %v10076_v61  ;;  %v10082_v63 = vld [vmem:[%s11285_s1 + $0x210] sm:$0xff] }
 0x484   :  { %2989 = vmatpush.bf16.msrb.mxu0 %v9179_v60  ;;  %3005 = vmatpush.bf16.msrb.mxu1 %v9185_v10  ;;  %11513 = vst [vmem:[#allocation15_spill] sm:$0xff] %v10082_v63  ;;  %v10088_v60 = vld [vmem:[%s11285_s1 + $0x208] sm:$0xff]  ;;  %v10094_v10 = vld [vmem:[%s11285_s1 + $0x200] sm:$0xff]  ;;  %v10100_v2 = vld [vmem:[%s11284_s0 + $0x16] sm:$0x1] }
 0x485   :  { %11514 = vst [vmem:[#allocation20_spill] sm:$0xff] %v10088_v60 }
 0x486   :  { %11515 = vst [vmem:[#allocation19_spill] sm:$0xff] %v10094_v10 }
 0x487   :  { %2960 = vmatpush.bf16.msra.mxu2 %v9197_v5  ;;  %2974 = vmatpush.bf16.msra.mxu3 %v9215_v12  ;;  %11516 = vst [vmem:[#allocation6_spill] sm:$0xff] %v10100_v2  ;;  %v5902_v5 = vld [vmem:[%s11287_s3 + $0x6e0] sm:$0xf] }
 0x488   :  { %2990 = vmatpush.bf16.msrb.mxu0 %v9203_v1  ;;  %3006 = vmatpush.bf16.msrb.mxu1 %v9209_v47  ;;  %v6660_v1 = vld [vmem:[%s11287_s3 + $0x6ec] sm:$0xf0]  ;;  %v5886_v47 = vld [vmem:[%s11287_s3 + $0x6c0] sm:$0xf] }
 0x489   :  { %v5903_v12 = vor.u32 %v6660_v1, %v5902_v5  ;;  %v6644_v5 = vld [vmem:[%s11287_s3 + $0x66c] sm:$0xf0]  ;;  %v5894_v1 = vld [vmem:[%s11287_s3 + $0x6c8] sm:$0xf] }
 0x48b   :  { %2961 = vmatpush.bf16.msra.mxu2 %v9221_v13  ;;  %2975 = vmatpush.bf16.msra.mxu3 %v10004_v45  ;;  %v6656_v13 = vld [vmem:[%s11287_s3 + $0x6cc] sm:$0xf0] }
 0x48c   :  { %2991 = vmatpush.bf16.msrb.mxu0 %v10010_v46  ;;  %3007 = vmatpush.bf16.msrb.mxu1 %v9687_v19 }
 0x48f   :  { %2962 = vmatpush.bf16.msra.mxu2 %v9693_v7  ;;  %2976 = vmatpush.bf16.msra.mxu3 %v10018_v50  ;;  %v5887_v7 = vor.u32 %v6656_v13, %v5886_v47  ;;  %v6657_v47 = vld [vmem:[%s11287_s3 + $0x6d4] sm:$0xf0] }
 0x490   :  { %2992 = vmatpush.bf16.msrb.mxu0 %v10030_v29  ;;  %3008 = vmatpush.bf16.msrb.mxu1 %v9702_v55  ;;  %v5895_v13 = vor.u32 %v6657_v47, %v5894_v1  ;;  %v5806_v1 = vld [vmem:[%s11287_s3 + $0x620] sm:$0xf] }
 0x492   :  { %2963 = vmatmul.bf16.vlgmr.msra.gmra.mxu2 %v10045_v56  ;;  %2977 = vmatmul.bf16.vlgmr.msra.gmra.mxu3 %v10051_v43 }
 0x493   :  { %3017 = vmatpush.bf16.msrb.mxu2 %v10024_v52  ;;  %2993 = vmatmul.bf16.vlgmr.msrb.gmra.mxu0 %v5753_v62  ;;  %v5891_v62 = vor.u32 %v6654_v22, %v5888_v39 }
 0x494   :  { %3009 = vmatmul.bf16.vlgmr.msrb.gmra.mxu1 %v10040_v48  ;;  %3227 = vmatpush.bf16.msrb.mxu3 %v5903_v12  ;;  %v5839_v12 = vor.u32 %v6644_v5, %v5838_v44  ;;  %v6646_v44 = vld [vmem:[%s11287_s3 + $0x684] sm:$0xf] }
 0x495   :  { %3240 = vmatpush.bf16.msra.mxu0 %v5907_v21  ;;  %3253 = vmatpush.bf16.msra.mxu1 %v5911_v58 }
 0x497   :  { %3018 = vmatpush.bf16.msrb.mxu2 %v10057_v11 }
 0x498   :  { %3228 = vmatpush.bf16.msrb.mxu3 %v5887_v7  ;;  %v6651_v7 = vld [vmem:[%s11287_s3 + $0x6ac] sm:$0xf] }
 0x499   :  { %3241 = vmatpush.bf16.msra.mxu0 %v5891_v62  ;;  %v5883_v15 = vor.u32 %v6651_v7, %v5880_v51  ;;  %3254 = vmatpush.bf16.msra.mxu1 %v5895_v13  ;;  %v5856_v62 = vld [vmem:[%s11287_s3 + $0x690] sm:$0xf0]  ;;  %v5862_v13 = vld [vmem:[%s11287_s3 + $0x688] sm:$0xf]  ;;  %v6649_v7 = vld [vmem:[%s11287_s3 + $0x694] sm:$0xf0] }
 0x49a   :  { %v5859_v5 = vor.u32 %v6646_v44, %v5856_v62  ;;  %v6643_v51 = vld [vmem:[%s11287_s3 + $0x66c] sm:$0xf]  ;;  %v5824_v44 = vld [vmem:[%s11287_s3 + $0x650] sm:$0xf0] }
 0x49b   :  { %3019 = vmatpush.bf16.msrb.mxu2 %v10064_v3 }
 0x49c   :  { %3229 = vmatpush.bf16.msrb.mxu3 %v5871_v31 }
 0x49f   :  { %3020 = vmatpush.bf16.msrb.mxu2 %v10070_v8 }
 0x4a0   :  { %3230 = vmatpush.bf16.msrb.mxu3 %v5855_v24  ;;  %v5878_v24 = vld [vmem:[%s11287_s3 + $0x6a8] sm:$0xf] }
 0x4a1   :  { %v5879_v6 = vor.u32 %v6653_v25, %v5878_v24  ;;  %v5846_v25 = vld [vmem:[%s11287_s3 + $0x668] sm:$0xf] }
 0x4a3   :  { %3021 = vmatpush.bf16.msrb.mxu2 %v10076_v61  ;;  %3255 = vmatpush.bf16.msra.mxu1 %v5879_v6 }
 0x4a4   :  { %3231 = vmatpush.bf16.msrb.mxu3 %v5839_v12 }
 0x4a7   :  { %3022 = vmatpush.bf16.msrb.mxu2 %v10082_v63 }
 0x4ab   :  { %3023 = vmatpush.bf16.msrb.mxu2 %v10088_v60 }
 0x4af   :  { %3024 = vmatpush.bf16.msrb.mxu2 %v10094_v10 }
 0x4b2   :  { %3025 = vmatmul.bf16.vlgmr.msrb.gmra.mxu2 %v10100_v2 }
 0x4b3   :  { %3266 = vmatpush.bf16.msra.mxu2 %v5915_v54  ;;  %v5872_v54 = vld [vmem:[%s11287_s3 + $0x6b0] sm:$0xf0] }
 0x4b4   :  { %v5875_v41 = vor.u32 %v6650_v36, %v5872_v54  ;;  %v5863_v36 = vor.u32 %v6649_v7, %v5862_v13  ;;  %v5840_v54 = vld [vmem:[%s11287_s3 + $0x670] sm:$0xf0]  ;;  %v6634_v13 = vld [vmem:[%s11287_s3 + $0x624] sm:$0xf] }
 0x4b5   :  { %v5808_v7 = vld [vmem:[%s11287_s3 + $0x630] sm:$0xf0] }
 0x4b6   :  { %3242 = vmatpush.bf16.msra.mxu0 %v5875_v41  ;;  %3256 = vmatpush.bf16.msra.mxu1 %v5863_v36  ;;  %v6632_v41 = vld [vmem:[%s11287_s3 + $0x60c] sm:$0xf0] }
 0x4b7   :  { %3267 = vmatpush.bf16.msra.mxu2 %v5899_v20 }
 0x4ba   :  { %3243 = vmatpush.bf16.msra.mxu0 %v5859_v5 }
 0x4bb   :  { %3268 = vmatpush.bf16.msra.mxu2 %v5883_v15  ;;  %v6642_v15 = vld [vmem:[%s11287_s3 + $0x664] sm:$0xf] }
 0x4ef   :  { %v2880_v31 = vpop.f32.mrf.mxu0  ;;  %v2893_v30 = vpop.f32.mrf.mxu1 }
 0x4f0   :  { %v10188_v0 = vadd.f32 %v2880_v31, %v9872_v18  ;;  %v10191_v21 = vadd.f32 %v2893_v30, %v9827_v23  ;;  %v5823_v18 = vor.u32 %v6640_v34, %v5822_v53  ;;  %v5864_v23 = vld [vmem:[%s11287_s3 + $0x698] sm:$0xf0]  ;;  %v5843_v53 = vor.u32 %v6642_v15, %v5840_v54  ;;  %v5790_v34 = vld [vmem:[%s11287_s3 + $0x600] sm:$0xf]  ;;  %v6631_v54 = vld [vmem:[%s11287_s3 + $0x60c] sm:$0xf] }
 0x4f1   :  { %v5867_v58 = vor.u32 %v6647_v38, %v5864_v23  ;;  %v5848_v31 = vld [vmem:[%s11287_s3 + $0x678] sm:$0xf0]  ;;  %v5791_v24 = vor.u32 %v6632_v41, %v5790_v34  ;;  %v6645_v38 = vld [vmem:[%s11287_s3 + $0x674] sm:$0xf0]  ;;  %v5811_v15 = vor.u32 %v6634_v13, %v5808_v7  ;;  %v6630_v34 = vld [vmem:[%s11287_s3 + $0x604] sm:$0xf] }
 0x4f2   :  { %3232 = vmatpush.bf16.msrb.mxu3 %v5823_v18  ;;  %v5851_v30 = vor.u32 %v6643_v51, %v5848_v31  ;;  %v6639_v18 = vld [vmem:[%s11287_s3 + $0x64c] sm:$0xf]  ;;  %3244 = vmatpush.bf16.msra.mxu0 %v5843_v53  ;;  %v5800_v53 = vld [vmem:[%s11287_s3 + $0x618] sm:$0xf0]  ;;  %v5792_v41 = vld [vmem:[%s11287_s3 + $0x610] sm:$0xf0] }
 0x4f3   :  { %3269 = vmatpush.bf16.msra.mxu2 %v5867_v58  ;;  %v5847_v58 = vor.u32 %v6645_v38, %v5846_v25  ;;  %v5803_v25 = vor.u32 %v6631_v54, %v5800_v53  ;;  %v5798_v38 = vld [vmem:[%s11287_s3 + $0x608] sm:$0xf]  ;;  %v10381_v54 = vld [vmem:[%s11285_s1 + $0x98] sm:$0xff] }
 0x4f4   :  { %v2854_v32 = vpop.f32.mrf.mxu2  ;;  %v2867_v20 = vpop.f32.mrf.mxu3  ;;  %v11518_v13 = vld [vmem:[#allocation29_spill] sm:$0xff]  ;;  %v11520_v53 = vld [vmem:[#allocation36_spill] sm:$0xff] }
 0x4f5   :  { %v10206_v22 = vadd.f32 %v2854_v32, %v9818_v37  ;;  %v10209_v39 = vadd.f32 %v2867_v20, %v9860_v49  ;;  %v6636_v37 = vld [vmem:[%s11287_s3 + $0x62c] sm:$0xf0]  ;;  %v5832_v32 = vld [vmem:[%s11287_s3 + $0x658] sm:$0xf0]  ;;  %v6638_v20 = vld [vmem:[%s11287_s3 + $0x644] sm:$0xf]  ;;  %3257 = vmatpush.bf16.msra.mxu1 %v5847_v58  ;;  %v5795_v58 = vor.u32 %v6630_v34, %v5792_v41 }
 0x4f6   :  { %v5807_v12 = vor.u32 %v6636_v37, %v5806_v1  ;;  %v5835_v62 = vor.u32 %v6639_v18, %v5832_v32  ;;  %v5827_v5 = vor.u32 %v6638_v20, %v5824_v44  ;;  %v5830_v1 = vld [vmem:[%s11287_s3 + $0x648] sm:$0xf]  ;;  %v6641_v37 = vld [vmem:[%s11287_s3 + $0x654] sm:$0xf0] }
 0x4f7   :  { %v2882_v49 = vpop.f32.mrf.mxu0  ;;  %v2895_v47 = vpop.f32.mrf.mxu1  ;;  %3270 = vmatpush.bf16.msra.mxu2 %v5851_v30  ;;  %v6637_v30 = vld [vmem:[%s11287_s3 + $0x634] sm:$0xf0] }
 0x4f8   :  { %3233 = vmatpush.bf16.msrb.mxu3 %v5807_v12  ;;  %v6635_v49 = vld [vmem:[%s11287_s3 + $0x62c] sm:$0xf]  ;;  %v5831_v47 = vor.u32 %v6641_v37, %v5830_v1  ;;  %v5816_v12 = vld [vmem:[%s11287_s3 + $0x638] sm:$0xf0]  ;;  %3245 = vmatpush.bf16.msra.mxu0 %v5827_v5  ;;  %v6633_v18 = vld [vmem:[%s11287_s3 + $0x614] sm:$0xf0] }
 0x4f9   :  { %v5819_v31 = vor.u32 %v6635_v49, %v5816_v12  ;;  %v5799_v32 = vor.u32 %v6633_v18, %v5798_v38  ;;  %v10318_v44 = vld [vmem:[%s11285_s1 + $0x38] sm:$0xff]  ;;  %v10332_v5 = vld [vmem:[%s11285_s1 + $0x30] sm:$0xff]  ;;  %v10346_v37 = vld [vmem:[%s11285_s1 + $0x28] sm:$0xff] }
 0x4fa   :  { %3258 = vmatpush.bf16.msra.mxu1 %v5831_v47  ;;  %v11517_v49 = vld [vmem:[#allocation28_spill] sm:$0xff]  ;;  %v10403_v38 = vld [vmem:[%s11285_s1 + $0x8] sm:$0xff] }
 0x4fb   :  { %3271 = vmatpush.bf16.msra.mxu2 %v5835_v62  ;;  %v10360_v12 = vld [vmem:[%s11285_s1 + $0x20] sm:$0xff]  ;;  %v10409_v18 = vld [vmem:[%s11285_s1 + $0x88] sm:$0xff] }
 0x4fc   :  { %v2856_v6 = vpop.f32.mrf.mxu2  ;;  %v2869_v23 = vpop.f32.mrf.mxu3  ;;  %3234 = vmatpush.bf16.msrb.mxu3 %v5791_v24  ;;  %3246 = vmatpush.bf16.msra.mxu0 %v5811_v15  ;;  %v11519_v15 = vld [vmem:[#allocation33_spill] sm:$0xff] }
 0x4ff   :  { %v10284_v51 = vpop.f32.mrf.mxu0  ;;  %v10286_v36 = vpop.f32.mrf.mxu1  ;;  %3272 = vmatpush.bf16.msra.mxu2 %v5819_v31 }
 0x500   :  { %3283 = vmatpush.bf16.msra.mxu3 %v11478_v28  ;;  %v5814_v28 = vld [vmem:[%s11287_s3 + $0x628] sm:$0xf]  ;;  %3247 = vmatpush.bf16.msra.mxu0 %v5795_v58 }
 0x501   :  { %v5815_v24 = vor.u32 %v6637_v30, %v5814_v28  ;;  %v10374_v30 = vld [vmem:[%s11285_s1 + $0x18] sm:$0xff] }
 0x503   :  { %3259 = vmatpush.bf16.msra.mxu1 %v5815_v24  ;;  %3273 = vmatpush.bf16.msra.mxu2 %v5803_v25  ;;  %v10389_v24 = vld [vmem:[%s11285_s1 + $0x10] sm:$0xff] }
 0x504   :  { %3284 = vmatpush.bf16.msra.mxu3 %v11479_v9  ;;  %v2910_v6 = vpop.f32.mrf.mxu2  ;;  %v2923_v23 = vpop.f32.mrf.mxu3  ;;  %3296 = vmatpush.bf16.msrb.mxu0 %v10318_v44  ;;  %v10395_v25 = vld [vmem:[%s11285_s1 + $0x90] sm:$0xff] }
 0x505   :  { %v2924_v31 = vadd.f32 %v2923_v23, %v2910_v6 }
 0x507   :  { %v2938_v9 = vpop.f32.mrf.mxu0  ;;  %v2952_v20 = vpop.f32.mrf.mxu1  ;;  %3323 = vmatpush.bf16.msrb.mxu2 %v11486_v27  ;;  %3260 = vmatpush.bf16.msra.mxu1 %v5799_v32 }
 0x508   :  { %3285 = vmatpush.bf16.msra.mxu3 %v11481_v57  ;;  %v10325_v57 = vld [vmem:[%s11285_s1 + $0xb8] sm:$0xff]  ;;  %3297 = vmatpush.bf16.msrb.mxu0 %v10332_v5  ;;  %v10428_v20 = vld [vmem:[%s11286_s2] ss:$0 sm:$0xff] }
 0x50b   :  { %3309 = vmatpush.bf16.msrb.mxu1 %v10325_v57  ;;  %3324 = vmatpush.bf16.msrb.mxu2 %v11490_v16 }
 0x50c   :  { %3286 = vmatpush.bf16.msra.mxu3 %v11483_v26  ;;  %v2912_v62 = vpop.f32.mrf.mxu2  ;;  %v2925_v27 = vpop.f32.mrf.mxu3  ;;  %v10339_v26 = vld [vmem:[%s11285_s1 + $0xb0] sm:$0xff]  ;;  %3298 = vmatpush.bf16.msrb.mxu0 %v10346_v37 }
 0x50f   :  { %3310 = vmatpush.bf16.msrb.mxu1 %v10339_v26  ;;  %3325 = vmatpush.bf16.msrb.mxu2 %v11494_v14 }
 0x510   :  { %3287 = vmatpush.bf16.msra.mxu3 %v11487_v59  ;;  %v2994_v1 = vpop.f32.mrf.mxu0  ;;  %v10353_v59 = vld [vmem:[%s11285_s1 + $0xa8] sm:$0xff]  ;;  %3299 = vmatpush.bf16.msrb.mxu0 %v10360_v12 }
 0x511   :  { %v3010_v16 = vpop.f32.mrf.mxu1 }
 0x513   :  { %3311 = vmatpush.bf16.msrb.mxu1 %v10353_v59  ;;  %3326 = vmatpush.bf16.msrb.mxu2 %v11517_v49 }
 0x514   :  { %3288 = vmatpush.bf16.msra.mxu3 %v11491_v4  ;;  %v10367_v4 = vld [vmem:[%s11285_s1 + $0xa0] sm:$0xff]  ;;  %3300 = vmatpush.bf16.msrb.mxu0 %v10374_v30 }
 0x515   :  { %v2964_v14 = vpop.f32.mrf.mxu2  ;;  %v2978_v47 = vpop.f32.mrf.mxu3 }
 0x517   :  { %3312 = vmatpush.bf16.msrb.mxu1 %v10367_v4  ;;  %3327 = vmatpush.bf16.msrb.mxu2 %v11502_v17  ;;  %v2940_v17 = vadd.f32 %v10284_v51, %v2924_v31  ;;  %v10464_v31 = vld [vmem:[%s11285_s1 + $0x1f0] sm:$0xff] }
 0x518   :  { %3289 = vmatpush.bf16.msra.mxu3 %v11518_v13  ;;  %v2996_v7 = vpop.f32.mrf.mxu0  ;;  %3301 = vmatpush.bf16.msrb.mxu0 %v10389_v24  ;;  %v10452_v13 = vld [vmem:[%s11285_s1 + $0x1b8] sm:$0xff] }
 0x519   :  { %v3012_v28 = vpop.f32.mrf.mxu1  ;;  %v2954_v51 = vadd.f32 %v10286_v36, %v2940_v17  ;;  %v10422_v36 = vld [vmem:[%s11285_s1 + $0x80] sm:$0xff]  ;;  %v10458_v7 = vld [vmem:[%s11285_s1 + $0x130] sm:$0xff]  ;;  %v10488_v17 = vld [vmem:[%s11285_s1 + $0x1e8] sm:$0xff] }
 0x51a   :  { %v10470_v28 = vld [vmem:[%s11285_s1 + $0x170] sm:$0xff] }
 0x51b   :  { %3313 = vmatpush.bf16.msrb.mxu1 %v10381_v54  ;;  %3328 = vmatpush.bf16.msrb.mxu2 %v11520_v53  ;;  %v2968_v6 = vadd.f32 %v2964_v14, %v2954_v51  ;;  %v10482_v53 = vld [vmem:[%s11285_s1 + $0x128] sm:$0xff]  ;;  %v10506_v51 = vld [vmem:[%s11285_s1 + $0x120] sm:$0xff] }
 0x51c   :  { %3290 = vmatpush.bf16.msra.mxu3 %v11519_v15  ;;  %3302 = vmatpush.bf16.msrb.mxu0 %v10403_v38  ;;  %v10476_v15 = vld [vmem:[%s11285_s1 + $0x1b0] sm:$0xff] }
 0x51d   :  { %v2966_v34 = vpop.f32.mrf.mxu2  ;;  %v2980_v41 = vpop.f32.mrf.mxu3  ;;  %v2982_v23 = vadd.f32 %v2978_v47, %v2968_v6  ;;  %v10446_v47 = vld [vmem:[%s11285_s1 + $0x178] sm:$0xff]  ;;  %v10512_v6 = vld [vmem:[%s11285_s1 + $0x1e0] sm:$0xff] }
 0x51e   :  { %v10494_v34 = vld [vmem:[%s11285_s1 + $0x168] sm:$0xff] }
 0x51f   :  { %3314 = vmatpush.bf16.msrb.mxu1 %v10395_v25  ;;  %3329 = vmatpush.bf16.msrb.mxu2 %v11507_v33  ;;  %v10416_v33 = vld [vmem:[%s11285_s1] sm:$0xff]  ;;  %v2998_v58 = vadd.f32 %v2994_v1, %v2982_v23  ;;  %v10434_v1 = vld [vmem:[%s11285_s1 + $0x138] sm:$0xff]  ;;  %v10500_v41 = vld [vmem:[%s11285_s1 + $0x1a8] sm:$0xff] }
 0x520   :  { %3303 = vmatpush.bf16.msrb.mxu0 %v10416_v33  ;;  %v10518_v23 = vld [vmem:[%s11285_s1 + $0x160] sm:$0xff] }
 0x521   :  { %v3014_v32 = vadd.f32 %v3010_v16, %v2998_v58  ;;  %v10440_v16 = vld [vmem:[%s11285_s1 + $0x1f8] sm:$0xff]  ;;  %v10524_v58 = vld [vmem:[%s11285_s1 + $0x1a0] sm:$0xff] }
 0x523   :  { %3315 = vmatpush.bf16.msrb.mxu1 %v10409_v18  ;;  %3330 = vmatpush.bf16.msrb.mxu2 %v9647_v40 }
 0x527   :  { %3316 = vmatpush.bf16.msrb.mxu1 %v10422_v36 }
 0x535   :  { %v3026_v9 = vpop.f32.mrf.mxu2 }
 0x536   :  { %v3030_v40 = vadd.f32 %v3026_v9, %v3014_v32  ;;  %v10533_v32 = vld [vmem:[%s11284_s0 + $0xd] sm:$0x1]  ;;  %v10539_v9 = vld [vmem:[%s11285_s1 + $0x118] sm:$0xff] }
 0x538   :  { %v3031_v62 = vadd.f32 %v10428_v20, %v3030_v40  ;;  %v10557_v40 = vld [vmem:[%s11285_s1 + $0x198] sm:$0xff] }
 0x53a   :  { %v3032_v27 = vmax.f32 %v3031_v62, 0.0  ;;  %v10563_v62 = vld [vmem:[%s11285_s1 + $0x110] sm:$0xff] }
 0x53b   :  { %11521 = vst [vmem:[#allocation11_spill] sm:$0xff] %v10563_v62 }
 0x53c   :  { %v3033_v49 = vpack.c.bf16 %v3032_v27, %v3032_v27  ;;  %v10569_v27 = vld [vmem:[%s11285_s1 + $0x1d0] sm:$0xff] }
 0x53d   :  { %v3028_v14 = vpop.f32.mrf.mxu2 }
 0x53e   :  { %3235 = vmatmul.bf16.vlgmr.msrb.gmra.mxu3 %v3033_v49  ;;  %3248 = vmatmul.bf16.vlgmr.msra.gmra.mxu0 %v3033_v49  ;;  %v10581_v14 = vld [vmem:[%s11285_s1 + $0x190] sm:$0xff] }
 0x53f   :  { %3261 = vmatmul.bf16.vlgmr.msra.gmra.mxu1 %v3033_v49  ;;  %3274 = vmatmul.bf16.vlgmr.msra.gmra.mxu2 %v3033_v49  ;;  %v10575_v49 = vld [vmem:[%s11285_s1 + $0x150] sm:$0xff] }
 0x540   :  { %3337 = vmatpush.bf16.msrb.mxu3 %v10434_v1  ;;  %3379 = vmatpush.bf16.msra.mxu2 %v10440_v16  ;;  %11522 = vst [vmem:[#allocation17_spill] sm:$0xff] %v10575_v49 }
 0x541   :  { %3351 = vmatpush.bf16.msra.mxu0 %v10446_v47  ;;  %3365 = vmatpush.bf16.msra.mxu1 %v10452_v13 }
 0x544   :  { %3338 = vmatpush.bf16.msrb.mxu3 %v10458_v7  ;;  %3380 = vmatpush.bf16.msra.mxu2 %v10464_v31 }
 0x545   :  { %3352 = vmatpush.bf16.msra.mxu0 %v10470_v28  ;;  %3366 = vmatpush.bf16.msra.mxu1 %v10476_v15 }
 0x548   :  { %3339 = vmatpush.bf16.msrb.mxu3 %v10482_v53  ;;  %3381 = vmatpush.bf16.msra.mxu2 %v10488_v17 }
 0x549   :  { %3353 = vmatpush.bf16.msra.mxu0 %v10494_v34  ;;  %3367 = vmatpush.bf16.msra.mxu1 %v10500_v41 }
 0x54c   :  { %3340 = vmatpush.bf16.msrb.mxu3 %v10506_v51  ;;  %3382 = vmatpush.bf16.msra.mxu2 %v10512_v6 }
 0x54d   :  { %3354 = vmatpush.bf16.msra.mxu0 %v10518_v23  ;;  %3368 = vmatpush.bf16.msra.mxu1 %v10524_v58 }
 0x54e   :  { %3291 = vmatmul.bf16.vlgmr.msra.gmra.mxu3 %v9986_v42  ;;  %3304 = vmatmul.bf16.vlgmr.msrb.gmra.mxu0 %v9977_v35  ;;  %v10545_v35 = vld [vmem:[%s11285_s1 + $0x1d8] sm:$0xff] }
 0x54f   :  { %3331 = vmatmul.bf16.vlgmr.msrb.gmra.mxu2 %v10045_v56  ;;  %3317 = vmatmul.bf16.vlgmr.msrb.gmra.mxu1 %v10533_v32  ;;  %v10551_v56 = vld [vmem:[%s11285_s1 + $0x158] sm:$0xff] }
 0x550   :  { %3341 = vmatpush.bf16.msrb.mxu3 %v10539_v9  ;;  %3383 = vmatpush.bf16.msra.mxu2 %v10545_v35 }
 0x551   :  { %3355 = vmatpush.bf16.msra.mxu0 %v10551_v56  ;;  %3369 = vmatpush.bf16.msra.mxu1 %v10557_v40 }
 0x554   :  { %3342 = vmatpush.bf16.msrb.mxu3 %v10563_v62  ;;  %3384 = vmatpush.bf16.msra.mxu2 %v10569_v27  ;;  %v10587_v62 = vld [vmem:[%s11285_s1 + $0x108] sm:$0xff] }
 0x555   :  { %3356 = vmatpush.bf16.msra.mxu0 %v10575_v49  ;;  %3370 = vmatpush.bf16.msra.mxu1 %v10581_v14  ;;  %v10596_v49 = vld [vmem:[%s11285_s1 + $0x100] sm:$0xff] }
 0x558   :  { %3343 = vmatpush.bf16.msrb.mxu3 %v10587_v62  ;;  %3385 = vmatpush.bf16.msra.mxu2 %v9687_v19  ;;  %v10608_v19 = vld [vmem:[%s11284_s0 + $0x12] sm:$0x1] }
 0x559   :  { %3357 = vmatpush.bf16.msra.mxu0 %v10004_v45  ;;  %3371 = vmatpush.bf16.msra.mxu1 %v10010_v46  ;;  %11523 = vst [vmem:[#allocation5_spill] sm:$0xff] %v10608_v19  ;;  %v6063_v45 = vld [vmem:[%s11287_s3 + $0x7e0] sm:$0xf] }
 0x55c   :  { %3344 = vmatpush.bf16.msrb.mxu3 %v10596_v49  ;;  %3386 = vmatpush.bf16.msra.mxu2 %v9702_v55  ;;  %v10622_v55 = vld [vmem:[%s11284_s0 + $0x17] sm:$0x1] }
 0x55d   :  { %3358 = vmatpush.bf16.msra.mxu0 %v10018_v50  ;;  %3372 = vmatpush.bf16.msra.mxu1 %v10030_v29  ;;  %11524 = vst [vmem:[#allocation10_spill] sm:$0xff] %v10622_v55  ;;  %v6692_v50 = vld [vmem:[%s11287_s3 + $0x7ec] sm:$0xf0] }
 0x55f   :  { %3345 = vmatmul.bf16.vlgmr.msrb.gmra.mxu3 %v10051_v43  ;;  %3387 = vmatmul.bf16.vlgmr.msra.gmra.mxu2 %v10100_v2 }
 0x560   :  { %3395 = vmatpush.bf16.msra.mxu3 %v10024_v52  ;;  %3359 = vmatmul.bf16.vlgmr.msra.gmra.mxu0 %v10608_v19  ;;  %v6071_v52 = vld [vmem:[%s11287_s3 + $0x7e8] sm:$0xf] }
 0x561   :  { %3373 = vmatmul.bf16.vlgmr.msra.gmra.mxu1 %v10040_v48  ;;  %v6064_v48 = vor.u32 %v6692_v50, %v6063_v45  ;;  %v6688_v45 = vld [vmem:[%s11287_s3 + $0x7cc] sm:$0xf0]  ;;  %v6690_v50 = vld [vmem:[%s11287_s3 + $0x7e4] sm:$0xf] }
 0x563   :  { %3605 = vmatpush.bf16.msrb.mxu0 %v6064_v48  ;;  %v6057_v48 = vld [vmem:[%s11287_s3 + $0x7d8] sm:$0xf0] }
 0x564   :  { %3396 = vmatpush.bf16.msra.mxu3 %v10057_v11 }
 0x568   :  { %3397 = vmatpush.bf16.msra.mxu3 %v10064_v3  ;;  %v6047_v3 = vld [vmem:[%s11287_s3 + $0x7c0] sm:$0xf] }
 0x569   :  { %v6048_v11 = vor.u32 %v6688_v45, %v6047_v3  ;;  %v6687_v3 = vld [vmem:[%s11287_s3 + $0x7cc] sm:$0xf]  ;;  %v6031_v45 = vld [vmem:[%s11287_s3 + $0x7a0] sm:$0xf] }
 0x56a   :  { %v6060_v19 = vor.u32 %v6687_v3, %v6057_v48  ;;  %v6041_v3 = vld [vmem:[%s11287_s3 + $0x7b8] sm:$0xf0]  ;;  %v6015_v48 = vld [vmem:[%s11287_s3 + $0x780] sm:$0xf] }
 0x56b   :  { %3606 = vmatpush.bf16.msrb.mxu0 %v6048_v11  ;;  %v6686_v11 = vld [vmem:[%s11287_s3 + $0x7c4] sm:$0xf] }
 0x56c   :  { %3398 = vmatpush.bf16.msra.mxu3 %v10070_v8 }
 0x570   :  { %3399 = vmatpush.bf16.msra.mxu3 %v10076_v61 }
 0x574   :  { %3400 = vmatpush.bf16.msra.mxu3 %v10082_v63  ;;  %v6073_v63 = vld [vmem:[%s11287_s3 + $0x7f8] sm:$0xf0] }
 0x578   :  { %3401 = vmatpush.bf16.msra.mxu3 %v10088_v60  ;;  %v6691_v60 = vld [vmem:[%s11287_s3 + $0x7ec] sm:$0xf] }
 0x579   :  { %v6076_v8 = vor.u32 %v6691_v60, %v6073_v63  ;;  %v6055_v63 = vld [vmem:[%s11287_s3 + $0x7c8] sm:$0xf]  ;;  %v6689_v60 = vld [vmem:[%s11287_s3 + $0x7d4] sm:$0xf0] }
 0x57c   :  { %3402 = vmatpush.bf16.msra.mxu3 %v10094_v10  ;;  %v6693_v10 = vld [vmem:[%s11287_s3 + $0x7f4] sm:$0xf0] }
 0x57d   :  { %v6072_v61 = vor.u32 %v6693_v10, %v6071_v52  ;;  %v6056_v52 = vor.u32 %v6689_v60, %v6055_v63  ;;  %v6039_v63 = vld [vmem:[%s11287_s3 + $0x7a8] sm:$0xf]  ;;  %v6685_v60 = vld [vmem:[%s11287_s3 + $0x7b4] sm:$0xf0] }
 0x57f   :  { %3403 = vmatmul.bf16.vlgmr.msra.gmra.mxu3 %v10622_v55  ;;  %v6065_v55 = vld [vmem:[%s11287_s3 + $0x7f0] sm:$0xf0]  ;;  %3631 = vmatpush.bf16.msrb.mxu2 %v6072_v61 }
 0x580   :  { %3644 = vmatpush.bf16.msrb.mxu3 %v6076_v8  ;;  %v6068_v10 = vor.u32 %v6690_v50, %v6065_v55  ;;  %v6684_v8 = vld [vmem:[%s11287_s3 + $0x7ac] sm:$0xf0]  ;;  %v6049_v61 = vld [vmem:[%s11287_s3 + $0x7d0] sm:$0xf0] }
 0x581   :  { %v6032_v55 = vor.u32 %v6684_v8, %v6031_v45  ;;  %v6052_v50 = vor.u32 %v6686_v11, %v6049_v61  ;;  %v6682_v11 = vld [vmem:[%s11287_s3 + $0x7a4] sm:$0xf]  ;;  %v6033_v61 = vld [vmem:[%s11287_s3 + $0x7b0] sm:$0xf0] }
 0x582   :  { %3618 = vmatpush.bf16.msrb.mxu1 %v6068_v10  ;;  %v6040_v10 = vor.u32 %v6685_v60, %v6039_v63  ;;  %v6681_v63 = vld [vmem:[%s11287_s3 + $0x794] sm:$0xf0] }
 0x583   :  { %3632 = vmatpush.bf16.msrb.mxu2 %v6056_v52  ;;  %v6683_v52 = vld [vmem:[%s11287_s3 + $0x7ac] sm:$0xf]  ;;  %3607 = vmatpush.bf16.msrb.mxu0 %v6032_v55  ;;  %v6023_v55 = vld [vmem:[%s11287_s3 + $0x788] sm:$0xf] }
 0x584   :  { %3645 = vmatpush.bf16.msrb.mxu3 %v6060_v19  ;;  %v6044_v45 = vor.u32 %v6683_v52, %v6041_v3  ;;  %v6680_v19 = vld [vmem:[%s11287_s3 + $0x78c] sm:$0xf0]  ;;  %v6024_v60 = vor.u32 %v6681_v63, %v6023_v55  ;;  %v6025_v52 = vld [vmem:[%s11287_s3 + $0x798] sm:$0xf0]  ;;  %v5999_v3 = vld [vmem:[%s11287_s3 + $0x760] sm:$0xf] }
 0x585   :  { %v6016_v8 = vor.u32 %v6680_v19, %v6015_v48  ;;  %v6678_v19 = vld [vmem:[%s11287_s3 + $0x784] sm:$0xf]  ;;  %v6677_v63 = vld [vmem:[%s11287_s3 + $0x774] sm:$0xf0] }
 0x586   :  { %3619 = vmatpush.bf16.msrb.mxu1 %v6052_v50  ;;  %v6036_v50 = vor.u32 %v6682_v11, %v6033_v61 }
 0x587   :  { %3633 = vmatpush.bf16.msrb.mxu2 %v6040_v10  ;;  %3608 = vmatpush.bf16.msrb.mxu0 %v6016_v8  ;;  %v6679_v10 = vld [vmem:[%s11287_s3 + $0x78c] sm:$0xf]  ;;  %v6017_v8 = vld [vmem:[%s11287_s3 + $0x790] sm:$0xf0] }
 0x588   :  { %3646 = vmatpush.bf16.msrb.mxu3 %v6044_v45  ;;  %v6028_v48 = vor.u32 %v6679_v10, %v6025_v52  ;;  %v6676_v45 = vld [vmem:[%s11287_s3 + $0x76c] sm:$0xf0]  ;;  %v6020_v55 = vor.u32 %v6678_v19, %v6017_v8 }
 0x589   :  { %v6000_v61 = vor.u32 %v6676_v45, %v5999_v3  ;;  %v6009_v3 = vld [vmem:[%s11287_s3 + $0x778] sm:$0xf0]  ;;  %v5983_v45 = vld [vmem:[%s11287_s3 + $0x740] sm:$0xf]  ;;  %v6672_v19 = vld [vmem:[%s11287_s3 + $0x74c] sm:$0xf0] }
 0x58a   :  { %3620 = vmatpush.bf16.msrb.mxu1 %v6036_v50  ;;  %v6007_v50 = vld [vmem:[%s11287_s3 + $0x768] sm:$0xf] }
 0x58b   :  { %3634 = vmatpush.bf16.msrb.mxu2 %v6024_v60  ;;  %v6675_v60 = vld [vmem:[%s11287_s3 + $0x76c] sm:$0xf]  ;;  %v6008_v2 = vor.u32 %v6677_v63, %v6007_v50  ;;  %3609 = vmatpush.bf16.msrb.mxu0 %v6000_v61  ;;  %v6001_v50 = vld [vmem:[%s11287_s3 + $0x770] sm:$0xf0]  ;;  %v5991_v63 = vld [vmem:[%s11287_s3 + $0x748] sm:$0xf] }
 0x58c   :  { %3647 = vmatpush.bf16.msrb.mxu3 %v6028_v48  ;;  %v5984_v48 = vor.u32 %v6672_v19, %v5983_v45 }
 0x58e   :  { %3621 = vmatpush.bf16.msrb.mxu1 %v6020_v55 }
 0x58f   :  { %3635 = vmatpush.bf16.msrb.mxu2 %v6008_v2  ;;  %3610 = vmatpush.bf16.msrb.mxu0 %v5984_v48  ;;  %v5993_v2 = vld [vmem:[%s11287_s3 + $0x758] sm:$0xf0] }
 0x5bb   :  { %v3249_v11 = vpop.f32.mrf.mxu0 }
 0x5bc   :  { %v10737_v10 = vadd.f32 %v3249_v11, %v10209_v39  ;;  %v3262_v52 = vpop.f32.mrf.mxu1  ;;  %v6012_v39 = vor.u32 %v6675_v60, %v6009_v3  ;;  %v6674_v11 = vld [vmem:[%s11287_s3 + $0x764] sm:$0xf]  ;;  %v6671_v3 = vld [vmem:[%s11287_s3 + $0x74c] sm:$0xf] }
 0x5bd   :  { %v10749_v8 = vadd.f32 %v3262_v52, %v10188_v0  ;;  %v6673_v0 = vld [vmem:[%s11287_s3 + $0x754] sm:$0xf0] }
 0x5be   :  { %11525 = vst [vmem:[#allocation8_spill] sm:$0xff] %v10737_v10  ;;  %v6004_v10 = vor.u32 %v6674_v11, %v6001_v50  ;;  %v5992_v61 = vor.u32 %v6673_v0, %v5991_v63  ;;  %3648 = vmatpush.bf16.msrb.mxu3 %v6012_v39  ;;  %v5996_v39 = vor.u32 %v6671_v3, %v5993_v2  ;;  %v6670_v50 = vld [vmem:[%s11287_s3 + $0x744] sm:$0xf]  ;;  %v5975_v63 = vld [vmem:[%s11287_s3 + $0x728] sm:$0xf] }
 0x5bf   :  { %v5977_v3 = vld [vmem:[%s11287_s3 + $0x738] sm:$0xf0] }
 0x5c0   :  { %3622 = vmatpush.bf16.msrb.mxu1 %v6004_v10  ;;  %3636 = vmatpush.bf16.msrb.mxu2 %v5992_v61  ;;  %v6668_v10 = vld [vmem:[%s11287_s3 + $0x72c] sm:$0xf0]  ;;  %v6669_v61 = vld [vmem:[%s11287_s3 + $0x734] sm:$0xf0] }
 0x5c1   :  { %v3236_v55 = vpop.f32.mrf.mxu3 }
 0x5c2   :  { %v10764_v60 = vadd.f32 %v3236_v55, %v10206_v22  ;;  %v3275_v52 = vpop.f32.mrf.mxu2  ;;  %v5967_v22 = vld [vmem:[%s11287_s3 + $0x720] sm:$0xf]  ;;  %3649 = vmatpush.bf16.msrb.mxu3 %v5996_v39  ;;  %v5976_v55 = vor.u32 %v6669_v61, %v5975_v63  ;;  %v6664_v39 = vld [vmem:[%s11287_s3 + $0x70c] sm:$0xf0]  ;;  %v6665_v63 = vld [vmem:[%s11287_s3 + $0x714] sm:$0xf0] }
 0x5c3   :  { %v10773_v45 = vadd.f32 %v3275_v52, %v10191_v21  ;;  %v3251_v19 = vpop.f32.mrf.mxu0  ;;  %v5968_v11 = vor.u32 %v6668_v10, %v5967_v22  ;;  %v5985_v21 = vld [vmem:[%s11287_s3 + $0x750] sm:$0xf0]  ;;  %v6667_v52 = vld [vmem:[%s11287_s3 + $0x72c] sm:$0xf]  ;;  %v6666_v10 = vld [vmem:[%s11287_s3 + $0x724] sm:$0xf] }
 0x5c4   :  { %v3264_v48 = vpop.f32.mrf.mxu1  ;;  %v5988_v0 = vor.u32 %v6670_v50, %v5985_v21  ;;  %v5980_v2 = vor.u32 %v6667_v52, %v5977_v3  ;;  %v5951_v19 = vld [vmem:[%s11287_s3 + $0x700] sm:$0xf]  ;;  %3637 = vmatpush.bf16.msrb.mxu2 %v5976_v55  ;;  %v5961_v61 = vld [vmem:[%s11287_s3 + $0x718] sm:$0xf0] }
 0x5c5   :  { %3611 = vmatpush.bf16.msrb.mxu0 %v5968_v11  ;;  %v5952_v22 = vor.u32 %v6664_v39, %v5951_v19  ;;  %v5969_v48 = vld [vmem:[%s11287_s3 + $0x730] sm:$0xf0]  ;;  %v5959_v11 = vld [vmem:[%s11287_s3 + $0x708] sm:$0xf] }
 0x5c6   :  { %3623 = vmatpush.bf16.msrb.mxu1 %v5988_v0  ;;  %3650 = vmatpush.bf16.msrb.mxu3 %v5980_v2  ;;  %v5972_v21 = vor.u32 %v6666_v10, %v5969_v48  ;;  %v6663_v0 = vld [vmem:[%s11287_s3 + $0x70c] sm:$0xf]  ;;  %v5960_v52 = vor.u32 %v6665_v63, %v5959_v11  ;;  %v6662_v2 = vld [vmem:[%s11287_s3 + $0x704] sm:$0xf]  ;;  %v5953_v19 = vld [vmem:[%s11287_s3 + $0x710] sm:$0xf0] }
 0x5c7   :  { %v5964_v3 = vor.u32 %v6663_v0, %v5961_v61  ;;  %v6968_v10 = vld [vmem:[%s11285_s1 + $0x78] sm:$0xff]  ;;  %v5956_v48 = vor.u32 %v6662_v2, %v5953_v19  ;;  %v6970_v11 = vld [vmem:[%s11285_s1 + $0x70] sm:$0xff]  ;;  %v6972_v61 = vld [vmem:[%s11285_s1 + $0x68] sm:$0xff] }
 0x5c8   :  { %3638 = vmatpush.bf16.msrb.mxu2 %v5960_v52  ;;  %v6978_v19 = vld [vmem:[%s11285_s1 + $0x50] sm:$0xff] }
 0x5c9   :  { %v3238_v50 = vpop.f32.mrf.mxu3  ;;  %3612 = vmatpush.bf16.msrb.mxu0 %v5952_v22  ;;  %v6969_v22 = vld [vmem:[%s11285_s1 + $0xf8] sm:$0xff] }
 0x5ca   :  { %v3277_v55 = vpop.f32.mrf.mxu2  ;;  %3624 = vmatpush.bf16.msrb.mxu1 %v5972_v21  ;;  %3651 = vmatpush.bf16.msrb.mxu3 %v5964_v3 }
 0x5cb   :  { %v3305_v39 = vpop.f32.mrf.mxu0 }
 0x5cc   :  { %v3318_v50 = vpop.f32.mrf.mxu1  ;;  %3687 = vmatpush.bf16.msra.mxu2 %v10325_v57  ;;  %v6971_v57 = vld [vmem:[%s11285_s1 + $0xf0] sm:$0xff] }
 0x5cd   :  { %3661 = vmatpush.bf16.msra.mxu0 %v6968_v10 }
 0x5ce   :  { %3701 = vmatpush.bf16.msra.mxu3 %v6969_v22  ;;  %3625 = vmatpush.bf16.msrb.mxu1 %v5956_v48  ;;  %v6980_v48 = vld [vmem:[%s11285_s1 + $0x48] sm:$0xff] }
 0x5d0   :  { %3688 = vmatpush.bf16.msra.mxu2 %v10339_v26  ;;  %v6974_v26 = vld [vmem:[%s11285_s1 + $0x60] sm:$0xff] }
 0x5d1   :  { %3662 = vmatpush.bf16.msra.mxu0 %v6970_v11  ;;  %v3292_v21 = vpop.f32.mrf.mxu3 }
 0x5d2   :  { %3674 = vmatpush.bf16.msra.mxu1 %v10318_v44  ;;  %v3332_v63 = vpop.f32.mrf.mxu2  ;;  %3702 = vmatpush.bf16.msra.mxu3 %v6971_v57  ;;  %v6973_v44 = vld [vmem:[%s11285_s1 + $0xe8] sm:$0xff]  ;;  %v6982_v57 = vld [vmem:[%s11285_s1 + $0x40] sm:$0xff] }
 0x5d3   :  { %v3307_v0 = vpop.f32.mrf.mxu0 }
 0x5d4   :  { %v3320_v55 = vpop.f32.mrf.mxu1  ;;  %3689 = vmatpush.bf16.msra.mxu2 %v10353_v59  ;;  %v6976_v59 = vld [vmem:[%s11285_s1 + $0x58] sm:$0xff] }
 0x5d5   :  { %3663 = vmatpush.bf16.msra.mxu0 %v6972_v61 }
 0x5d6   :  { %3675 = vmatpush.bf16.msra.mxu1 %v10332_v5  ;;  %3703 = vmatpush.bf16.msra.mxu3 %v6973_v44  ;;  %v6975_v5 = vld [vmem:[%s11285_s1 + $0xe0] sm:$0xff] }
 0x5d8   :  { %3690 = vmatpush.bf16.msra.mxu2 %v10367_v4  ;;  %v6977_v4 = vld [vmem:[%s11285_s1 + $0xd8] sm:$0xff] }
 0x5d9   :  { %3664 = vmatpush.bf16.msra.mxu0 %v6974_v26  ;;  %v3294_v52 = vpop.f32.mrf.mxu3 }
 0x5da   :  { %3676 = vmatpush.bf16.msra.mxu1 %v10346_v37  ;;  %v3334_v3 = vpop.f32.mrf.mxu2  ;;  %3704 = vmatpush.bf16.msra.mxu3 %v6975_v5 }
 0x5dc   :  { %3691 = vmatpush.bf16.msra.mxu2 %v10381_v54  ;;  %v6979_v54 = vld [vmem:[%s11285_s1 + $0xd0] sm:$0xff] }
 0x5dd   :  { %3665 = vmatpush.bf16.msra.mxu0 %v6976_v59  ;;  %v3360_v2 = vpop.f32.mrf.mxu0 }
 0x5de   :  { %3677 = vmatpush.bf16.msra.mxu1 %v10360_v12  ;;  %v3374_v37 = vpop.f32.mrf.mxu1  ;;  %3705 = vmatpush.bf16.msra.mxu3 %v6977_v4  ;;  %v6723_v4 = vld [vmem:[%s11287_s3 + $0x8ec] sm:$0xf] }
 0x5e0   :  { %3692 = vmatpush.bf16.msra.mxu2 %v10395_v25  ;;  %v6981_v25 = vld [vmem:[%s11285_s1 + $0xc8] sm:$0xff] }
 0x5e1   :  { %3666 = vmatpush.bf16.msra.mxu0 %v6978_v19  ;;  %v6234_v19 = vld [vmem:[%s11287_s3 + $0x8f8] sm:$0xf0] }
 0x5e2   :  { %3678 = vmatpush.bf16.msra.mxu1 %v10374_v30  ;;  %v3346_v10 = vpop.f32.mrf.mxu3  ;;  %v3388_v12 = vpop.f32.mrf.mxu2  ;;  %3706 = vmatpush.bf16.msra.mxu3 %v6979_v54  ;;  %v3306_v30 = vadd.f32 %v3305_v39, %v3292_v21 }
 0x5e4   :  { %3693 = vmatpush.bf16.msra.mxu2 %v10409_v18  ;;  %v6983_v18 = vld [vmem:[%s11285_s1 + $0xc0] sm:$0xff] }
 0x5e5   :  { %3667 = vmatpush.bf16.msra.mxu0 %v6980_v48  ;;  %v3362_v22 = vpop.f32.mrf.mxu0 }
 0x5e6   :  { %3679 = vmatpush.bf16.msra.mxu1 %v10389_v24  ;;  %v3376_v11 = vpop.f32.mrf.mxu1  ;;  %3707 = vmatpush.bf16.msra.mxu3 %v6981_v25  ;;  %v3322_v24 = vadd.f32 %v3318_v50, %v3306_v30  ;;  %v6237_v22 = vor.u32 %v6723_v4, %v6234_v19  ;;  %v6208_v30 = vld [vmem:[%s11287_s3 + $0x8c0] sm:$0xf]  ;;  %v6210_v25 = vld [vmem:[%s11287_s3 + $0x8d0] sm:$0xf0]  ;;  %v6152_v19 = vld [vmem:[%s11287_s3 + $0x848] sm:$0xf] }
 0x5e7   :  { %v6720_v11 = vld [vmem:[%s11287_s3 + $0x8cc] sm:$0xf0]  ;;  %v6146_v4 = vld [vmem:[%s11287_s3 + $0x850] sm:$0xf0] }
 0x5e8   :  { %3694 = vmatpush.bf16.msra.mxu2 %v10422_v36  ;;  %v3336_v39 = vadd.f32 %v3332_v63, %v3322_v24  ;;  %v6721_v24 = vld [vmem:[%s11287_s3 + $0x8d4] sm:$0xf0] }
 0x5e9   :  { %3668 = vmatpush.bf16.msra.mxu0 %v6982_v57  ;;  %v6216_v57 = vld [vmem:[%s11287_s3 + $0x8c8] sm:$0xf] }
 0x5ea   :  { %3680 = vmatpush.bf16.msra.mxu1 %v10403_v38  ;;  %v3348_v0 = vpop.f32.mrf.mxu3  ;;  %v3390_v61 = vpop.f32.mrf.mxu2  ;;  %3708 = vmatpush.bf16.msra.mxu3 %v6983_v18  ;;  %v3350_v21 = vadd.f32 %v3346_v10, %v3336_v39  ;;  %v6719_v18 = vld [vmem:[%s11287_s3 + $0x8cc] sm:$0xf]  ;;  %v6218_v39 = vld [vmem:[%s11287_s3 + $0x8d8] sm:$0xf0] }
 0x5eb   :  { %v6217_v61 = vor.u32 %v6721_v24, %v6216_v57 }
 0x5ec   :  { %v3364_v55 = vadd.f32 %v3360_v2, %v3350_v21  ;;  %v6192_v21 = vld [vmem:[%s11287_s3 + $0x8a0] sm:$0xf] }
 0x5ee   :  { %3681 = vmatpush.bf16.msra.mxu1 %v10416_v33  ;;  %v3378_v44 = vadd.f32 %v3374_v37, %v3364_v55  ;;  %v6984_v33 = vld [vmem:[%s11284_s0 + $0xe] sm:$0x1]  ;;  %v6221_v55 = vor.u32 %v6719_v18, %v6218_v39  ;;  %v6700_v18 = vld [vmem:[%s11287_s3 + $0x82c] sm:$0xf0]  ;;  %v6698_v39 = vld [vmem:[%s11287_s3 + $0x824] sm:$0xf] }
 0x5f0   :  { %v3392_v26 = vadd.f32 %v3388_v12, %v3378_v44  ;;  %v6716_v44 = vld [vmem:[%s11287_s3 + $0x8ac] sm:$0xf0] }
 0x602   :  { %v3404_v52 = vpop.f32.mrf.mxu3 }
 0x603   :  { %v3408_v3 = vadd.f32 %v3404_v52, %v3392_v26  ;;  %v6714_v26 = vld [vmem:[%s11287_s3 + $0x8a4] sm:$0xf]  ;;  %v6194_v52 = vld [vmem:[%s11287_s3 + $0x8b0] sm:$0xf0] }
 0x605   :  { %v3409_v38 = vadd.f32 %v10428_v20, %v3408_v3  ;;  %v11526_v20 = vld [vmem:[#allocation11_spill] sm:$0xff]  ;;  %v6193_v3 = vor.u32 %v6716_v44, %v6192_v21  ;;  %v6136_v44 = vld [vmem:[%s11287_s3 + $0x828] sm:$0xf] }
 0x607   :  { %v3410_v36 = vmax.f32 %v3409_v38, 0.0  ;;  %v6197_v38 = vor.u32 %v6714_v26, %v6194_v52  ;;  %v6701_v26 = vld [vmem:[%s11287_s3 + $0x834] sm:$0xf0] }
 0x609   :  { %v3411_v50 = vpack.c.bf16 %v3410_v36, %v3410_v36  ;;  %v6200_v36 = vld [vmem:[%s11287_s3 + $0x8a8] sm:$0xf] }
 0x60a   :  { %v3406_v5 = vpop.f32.mrf.mxu3 }
 0x60b   :  { %3613 = vmatmul.bf16.vlgmr.msrb.gmra.mxu0 %v3411_v50  ;;  %3626 = vmatmul.bf16.vlgmr.msrb.gmra.mxu1 %v3411_v50  ;;  %v6715_v5 = vld [vmem:[%s11287_s3 + $0x8ac] sm:$0xf] }
 0x60c   :  { %3639 = vmatmul.bf16.vlgmr.msrb.gmra.mxu2 %v3411_v50  ;;  %3652 = vmatmul.bf16.vlgmr.msrb.gmra.mxu3 %v3411_v50  ;;  %v6717_v50 = vld [vmem:[%s11287_s3 + $0x8b4] sm:$0xf0] }
 0x60d   :  { %3715 = vmatpush.bf16.msrb.mxu0 %v10434_v1  ;;  %3743 = vmatpush.bf16.msrb.mxu2 %v10452_v13  ;;  %v6986_v1 = vld [vmem:[%s11285_s1 + $0x148] sm:$0xff] }
 0x60e   :  { %3757 = vmatpush.bf16.msrb.mxu3 %v10440_v16  ;;  %3729 = vmatpush.bf16.msrb.mxu1 %v10446_v47  ;;  %v6987_v16 = vld [vmem:[%s11285_s1 + $0x238] sm:$0xff]  ;;  %v6989_v47 = vld [vmem:[%s11285_s1 + $0x140] sm:$0xff]  ;;  %v11528_v13 = vld [vmem:[#allocation6_spill] sm:$0xff] }
 0x611   :  { %3716 = vmatpush.bf16.msrb.mxu0 %v10458_v7  ;;  %3744 = vmatpush.bf16.msrb.mxu2 %v10476_v15  ;;  %v11529_v7 = vld [vmem:[#allocation5_spill] sm:$0xff]  ;;  %v11532_v15 = vld [vmem:[#allocation16_spill] sm:$0xff] }
 0x612   :  { %3758 = vmatpush.bf16.msrb.mxu3 %v10464_v31  ;;  %3730 = vmatpush.bf16.msrb.mxu1 %v10470_v28  ;;  %v11531_v31 = vld [vmem:[#allocation13_spill] sm:$0xff]  ;;  %v6990_v28 = vld [vmem:[%s11284_s0 + $0x13] sm:$0x1] }
 0x615   :  { %3717 = vmatpush.bf16.msrb.mxu0 %v10482_v53  ;;  %3745 = vmatpush.bf16.msrb.mxu2 %v10500_v41  ;;  %v11533_v53 = vld [vmem:[#allocation14_spill] sm:$0xff]  ;;  %v11536_v41 = vld [vmem:[#allocation20_spill] sm:$0xff] }
 0x616   :  { %3759 = vmatpush.bf16.msrb.mxu3 %v10488_v17  ;;  %3731 = vmatpush.bf16.msrb.mxu1 %v10494_v34  ;;  %v11534_v17 = vld [vmem:[#allocation18_spill] sm:$0xff]  ;;  %v11535_v34 = vld [vmem:[#allocation15_spill] sm:$0xff] }
 0x619   :  { %3718 = vmatpush.bf16.msrb.mxu0 %v10506_v51  ;;  %3746 = vmatpush.bf16.msrb.mxu2 %v10524_v58  ;;  %v11537_v51 = vld [vmem:[#allocation19_spill] sm:$0xff] }
 0x61a   :  { %3760 = vmatpush.bf16.msrb.mxu3 %v10512_v6  ;;  %3732 = vmatpush.bf16.msrb.mxu1 %v10518_v23  ;;  %v6077_v6 = vld [vmem:[%s11284_s0 + $0x18] sm:$0x1] }
 0x61b   :  { %3669 = vmatmul.bf16.vlgmr.msra.gmra.mxu0 %v10533_v32  ;;  %3682 = vmatmul.bf16.vlgmr.msra.gmra.mxu1 %v9986_v42  ;;  %v11527_v42 = vld [vmem:[#allocation17_spill] sm:$0xff] }
 0x61c   :  { %3695 = vmatmul.bf16.vlgmr.msra.gmra.mxu2 %v6984_v33  ;;  %3709 = vmatmul.bf16.vlgmr.msra.gmra.mxu3 %v10051_v43  ;;  %v6985_v43 = vld [vmem:[%s11285_s1 + $0x1c8] sm:$0xff]  ;;  %v6201_v33 = vor.u32 %v6717_v50, %v6200_v36  ;;  %v6137_v36 = vor.u32 %v6701_v26, %v6136_v44 }
 0x61d   :  { %3719 = vmatpush.bf16.msrb.mxu0 %v10539_v9  ;;  %3747 = vmatpush.bf16.msrb.mxu2 %v10557_v40  ;;  %v11538_v9 = vld [vmem:[#allocation8_spill] sm:$0xff]  ;;  %v6724_v40 = vld [vmem:[%s11287_s3 + $0x8ec] sm:$0xf0]  ;;  %v6699_v50 = vld [vmem:[%s11287_s3 + $0x82c] sm:$0xf] }
 0x61e   :  { %3761 = vmatpush.bf16.msrb.mxu3 %v10545_v35  ;;  %3733 = vmatpush.bf16.msrb.mxu1 %v10551_v56  ;;  %v6224_v56 = vld [vmem:[%s11287_s3 + $0x8e0] sm:$0xf] }
 0x621   :  { %3720 = vmatpush.bf16.msrb.mxu0 %v11526_v20  ;;  %3748 = vmatpush.bf16.msrb.mxu2 %v10581_v14  ;;  %v6232_v14 = vld [vmem:[%s11287_s3 + $0x8e8] sm:$0xf]  ;;  %v6202_v20 = vld [vmem:[%s11287_s3 + $0x8b8] sm:$0xf0] }
 0x622   :  { %3762 = vmatpush.bf16.msrb.mxu3 %v10569_v27  ;;  %3734 = vmatpush.bf16.msrb.mxu1 %v11527_v42  ;;  %v6225_v27 = vor.u32 %v6724_v40, %v6224_v56  ;;  %v6176_v42 = vld [vmem:[%s11287_s3 + $0x880] sm:$0xf]  ;;  %v6168_v56 = vld [vmem:[%s11287_s3 + $0x868] sm:$0xf]  ;;  %v6709_v40 = vld [vmem:[%s11287_s3 + $0x874] sm:$0xf0] }
 0x625   :  { %3721 = vmatpush.bf16.msrb.mxu0 %v10587_v62  ;;  %3749 = vmatpush.bf16.msrb.mxu2 %v10010_v46  ;;  %v6988_v46 = vld [vmem:[%s11285_s1 + $0x1c0] sm:$0xff] }
 0x626   :  { %3763 = vmatpush.bf16.msrb.mxu3 %v6985_v43  ;;  %3735 = vmatpush.bf16.msrb.mxu1 %v6986_v1  ;;  %v6722_v62 = vld [vmem:[%s11287_s3 + $0x8e4] sm:$0xf]  ;;  %v6712_v43 = vld [vmem:[%s11287_s3 + $0x88c] sm:$0xf0] }
 0x629   :  { %3722 = vmatpush.bf16.msrb.mxu0 %v10596_v49  ;;  %3750 = vmatpush.bf16.msrb.mxu2 %v10030_v29  ;;  %v11530_v29 = vld [vmem:[#allocation10_spill] sm:$0xff]  ;;  %v6226_v49 = vld [vmem:[%s11287_s3 + $0x8f0] sm:$0xf0] }
 0x62a   :  { %3764 = vmatpush.bf16.msrb.mxu3 %v6988_v46  ;;  %3736 = vmatpush.bf16.msrb.mxu1 %v6989_v47  ;;  %v6229_v2 = vor.u32 %v6722_v62, %v6226_v49  ;;  %v6205_v46 = vor.u32 %v6715_v5, %v6202_v20  ;;  %v6710_v47 = vld [vmem:[%s11287_s3 + $0x884] sm:$0xf]  ;;  %v6707_v62 = vld [vmem:[%s11287_s3 + $0x86c] sm:$0xf]  ;;  %v6138_v5 = vld [vmem:[%s11287_s3 + $0x838] sm:$0xf0] }
 0x62c   :  { %3751 = vmatmul.bf16.vlgmr.msrb.gmra.mxu2 %v11528_v13  ;;  %3723 = vmatmul.bf16.vlgmr.msrb.gmra.mxu0 %v11529_v7  ;;  %v6178_v13 = vld [vmem:[%s11287_s3 + $0x890] sm:$0xf0]  ;;  %v6184_v7 = vld [vmem:[%s11287_s3 + $0x888] sm:$0xf] }
 0x62d   :  { %3773 = vmatpush.bf16.msra.mxu0 %v6987_v16  ;;  %3765 = vmatmul.bf16.vlgmr.msrb.gmra.mxu3 %v11530_v29 }
 0x62e   :  { %3737 = vmatmul.bf16.vlgmr.msrb.gmra.mxu1 %v6990_v28  ;;  %3996 = vmatpush.bf16.msra.mxu2 %v6229_v2  ;;  %v6177_v28 = vor.u32 %v6712_v43, %v6176_v42  ;;  %v6702_v2 = vld [vmem:[%s11287_s3 + $0x844] sm:$0xf]  ;;  %v6112_v42 = vld [vmem:[%s11287_s3 + $0x800] sm:$0xf]  ;;  %v6696_v43 = vld [vmem:[%s11287_s3 + $0x80c] sm:$0xf0] }
 0x62f   :  { %3983 = vmatpush.bf16.msra.mxu1 %v6225_v27  ;;  %v6170_v27 = vld [vmem:[%s11287_s3 + $0x878] sm:$0xf0]  ;;  %v6149_v57 = vor.u32 %v6702_v2, %v6146_v4  ;;  %v6747_v4 = vld [vmem:[%s11289_s5 + $0xa8] sm:$0xff] }
 0x631   :  { %3774 = vmatpush.bf16.msra.mxu0 %v11531_v31 }
 0x635   :  { %3775 = vmatpush.bf16.msra.mxu0 %v11532_v15  ;;  %v6713_v15 = vld [vmem:[%s11287_s3 + $0x894] sm:$0xf0] }
 0x639   :  { %3776 = vmatpush.bf16.msra.mxu0 %v11533_v53  ;;  %v6711_v53 = vld [vmem:[%s11287_s3 + $0x88c] sm:$0xf] }
 0x63d   :  { %3777 = vmatpush.bf16.msra.mxu0 %v11534_v17  ;;  %v6186_v17 = vld [vmem:[%s11287_s3 + $0x898] sm:$0xf0] }
 0x641   :  { %3778 = vmatpush.bf16.msra.mxu0 %v11535_v34  ;;  %v6181_v34 = vor.u32 %v6710_v47, %v6178_v13  ;;  %v6120_v47 = vld [vmem:[%s11287_s3 + $0x808] sm:$0xf]  ;;  %v6697_v13 = vld [vmem:[%s11287_s3 + $0x814] sm:$0xf0] }
 0x645   :  { %3779 = vmatpush.bf16.msra.mxu0 %v11536_v41  ;;  %v6185_v41 = vor.u32 %v6713_v15, %v6184_v7  ;;  %v6121_v15 = vor.u32 %v6697_v13, %v6120_v47  ;;  %v4039_v47 = vld [vmem:[%s11288_s4] sm:$0xf] }
 0x646   :  { %v4041_v13 = vperm.slane %v4039_v47, 0 }
 0x649   :  { %3780 = vmatpush.bf16.msra.mxu0 %v11537_v51  ;;  %v6160_v51 = vld [vmem:[%s11287_s3 + $0x860] sm:$0xf] }
 0x64c   :  { %3781 = vmatmul.bf16.vlgmr.msra.gmra.mxu0 %v6077_v6  ;;  %v6708_v6 = vld [vmem:[%s11287_s3 + $0x86c] sm:$0xf0] }
 0x64d   :  { %4022 = vmatpush.bf16.msrb.mxu0 %v6237_v22  ;;  %v6161_v49 = vor.u32 %v6708_v6, %v6160_v51 }
 0x651   :  { %4023 = vmatpush.bf16.msrb.mxu0 %v6221_v55  ;;  %v6130_v55 = vld [vmem:[%s11287_s3 + $0x830] sm:$0xf0] }
 0x655   :  { %4024 = vmatpush.bf16.msrb.mxu0 %v6205_v46  ;;  %v6114_v46 = vld [vmem:[%s11287_s3 + $0x810] sm:$0xf0] }
 0x688   :  { %v3614_v23 = vpop.f32.mrf.mxu0  ;;  %v3627_v58 = vpop.f32.mrf.mxu1 }
 0x689   :  { %v10960_v32 = vadd.f32 %v3614_v23, %v10764_v60  ;;  %v10963_v35 = vadd.f32 %v3627_v58, %v11538_v9  ;;  %v6725_v60 = vld [vmem:[%s11287_s3 + $0x8f4] sm:$0xf0]  ;;  %v6706_v23 = vld [vmem:[%s11287_s3 + $0x864] sm:$0xf]  ;;  %v6189_v58 = vor.u32 %v6711_v53, %v6186_v17  ;;  %v6162_v9 = vld [vmem:[%s11287_s3 + $0x870] sm:$0xf0] }
 0x68a   :  { %v6233_v37 = vor.u32 %v6725_v60, %v6232_v14  ;;  %v6165_v14 = vor.u32 %v6706_v23, %v6162_v9  ;;  %v6169_v60 = vor.u32 %v6709_v40, %v6168_v56  ;;  %v6695_v53 = vld [vmem:[%s11287_s3 + $0x80c] sm:$0xf]  ;;  %v6122_v17 = vld [vmem:[%s11287_s3 + $0x818] sm:$0xf0] }
 0x68b   :  { %4025 = vmatpush.bf16.msrb.mxu0 %v6189_v58  ;;  %v6733_v23 = vld [vmem:[%s11289_s5 + $0x38] sm:$0xff] }
 0x68c   :  { %4009 = vmatpush.bf16.msra.mxu3 %v6233_v37  ;;  %v6173_v37 = vor.u32 %v6707_v62, %v6170_v27  ;;  %v6757_v58 = vld [vmem:[%s11289_s5 + $0xf8] sm:$0xff]  ;;  %v6756_v62 = vld [vmem:[%s11289_s5 + $0xf0] sm:$0xff] }
 0x68d   :  { %v6741_v40 = vld [vmem:[%s11289_s5 + $0x78] sm:$0xff] }
 0x68f   :  { %v3640_v63 = vpop.f32.mrf.mxu2  ;;  %v3653_v59 = vpop.f32.mrf.mxu3  ;;  %4026 = vmatpush.bf16.msrb.mxu0 %v6173_v37  ;;  %v6739_v37 = vld [vmem:[%s11289_s5 + $0x68] sm:$0xff] }
 0x690   :  { %v10990_v10 = vadd.f32 %v3640_v63, %v10749_v8  ;;  %v10993_v12 = vadd.f32 %v3653_v59, %v10773_v45  ;;  %v3616_v54 = vpop.f32.mrf.mxu0  ;;  %v3629_v48 = vpop.f32.mrf.mxu1  ;;  %v6718_v8 = vld [vmem:[%s11287_s3 + $0x8c4] sm:$0xf]  ;;  %v6209_v45 = vor.u32 %v6720_v11, %v6208_v30  ;;  %4010 = vmatpush.bf16.msra.mxu3 %v6217_v61  ;;  %v6144_v63 = vld [vmem:[%s11287_s3 + $0x840] sm:$0xf]  ;;  %v6704_v59 = vld [vmem:[%s11287_s3 + $0x84c] sm:$0xf0] }
 0x691   :  { %v6213_v0 = vor.u32 %v6718_v8, %v6210_v25  ;;  %v6705_v54 = vld [vmem:[%s11287_s3 + $0x854] sm:$0xf0]  ;;  %v6703_v30 = vld [vmem:[%s11287_s3 + $0x84c] sm:$0xf]  ;;  %v6154_v11 = vld [vmem:[%s11287_s3 + $0x858] sm:$0xf0]  ;;  %v6145_v25 = vor.u32 %v6704_v59, %v6144_v63 }
 0x692   :  { %3984 = vmatpush.bf16.msra.mxu1 %v6209_v45  ;;  %v6153_v24 = vor.u32 %v6705_v54, %v6152_v19  ;;  %v6128_v61 = vld [vmem:[%s11287_s3 + $0x820] sm:$0xf]  ;;  %v6731_v63 = vld [vmem:[%s11289_s5 + $0x28] sm:$0xff] }
 0x693   :  { %3997 = vmatpush.bf16.msra.mxu2 %v6213_v0  ;;  %v6157_v0 = vor.u32 %v6703_v30, %v6154_v11  ;;  %v6129_v21 = vor.u32 %v6700_v18, %v6128_v61  ;;  %v6755_v59 = vld [vmem:[%s11289_s5 + $0xe8] sm:$0xff]  ;;  %v6738_v30 = vld [vmem:[%s11289_s5 + $0x60] sm:$0xff] }
 0x694   :  { %4011 = vmatpush.bf16.msra.mxu3 %v6201_v33  ;;  %v6141_v33 = vor.u32 %v6699_v50, %v6138_v5  ;;  %v6746_v11 = vld [vmem:[%s11289_s5 + $0xa0] sm:$0xff]  ;;  %v6751_v50 = vld [vmem:[%s11289_s5 + $0xc8] sm:$0xff]  ;;  %v6736_v5 = vld [vmem:[%s11289_s5 + $0x50] sm:$0xff] }
 0x695   :  { %4027 = vmatpush.bf16.msrb.mxu0 %v6157_v0  ;;  %v6752_v0 = vld [vmem:[%s11289_s5 + $0xd0] sm:$0xff] }
 0x696   :  { %3985 = vmatpush.bf16.msra.mxu1 %v6193_v3 }
 0x697   :  { %v3642_v1 = vpop.f32.mrf.mxu2  ;;  %v3655_v16 = vpop.f32.mrf.mxu3  ;;  %3998 = vmatpush.bf16.msra.mxu2 %v6197_v38  ;;  %v6133_v38 = vor.u32 %v6698_v39, %v6130_v55 }
 0x698   :  { %v11058_v29 = vpop.f32.mrf.mxu0  ;;  %v11060_v31 = vpop.f32.mrf.mxu1  ;;  %4012 = vmatpush.bf16.msra.mxu3 %v6185_v41  ;;  %v6694_v1 = vld [vmem:[%s11287_s3 + $0x804] sm:$0xf]  ;;  %v6113_v16 = vor.u32 %v6696_v43, %v6112_v42  ;;  %v6735_v43 = vld [vmem:[%s11289_s5 + $0x48] sm:$0xff] }
 0x699   :  { %4028 = vmatpush.bf16.msrb.mxu0 %v6141_v33  ;;  %v3684_v41 = vadd.f32 %v11060_v31, %v11058_v29  ;;  %v6749_v29 = vld [vmem:[%s11289_s5 + $0xb8] sm:$0xff]  ;;  %v6732_v31 = vld [vmem:[%s11289_s5 + $0x30] sm:$0xff]  ;;  %v6750_v42 = vld [vmem:[%s11289_s5 + $0xc0] sm:$0xff] }
 0x69a   :  { %3986 = vmatpush.bf16.msra.mxu1 %v6177_v28  ;;  %v6117_v28 = vor.u32 %v6694_v1, %v6114_v46  ;;  %v6744_v33 = vld [vmem:[%s11289_s5 + $0x90] sm:$0xff]  ;;  %v6743_v1 = vld [vmem:[%s11289_s5 + $0x88] sm:$0xff]  ;;  %v6742_v46 = vld [vmem:[%s11289_s5 + $0x80] sm:$0xff] }
 0x69b   :  { %3999 = vmatpush.bf16.msra.mxu2 %v6181_v34  ;;  %v6125_v34 = vor.u32 %v6695_v53, %v6122_v17 }
 0x69c   :  { %4013 = vmatpush.bf16.msra.mxu3 %v6169_v60 }
 0x69d   :  { %4029 = vmatpush.bf16.msrb.mxu0 %v6125_v34 }
 0x69e   :  { %3987 = vmatpush.bf16.msra.mxu1 %v6161_v49  ;;  %v6740_v49 = vld [vmem:[%s11289_s5 + $0x70] sm:$0xff] }
 0x69f   :  { %v3696_v48 = vpop.f32.mrf.mxu2  ;;  %v11113_v22 = vpop.f32.mrf.mxu3  ;;  %4000 = vmatpush.bf16.msra.mxu2 %v6165_v14  ;;  %v6748_v14 = vld [vmem:[%s11289_s5 + $0xb0] sm:$0xff] }
 0x6a0   :  { %v3672_v8 = vpop.f32.mrf.mxu0  ;;  %v3685_v45 = vpop.f32.mrf.mxu1  ;;  %4014 = vmatpush.bf16.msra.mxu3 %v6153_v24  ;;  %v3700_v9 = vadd.f32 %v3696_v48, %v3684_v41  ;;  %v6730_v48 = vld [vmem:[%s11289_s5 + $0x20] sm:$0xff]  ;;  %v6728_v24 = vld [vmem:[%s11289_s5 + $0x10] sm:$0xff] }
 0x6a1   :  { %4360 = vmatpush.bf16.msra.mxu0 %v6757_v58  ;;  %v6729_v45 = vld [vmem:[%s11289_s5 + $0x18] sm:$0xff] }
 0x6a2   :  { %3988 = vmatpush.bf16.msra.mxu1 %v6145_v25  ;;  %v3714_v60 = vadd.f32 %v11113_v22, %v3700_v9  ;;  %v6754_v22 = vld [vmem:[%s11289_s5 + $0xe0] sm:$0xff]  ;;  %v6753_v25 = vld [vmem:[%s11289_s5 + $0xd8] sm:$0xff]  ;;  %v4043_v9 = vperm.slane %v4039_v47, 2 }
 0x6a3   :  { %4001 = vmatpush.bf16.msra.mxu2 %v6149_v57 }
 0x6a4   :  { %4015 = vmatpush.bf16.msra.mxu3 %v6137_v36  ;;  %v6727_v36 = vld [vmem:[%s11289_s5 + $0x8] sm:$0xff] }
 0x6a5   :  { %4361 = vmatpush.bf16.msra.mxu0 %v6756_v62 }
 0x6a6   :  { %3989 = vmatpush.bf16.msra.mxu1 %v6129_v21  ;;  %v6991_v21 = vld [vmem:[%s11286_s2] ss:$0 sm:$0xff] }
 0x6a7   :  { %v3698_v52 = vpop.f32.mrf.mxu2  ;;  %v3712_v3 = vpop.f32.mrf.mxu3  ;;  %4002 = vmatpush.bf16.msra.mxu2 %v6133_v38  ;;  %v6745_v38 = vld [vmem:[%s11289_s5 + $0x98] sm:$0xff] }
 0x6a8   :  { %4016 = vmatpush.bf16.msra.mxu3 %v6121_v15  ;;  %v6737_v3 = vld [vmem:[%s11289_s5 + $0x58] sm:$0xff] }
 0x6a9   :  { %v3724_v20 = vpop.f32.mrf.mxu0  ;;  %4362 = vmatpush.bf16.msra.mxu0 %v6755_v59 }
 0x6aa   :  { %3990 = vmatpush.bf16.msra.mxu1 %v6113_v16  ;;  %v3728_v54 = vadd.f32 %v3724_v20, %v3714_v60  ;;  %v6726_v20 = vld [vmem:[%s11289_s5] sm:$0xff] }
 0x6ab   :  { %v3738_v7 = vpop.f32.mrf.mxu1  ;;  %4003 = vmatpush.bf16.msra.mxu2 %v6117_v28  ;;  %v6734_v16 = vld [vmem:[%s11289_s5 + $0x40] sm:$0xff]  ;;  %v4044_v28 = vperm.slane %v4039_v47, 3 }
 0x6ac   :  { %4347 = vmatpush.bf16.msrb.mxu3 %v6749_v29  ;;  %v3742_v8 = vadd.f32 %v3738_v7, %v3728_v54 }
 0x6ad   :  { %4363 = vmatpush.bf16.msra.mxu0 %v6754_v22 }
 0x6ae   :  { %4321 = vmatpush.bf16.msrb.mxu1 %v6733_v23 }
 0x6af   :  { %v3752_v51 = vpop.f32.mrf.mxu2  ;;  %4334 = vmatpush.bf16.msrb.mxu2 %v6741_v40 }
 0x6b0   :  { %v3766_v6 = vpop.f32.mrf.mxu3  ;;  %4348 = vmatpush.bf16.msrb.mxu3 %v6748_v14  ;;  %v3756_v57 = vadd.f32 %v3752_v51, %v3742_v8 }
 0x6b1   :  { %v3726_v56 = vpop.f32.mrf.mxu0  ;;  %4364 = vmatpush.bf16.msra.mxu0 %v6753_v25 }
 0x6b2   :  { %4322 = vmatpush.bf16.msrb.mxu1 %v6732_v31  ;;  %v3770_v61 = vadd.f32 %v3766_v6, %v3756_v57  ;;  %v4042_v6 = vperm.slane %v4039_v47, 1 }
 0x6b3   :  { %v3740_v27 = vpop.f32.mrf.mxu1  ;;  %4335 = vmatpush.bf16.msrb.mxu2 %v6740_v49 }
 0x6b4   :  { %4349 = vmatpush.bf16.msrb.mxu3 %v6747_v4 }
 0x6b5   :  { %4365 = vmatpush.bf16.msra.mxu0 %v6752_v0 }
 0x6b6   :  { %4323 = vmatpush.bf16.msrb.mxu1 %v6731_v63 }
 0x6b7   :  { %v3754_v2 = vpop.f32.mrf.mxu2  ;;  %4336 = vmatpush.bf16.msrb.mxu2 %v6739_v37 }
 0x6b8   :  { %v3768_v19 = vpop.f32.mrf.mxu3  ;;  %4350 = vmatpush.bf16.msrb.mxu3 %v6746_v11 }
 0x6b9   :  { %4366 = vmatpush.bf16.msra.mxu0 %v6751_v50 }
 0x6ba   :  { %4324 = vmatpush.bf16.msrb.mxu1 %v6730_v48 }
 0x6bb   :  { %4337 = vmatpush.bf16.msrb.mxu2 %v6738_v30 }
 0x6bc   :  { %4351 = vmatpush.bf16.msrb.mxu3 %v6745_v38 }
 0x6bd   :  { %4367 = vmatpush.bf16.msra.mxu0 %v6750_v42 }
 0x6be   :  { %4325 = vmatpush.bf16.msrb.mxu1 %v6729_v45 }
 0x6bf   :  { %4338 = vmatpush.bf16.msrb.mxu2 %v6737_v3 }
 0x6c0   :  { %4352 = vmatpush.bf16.msrb.mxu3 %v6744_v33 }
 0x6c2   :  { %4326 = vmatpush.bf16.msrb.mxu1 %v6728_v24 }
 0x6c3   :  { %4339 = vmatpush.bf16.msrb.mxu2 %v6736_v5 }
 0x6c4   :  { %4353 = vmatpush.bf16.msrb.mxu3 %v6743_v1 }
 0x6c6   :  { %4327 = vmatpush.bf16.msrb.mxu1 %v6727_v36 }
 0x6c7   :  { %4340 = vmatpush.bf16.msrb.mxu2 %v6735_v43 }
 0x6c8   :  { %4354 = vmatpush.bf16.msrb.mxu3 %v6742_v46 }
 0x6c9   :  { %v3782_v18 = vpop.f32.mrf.mxu0 }
 0x6ca   :  { %v3786_v39 = vadd.f32 %v3782_v18, %v3770_v61  ;;  %4328 = vmatpush.bf16.msrb.mxu1 %v6726_v20 }
 0x6cb   :  { %4341 = vmatpush.bf16.msrb.mxu2 %v6734_v16 }
 0x6cc   :  { %v3787_v55 = vadd.f32 %v6991_v21, %v3786_v39 }
 0x6ce   :  { %v3788_v44 = vmax.f32 %v3787_v55, 0.0 }
 0x6d0   :  { %v3789_v26 = vpack.c.bf16 %v3788_v44, %v3788_v44 }
 0x6d1   :  { %v3784_v52 = vpop.f32.mrf.mxu0 }
 0x6d2   :  { %3991 = vmatmul.bf16.vlgmr.msra.gmra.mxu1 %v3789_v26  ;;  %4004 = vmatmul.bf16.vlgmr.msra.gmra.mxu2 %v3789_v26 }
 0x6d3   :  { %4017 = vmatmul.bf16.vlgmr.msra.gmra.mxu3 %v3789_v26  ;;  %4030 = vmatmul.bf16.vlgmr.msrb.gmra.mxu0 %v3789_v26 }
 0x74f   :  { %v3992_v7 = vpop.f32.mrf.mxu1 }
 0x750   :  { %v4035_v15 = vadd.f32 %v3992_v7, %v10960_v32  ;;  %v4031_v53 = vpop.f32.mrf.mxu0 }
 0x751   :  { %v4038_v17 = vadd.f32 %v4031_v53, %v10993_v12 }
 0x752   :  { %v4049_v34 = vadd.f32 %v4041_v13, %v4035_v15 }
 0x753   :  { %v4052_v41 = vadd.f32 %v4044_v28, %v4038_v17 }
 0x754   :  { %v4053_v51 = vmax.f32 %v4049_v34, 0.0 }
 0x755   :  { %v4056_v23 = vmax.f32 %v4052_v41, 0.0  ;;  %v4005_v58 = vpop.f32.mrf.mxu2 }
 0x756   :  { %v4057_v56 = vpack.c.bf16 %v4053_v51, %v4053_v51  ;;  %v4036_v40 = vadd.f32 %v4005_v58, %v10963_v35  ;;  %v4018_v29 = vpop.f32.mrf.mxu3 }
 0x757   :  { %v4060_v31 = vpack.c.bf16 %v4056_v23, %v4056_v23  ;;  %v4037_v62 = vadd.f32 %v4018_v29, %v10990_v10  ;;  %v3994_v27 = vpop.f32.mrf.mxu1  ;;  %v6760_v10 = vld [vmem:[%s11290_s6] ss:$0 sm:$0xff] }
 0x758   :  { %v4050_v49 = vadd.f32 %v4042_v6, %v4036_v40  ;;  %v4033_v32 = vpop.f32.mrf.mxu0  ;;  %4329 = vmatmul.bf16.vlgmr.msrb.gmra.mxu1 %v4057_v56 }
 0x759   :  { %v4051_v14 = vadd.f32 %v4043_v9, %v4037_v62  ;;  %4368 = vmatmul.bf16.vlgmr.msra.gmra.mxu0 %v4060_v31 }
 0x75a   :  { %v4054_v12 = vmax.f32 %v4050_v49, 0.0 }
 0x75b   :  { %v4055_v60 = vmax.f32 %v4051_v14, 0.0 }
 0x75c   :  { %v4058_v63 = vpack.c.bf16 %v4054_v12, %v4054_v12 }
 0x75d   :  { %v4059_v59 = vpack.c.bf16 %v4055_v60, %v4055_v60  ;;  %v4007_v2 = vpop.f32.mrf.mxu2 }
 0x75e   :  { %v4020_v37 = vpop.f32.mrf.mxu3  ;;  %4342 = vmatmul.bf16.vlgmr.msrb.gmra.mxu2 %v4058_v63 }
 0x75f   :  { %4355 = vmatmul.bf16.vlgmr.msrb.gmra.mxu3 %v4059_v59 }
 0x7d5   :  { %v4330_v4 = vpop.f32.mrf.mxu1 }
 0x7d6   :  { %v4369_v35 = vpop.f32.mrf.mxu0  ;;  %v4331_v48 = vadd.f32 %v6760_v10, %v4330_v4 }
 0x7dd   :  { %v4332_v19 = vpop.f32.mrf.mxu1 }
 0x7de   :  { %v4371_v54 = vpop.f32.mrf.mxu0 }
 0x7e1   :  { %v4343_v22 = vpop.f32.mrf.mxu2 }
 0x7e2   :  { %v4344_v30 = vadd.f32 %v4343_v22, %v4331_v48  ;;  %v4356_v11 = vpop.f32.mrf.mxu3 }
 0x7e4   :  { %v4357_v8 = vadd.f32 %v4356_v11, %v4344_v30 }
 0x7e6   :  { %v4370_v45 = vadd.f32 %v4369_v35, %v4357_v8 }
 0x7e8   :  { %4373 = vst [vmem:[#allocation2] sm:$0x3] %v4370_v45 }
 0x7e9   :  { %v4345_v25 = vpop.f32.mrf.mxu2  ;;  %4384 = dma.vmem_to_hbm [thread:$0]  %s4380_s18, 32, %s4382_s21, [#allocation3]  }
 0x7ea   :  { %v4358_v57 = vpop.f32.mrf.mxu3 }
 0x7eb   :  { %7016 = dma.done.wait [#allocation3], 32  }
 0x7ec   :  { %7017 = vsyncadd [#allocation3], 4294967264 }
 0x7ed   :  { %4389 = vsyncpa [#allocation3], 1 }

</bundles_post_ra>
